<compile_context>
chip_gen: v7x
topology: tpu7x:2x2x1
jax: 0.10.0
libtpu: 0.0.40
codegen_flags: <defaults>
</compile_context>

<pallas_src>
import functools

import jax
import jax.numpy as jnp
from jax.experimental import pallas as pl
from jax.experimental.pallas import tpu as pltpu


# ---------------------------------------------------------------------------
# Fused double_conv kernel
# ---------------------------------------------------------------------------

def _double_conv_kernel(x_ref, w1_ref, b1_ref, g1_ref, be1_ref,
                        w2_ref, b2_ref, g2_ref, be2_ref,
                        o_ref, xp_ref, mid_ref, *, B, H, W, Cin, Cout):
    """x_ref: (B, H, W, Cin) NHWC.  w*_ref: (3, 3, cin, cout).  b/g/be: (1, cout).
    o_ref: (B, H, W, Cout).  xp_ref / mid_ref: zero-padded VMEM scratch."""
    n = B * H * W
    inv_n = 1.0 / float(n)

    def conv3x3(src_ref, w_ref, b_ref, cin, cout):
        # src_ref: (B, H+2, W+2, cin), already zero-padded.
        acc = jnp.zeros((n, cout), jnp.float32)
        for dy in range(3):                                    # static 3x3 taps
            for dx in range(3):
                patch = src_ref[:, pl.ds(dy, H), pl.ds(dx, W), :]   # (B,H,W,cin)
                acc = acc + jnp.dot(patch.reshape(n, cin), w_ref[dy, dx],
                                    preferred_element_type=jnp.float32)
        return acc + b_ref[...]                                # (n, cout)

    def bn_relu(y, g_ref, be_ref):
        # Training-mode batch stats (biased variance, eps=1e-5), one pass.
        s = jnp.sum(y, axis=0, keepdims=True)                  # (1, cout)
        sq = jnp.sum(y * y, axis=0, keepdims=True)
        mean = s * inv_n
        var = sq * inv_n - mean * mean
        yhat = (y - mean) * jax.lax.rsqrt(var + 1e-5)
        return jnp.maximum(yhat * g_ref[...] + be_ref[...], 0.0)

    # ---- zero-pad the input into VMEM scratch (padding=1) ----
    xp_ref[...] = jnp.zeros_like(xp_ref)
    xp_ref[:, pl.ds(1, H), pl.ds(1, W), :] = x_ref[...]

    # ---- conv1 -> BN1 -> ReLU (stays in VMEM / vregs) ----
    y1 = bn_relu(conv3x3(xp_ref, w1_ref, b1_ref, Cin, Cout), g1_ref, be1_ref)

    # ---- zero-pad the intermediate into VMEM scratch (padding=1) ----
    mid_ref[...] = jnp.zeros_like(mid_ref)
    mid_ref[:, pl.ds(1, H), pl.ds(1, W), :] = y1.reshape(B, H, W, Cout)

    # ---- conv2 -> BN2 -> ReLU ----
    y2 = bn_relu(conv3x3(mid_ref, w2_ref, b2_ref, Cout, Cout), g2_ref, be2_ref)

    # single bulk store of the whole output tile
    o_ref[...] = y2.reshape(B, H, W, Cout)


# ---------------------------------------------------------------------------
# Wrapper
# ---------------------------------------------------------------------------

_VMEM = pl.BlockSpec(memory_space=pltpu.MemorySpace.VMEM)


def double_conv_apply(x_nchw, params):
    """x_nchw: (B, Cin, H, W) float32 (PyTorch layout). Returns (B, Cout, H, W)."""
    B, Cin, H, W = x_nchw.shape
    Cout = params["w1"].shape[-1]
    x = jnp.transpose(x_nchw, (0, 2, 3, 1))                    # NCHW -> NHWC
    kern = functools.partial(_double_conv_kernel, B=B, H=H, W=W, Cin=Cin, Cout=Cout)
    rs = lambda v: v.reshape(1, Cout)
    y = pl.pallas_call(
        kern,
        out_shape=jax.ShapeDtypeStruct((B, H, W, Cout), jnp.float32),
        in_specs=[_VMEM] * 9,
        out_specs=_VMEM,
        scratch_shapes=[
            pltpu.VMEM((B, H + 2, W + 2, Cin), jnp.float32),   # padded input
            pltpu.VMEM((B, H + 2, W + 2, Cout), jnp.float32),  # padded intermediate
        ],
    )(x,
      params["w1"], rs(params["b1"]), rs(params["g1"]), rs(params["be1"]),
      params["w2"], rs(params["b2"]), rs(params["g2"]), rs(params["be2"]))
    return jnp.transpose(y, (0, 3, 1, 2))                      # NHWC -> NCHW


# ---------------------------------------------------------------------------
# Parameter init + pure-JAX reference (for correctness check)
# ---------------------------------------------------------------------------

def init_double_conv(key, cin, cout):
    ks = jax.random.split(key, 8)
    u = lambda k, s, lo, hi: jax.random.uniform(k, s, jnp.float32, lo, hi)
    return dict(
        w1=u(ks[0], (3, 3, cin, cout), -0.05, 0.05),   # HWIO conv weights
        b1=u(ks[1], (cout,), -0.05, 0.05),
        g1=u(ks[2], (cout,), 0.5, 1.5),                # BN gamma
        be1=u(ks[3], (cout,), -0.1, 0.1),              # BN beta
        w2=u(ks[4], (3, 3, cout, cout), -0.05, 0.05),
        b2=u(ks[5], (cout,), -0.05, 0.05),
        g2=u(ks[6], (cout,), 0.5, 1.5),
        be2=u(ks[7], (cout,), -0.1, 0.1),
    )


def _conv_bn_relu_ref(x, w, b, g, be):
    y = jax.lax.conv_general_dilated(
        x, w, window_strides=(1, 1), padding="SAME",
        dimension_numbers=("NHWC", "HWIO", "NHWC"),
        precision=jax.lax.Precision.HIGHEST) + b
    mean = jnp.mean(y, axis=(0, 1, 2), keepdims=True)
    var = jnp.mean((y - mean) ** 2, axis=(0, 1, 2), keepdims=True)
    return jnp.maximum((y - mean) * jax.lax.rsqrt(var + 1e-5) * g + be, 0.0)


def double_conv_ref(x_nchw, p):
    x = jnp.transpose(x_nchw, (0, 2, 3, 1))
    x = _conv_bn_relu_ref(x, p["w1"], p["b1"], p["g1"], p["be1"])
    x = _conv_bn_relu_ref(x, p["w2"], p["b2"], p["g2"], p["be2"])
    return jnp.transpose(x, (0, 3, 1, 2))


# ---------------------------------------------------------------------------
# main
# ---------------------------------------------------------------------------

if __name__ == "__main__":
    B, CIN, COUT, H, W = 2, 4, 16, 16, 16

    key = jax.random.PRNGKey(0)
    kp, kx = jax.random.split(key)
    params = init_double_conv(kp, CIN, COUT)
    x = jax.random.normal(kx, (B, CIN, H, W), jnp.float32)     # NCHW, like PyTorch

    out = jax.jit(double_conv_apply)(x, params)
    jax.block_until_ready(out)
    assert out.shape == (B, COUT, H, W), out.shape
    assert out.dtype == jnp.float32

    ref = double_conv_ref(x, params)
    err = float(jnp.max(jnp.abs(out - ref)))
    assert jnp.allclose(out, ref, rtol=1e-4, atol=1e-4), err

    print("KERNEL_OK")
</pallas_src>

<mosaic_0001>
module attributes {stable_mosaic.version = 11 : i64} {
  func.func @_double_conv_kernel(%arg0: memref<2x16x16x4xf32, #tpu.memory_space<vmem>>, %arg1: memref<3x3x4x16xf32, #tpu.memory_space<vmem>>, %arg2: memref<1x16xf32, #tpu.memory_space<vmem>>, %arg3: memref<1x16xf32, #tpu.memory_space<vmem>>, %arg4: memref<1x16xf32, #tpu.memory_space<vmem>>, %arg5: memref<3x3x16x16xf32, #tpu.memory_space<vmem>>, %arg6: memref<1x16xf32, #tpu.memory_space<vmem>>, %arg7: memref<1x16xf32, #tpu.memory_space<vmem>>, %arg8: memref<1x16xf32, #tpu.memory_space<vmem>>, %arg9: memref<2x16x16x16xf32, #tpu.memory_space<vmem>>, %arg10: memref<2x18x18x4xf32, #tpu.memory_space<vmem>>, %arg11: memref<2x18x18x16xf32, #tpu.memory_space<vmem>>) attributes {dimension_semantics = [], scalar_prefetch = 0 : i64, scratch_operands = 2 : i64, tpu.core_type = #tpu.core_type<tc>} {
    %cst = arith.constant 0.000000e+00 : f32
    %0 = vector.broadcast %cst : f32 to vector<2x18x18x4xf32>
    %c0 = arith.constant 0 : index
    %c0_0 = arith.constant 0 : index
    %c0_1 = arith.constant 0 : index
    %c0_2 = arith.constant 0 : index
    %1 = vector.load %arg10[%c0, %c0_0, %c0_1, %c0_2] : memref<2x18x18x4xf32, #tpu.memory_space<vmem>>, vector<2x18x18x4xf32>
    tpu.vector_store %arg10[%c0, %c0_0, %c0_1, %c0_2], %0 {strides = array<i32>} : memref<2x18x18x4xf32, #tpu.memory_space<vmem>>, vector<2x18x18x4xf32>,
    %c0_3 = arith.constant 0 : index
    %c0_4 = arith.constant 0 : index
    %c0_5 = arith.constant 0 : index
    %c0_6 = arith.constant 0 : index
    %2 = vector.load %arg0[%c0_3, %c0_4, %c0_5, %c0_6] : memref<2x16x16x4xf32, #tpu.memory_space<vmem>>, vector<2x16x16x4xf32>
    %c0_7 = arith.constant 0 : index
    %c1 = arith.constant 1 : index
    %c1_8 = arith.constant 1 : index
    %c0_9 = arith.constant 0 : index
    %3 = vector.load %arg10[%c0_7, %c1, %c1_8, %c0_9] : memref<2x18x18x4xf32, #tpu.memory_space<vmem>>, vector<2x16x16x4xf32>
    tpu.vector_store %arg10[%c0_7, %c1, %c1_8, %c0_9], %2 {strides = array<i32>} : memref<2x18x18x4xf32, #tpu.memory_space<vmem>>, vector<2x16x16x4xf32>,
    %cst_10 = arith.constant 0.000000e+00 : f32
    %4 = vector.broadcast %cst_10 : f32 to vector<512x16xf32>
    %c0_11 = arith.constant 0 : index
    %c0_12 = arith.constant 0 : index
    %c0_13 = arith.constant 0 : index
    %c0_14 = arith.constant 0 : index
    %5 = vector.load %arg10[%c0_11, %c0_12, %c0_13, %c0_14] : memref<2x18x18x4xf32, #tpu.memory_space<vmem>>, vector<2x16x16x4xf32>
    %6 = vector.shape_cast %5 : vector<2x16x16x4xf32> to vector<512x4xf32>
    %c0_15 = arith.constant 0 : index
    %c0_16 = arith.constant 0 : index
    %c0_17 = arith.constant 0 : index
    %c0_18 = arith.constant 0 : index
    %7 = vector.load %arg1[%c0_15, %c0_16, %c0_17, %c0_18] : memref<3x3x4x16xf32, #tpu.memory_space<vmem>>, vector<1x1x4x16xf32>
    %8 = vector.shape_cast %7 : vector<1x1x4x16xf32> to vector<4x16xf32>
    %cst_19 = arith.constant dense<0.000000e+00> : vector<512x16xf32>
    %9 = tpu.matmul %6, %8, %cst_19 {dimension_numbers = #tpu.dot_dimension_numbers<[1], [0], [0], [1], [0, 0, 1, 1], [], []>} : vector<512x4xf32>, vector<4x16xf32>, vector<512x16xf32> -> vector<512x16xf32>
    %10 = arith.addf %4, %9 : vector<512x16xf32>
    %c0_20 = arith.constant 0 : index
    %c0_21 = arith.constant 0 : index
    %c1_22 = arith.constant 1 : index
    %c0_23 = arith.constant 0 : index
    %11 = vector.load %arg10[%c0_20, %c0_21, %c1_22, %c0_23] : memref<2x18x18x4xf32, #tpu.memory_space<vmem>>, vector<2x16x16x4xf32>
    %12 = vector.shape_cast %11 : vector<2x16x16x4xf32> to vector<512x4xf32>
    %c0_24 = arith.constant 0 : index
    %c1_25 = arith.constant 1 : index
    %c0_26 = arith.constant 0 : index
    %c0_27 = arith.constant 0 : index
    %13 = vector.load %arg1[%c0_24, %c1_25, %c0_26, %c0_27] : memref<3x3x4x16xf32, #tpu.memory_space<vmem>>, vector<1x1x4x16xf32>
    %14 = vector.shape_cast %13 : vector<1x1x4x16xf32> to vector<4x16xf32>
    %cst_28 = arith.constant dense<0.000000e+00> : vector<512x16xf32>
    %15 = tpu.matmul %12, %14, %cst_28 {dimension_numbers = #tpu.dot_dimension_numbers<[1], [0], [0], [1], [0, 0, 1, 1], [], []>} : vector<512x4xf32>, vector<4x16xf32>, vector<512x16xf32> -> vector<512x16xf32>
    %16 = arith.addf %10, %15 : vector<512x16xf32>
    %c0_29 = arith.constant 0 : index
    %c0_30 = arith.constant 0 : index
    %c2 = arith.constant 2 : index
    %c0_31 = arith.constant 0 : index
    %17 = vector.load %arg10[%c0_29, %c0_30, %c2, %c0_31] : memref<2x18x18x4xf32, #tpu.memory_space<vmem>>, vector<2x16x16x4xf32>
    %18 = vector.shape_cast %17 : vector<2x16x16x4xf32> to vector<512x4xf32>
    %c0_32 = arith.constant 0 : index
    %c2_33 = arith.constant 2 : index
    %c0_34 = arith.constant 0 : index
    %c0_35 = arith.constant 0 : index
    %19 = vector.load %arg1[%c0_32, %c2_33, %c0_34, %c0_35] : memref<3x3x4x16xf32, #tpu.memory_space<vmem>>, vector<1x1x4x16xf32>
    %20 = vector.shape_cast %19 : vector<1x1x4x16xf32> to vector<4x16xf32>
    %cst_36 = arith.constant dense<0.000000e+00> : vector<512x16xf32>
    %21 = tpu.matmul %18, %20, %cst_36 {dimension_numbers = #tpu.dot_dimension_numbers<[1], [0], [0], [1], [0, 0, 1, 1], [], []>} : vector<512x4xf32>, vector<4x16xf32>, vector<512x16xf32> -> vector<512x16xf32>
    %22 = arith.addf %16, %21 : vector<512x16xf32>
    %c0_37 = arith.constant 0 : index
    %c1_38 = arith.constant 1 : index
    %c0_39 = arith.constant 0 : index
    %c0_40 = arith.constant 0 : index
    %23 = vector.load %arg10[%c0_37, %c1_38, %c0_39, %c0_40] : memref<2x18x18x4xf32, #tpu.memory_space<vmem>>, vector<2x16x16x4xf32>
    %24 = vector.shape_cast %23 : vector<2x16x16x4xf32> to vector<512x4xf32>
    %c1_41 = arith.constant 1 : index
    %c0_42 = arith.constant 0 : index
    %c0_43 = arith.constant 0 : index
    %c0_44 = arith.constant 0 : index
    %25 = vector.load %arg1[%c1_41, %c0_42, %c0_43, %c0_44] : memref<3x3x4x16xf32, #tpu.memory_space<vmem>>, vector<1x1x4x16xf32>
    %26 = vector.shape_cast %25 : vector<1x1x4x16xf32> to vector<4x16xf32>
    %cst_45 = arith.constant dense<0.000000e+00> : vector<512x16xf32>
    %27 = tpu.matmul %24, %26, %cst_45 {dimension_numbers = #tpu.dot_dimension_numbers<[1], [0], [0], [1], [0, 0, 1, 1], [], []>} : vector<512x4xf32>, vector<4x16xf32>, vector<512x16xf32> -> vector<512x16xf32>
    %28 = arith.addf %22, %27 : vector<512x16xf32>
    %c0_46 = arith.constant 0 : index
    %c1_47 = arith.constant 1 : index
    %c1_48 = arith.constant 1 : index
    %c0_49 = arith.constant 0 : index
    %29 = vector.load %arg10[%c0_46, %c1_47, %c1_48, %c0_49] : memref<2x18x18x4xf32, #tpu.memory_space<vmem>>, vector<2x16x16x4xf32>
    %30 = vector.shape_cast %29 : vector<2x16x16x4xf32> to vector<512x4xf32>
    %c1_50 = arith.constant 1 : index
    %c1_51 = arith.constant 1 : index
    %c0_52 = arith.constant 0 : index
    %c0_53 = arith.constant 0 : index
    %31 = vector.load %arg1[%c1_50, %c1_51, %c0_52, %c0_53] : memref<3x3x4x16xf32, #tpu.memory_space<vmem>>, vector<1x1x4x16xf32>
    %32 = vector.shape_cast %31 : vector<1x1x4x16xf32> to vector<4x16xf32>
    %cst_54 = arith.constant dense<0.000000e+00> : vector<512x16xf32>
    %33 = tpu.matmul %30, %32, %cst_54 {dimension_numbers = #tpu.dot_dimension_numbers<[1], [0], [0], [1], [0, 0, 1, 1], [], []>} : vector<512x4xf32>, vector<4x16xf32>, vector<512x16xf32> -> vector<512x16xf32>
    %34 = arith.addf %28, %33 : vector<512x16xf32>
    %c0_55 = arith.constant 0 : index
    %c1_56 = arith.constant 1 : index
    %c2_57 = arith.constant 2 : index
    %c0_58 = arith.constant 0 : index
    %35 = vector.load %arg10[%c0_55, %c1_56, %c2_57, %c0_58] : memref<2x18x18x4xf32, #tpu.memory_space<vmem>>, vector<2x16x16x4xf32>
    %36 = vector.shape_cast %35 : vector<2x16x16x4xf32> to vector<512x4xf32>
    %c1_59 = arith.constant 1 : index
    %c2_60 = arith.constant 2 : index
    %c0_61 = arith.constant 0 : index
    %c0_62 = arith.constant 0 : index
    %37 = vector.load %arg1[%c1_59, %c2_60, %c0_61, %c0_62] : memref<3x3x4x16xf32, #tpu.memory_space<vmem>>, vector<1x1x4x16xf32>
    %38 = vector.shape_cast %37 : vector<1x1x4x16xf32> to vector<4x16xf32>
    %cst_63 = arith.constant dense<0.000000e+00> : vector<512x16xf32>
    %39 = tpu.matmul %36, %38, %cst_63 {dimension_numbers = #tpu.dot_dimension_numbers<[1], [0], [0], [1], [0, 0, 1, 1], [], []>} : vector<512x4xf32>, vector<4x16xf32>, vector<512x16xf32> -> vector<512x16xf32>
    %40 = arith.addf %34, %39 : vector<512x16xf32>
    %c0_64 = arith.constant 0 : index
    %c2_65 = arith.constant 2 : index
    %c0_66 = arith.constant 0 : index
    %c0_67 = arith.constant 0 : index
    %41 = vector.load %arg10[%c0_64, %c2_65, %c0_66, %c0_67] : memref<2x18x18x4xf32, #tpu.memory_space<vmem>>, vector<2x16x16x4xf32>
    %42 = vector.shape_cast %41 : vector<2x16x16x4xf32> to vector<512x4xf32>
    %c2_68 = arith.constant 2 : index
    %c0_69 = arith.constant 0 : index
    %c0_70 = arith.constant 0 : index
    %c0_71 = arith.constant 0 : index
    %43 = vector.load %arg1[%c2_68, %c0_69, %c0_70, %c0_71] : memref<3x3x4x16xf32, #tpu.memory_space<vmem>>, vector<1x1x4x16xf32>
    %44 = vector.shape_cast %43 : vector<1x1x4x16xf32> to vector<4x16xf32>
    %cst_72 = arith.constant dense<0.000000e+00> : vector<512x16xf32>
    %45 = tpu.matmul %42, %44, %cst_72 {dimension_numbers = #tpu.dot_dimension_numbers<[1], [0], [0], [1], [0, 0, 1, 1], [], []>} : vector<512x4xf32>, vector<4x16xf32>, vector<512x16xf32> -> vector<512x16xf32>
    %46 = arith.addf %40, %45 : vector<512x16xf32>
    %c0_73 = arith.constant 0 : index
    %c2_74 = arith.constant 2 : index
    %c1_75 = arith.constant 1 : index
    %c0_76 = arith.constant 0 : index
    %47 = vector.load %arg10[%c0_73, %c2_74, %c1_75, %c0_76] : memref<2x18x18x4xf32, #tpu.memory_space<vmem>>, vector<2x16x16x4xf32>
    %48 = vector.shape_cast %47 : vector<2x16x16x4xf32> to vector<512x4xf32>
    %c2_77 = arith.constant 2 : index
    %c1_78 = arith.constant 1 : index
    %c0_79 = arith.constant 0 : index
    %c0_80 = arith.constant 0 : index
    %49 = vector.load %arg1[%c2_77, %c1_78, %c0_79, %c0_80] : memref<3x3x4x16xf32, #tpu.memory_space<vmem>>, vector<1x1x4x16xf32>
    %50 = vector.shape_cast %49 : vector<1x1x4x16xf32> to vector<4x16xf32>
    %cst_81 = arith.constant dense<0.000000e+00> : vector<512x16xf32>
    %51 = tpu.matmul %48, %50, %cst_81 {dimension_numbers = #tpu.dot_dimension_numbers<[1], [0], [0], [1], [0, 0, 1, 1], [], []>} : vector<512x4xf32>, vector<4x16xf32>, vector<512x16xf32> -> vector<512x16xf32>
    %52 = arith.addf %46, %51 : vector<512x16xf32>
    %c0_82 = arith.constant 0 : index
    %c2_83 = arith.constant 2 : index
    %c2_84 = arith.constant 2 : index
    %c0_85 = arith.constant 0 : index
    %53 = vector.load %arg10[%c0_82, %c2_83, %c2_84, %c0_85] : memref<2x18x18x4xf32, #tpu.memory_space<vmem>>, vector<2x16x16x4xf32>
    %54 = vector.shape_cast %53 : vector<2x16x16x4xf32> to vector<512x4xf32>
    %c2_86 = arith.constant 2 : index
    %c2_87 = arith.constant 2 : index
    %c0_88 = arith.constant 0 : index
    %c0_89 = arith.constant 0 : index
    %55 = vector.load %arg1[%c2_86, %c2_87, %c0_88, %c0_89] : memref<3x3x4x16xf32, #tpu.memory_space<vmem>>, vector<1x1x4x16xf32>
    %56 = vector.shape_cast %55 : vector<1x1x4x16xf32> to vector<4x16xf32>
    %cst_90 = arith.constant dense<0.000000e+00> : vector<512x16xf32>
    %57 = tpu.matmul %54, %56, %cst_90 {dimension_numbers = #tpu.dot_dimension_numbers<[1], [0], [0], [1], [0, 0, 1, 1], [], []>} : vector<512x4xf32>, vector<4x16xf32>, vector<512x16xf32> -> vector<512x16xf32>
    %58 = arith.addf %52, %57 : vector<512x16xf32>
    %c0_91 = arith.constant 0 : index
    %c0_92 = arith.constant 0 : index
    %59 = vector.load %arg2[%c0_91, %c0_92] : memref<1x16xf32, #tpu.memory_space<vmem>>, vector<1x16xf32>
    %60 = vector.broadcast %59 : vector<1x16xf32> to vector<512x16xf32>
    %61 = arith.addf %58, %60 : vector<512x16xf32>
    %cst_93 = arith.constant dense<0.000000e+00> : vector<16xf32>
    %62 = vector.multi_reduction <add>, %61, %cst_93 [0] : vector<512x16xf32> to vector<16xf32>
    %63 = vector.shape_cast %62 : vector<16xf32> to vector<1x16xf32>
    %64 = arith.mulf %61, %61 : vector<512x16xf32>
    %cst_94 = arith.constant dense<0.000000e+00> : vector<16xf32>
    %65 = vector.multi_reduction <add>, %64, %cst_94 [0] : vector<512x16xf32> to vector<16xf32>
    %66 = vector.shape_cast %65 : vector<16xf32> to vector<1x16xf32>
    %cst_95 = arith.constant 0.001953125 : f32
    %67 = vector.broadcast %cst_95 : f32 to vector<1x16xf32>
    %68 = arith.mulf %63, %67 : vector<1x16xf32>
    %cst_96 = arith.constant 0.001953125 : f32
    %69 = vector.broadcast %cst_96 : f32 to vector<1x16xf32>
    %70 = arith.mulf %66, %69 : vector<1x16xf32>
    %71 = arith.mulf %68, %68 : vector<1x16xf32>
    %72 = arith.subf %70, %71 : vector<1x16xf32>
    %73 = vector.broadcast %68 : vector<1x16xf32> to vector<512x16xf32>
    %74 = arith.subf %61, %73 : vector<512x16xf32>
    %cst_97 = arith.constant 9.99999974E-6 : f32
    %75 = vector.broadcast %cst_97 : f32 to vector<1x16xf32>
    %76 = arith.addf %72, %75 : vector<1x16xf32>
    %77 = math.rsqrt %76 : vector<1x16xf32>
    %78 = vector.broadcast %77 : vector<1x16xf32> to vector<512x16xf32>
    %79 = arith.mulf %74, %78 : vector<512x16xf32>
    %c0_98 = arith.constant 0 : index
    %c0_99 = arith.constant 0 : index
    %80 = vector.load %arg3[%c0_98, %c0_99] : memref<1x16xf32, #tpu.memory_space<vmem>>, vector<1x16xf32>
    %81 = vector.broadcast %80 : vector<1x16xf32> to vector<512x16xf32>
    %82 = arith.mulf %79, %81 : vector<512x16xf32>
    %c0_100 = arith.constant 0 : index
    %c0_101 = arith.constant 0 : index
    %83 = vector.load %arg4[%c0_100, %c0_101] : memref<1x16xf32, #tpu.memory_space<vmem>>, vector<1x16xf32>
    %84 = vector.broadcast %83 : vector<1x16xf32> to vector<512x16xf32>
    %85 = arith.addf %82, %84 : vector<512x16xf32>
    %cst_102 = arith.constant 0.000000e+00 : f32
    %86 = vector.broadcast %cst_102 : f32 to vector<512x16xf32>
    %87 = arith.maximumf %85, %86 : vector<512x16xf32>
    %cst_103 = arith.constant 0.000000e+00 : f32
    %88 = vector.broadcast %cst_103 : f32 to vector<2x18x18x16xf32>
    %c0_104 = arith.constant 0 : index
    %c0_105 = arith.constant 0 : index
    %c0_106 = arith.constant 0 : index
    %c0_107 = arith.constant 0 : index
    %89 = vector.load %arg11[%c0_104, %c0_105, %c0_106, %c0_107] : memref<2x18x18x16xf32, #tpu.memory_space<vmem>>, vector<2x18x18x16xf32>
    tpu.vector_store %arg11[%c0_104, %c0_105, %c0_106, %c0_107], %88 {strides = array<i32>} : memref<2x18x18x16xf32, #tpu.memory_space<vmem>>, vector<2x18x18x16xf32>,
    %90 = vector.shape_cast %87 : vector<512x16xf32> to vector<2x16x16x16xf32>
    %c0_108 = arith.constant 0 : index
    %c1_109 = arith.constant 1 : index
    %c1_110 = arith.constant 1 : index
    %c0_111 = arith.constant 0 : index
    %91 = vector.load %arg11[%c0_108, %c1_109, %c1_110, %c0_111] : memref<2x18x18x16xf32, #tpu.memory_space<vmem>>, vector<2x16x16x16xf32>
    tpu.vector_store %arg11[%c0_108, %c1_109, %c1_110, %c0_111], %90 {strides = array<i32>} : memref<2x18x18x16xf32, #tpu.memory_space<vmem>>, vector<2x16x16x16xf32>,
    %cst_112 = arith.constant 0.000000e+00 : f32
    %92 = vector.broadcast %cst_112 : f32 to vector<512x16xf32>
    %c0_113 = arith.constant 0 : index
    %c0_114 = arith.constant 0 : index
    %c0_115 = arith.constant 0 : index
    %c0_116 = arith.constant 0 : index
    %93 = vector.load %arg11[%c0_113, %c0_114, %c0_115, %c0_116] : memref<2x18x18x16xf32, #tpu.memory_space<vmem>>, vector<2x16x16x16xf32>
    %94 = vector.shape_cast %93 : vector<2x16x16x16xf32> to vector<512x16xf32>
    %c0_117 = arith.constant 0 : index
    %c0_118 = arith.constant 0 : index
    %c0_119 = arith.constant 0 : index
    %c0_120 = arith.constant 0 : index
    %95 = vector.load %arg5[%c0_117, %c0_118, %c0_119, %c0_120] : memref<3x3x16x16xf32, #tpu.memory_space<vmem>>, vector<1x1x16x16xf32>
    %96 = vector.shape_cast %95 : vector<1x1x16x16xf32> to vector<16x16xf32>
    %cst_121 = arith.constant dense<0.000000e+00> : vector<512x16xf32>
    %97 = tpu.matmul %94, %96, %cst_121 {dimension_numbers = #tpu.dot_dimension_numbers<[1], [0], [0], [1], [0, 0, 1, 1], [], []>} : vector<512x16xf32>, vector<16x16xf32>, vector<512x16xf32> -> vector<512x16xf32>
    %98 = arith.addf %92, %97 : vector<512x16xf32>
    %c0_122 = arith.constant 0 : index
    %c0_123 = arith.constant 0 : index
    %c1_124 = arith.constant 1 : index
    %c0_125 = arith.constant 0 : index
    %99 = vector.load %arg11[%c0_122, %c0_123, %c1_124, %c0_125] : memref<2x18x18x16xf32, #tpu.memory_space<vmem>>, vector<2x16x16x16xf32>
    %100 = vector.shape_cast %99 : vector<2x16x16x16xf32> to vector<512x16xf32>
    %c0_126 = arith.constant 0 : index
    %c1_127 = arith.constant 1 : index
    %c0_128 = arith.constant 0 : index
    %c0_129 = arith.constant 0 : index
    %101 = vector.load %arg5[%c0_126, %c1_127, %c0_128, %c0_129] : memref<3x3x16x16xf32, #tpu.memory_space<vmem>>, vector<1x1x16x16xf32>
    %102 = vector.shape_cast %101 : vector<1x1x16x16xf32> to vector<16x16xf32>
    %cst_130 = arith.constant dense<0.000000e+00> : vector<512x16xf32>
    %103 = tpu.matmul %100, %102, %cst_130 {dimension_numbers = #tpu.dot_dimension_numbers<[1], [0], [0], [1], [0, 0, 1, 1], [], []>} : vector<512x16xf32>, vector<16x16xf32>, vector<512x16xf32> -> vector<512x16xf32>
    %104 = arith.addf %98, %103 : vector<512x16xf32>
    %c0_131 = arith.constant 0 : index
    %c0_132 = arith.constant 0 : index
    %c2_133 = arith.constant 2 : index
    %c0_134 = arith.constant 0 : index
    %105 = vector.load %arg11[%c0_131, %c0_132, %c2_133, %c0_134] : memref<2x18x18x16xf32, #tpu.memory_space<vmem>>, vector<2x16x16x16xf32>
    %106 = vector.shape_cast %105 : vector<2x16x16x16xf32> to vector<512x16xf32>
    %c0_135 = arith.constant 0 : index
    %c2_136 = arith.constant 2 : index
    %c0_137 = arith.constant 0 : index
    %c0_138 = arith.constant 0 : index
    %107 = vector.load %arg5[%c0_135, %c2_136, %c0_137, %c0_138] : memref<3x3x16x16xf32, #tpu.memory_space<vmem>>, vector<1x1x16x16xf32>
    %108 = vector.shape_cast %107 : vector<1x1x16x16xf32> to vector<16x16xf32>
    %cst_139 = arith.constant dense<0.000000e+00> : vector<512x16xf32>
    %109 = tpu.matmul %106, %108, %cst_139 {dimension_numbers = #tpu.dot_dimension_numbers<[1], [0], [0], [1], [0, 0, 1, 1], [], []>} : vector<512x16xf32>, vector<16x16xf32>, vector<512x16xf32> -> vector<512x16xf32>
    %110 = arith.addf %104, %109 : vector<512x16xf32>
    %c0_140 = arith.constant 0 : index
    %c1_141 = arith.constant 1 : index
    %c0_142 = arith.constant 0 : index
    %c0_143 = arith.constant 0 : index
    %111 = vector.load %arg11[%c0_140, %c1_141, %c0_142, %c0_143] : memref<2x18x18x16xf32, #tpu.memory_space<vmem>>, vector<2x16x16x16xf32>
    %112 = vector.shape_cast %111 : vector<2x16x16x16xf32> to vector<512x16xf32>
    %c1_144 = arith.constant 1 : index
    %c0_145 = arith.constant 0 : index
    %c0_146 = arith.constant 0 : index
    %c0_147 = arith.constant 0 : index
    %113 = vector.load %arg5[%c1_144, %c0_145, %c0_146, %c0_147] : memref<3x3x16x16xf32, #tpu.memory_space<vmem>>, vector<1x1x16x16xf32>
    %114 = vector.shape_cast %113 : vector<1x1x16x16xf32> to vector<16x16xf32>
    %cst_148 = arith.constant dense<0.000000e+00> : vector<512x16xf32>
    %115 = tpu.matmul %112, %114, %cst_148 {dimension_numbers = #tpu.dot_dimension_numbers<[1], [0], [0], [1], [0, 0, 1, 1], [], []>} : vector<512x16xf32>, vector<16x16xf32>, vector<512x16xf32> -> vector<512x16xf32>
    %116 = arith.addf %110, %115 : vector<512x16xf32>
    %c0_149 = arith.constant 0 : index
    %c1_150 = arith.constant 1 : index
    %c1_151 = arith.constant 1 : index
    %c0_152 = arith.constant 0 : index
    %117 = vector.load %arg11[%c0_149, %c1_150, %c1_151, %c0_152] : memref<2x18x18x16xf32, #tpu.memory_space<vmem>>, vector<2x16x16x16xf32>
    %118 = vector.shape_cast %117 : vector<2x16x16x16xf32> to vector<512x16xf32>
    %c1_153 = arith.constant 1 : index
    %c1_154 = arith.constant 1 : index
    %c0_155 = arith.constant 0 : index
    %c0_156 = arith.constant 0 : index
    %119 = vector.load %arg5[%c1_153, %c1_154, %c0_155, %c0_156] : memref<3x3x16x16xf32, #tpu.memory_space<vmem>>, vector<1x1x16x16xf32>
    %120 = vector.shape_cast %119 : vector<1x1x16x16xf32> to vector<16x16xf32>
    %cst_157 = arith.constant dense<0.000000e+00> : vector<512x16xf32>
    %121 = tpu.matmul %118, %120, %cst_157 {dimension_numbers = #tpu.dot_dimension_numbers<[1], [0], [0], [1], [0, 0, 1, 1], [], []>} : vector<512x16xf32>, vector<16x16xf32>, vector<512x16xf32> -> vector<512x16xf32>
    %122 = arith.addf %116, %121 : vector<512x16xf32>
    %c0_158 = arith.constant 0 : index
    %c1_159 = arith.constant 1 : index
    %c2_160 = arith.constant 2 : index
    %c0_161 = arith.constant 0 : index
    %123 = vector.load %arg11[%c0_158, %c1_159, %c2_160, %c0_161] : memref<2x18x18x16xf32, #tpu.memory_space<vmem>>, vector<2x16x16x16xf32>
    %124 = vector.shape_cast %123 : vector<2x16x16x16xf32> to vector<512x16xf32>
    %c1_162 = arith.constant 1 : index
    %c2_163 = arith.constant 2 : index
    %c0_164 = arith.constant 0 : index
    %c0_165 = arith.constant 0 : index
    %125 = vector.load %arg5[%c1_162, %c2_163, %c0_164, %c0_165] : memref<3x3x16x16xf32, #tpu.memory_space<vmem>>, vector<1x1x16x16xf32>
    %126 = vector.shape_cast %125 : vector<1x1x16x16xf32> to vector<16x16xf32>
    %cst_166 = arith.constant dense<0.000000e+00> : vector<512x16xf32>
    %127 = tpu.matmul %124, %126, %cst_166 {dimension_numbers = #tpu.dot_dimension_numbers<[1], [0], [0], [1], [0, 0, 1, 1], [], []>} : vector<512x16xf32>, vector<16x16xf32>, vector<512x16xf32> -> vector<512x16xf32>
    %128 = arith.addf %122, %127 : vector<512x16xf32>
    %c0_167 = arith.constant 0 : index
    %c2_168 = arith.constant 2 : index
    %c0_169 = arith.constant 0 : index
    %c0_170 = arith.constant 0 : index
    %129 = vector.load %arg11[%c0_167, %c2_168, %c0_169, %c0_170] : memref<2x18x18x16xf32, #tpu.memory_space<vmem>>, vector<2x16x16x16xf32>
    %130 = vector.shape_cast %129 : vector<2x16x16x16xf32> to vector<512x16xf32>
    %c2_171 = arith.constant 2 : index
    %c0_172 = arith.constant 0 : index
    %c0_173 = arith.constant 0 : index
    %c0_174 = arith.constant 0 : index
    %131 = vector.load %arg5[%c2_171, %c0_172, %c0_173, %c0_174] : memref<3x3x16x16xf32, #tpu.memory_space<vmem>>, vector<1x1x16x16xf32>
    %132 = vector.shape_cast %131 : vector<1x1x16x16xf32> to vector<16x16xf32>
    %cst_175 = arith.constant dense<0.000000e+00> : vector<512x16xf32>
    %133 = tpu.matmul %130, %132, %cst_175 {dimension_numbers = #tpu.dot_dimension_numbers<[1], [0], [0], [1], [0, 0, 1, 1], [], []>} : vector<512x16xf32>, vector<16x16xf32>, vector<512x16xf32> -> vector<512x16xf32>
    %134 = arith.addf %128, %133 : vector<512x16xf32>
    %c0_176 = arith.constant 0 : index
    %c2_177 = arith.constant 2 : index
    %c1_178 = arith.constant 1 : index
    %c0_179 = arith.constant 0 : index
    %135 = vector.load %arg11[%c0_176, %c2_177, %c1_178, %c0_179] : memref<2x18x18x16xf32, #tpu.memory_space<vmem>>, vector<2x16x16x16xf32>
    %136 = vector.shape_cast %135 : vector<2x16x16x16xf32> to vector<512x16xf32>
    %c2_180 = arith.constant 2 : index
    %c1_181 = arith.constant 1 : index
    %c0_182 = arith.constant 0 : index
    %c0_183 = arith.constant 0 : index
    %137 = vector.load %arg5[%c2_180, %c1_181, %c0_182, %c0_183] : memref<3x3x16x16xf32, #tpu.memory_space<vmem>>, vector<1x1x16x16xf32>
    %138 = vector.shape_cast %137 : vector<1x1x16x16xf32> to vector<16x16xf32>
    %cst_184 = arith.constant dense<0.000000e+00> : vector<512x16xf32>
    %139 = tpu.matmul %136, %138, %cst_184 {dimension_numbers = #tpu.dot_dimension_numbers<[1], [0], [0], [1], [0, 0, 1, 1], [], []>} : vector<512x16xf32>, vector<16x16xf32>, vector<512x16xf32> -> vector<512x16xf32>
    %140 = arith.addf %134, %139 : vector<512x16xf32>
    %c0_185 = arith.constant 0 : index
    %c2_186 = arith.constant 2 : index
    %c2_187 = arith.constant 2 : index
    %c0_188 = arith.constant 0 : index
    %141 = vector.load %arg11[%c0_185, %c2_186, %c2_187, %c0_188] : memref<2x18x18x16xf32, #tpu.memory_space<vmem>>, vector<2x16x16x16xf32>
    %142 = vector.shape_cast %141 : vector<2x16x16x16xf32> to vector<512x16xf32>
    %c2_189 = arith.constant 2 : index
    %c2_190 = arith.constant 2 : index
    %c0_191 = arith.constant 0 : index
    %c0_192 = arith.constant 0 : index
    %143 = vector.load %arg5[%c2_189, %c2_190, %c0_191, %c0_192] : memref<3x3x16x16xf32, #tpu.memory_space<vmem>>, vector<1x1x16x16xf32>
    %144 = vector.shape_cast %143 : vector<1x1x16x16xf32> to vector<16x16xf32>
    %cst_193 = arith.constant dense<0.000000e+00> : vector<512x16xf32>
    %145 = tpu.matmul %142, %144, %cst_193 {dimension_numbers = #tpu.dot_dimension_numbers<[1], [0], [0], [1], [0, 0, 1, 1], [], []>} : vector<512x16xf32>, vector<16x16xf32>, vector<512x16xf32> -> vector<512x16xf32>
    %146 = arith.addf %140, %145 : vector<512x16xf32>
    %c0_194 = arith.constant 0 : index
    %c0_195 = arith.constant 0 : index
    %147 = vector.load %arg6[%c0_194, %c0_195] : memref<1x16xf32, #tpu.memory_space<vmem>>, vector<1x16xf32>
    %148 = vector.broadcast %147 : vector<1x16xf32> to vector<512x16xf32>
    %149 = arith.addf %146, %148 : vector<512x16xf32>
    %cst_196 = arith.constant dense<0.000000e+00> : vector<16xf32>
    %150 = vector.multi_reduction <add>, %149, %cst_196 [0] : vector<512x16xf32> to vector<16xf32>
    %151 = vector.shape_cast %150 : vector<16xf32> to vector<1x16xf32>
    %152 = arith.mulf %149, %149 : vector<512x16xf32>
    %cst_197 = arith.constant dense<0.000000e+00> : vector<16xf32>
    %153 = vector.multi_reduction <add>, %152, %cst_197 [0] : vector<512x16xf32> to vector<16xf32>
    %154 = vector.shape_cast %153 : vector<16xf32> to vector<1x16xf32>
    %cst_198 = arith.constant 0.001953125 : f32
    %155 = vector.broadcast %cst_198 : f32 to vector<1x16xf32>
    %156 = arith.mulf %151, %155 : vector<1x16xf32>
    %cst_199 = arith.constant 0.001953125 : f32
    %157 = vector.broadcast %cst_199 : f32 to vector<1x16xf32>
    %158 = arith.mulf %154, %157 : vector<1x16xf32>
    %159 = arith.mulf %156, %156 : vector<1x16xf32>
    %160 = arith.subf %158, %159 : vector<1x16xf32>
    %161 = vector.broadcast %156 : vector<1x16xf32> to vector<512x16xf32>
    %162 = arith.subf %149, %161 : vector<512x16xf32>
    %cst_200 = arith.constant 9.99999974E-6 : f32
    %163 = vector.broadcast %cst_200 : f32 to vector<1x16xf32>
    %164 = arith.addf %160, %163 : vector<1x16xf32>
    %165 = math.rsqrt %164 : vector<1x16xf32>
    %166 = vector.broadcast %165 : vector<1x16xf32> to vector<512x16xf32>
    %167 = arith.mulf %162, %166 : vector<512x16xf32>
    %c0_201 = arith.constant 0 : index
    %c0_202 = arith.constant 0 : index
    %168 = vector.load %arg7[%c0_201, %c0_202] : memref<1x16xf32, #tpu.memory_space<vmem>>, vector<1x16xf32>
    %169 = vector.broadcast %168 : vector<1x16xf32> to vector<512x16xf32>
    %170 = arith.mulf %167, %169 : vector<512x16xf32>
    %c0_203 = arith.constant 0 : index
    %c0_204 = arith.constant 0 : index
    %171 = vector.load %arg8[%c0_203, %c0_204] : memref<1x16xf32, #tpu.memory_space<vmem>>, vector<1x16xf32>
    %172 = vector.broadcast %171 : vector<1x16xf32> to vector<512x16xf32>
    %173 = arith.addf %170, %172 : vector<512x16xf32>
    %cst_205 = arith.constant 0.000000e+00 : f32
    %174 = vector.broadcast %cst_205 : f32 to vector<512x16xf32>
    %175 = arith.maximumf %173, %174 : vector<512x16xf32>
    %176 = vector.shape_cast %175 : vector<512x16xf32> to vector<2x16x16x16xf32>
    %c0_206 = arith.constant 0 : index
    %c0_207 = arith.constant 0 : index
    %c0_208 = arith.constant 0 : index
    %c0_209 = arith.constant 0 : index
    %177 = vector.load %arg9[%c0_206, %c0_207, %c0_208, %c0_209] : memref<2x16x16x16xf32, #tpu.memory_space<vmem>>, vector<2x16x16x16xf32>
    tpu.vector_store %arg9[%c0_206, %c0_207, %c0_208, %c0_209], %176 {strides = array<i32>} : memref<2x16x16x16xf32, #tpu.memory_space<vmem>>, vector<2x16x16x16xf32>,
    return
  }
}

</mosaic_0001>

<bundles_post_ra>
// kernel: double_conv_apply.1
= control target key start
LH: loop header
LB: loop body
LE: loop exit
PB: predicated region body
PF: predicated region fallthrough
CT: control target
= control target key end

     0   :  { %vm594_vm0 = vcmask 1043456   ;;  %vm32_vm1 = vcmask 31744   ;;  %vm35_vm2 = vcmask 25600   ;;  %v26706_v1 = vmov 0.0   ;;  %s26696_s1 = inlined_call_operand.vmem [shape: f32[3,3,4,16], index: 1, kind: input, shape index: {}]   ;;  %s26697_s0 = inlined_call_operand.vmem [shape: f32[2,16,16,4], index: 0, kind: input, shape index: {}]   ;;  %s26698_s2 = inlined_call_operand.vmem [shape: f32[1,16], index: 2, kind: input, shape index: {}]   ;;  %s26699_s5 = inlined_call_operand.vmem [shape: f32[3,3,16,16], index: 5, kind: input, shape index: {}]   ;;  %s26700_s3 = inlined_call_operand.vmem [shape: f32[1,16], index: 3, kind: input, shape index: {}]   ;;  %s26701_s4 = inlined_call_operand.vmem [shape: f32[1,16], index: 4, kind: input, shape index: {}]   ;;  %s26702_s6 = inlined_call_operand.vmem [shape: f32[1,16], index: 6, kind: input, shape index: {}]   ;;  %s26703_s7 = inlined_call_operand.vmem [shape: f32[1,16], index: 7, kind: input, shape index: {}]   ;;  %s26704_s8 = inlined_call_operand.vmem [shape: f32[1,16], index: 8, kind: input, shape index: {}]   ;;  %s26705_s9 = inlined_call_operand.vmem [shape: f32[2,16,16,16], index: 9, kind: output, shape index: {}]  }
   0x1   :  { %v19774_v0 = vld [vmem:[%s26696_s1 + $0x4] sm:$0xf]  ;;  %33 = vst.msk [vmem:[#allocation2] sm:$0xff] %vm32_vm1, %v26706_v1  ;;  %34 = vst.msk [vmem:[#allocation2 + $0x8] sm:$0xff] %vm32_vm1, %v26706_v1  ;;  %v19923_v2 = vld [vmem:[%s26696_s1] sm:$0xf] }
   0x2   :  { %37 = vst.msk [vmem:[#allocation2 + $0x18] sm:$0xff] %vm32_vm1, %v26706_v1  ;;  %38 = vst.msk [vmem:[#allocation2 + $0x20] sm:$0xff] %vm32_vm1, %v26706_v1  ;;  %v142_v3 = vld [vmem:[%s26697_s0] sm:$0xff]  ;;  %16873 = vmatprep.subr.msk.mxu0 %vm594_vm0, %v19774_v0  ;;  %v143_v4 = vld [vmem:[%s26697_s0 + $0x8] sm:$0xff]  ;;  %vm6605_vm3 = vcmask 130048   ;;  %vm7278_vm4 = vcmask 123904  }
   0x3   :  { %40 = vst.msk [vmem:[#allocation2 + $0x30] sm:$0xff] %vm32_vm1, %v26706_v1  ;;  %41 = vst.msk [vmem:[#allocation2 + $0x38] sm:$0xff] %vm32_vm1, %v26706_v1  ;;  %v144_v5 = vld [vmem:[%s26697_s0 + $0x10] sm:$0xff]  ;;  %v145_v6 = vld [vmem:[%s26697_s0 + $0x18] sm:$0xff]  ;;  %16874 = vmatpush3.msk.msra.mxu0 %vm594_vm0, %v19774_v0 }
   0x4   :  { %43 = vst.msk [vmem:[#allocation2 + $0x48] sm:$0xff] %vm32_vm1, %v26706_v1  ;;  %44 = vst.msk [vmem:[#allocation2 + $0x50] sm:$0xff] %vm32_vm1, %v26706_v1  ;;  %v146_v7 = vld [vmem:[%s26697_s0 + $0x20] sm:$0xff]  ;;  %v147_v8 = vld [vmem:[%s26697_s0 + $0x28] sm:$0xff]  ;;  %16971 = vmatprep.subr.msk.mxu0 %vm594_vm0, %v19923_v2 }
   0x5   :  { %46 = vst.msk [vmem:[#allocation2 + $0x60] sm:$0xff] %vm32_vm1, %v26706_v1  ;;  %47 = vst.msk [vmem:[#allocation2 + $0x68] sm:$0xff] %vm32_vm1, %v26706_v1  ;;  %v148_v9 = vld [vmem:[%s26697_s0 + $0x30] sm:$0xff]  ;;  %v149_v10 = vld [vmem:[%s26697_s0 + $0x38] sm:$0xff] }
   0x6   :  { %49 = vst.msk [vmem:[#allocation2 + $0x78] sm:$0xff] %vm32_vm1, %v26706_v1  ;;  %50 = vst.msk [vmem:[#allocation2 + $0x80] sm:$0xff] %vm32_vm1, %v26706_v1  ;;  %v150_v11 = vld [vmem:[%s26697_s0 + $0x40] sm:$0xff]  ;;  %v151_v12 = vld [vmem:[%s26697_s0 + $0x48] sm:$0xff] }
   0x7   :  { %52 = vst.msk [vmem:[#allocation2 + $0x90] sm:$0xff] %vm32_vm1, %v26706_v1  ;;  %53 = vst.msk [vmem:[#allocation2 + $0x98] sm:$0xff] %vm32_vm1, %v26706_v1  ;;  %v152_v13 = vld [vmem:[%s26697_s0 + $0x50] sm:$0xff]  ;;  %v153_v14 = vld [vmem:[%s26697_s0 + $0x58] sm:$0xff] }
   0x8   :  { %55 = vst.msk [vmem:[#allocation2 + $0xa8] sm:$0xff] %vm32_vm1, %v26706_v1  ;;  %56 = vst.msk [vmem:[#allocation2 + $0xb0] sm:$0xff] %vm32_vm1, %v26706_v1  ;;  %v154_v15 = vld [vmem:[%s26697_s0 + $0x60] sm:$0xff]  ;;  %v155_v16 = vld [vmem:[%s26697_s0 + $0x68] sm:$0xff] }
   0x9   :  { %58 = vst.msk [vmem:[#allocation2 + $0xc0] sm:$0xff] %vm32_vm1, %v26706_v1  ;;  %59 = vst.msk [vmem:[#allocation2 + $0xc8] sm:$0xff] %vm32_vm1, %v26706_v1  ;;  %v156_v17 = vld [vmem:[%s26697_s0 + $0x70] sm:$0xff]  ;;  %v157_v18 = vld [vmem:[%s26697_s0 + $0x78] sm:$0xff] }
   0xa   :  { %61 = vst.msk [vmem:[#allocation2 + $0xd8] sm:$0xff] %vm32_vm1, %v26706_v1  ;;  %62 = vst.msk [vmem:[#allocation2 + $0xe0] sm:$0xff] %vm32_vm1, %v26706_v1  ;;  %v158_v19 = vld [vmem:[%s26697_s0 + $0x80] sm:$0xff]  ;;  %v159_v20 = vld [vmem:[%s26697_s0 + $0x88] sm:$0xff] }
   0xb   :  { %64 = vst.msk [vmem:[#allocation2 + $0xf0] sm:$0xff] %vm32_vm1, %v26706_v1  ;;  %65 = vst.msk [vmem:[#allocation2 + $0xf8] sm:$0xff] %vm32_vm1, %v26706_v1  ;;  %v160_v21 = vld [vmem:[%s26697_s0 + $0x90] sm:$0xff]  ;;  %v336_v22 = vld [vmem:[#allocation2 + $0x1] sm:$0xff] }
   0xc   :  { %67 = vst.msk [vmem:[#allocation2 + $0x108] sm:$0xff] %vm32_vm1, %v26706_v1  ;;  %68 = vst.msk [vmem:[#allocation2 + $0x110] sm:$0xff] %vm32_vm1, %v26706_v1  ;;  %v161_v24 = vld [vmem:[%s26697_s0 + $0x98] sm:$0xff]  ;;  %16875 = vmatprep.mubr.msk.f32.mxu0 %vm32_vm1, %v336_v22  ;;  %v162_v26 = vld [vmem:[%s26697_s0 + $0xa0] sm:$0xff] }
   0xd   :  { %70 = vst.msk [vmem:[#allocation2 + $0x120] sm:$0xff] %vm32_vm1, %v26706_v1  ;;  %71 = vst.msk [vmem:[#allocation2 + $0x128] sm:$0xff] %vm32_vm1, %v26706_v1  ;;  %v163_v27 = vld [vmem:[%s26697_s0 + $0xa8] sm:$0xff]  ;;  %v164_v32 = vld [vmem:[%s26697_s0 + $0xb0] sm:$0xff] }
   0xe   :  { %73 = vst.msk [vmem:[#allocation2 + $0x138] sm:$0xff] %vm32_vm1, %v26706_v1  ;;  %74 = vst.msk [vmem:[#allocation2 + $0x140] sm:$0xff] %vm32_vm1, %v26706_v1  ;;  %v165_v33 = vld [vmem:[%s26697_s0 + $0xb8] sm:$0xff]  ;;  %v166_v34 = vld [vmem:[%s26697_s0 + $0xc0] sm:$0xff] }
   0xf   :  { %76 = vst.msk [vmem:[#allocation2 + $0x150] sm:$0xff] %vm32_vm1, %v26706_v1  ;;  %77 = vst.msk [vmem:[#allocation2 + $0x158] sm:$0xff] %vm32_vm1, %v26706_v1  ;;  %v167_v35 = vld [vmem:[%s26697_s0 + $0xc8] sm:$0xff]  ;;  %v168_v36 = vld [vmem:[%s26697_s0 + $0xd0] sm:$0xff] }
  0x10   :  { %79 = vst.msk [vmem:[#allocation2 + $0x168] sm:$0xff] %vm32_vm1, %v26706_v1  ;;  %80 = vst.msk [vmem:[#allocation2 + $0x170] sm:$0xff] %vm32_vm1, %v26706_v1  ;;  %v169_v37 = vld [vmem:[%s26697_s0 + $0xd8] sm:$0xff]  ;;  %v170_v39 = vld [vmem:[%s26697_s0 + $0xe0] sm:$0xff] }
  0x11   :  { %82 = vst.msk [vmem:[#allocation2 + $0x180] sm:$0xff] %vm32_vm1, %v26706_v1  ;;  %83 = vst.msk [vmem:[#allocation2 + $0x188] sm:$0xff] %vm32_vm1, %v26706_v1  ;;  %v171_v40 = vld [vmem:[%s26697_s0 + $0xe8] sm:$0xff]  ;;  %v174_v42 = vld [vmem:[%s26697_s0 + $0x100] sm:$0xff] }
  0x12   :  { %85 = vst.msk [vmem:[#allocation2 + $0x198] sm:$0xff] %vm32_vm1, %v26706_v1  ;;  %86 = vst.msk [vmem:[#allocation2 + $0x1a0] sm:$0xff] %vm32_vm1, %v26706_v1  ;;  %v175_v43 = vld [vmem:[%s26697_s0 + $0x108] sm:$0xff]  ;;  %v176_v45 = vld [vmem:[%s26697_s0 + $0x110] sm:$0xff] }
  0x13   :  { %88 = vst.msk [vmem:[#allocation2 + $0x1b0] sm:$0xff] %vm32_vm1, %v26706_v1  ;;  %89 = vst.msk [vmem:[#allocation2 + $0x1b8] sm:$0xff] %vm32_vm1, %v26706_v1  ;;  %v177_v46 = vld [vmem:[%s26697_s0 + $0x118] sm:$0xff]  ;;  %v178_v47 = vld [vmem:[%s26697_s0 + $0x120] sm:$0xff] }
  0x14   :  { %91 = vst.msk [vmem:[#allocation2 + $0x1c8] sm:$0xff] %vm32_vm1, %v26706_v1  ;;  %92 = vst.msk [vmem:[#allocation2 + $0x1d0] sm:$0xff] %vm32_vm1, %v26706_v1  ;;  %v179_v48 = vld [vmem:[%s26697_s0 + $0x128] sm:$0xff]  ;;  %v180_v49 = vld [vmem:[%s26697_s0 + $0x130] sm:$0xff] }
  0x15   :  { %94 = vst.msk [vmem:[#allocation2 + $0x1e0] sm:$0xff] %vm32_vm1, %v26706_v1  ;;  %95 = vst.msk [vmem:[#allocation2 + $0x1e8] sm:$0xff] %vm32_vm1, %v26706_v1  ;;  %v181_v50 = vld [vmem:[%s26697_s0 + $0x138] sm:$0xff]  ;;  %v182_v51 = vld [vmem:[%s26697_s0 + $0x140] sm:$0xff] }
  0x16   :  { %97 = vst.msk [vmem:[#allocation2 + $0x1f8] sm:$0xff] %vm32_vm1, %v26706_v1  ;;  %98 = vst.msk [vmem:[#allocation2 + $0x200] sm:$0xff] %vm32_vm1, %v26706_v1  ;;  %v183_v52 = vld [vmem:[%s26697_s0 + $0x148] sm:$0xff]  ;;  %v184_v53 = vld [vmem:[%s26697_s0 + $0x150] sm:$0xff] }
  0x17   :  { %100 = vst.msk [vmem:[#allocation2 + $0x210] sm:$0xff] %vm32_vm1, %v26706_v1  ;;  %101 = vst.msk [vmem:[#allocation2 + $0x218] sm:$0xff] %vm32_vm1, %v26706_v1  ;;  %v185_v55 = vld [vmem:[%s26697_s0 + $0x158] sm:$0xff]  ;;  %v186_v56 = vld [vmem:[%s26697_s0 + $0x160] sm:$0xff] }
  0x18   :  { %103 = vst.msk [vmem:[#allocation2 + $0x228] sm:$0xff] %vm32_vm1, %v26706_v1  ;;  %104 = vst.msk [vmem:[#allocation2 + $0x230] sm:$0xff] %vm32_vm1, %v26706_v1  ;;  %v187_v57 = vld [vmem:[%s26697_s0 + $0x168] sm:$0xff]  ;;  %v188_v59 = vld [vmem:[%s26697_s0 + $0x170] sm:$0xff] }
  0x19   :  { %106 = vst.msk [vmem:[#allocation2 + $0x240] sm:$0xff] %vm32_vm1, %v26706_v1  ;;  %107 = vst.msk [vmem:[#allocation2 + $0x248] sm:$0xff] %vm32_vm1, %v26706_v1  ;;  %v189_v61 = vld [vmem:[%s26697_s0 + $0x178] sm:$0xff]  ;;  %v190_v0 = vld [vmem:[%s26697_s0 + $0x180] sm:$0xff] }
  0x1a   :  { %109 = vst.msk [vmem:[#allocation2 + $0x258] sm:$0xff] %vm32_vm1, %v26706_v1  ;;  %110 = vst.msk [vmem:[#allocation2 + $0x260] sm:$0xff] %vm32_vm1, %v26706_v1 }
  0x1b   :  { %112 = vst.msk [vmem:[#allocation2 + $0x270] sm:$0xff] %vm32_vm1, %v26706_v1  ;;  %113 = vst.msk [vmem:[#allocation2 + $0x278] sm:$0xff] %vm32_vm1, %v26706_v1 }
  0x1c   :  { %115 = vst.msk [vmem:[#allocation2 + $0x288] sm:$0xff] %vm32_vm1, %v26706_v1  ;;  %116 = vst.msk [vmem:[#allocation2 + $0x290] sm:$0xff] %vm32_vm1, %v26706_v1 }
  0x1d   :  { %118 = vst.msk [vmem:[#allocation2 + $0x2a0] sm:$0xff] %vm32_vm1, %v26706_v1  ;;  %119 = vst.msk [vmem:[#allocation2 + $0x2a8] sm:$0xff] %vm32_vm1, %v26706_v1 }
  0x1e   :  { %121 = vst.msk [vmem:[#allocation2 + $0x2b8] sm:$0xff] %vm32_vm1, %v26706_v1  ;;  %122 = vst.msk [vmem:[#allocation2 + $0x2c0] sm:$0xff] %vm32_vm1, %v26706_v1 }
  0x1f   :  { %124 = vst.msk [vmem:[#allocation2 + $0x2d0] sm:$0xff] %vm32_vm1, %v26706_v1  ;;  %125 = vst.msk [vmem:[#allocation2 + $0x2d8] sm:$0xff] %vm32_vm1, %v26706_v1 }
  0x20   :  { %127 = vst.msk [vmem:[#allocation2 + $0x2e8] sm:$0xff] %vm32_vm1, %v26706_v1  ;;  %128 = vst.msk [vmem:[#allocation2 + $0x2f0] sm:$0xff] %vm32_vm1, %v26706_v1 }
  0x21   :  { %130 = vst.msk [vmem:[#allocation2 + $0x300] sm:$0xff] %vm32_vm1, %v26706_v1  ;;  %131 = vst.msk [vmem:[#allocation2 + $0x308] sm:$0xff] %vm32_vm1, %v26706_v1 }
  0x22   :  { %133 = vst.msk [vmem:[#allocation2 + $0x318] sm:$0xff] %vm32_vm1, %v26706_v1  ;;  %134 = vst.msk [vmem:[#allocation2 + $0x320] sm:$0xff] %vm32_vm1, %v26706_v1 }
  0x23   :  { %136 = vst.msk [vmem:[#allocation2 + $0x330] sm:$0xff] %vm32_vm1, %v26706_v1  ;;  %137 = vst.msk [vmem:[#allocation2 + $0x338] sm:$0xff] %vm32_vm1, %v26706_v1 }
  0x24   :  { %139 = vst.msk [vmem:[#allocation2 + $0x348] sm:$0xff] %vm32_vm1, %v26706_v1  ;;  %140 = vst.msk [vmem:[#allocation2 + $0x350] sm:$0xff] %vm32_vm1, %v26706_v1 }
  0x25   :  { %36 = vst.msk [vmem:[#allocation2 + $0x10] sm:$0x3] %vm35_vm2, %v26706_v1  ;;  %39 = vst.msk [vmem:[#allocation2 + $0x28] sm:$0x3] %vm35_vm2, %v26706_v1 }
  0x26   :  { %42 = vst.msk [vmem:[#allocation2 + $0x40] sm:$0x3] %vm35_vm2, %v26706_v1  ;;  %45 = vst.msk [vmem:[#allocation2 + $0x58] sm:$0x3] %vm35_vm2, %v26706_v1 }
  0x27   :  { %48 = vst.msk [vmem:[#allocation2 + $0x70] sm:$0x3] %vm35_vm2, %v26706_v1  ;;  %51 = vst.msk [vmem:[#allocation2 + $0x88] sm:$0x3] %vm35_vm2, %v26706_v1 }
  0x28   :  { %54 = vst.msk [vmem:[#allocation2 + $0xa0] sm:$0x3] %vm35_vm2, %v26706_v1  ;;  %57 = vst.msk [vmem:[#allocation2 + $0xb8] sm:$0x3] %vm35_vm2, %v26706_v1 }
  0x29   :  { %60 = vst.msk [vmem:[#allocation2 + $0xd0] sm:$0x3] %vm35_vm2, %v26706_v1  ;;  %63 = vst.msk [vmem:[#allocation2 + $0xe8] sm:$0x3] %vm35_vm2, %v26706_v1 }
  0x2a   :  { %66 = vst.msk [vmem:[#allocation2 + $0x100] sm:$0x3] %vm35_vm2, %v26706_v1  ;;  %69 = vst.msk [vmem:[#allocation2 + $0x118] sm:$0x3] %vm35_vm2, %v26706_v1 }
  0x2b   :  { %72 = vst.msk [vmem:[#allocation2 + $0x130] sm:$0x3] %vm35_vm2, %v26706_v1  ;;  %75 = vst.msk [vmem:[#allocation2 + $0x148] sm:$0x3] %vm35_vm2, %v26706_v1 }
  0x2c   :  { %78 = vst.msk [vmem:[#allocation2 + $0x160] sm:$0x3] %vm35_vm2, %v26706_v1  ;;  %81 = vst.msk [vmem:[#allocation2 + $0x178] sm:$0x3] %vm35_vm2, %v26706_v1  ;;  %v337_v23 = vld [vmem:[#allocation2 + $0x9] sm:$0xff] }
  0x2d   :  { %84 = vst.msk [vmem:[#allocation2 + $0x190] sm:$0x3] %vm35_vm2, %v26706_v1  ;;  %87 = vst.msk [vmem:[#allocation2 + $0x1a8] sm:$0x3] %vm35_vm2, %v26706_v1  ;;  %16876 = vmatmul.mubr.msk.f32.vlgmr.msra.gmra.mrb[0].mxu0 %vm32_vm1, %v337_v23 }
  0x2e   :  { %90 = vst.msk [vmem:[#allocation2 + $0x1c0] sm:$0x3] %vm35_vm2, %v26706_v1  ;;  %93 = vst.msk [vmem:[#allocation2 + $0x1d8] sm:$0x3] %vm35_vm2, %v26706_v1  ;;  %16972 = vmatpush3.msk.msra.mxu0 %vm594_vm0, %v19923_v2  ;;  %v191_v2 = vld [vmem:[%s26697_s0 + $0x188] sm:$0xff] }
  0x2f   :  { %96 = vst.msk [vmem:[#allocation2 + $0x1f0] sm:$0x3] %vm35_vm2, %v26706_v1  ;;  %99 = vst.msk [vmem:[#allocation2 + $0x208] sm:$0x3] %vm35_vm2, %v26706_v1 }
  0x30   :  { %102 = vst.msk [vmem:[#allocation2 + $0x220] sm:$0x3] %vm35_vm2, %v26706_v1  ;;  %105 = vst.msk [vmem:[#allocation2 + $0x238] sm:$0x3] %vm35_vm2, %v26706_v1 }
  0x31   :  { %108 = vst.msk [vmem:[#allocation2 + $0x250] sm:$0x3] %vm35_vm2, %v26706_v1  ;;  %111 = vst.msk [vmem:[#allocation2 + $0x268] sm:$0x3] %vm35_vm2, %v26706_v1 }
  0x32   :  { %114 = vst.msk [vmem:[#allocation2 + $0x280] sm:$0x3] %vm35_vm2, %v26706_v1  ;;  %117 = vst.msk [vmem:[#allocation2 + $0x298] sm:$0x3] %vm35_vm2, %v26706_v1 }
  0x33   :  { %120 = vst.msk [vmem:[#allocation2 + $0x2b0] sm:$0x3] %vm35_vm2, %v26706_v1  ;;  %123 = vst.msk [vmem:[#allocation2 + $0x2c8] sm:$0x3] %vm35_vm2, %v26706_v1 }
  0x34   :  { %126 = vst.msk [vmem:[#allocation2 + $0x2e0] sm:$0x3] %vm35_vm2, %v26706_v1  ;;  %129 = vst.msk [vmem:[#allocation2 + $0x2f8] sm:$0x3] %vm35_vm2, %v26706_v1 }
  0x35   :  { %132 = vst.msk [vmem:[#allocation2 + $0x310] sm:$0x3] %vm35_vm2, %v26706_v1  ;;  %135 = vst.msk [vmem:[#allocation2 + $0x328] sm:$0x3] %vm35_vm2, %v26706_v1 }
  0x36   :  { %138 = vst.msk [vmem:[#allocation2 + $0x340] sm:$0x3] %vm35_vm2, %v26706_v1  ;;  %141 = vst.msk [vmem:[#allocation2 + $0x358] sm:$0x3] %vm35_vm2, %v26706_v1 }
  0x37   :  { %207 = vst.msk [vmem:[#allocation2 + $0x19] sm:$0xff] %vm32_vm1, %v142_v3  ;;  %208 = vst.msk [vmem:[#allocation2 + $0x21] sm:$0xff] %vm32_vm1, %v143_v4  ;;  %v192_v3 = vld [vmem:[%s26697_s0 + $0x190] sm:$0xff]  ;;  %v193_v4 = vld [vmem:[%s26697_s0 + $0x198] sm:$0xff] }
  0x38   :  { %209 = vst.msk [vmem:[#allocation2 + $0x31] sm:$0xff] %vm32_vm1, %v144_v5  ;;  %210 = vst.msk [vmem:[#allocation2 + $0x39] sm:$0xff] %vm32_vm1, %v145_v6  ;;  %v194_v5 = vld [vmem:[%s26697_s0 + $0x1a0] sm:$0xff]  ;;  %v195_v6 = vld [vmem:[%s26697_s0 + $0x1a8] sm:$0xff] }
  0x39   :  { %211 = vst.msk [vmem:[#allocation2 + $0x49] sm:$0xff] %vm32_vm1, %v146_v7  ;;  %212 = vst.msk [vmem:[#allocation2 + $0x51] sm:$0xff] %vm32_vm1, %v147_v8  ;;  %v196_v8 = vld [vmem:[%s26697_s0 + $0x1b0] sm:$0xff] }
  0x3a   :  { %213 = vst.msk [vmem:[#allocation2 + $0x61] sm:$0xff] %vm32_vm1, %v148_v9  ;;  %214 = vst.msk [vmem:[#allocation2 + $0x69] sm:$0xff] %vm32_vm1, %v149_v10  ;;  %v197_v9 = vld [vmem:[%s26697_s0 + $0x1b8] sm:$0xff] }
  0x3b   :  { %215 = vst.msk [vmem:[#allocation2 + $0x79] sm:$0xff] %vm32_vm1, %v150_v11  ;;  %216 = vst.msk [vmem:[#allocation2 + $0x81] sm:$0xff] %vm32_vm1, %v151_v12  ;;  %v198_v11 = vld [vmem:[%s26697_s0 + $0x1c0] sm:$0xff]  ;;  %v199_v12 = vld [vmem:[%s26697_s0 + $0x1c8] sm:$0xff] }
  0x3c   :  { %217 = vst.msk [vmem:[#allocation2 + $0x91] sm:$0xff] %vm32_vm1, %v152_v13  ;;  %218 = vst.msk [vmem:[#allocation2 + $0x99] sm:$0xff] %vm32_vm1, %v153_v14  ;;  %v200_v13 = vld [vmem:[%s26697_s0 + $0x1d0] sm:$0xff]  ;;  %v201_v14 = vld [vmem:[%s26697_s0 + $0x1d8] sm:$0xff] }
  0x3d   :  { %219 = vst.msk [vmem:[#allocation2 + $0xa9] sm:$0xff] %vm32_vm1, %v154_v15  ;;  %220 = vst.msk [vmem:[#allocation2 + $0xb1] sm:$0xff] %vm32_vm1, %v155_v16  ;;  %v202_v15 = vld [vmem:[%s26697_s0 + $0x1e0] sm:$0xff]  ;;  %v203_v16 = vld [vmem:[%s26697_s0 + $0x1e8] sm:$0xff] }
  0x3e   :  { %221 = vst.msk [vmem:[#allocation2 + $0xc1] sm:$0xff] %vm32_vm1, %v156_v17  ;;  %222 = vst.msk [vmem:[#allocation2 + $0xc9] sm:$0xff] %vm32_vm1, %v157_v18  ;;  %v338_v25 = vld [vmem:[#allocation2 + $0x19] sm:$0xff]  ;;  %v339_v28 = vld [vmem:[#allocation2 + $0x21] sm:$0xff] }
  0x3f   :  { %223 = vst.msk [vmem:[#allocation2 + $0xd9] sm:$0xff] %vm32_vm1, %v158_v19  ;;  %224 = vst.msk [vmem:[#allocation2 + $0xe1] sm:$0xff] %vm32_vm1, %v159_v20  ;;  %16878 = vmatprep.mubr.msk.f32.mxu0 %vm32_vm1, %v338_v25  ;;  %v340_v29 = vld [vmem:[#allocation2 + $0x31] sm:$0xff]  ;;  %v341_v30 = vld [vmem:[#allocation2 + $0x39] sm:$0xff] }
  0x40   :  { %225 = vst.msk [vmem:[#allocation2 + $0xf1] sm:$0xff] %vm32_vm1, %v160_v21  ;;  %226 = vst.msk [vmem:[#allocation2 + $0xf9] sm:$0xff] %vm32_vm1, %v161_v24  ;;  %16879 = vmatmul.mubr.msk.f32.gmra.mrb[2].mxu0 %vm32_vm1, %v339_v28  ;;  %v342_v31 = vld [vmem:[#allocation2 + $0x49] sm:$0xff]  ;;  %v343_v38 = vld [vmem:[#allocation2 + $0x51] sm:$0xff] }
  0x41   :  { %227 = vst.msk [vmem:[#allocation2 + $0x109] sm:$0xff] %vm32_vm1, %v162_v26  ;;  %228 = vst.msk [vmem:[#allocation2 + $0x111] sm:$0xff] %vm32_vm1, %v163_v27  ;;  %16881 = vmatprep.mubr.msk.f32.mxu0 %vm32_vm1, %v340_v29  ;;  %v344_v41 = vld [vmem:[#allocation2 + $0x61] sm:$0xff]  ;;  %v345_v44 = vld [vmem:[#allocation2 + $0x69] sm:$0xff] }
  0x42   :  { %229 = vst.msk [vmem:[#allocation2 + $0x121] sm:$0xff] %vm32_vm1, %v164_v32  ;;  %230 = vst.msk [vmem:[#allocation2 + $0x129] sm:$0xff] %vm32_vm1, %v165_v33  ;;  %v346_v54 = vld [vmem:[#allocation2 + $0x79] sm:$0xff]  ;;  %v347_v58 = vld [vmem:[#allocation2 + $0x81] sm:$0xff] }
  0x43   :  { %231 = vst.msk [vmem:[#allocation2 + $0x139] sm:$0xff] %vm32_vm1, %v166_v34  ;;  %232 = vst.msk [vmem:[#allocation2 + $0x141] sm:$0xff] %vm32_vm1, %v167_v35  ;;  %v348_v60 = vld [vmem:[#allocation2 + $0x91] sm:$0xff]  ;;  %v349_v62 = vld [vmem:[#allocation2 + $0x99] sm:$0xff] }
  0x44   :  { %16882 = vmatmul.mubr.msk.f32.gmra.mrb[4].mxu0 %vm32_vm1, %v341_v30  ;;  %233 = vst.msk [vmem:[#allocation2 + $0x151] sm:$0xff] %vm32_vm1, %v168_v36  ;;  %234 = vst.msk [vmem:[#allocation2 + $0x159] sm:$0xff] %vm32_vm1, %v169_v37  ;;  %v350_v63 = vld [vmem:[#allocation2 + $0xa9] sm:$0xff]  ;;  %v351_v7 = vld [vmem:[#allocation2 + $0xb1] sm:$0xff] }
  0x45   :  { %16884 = vmatprep.mubr.msk.f32.mxu0 %vm32_vm1, %v342_v31  ;;  %235 = vst.msk [vmem:[#allocation2 + $0x169] sm:$0xff] %vm32_vm1, %v170_v39  ;;  %236 = vst.msk [vmem:[#allocation2 + $0x171] sm:$0xff] %vm32_vm1, %v171_v40  ;;  %v352_v10 = vld [vmem:[#allocation2 + $0xc1] sm:$0xff]  ;;  %v353_v18 = vld [vmem:[#allocation2 + $0xc9] sm:$0xff] }
  0x46   :  { %239 = vst.msk [vmem:[#allocation2 + $0x1c9] sm:$0xff] %vm32_vm1, %v174_v42  ;;  %240 = vst.msk [vmem:[#allocation2 + $0x1d1] sm:$0xff] %vm32_vm1, %v175_v43  ;;  %v20263_v17 = vld [vmem:[%s26696_s1 + $0x8] sm:$0xf]  ;;  %v354_v19 = vld [vmem:[#allocation2 + $0xd9] sm:$0xff] }
  0x47   :  { %241 = vst.msk [vmem:[#allocation2 + $0x1e1] sm:$0xff] %vm32_vm1, %v176_v45  ;;  %242 = vst.msk [vmem:[#allocation2 + $0x1e9] sm:$0xff] %vm32_vm1, %v177_v46  ;;  %17069 = vmatprep.subr.msk.mxu0 %vm594_vm0, %v20263_v17  ;;  %v355_v20 = vld [vmem:[#allocation2 + $0xe1] sm:$0xff]  ;;  %v356_v21 = vld [vmem:[#allocation2 + $0xf1] sm:$0xff] }
  0x48   :  { %16885 = vmatmul.mubr.msk.f32.gmra.mrb[6].mxu0 %vm32_vm1, %v343_v38  ;;  %243 = vst.msk [vmem:[#allocation2 + $0x1f9] sm:$0xff] %vm32_vm1, %v178_v47  ;;  %244 = vst.msk [vmem:[#allocation2 + $0x201] sm:$0xff] %vm32_vm1, %v179_v48  ;;  %v357_v22 = vld [vmem:[#allocation2 + $0xf9] sm:$0xff]  ;;  %v358_v23 = vld [vmem:[#allocation2 + $0x109] sm:$0xff] }
  0x49   :  { %16887 = vmatprep.mubr.msk.f32.mxu0 %vm32_vm1, %v344_v41  ;;  %245 = vst.msk [vmem:[#allocation2 + $0x211] sm:$0xff] %vm32_vm1, %v180_v49  ;;  %246 = vst.msk [vmem:[#allocation2 + $0x219] sm:$0xff] %vm32_vm1, %v181_v50  ;;  %v359_v24 = vld [vmem:[#allocation2 + $0x111] sm:$0xff]  ;;  %v360_v25 = vld [vmem:[#allocation2 + $0x121] sm:$0xff] }
  0x4a   :  { %247 = vst.msk [vmem:[#allocation2 + $0x229] sm:$0xff] %vm32_vm1, %v182_v51  ;;  %248 = vst.msk [vmem:[#allocation2 + $0x231] sm:$0xff] %vm32_vm1, %v183_v52  ;;  %v361_v26 = vld [vmem:[#allocation2 + $0x129] sm:$0xff]  ;;  %v362_v27 = vld [vmem:[#allocation2 + $0x139] sm:$0xff] }
  0x4b   :  { %249 = vst.msk [vmem:[#allocation2 + $0x241] sm:$0xff] %vm32_vm1, %v184_v53  ;;  %250 = vst.msk [vmem:[#allocation2 + $0x249] sm:$0xff] %vm32_vm1, %v185_v55  ;;  %v363_v28 = vld [vmem:[#allocation2 + $0x141] sm:$0xff]  ;;  %v364_v29 = vld [vmem:[#allocation2 + $0x151] sm:$0xff] }
  0x4c   :  { %16888 = vmatmul.mubr.msk.f32.gmra.mrb[8].mxu0 %vm32_vm1, %v345_v44  ;;  %251 = vst.msk [vmem:[#allocation2 + $0x259] sm:$0xff] %vm32_vm1, %v186_v56  ;;  %252 = vst.msk [vmem:[#allocation2 + $0x261] sm:$0xff] %vm32_vm1, %v187_v57  ;;  %v365_v30 = vld [vmem:[#allocation2 + $0x159] sm:$0xff]  ;;  %v366_v31 = vld [vmem:[#allocation2 + $0x169] sm:$0xff] }
  0x4d   :  { %16890 = vmatprep.mubr.msk.f32.mxu0 %vm32_vm1, %v346_v54  ;;  %253 = vst.msk [vmem:[#allocation2 + $0x271] sm:$0xff] %vm32_vm1, %v188_v59  ;;  %254 = vst.msk [vmem:[#allocation2 + $0x279] sm:$0xff] %vm32_vm1, %v189_v61  ;;  %v367_v32 = vld [vmem:[#allocation2 + $0x171] sm:$0xff]  ;;  %v369_v34 = vld [vmem:[#allocation2 + $0x1b9] sm:$0xff] }
  0x4e   :  { %255 = vst.msk [vmem:[#allocation2 + $0x289] sm:$0xff] %vm32_vm1, %v190_v0  ;;  %256 = vst.msk [vmem:[#allocation2 + $0x291] sm:$0xff] %vm32_vm1, %v191_v2  ;;  %v368_v33 = vld [vmem:[#allocation2 + $0x1b1] sm:$0xff]  ;;  %v370_v35 = vld [vmem:[#allocation2 + $0x1c9] sm:$0xff] }
  0x4f   :  { %257 = vst.msk [vmem:[#allocation2 + $0x2a1] sm:$0xff] %vm32_vm1, %v192_v3  ;;  %258 = vst.msk [vmem:[#allocation2 + $0x2a9] sm:$0xff] %vm32_vm1, %v193_v4  ;;  %v371_v36 = vld [vmem:[#allocation2 + $0x1d1] sm:$0xff]  ;;  %v372_v37 = vld [vmem:[#allocation2 + $0x1e1] sm:$0xff] }
  0x50   :  { %16891 = vmatmul.mubr.msk.f32.gmra.mrb[10].mxu0 %vm32_vm1, %v347_v58  ;;  %259 = vst.msk [vmem:[#allocation2 + $0x2b9] sm:$0xff] %vm32_vm1, %v194_v5  ;;  %260 = vst.msk [vmem:[#allocation2 + $0x2c1] sm:$0xff] %vm32_vm1, %v195_v6  ;;  %v373_v38 = vld [vmem:[#allocation2 + $0x1e9] sm:$0xff]  ;;  %v374_v39 = vld [vmem:[#allocation2 + $0x1f9] sm:$0xff] }
  0x51   :  { %16893 = vmatprep.mubr.msk.f32.mxu0 %vm32_vm1, %v348_v60  ;;  %261 = vst.msk [vmem:[#allocation2 + $0x2d1] sm:$0xff] %vm32_vm1, %v196_v8  ;;  %262 = vst.msk [vmem:[#allocation2 + $0x2d9] sm:$0xff] %vm32_vm1, %v197_v9  ;;  %v375_v40 = vld [vmem:[#allocation2 + $0x201] sm:$0xff]  ;;  %v376_v41 = vld [vmem:[#allocation2 + $0x211] sm:$0xff] }
  0x52   :  { %263 = vst.msk [vmem:[#allocation2 + $0x2e9] sm:$0xff] %vm32_vm1, %v198_v11  ;;  %264 = vst.msk [vmem:[#allocation2 + $0x2f1] sm:$0xff] %vm32_vm1, %v199_v12  ;;  %v377_v42 = vld [vmem:[#allocation2 + $0x219] sm:$0xff]  ;;  %v378_v43 = vld [vmem:[#allocation2 + $0x229] sm:$0xff] }
  0x53   :  { %265 = vst.msk [vmem:[#allocation2 + $0x301] sm:$0xff] %vm32_vm1, %v200_v13  ;;  %266 = vst.msk [vmem:[#allocation2 + $0x309] sm:$0xff] %vm32_vm1, %v201_v14  ;;  %v379_v44 = vld [vmem:[#allocation2 + $0x231] sm:$0xff]  ;;  %v380_v45 = vld [vmem:[#allocation2 + $0x241] sm:$0xff] }
  0x54   :  { %16894 = vmatmul.mubr.msk.f32.gmra.mrb[12].mxu0 %vm32_vm1, %v349_v62  ;;  %267 = vst.msk [vmem:[#allocation2 + $0x319] sm:$0xff] %vm32_vm1, %v202_v15  ;;  %268 = vst.msk [vmem:[#allocation2 + $0x321] sm:$0xff] %vm32_vm1, %v203_v16  ;;  %v381_v46 = vld [vmem:[#allocation2 + $0x249] sm:$0xff]  ;;  %v382_v47 = vld [vmem:[#allocation2 + $0x259] sm:$0xff] }
  0x55   :  { %16896 = vmatprep.mubr.msk.f32.mxu0 %vm32_vm1, %v350_v63  ;;  %v383_v48 = vld [vmem:[#allocation2 + $0x261] sm:$0xff]  ;;  %v384_v49 = vld [vmem:[#allocation2 + $0x271] sm:$0xff]  ;;  %v385_v50 = vld [vmem:[#allocation2 + $0x279] sm:$0xff] }
  0x56   :  { %v386_v51 = vld [vmem:[#allocation2 + $0x289] sm:$0xff]  ;;  %v387_v52 = vld [vmem:[#allocation2 + $0x291] sm:$0xff]  ;;  %v388_v53 = vld [vmem:[#allocation2 + $0x2a1] sm:$0xff] }
  0x57   :  { %v389_v54 = vld [vmem:[#allocation2 + $0x2a9] sm:$0xff]  ;;  %v390_v55 = vld [vmem:[#allocation2 + $0x2b9] sm:$0xff]  ;;  %v391_v56 = vld [vmem:[#allocation2 + $0x2c1] sm:$0xff] }
  0x58   :  { %16897 = vmatmul.mubr.msk.f32.gmra.mrb[14].mxu0 %vm32_vm1, %v351_v7  ;;  %v392_v57 = vld [vmem:[#allocation2 + $0x2d1] sm:$0xff]  ;;  %v393_v58 = vld [vmem:[#allocation2 + $0x2d9] sm:$0xff]  ;;  %v272_v3 = vld [vmem:[#allocation2 + $0x8] sm:$0xff] }
  0x59   :  { %16899 = vmatprep.mubr.msk.f32.mxu0 %vm32_vm1, %v352_v10  ;;  %v394_v59 = vld [vmem:[#allocation2 + $0x2e9] sm:$0xff]  ;;  %v395_v60 = vld [vmem:[#allocation2 + $0x2f1] sm:$0xff]  ;;  %v271_v2 = vld [vmem:[#allocation2] sm:$0xff] }
  0x5a   :  { %v396_v61 = vld [vmem:[#allocation2 + $0x301] sm:$0xff]  ;;  %v397_v62 = vld [vmem:[#allocation2 + $0x309] sm:$0xff]  ;;  %v20317_v4 = vld [vmem:[#allocation2 + $0x18] sm:$0xff] }
  0x5b   :  { %v398_v63 = vld [vmem:[#allocation2 + $0x319] sm:$0xff]  ;;  %v399_v0 = vld [vmem:[#allocation2 + $0x321] sm:$0xff]  ;;  %v20322_v5 = vld [vmem:[%s26696_s1 + $0xc] sm:$0xf] }
  0x5c   :  { %16900 = vmatmul.mubr.msk.f32.gmra.mrb[16].mxu0 %vm32_vm1, %v353_v18  ;;  %v20329_v6 = vld [vmem:[#allocation2 + $0x20] sm:$0xff]  ;;  %v20331_v7 = vld [vmem:[#allocation2 + $0x30] sm:$0xff]  ;;  %v20339_v8 = vld [vmem:[#allocation2 + $0x38] sm:$0xff] }
  0x5d   :  { %16902 = vmatprep.mubr.msk.f32.mxu0 %vm32_vm1, %v354_v19  ;;  %v20341_v9 = vld [vmem:[#allocation2 + $0x48] sm:$0xff]  ;;  %v20347_v10 = vld [vmem:[#allocation2 + $0x50] sm:$0xff]  ;;  %v20349_v11 = vld [vmem:[#allocation2 + $0x60] sm:$0xff] }
  0x5e   :  { %v20355_v12 = vld [vmem:[#allocation2 + $0x68] sm:$0xff]  ;;  %v20357_v13 = vld [vmem:[#allocation2 + $0x78] sm:$0xff]  ;;  %v20363_v14 = vld [vmem:[#allocation2 + $0x80] sm:$0xff] }
  0x5f   :  { %v20365_v15 = vld [vmem:[#allocation2 + $0x90] sm:$0xff]  ;;  %v20371_v16 = vld [vmem:[#allocation2 + $0x98] sm:$0xff]  ;;  %v20381_v19 = vld [vmem:[#allocation2 + $0xc0] sm:$0xff] }
  0x60   :  { %16903 = vmatmul.mubr.msk.f32.gmra.mrb[18].mxu0 %vm32_vm1, %v355_v20  ;;  %v20379_v18 = vld [vmem:[#allocation2 + $0xb0] sm:$0xff]  ;;  %v20387_v20 = vld [vmem:[#allocation2 + $0xc8] sm:$0xff]  ;;  %v20570_v1 = vld [vmem:[#allocation2 + $0x1a] sm:$0xff] }
  0x61   :  { %16905 = vmatprep.mubr.msk.f32.mxu0 %vm32_vm1, %v356_v21  ;;  %v20389_v21 = vld [vmem:[#allocation2 + $0xd8] sm:$0xff]  ;;  %26939 = vst [vmem:[#allocation8_spill] sm:$0xff] %v20570_v1 }
  0x64   :  { %16906 = vmatmul.mubr.msk.f32.gmra.mrb[20].mxu0 %vm32_vm1, %v357_v22  ;;  %v20395_v22 = vld [vmem:[#allocation2 + $0xe0] sm:$0xff] }
  0x65   :  { %16908 = vmatprep.mubr.msk.f32.mxu0 %vm32_vm1, %v358_v23  ;;  %v20397_v23 = vld [vmem:[#allocation2 + $0xf0] sm:$0xff] }
  0x68   :  { %16909 = vmatmul.mubr.msk.f32.gmra.mrb[22].mxu0 %vm32_vm1, %v359_v24  ;;  %v20403_v24 = vld [vmem:[#allocation2 + $0xf8] sm:$0xff] }
  0x69   :  { %16911 = vmatprep.mubr.msk.f32.mxu0 %vm32_vm1, %v360_v25  ;;  %v20405_v25 = vld [vmem:[#allocation2 + $0x108] sm:$0xff] }
  0x6c   :  { %16912 = vmatmul.mubr.msk.f32.gmra.mrb[24].mxu0 %vm32_vm1, %v361_v26  ;;  %v20411_v26 = vld [vmem:[#allocation2 + $0x110] sm:$0xff] }
  0x6d   :  { %16914 = vmatprep.mubr.msk.f32.mxu0 %vm32_vm1, %v362_v27  ;;  %v20413_v27 = vld [vmem:[#allocation2 + $0x120] sm:$0xff] }
  0x70   :  { %16915 = vmatmul.mubr.msk.f32.gmra.mrb[26].mxu0 %vm32_vm1, %v363_v28  ;;  %v20419_v28 = vld [vmem:[#allocation2 + $0x128] sm:$0xff] }
  0x71   :  { %16917 = vmatprep.mubr.msk.f32.mxu0 %vm32_vm1, %v364_v29  ;;  %v20421_v29 = vld [vmem:[#allocation2 + $0x138] sm:$0xff] }
  0x74   :  { %16918 = vmatmul.mubr.msk.f32.gmra.mrb[28].mxu0 %vm32_vm1, %v365_v30  ;;  %v20427_v30 = vld [vmem:[#allocation2 + $0x140] sm:$0xff] }
  0x75   :  { %16920 = vmatprep.mubr.msk.f32.mxu0 %vm32_vm1, %v366_v31  ;;  %v20429_v31 = vld [vmem:[#allocation2 + $0x150] sm:$0xff] }
  0x78   :  { %16921 = vmatmul.mubr.msk.f32.gmra.mrb[30].mxu0 %vm32_vm1, %v367_v32  ;;  %v20435_v32 = vld [vmem:[#allocation2 + $0x158] sm:$0xff] }
  0x79   :  { %16923 = vmatprep.mubr.msk.f32.mxu0 %vm32_vm1, %v368_v33  ;;  %v20437_v33 = vld [vmem:[#allocation2 + $0x168] sm:$0xff] }
  0x7c   :  { %16924 = vmatmul.mubr.msk.f32.gmra.mrb[32].mxu0 %vm32_vm1, %v369_v34  ;;  %v20443_v34 = vld [vmem:[#allocation2 + $0x170] sm:$0xff] }
  0x7d   :  { %16926 = vmatprep.mubr.msk.f32.mxu0 %vm32_vm1, %v370_v35  ;;  %v303_v35 = vld [vmem:[#allocation2 + $0x1b0] sm:$0xff] }
  0x80   :  { %16927 = vmatmul.mubr.msk.f32.gmra.mrb[34].mxu0 %vm32_vm1, %v371_v36  ;;  %v304_v36 = vld [vmem:[#allocation2 + $0x1b8] sm:$0xff] }
  0x81   :  { %16929 = vmatprep.mubr.msk.f32.mxu0 %vm32_vm1, %v372_v37  ;;  %v20448_v37 = vld [vmem:[#allocation2 + $0x1c8] sm:$0xff] }
  0x84   :  { %16930 = vmatmul.mubr.msk.f32.gmra.mrb[36].mxu0 %vm32_vm1, %v373_v38  ;;  %v20453_v38 = vld [vmem:[#allocation2 + $0x1d0] sm:$0xff] }
  0x85   :  { %16932 = vmatprep.mubr.msk.f32.mxu0 %vm32_vm1, %v374_v39  ;;  %v20455_v39 = vld [vmem:[#allocation2 + $0x1e0] sm:$0xff] }
  0x88   :  { %16933 = vmatmul.mubr.msk.f32.gmra.mrb[38].mxu0 %vm32_vm1, %v375_v40  ;;  %v20461_v40 = vld [vmem:[#allocation2 + $0x1e8] sm:$0xff] }
  0x89   :  { %16935 = vmatprep.mubr.msk.f32.mxu0 %vm32_vm1, %v376_v41  ;;  %v20463_v41 = vld [vmem:[#allocation2 + $0x1f8] sm:$0xff] }
  0x8c   :  { %16936 = vmatmul.mubr.msk.f32.gmra.mrb[40].mxu0 %vm32_vm1, %v377_v42  ;;  %v20469_v42 = vld [vmem:[#allocation2 + $0x200] sm:$0xff] }
  0x8d   :  { %16938 = vmatprep.mubr.msk.f32.mxu0 %vm32_vm1, %v378_v43  ;;  %v20471_v43 = vld [vmem:[#allocation2 + $0x210] sm:$0xff] }
  0x90   :  { %16939 = vmatmul.mubr.msk.f32.gmra.mrb[42].mxu0 %vm32_vm1, %v379_v44  ;;  %v20477_v44 = vld [vmem:[#allocation2 + $0x218] sm:$0xff] }
  0x91   :  { %16941 = vmatprep.mubr.msk.f32.mxu0 %vm32_vm1, %v380_v45  ;;  %v20479_v45 = vld [vmem:[#allocation2 + $0x228] sm:$0xff] }
  0x94   :  { %16942 = vmatmul.mubr.msk.f32.gmra.mrb[44].mxu0 %vm32_vm1, %v381_v46  ;;  %v20485_v46 = vld [vmem:[#allocation2 + $0x230] sm:$0xff] }
  0x95   :  { %16944 = vmatprep.mubr.msk.f32.mxu0 %vm32_vm1, %v382_v47  ;;  %v20487_v47 = vld [vmem:[#allocation2 + $0x240] sm:$0xff] }
  0x98   :  { %16945 = vmatmul.mubr.msk.f32.gmra.mrb[46].mxu0 %vm32_vm1, %v383_v48  ;;  %v20493_v48 = vld [vmem:[#allocation2 + $0x248] sm:$0xff] }
  0x99   :  { %16947 = vmatprep.mubr.msk.f32.mxu0 %vm32_vm1, %v384_v49  ;;  %v20495_v49 = vld [vmem:[#allocation2 + $0x258] sm:$0xff] }
  0x9c   :  { %16948 = vmatmul.mubr.msk.f32.gmra.mrb[48].mxu0 %vm32_vm1, %v385_v50  ;;  %v20501_v50 = vld [vmem:[#allocation2 + $0x260] sm:$0xff] }
  0x9d   :  { %16950 = vmatprep.mubr.msk.f32.mxu0 %vm32_vm1, %v386_v51  ;;  %v20503_v51 = vld [vmem:[#allocation2 + $0x270] sm:$0xff] }
  0xa0   :  { %16951 = vmatmul.mubr.msk.f32.gmra.mrb[50].mxu0 %vm32_vm1, %v387_v52  ;;  %v20509_v52 = vld [vmem:[#allocation2 + $0x278] sm:$0xff] }
  0xa1   :  { %16953 = vmatprep.mubr.msk.f32.mxu0 %vm32_vm1, %v388_v53  ;;  %v20511_v53 = vld [vmem:[#allocation2 + $0x288] sm:$0xff] }
  0xa4   :  { %16954 = vmatmul.mubr.msk.f32.gmra.mrb[52].mxu0 %vm32_vm1, %v389_v54  ;;  %v20517_v54 = vld [vmem:[#allocation2 + $0x290] sm:$0xff] }
  0xa5   :  { %16956 = vmatprep.mubr.msk.f32.mxu0 %vm32_vm1, %v390_v55  ;;  %v20519_v55 = vld [vmem:[#allocation2 + $0x2a0] sm:$0xff] }
  0xa8   :  { %16957 = vmatmul.mubr.msk.f32.gmra.mrb[54].mxu0 %vm32_vm1, %v391_v56  ;;  %v20525_v56 = vld [vmem:[#allocation2 + $0x2a8] sm:$0xff] }
  0xa9   :  { %16959 = vmatprep.mubr.msk.f32.mxu0 %vm32_vm1, %v392_v57  ;;  %v20527_v57 = vld [vmem:[#allocation2 + $0x2b8] sm:$0xff] }
  0xac   :  { %16960 = vmatmul.mubr.msk.f32.gmra.mrb[56].mxu0 %vm32_vm1, %v393_v58  ;;  %v20533_v58 = vld [vmem:[#allocation2 + $0x2c0] sm:$0xff] }
  0xad   :  { %16962 = vmatprep.mubr.msk.f32.mxu0 %vm32_vm1, %v394_v59  ;;  %v20535_v59 = vld [vmem:[#allocation2 + $0x2d0] sm:$0xff] }
  0xb0   :  { %16963 = vmatmul.mubr.msk.f32.gmra.mrb[58].mxu0 %vm32_vm1, %v395_v60  ;;  %v20541_v60 = vld [vmem:[#allocation2 + $0x2d8] sm:$0xff] }
  0xb1   :  { %16965 = vmatprep.mubr.msk.f32.mxu0 %vm32_vm1, %v396_v61  ;;  %v20543_v61 = vld [vmem:[#allocation2 + $0x2e8] sm:$0xff] }
  0xb4   :  { %16966 = vmatmul.mubr.msk.f32.gmra.mrb[60].mxu0 %vm32_vm1, %v397_v62  ;;  %v20549_v62 = vld [vmem:[#allocation2 + $0x2f0] sm:$0xff] }
  0xb5   :  { %16968 = vmatprep.mubr.msk.f32.mxu0 %vm32_vm1, %v398_v63  ;;  %v20551_v63 = vld [vmem:[#allocation2 + $0x300] sm:$0xff] }
  0xb6   :  { %26935 = vst [vmem:[#allocation4_spill] sm:$0xff] %v20551_v63 }
  0xb8   :  { %16969 = vmatmul.mubr.msk.f32.gmra.mrb[62].mxu0 %vm32_vm1, %v399_v0  ;;  %v20557_v0 = vld [vmem:[#allocation2 + $0x308] sm:$0xff] }
  0xb9   :  { %16973 = vmatprep.mubr.msk.f32.mxu0 %vm32_vm1, %v271_v2  ;;  %26936 = vst [vmem:[#allocation5_spill] sm:$0xff] %v20557_v0  ;;  %v20559_v2 = vld [vmem:[#allocation2 + $0x318] sm:$0xff] }
  0xba   :  { %26937 = vst [vmem:[#allocation6_spill] sm:$0xff] %v20559_v2 }
  0xbc   :  { %16974 = vmatmul.mubr.msk.f32.vlgmr.msra.gmra.mrb[0].mxu0 %vm32_vm1, %v272_v3  ;;  %v20565_v3 = vld [vmem:[#allocation2 + $0x320] sm:$0xff] }
  0xbd   :  { %17070 = vmatpush3.msk.msra.mxu0 %vm594_vm0, %v20263_v17  ;;  %16976 = vmatprep.mubr.msk.f32.mxu0 %vm32_vm1, %v20317_v4  ;;  %v20373_v17 = vld [vmem:[#allocation2 + $0xa8] sm:$0xff]  ;;  %26938 = vst [vmem:[#allocation7_spill] sm:$0xff] %v20565_v3 }
  0xbe   :  { %17167 = vmatprep.subr.msk.mxu0 %vm594_vm0, %v20322_v5 }
  0xc0   :  { %16977 = vmatmul.mubr.msk.f32.gmra.mrb[2].mxu0 %vm32_vm1, %v20329_v6 }
  0xc1   :  { %16979 = vmatprep.mubr.msk.f32.mxu0 %vm32_vm1, %v20331_v7 }
  0xc4   :  { %16980 = vmatmul.mubr.msk.f32.gmra.mrb[4].mxu0 %vm32_vm1, %v20339_v8 }
  0xc5   :  { %16982 = vmatprep.mubr.msk.f32.mxu0 %vm32_vm1, %v20341_v9 }
  0xc8   :  { %16983 = vmatmul.mubr.msk.f32.gmra.mrb[6].mxu0 %vm32_vm1, %v20347_v10 }
  0xc9   :  { %16985 = vmatprep.mubr.msk.f32.mxu0 %vm32_vm1, %v20349_v11 }
  0xcc   :  { %16986 = vmatmul.mubr.msk.f32.gmra.mrb[8].mxu0 %vm32_vm1, %v20355_v12 }
  0xcd   :  { %16988 = vmatprep.mubr.msk.f32.mxu0 %vm32_vm1, %v20357_v13 }
  0xd0   :  { %16989 = vmatmul.mubr.msk.f32.gmra.mrb[10].mxu0 %vm32_vm1, %v20363_v14 }
  0xd1   :  { %16991 = vmatprep.mubr.msk.f32.mxu0 %vm32_vm1, %v20365_v15 }
  0xd4   :  { %16992 = vmatmul.mubr.msk.f32.gmra.mrb[12].mxu0 %vm32_vm1, %v20371_v16 }
  0xd5   :  { %16994 = vmatprep.mubr.msk.f32.mxu0 %vm32_vm1, %v20373_v17 }
  0xd8   :  { %16995 = vmatmul.mubr.msk.f32.gmra.mrb[14].mxu0 %vm32_vm1, %v20379_v18 }
  0xd9   :  { %16997 = vmatprep.mubr.msk.f32.mxu0 %vm32_vm1, %v20381_v19 }
  0xdc   :  { %16998 = vmatmul.mubr.msk.f32.gmra.mrb[16].mxu0 %vm32_vm1, %v20387_v20 }
  0xdd   :  { %17000 = vmatprep.mubr.msk.f32.mxu0 %vm32_vm1, %v20389_v21 }
  0xe0   :  { %17001 = vmatmul.mubr.msk.f32.gmra.mrb[18].mxu0 %vm32_vm1, %v20395_v22 }
  0xe1   :  { %17003 = vmatprep.mubr.msk.f32.mxu0 %vm32_vm1, %v20397_v23 }
  0xe4   :  { %17004 = vmatmul.mubr.msk.f32.gmra.mrb[20].mxu0 %vm32_vm1, %v20403_v24 }
  0xe5   :  { %17006 = vmatprep.mubr.msk.f32.mxu0 %vm32_vm1, %v20405_v25 }
  0xe8   :  { %17007 = vmatmul.mubr.msk.f32.gmra.mrb[22].mxu0 %vm32_vm1, %v20411_v26 }
  0xe9   :  { %17009 = vmatprep.mubr.msk.f32.mxu0 %vm32_vm1, %v20413_v27 }
  0xec   :  { %17010 = vmatmul.mubr.msk.f32.gmra.mrb[24].mxu0 %vm32_vm1, %v20419_v28 }
  0xed   :  { %17012 = vmatprep.mubr.msk.f32.mxu0 %vm32_vm1, %v20421_v29 }
  0xf0   :  { %17013 = vmatmul.mubr.msk.f32.gmra.mrb[26].mxu0 %vm32_vm1, %v20427_v30 }
  0xf1   :  { %17015 = vmatprep.mubr.msk.f32.mxu0 %vm32_vm1, %v20429_v31 }
  0xf4   :  { %17016 = vmatmul.mubr.msk.f32.gmra.mrb[28].mxu0 %vm32_vm1, %v20435_v32 }
  0xf5   :  { %17018 = vmatprep.mubr.msk.f32.mxu0 %vm32_vm1, %v20437_v33 }
  0xf8   :  { %17019 = vmatmul.mubr.msk.f32.gmra.mrb[30].mxu0 %vm32_vm1, %v20443_v34 }
  0xf9   :  { %17021 = vmatprep.mubr.msk.f32.mxu0 %vm32_vm1, %v303_v35  ;;  %v1563_v35 = vld [vmem:[#allocation2 + $0x2] sm:$0xff] }
  0xfc   :  { %17022 = vmatmul.mubr.msk.f32.gmra.mrb[32].mxu0 %vm32_vm1, %v304_v36  ;;  %v1564_v36 = vld [vmem:[#allocation2 + $0xa] sm:$0xff] }
  0xfd   :  { %17024 = vmatprep.mubr.msk.f32.mxu0 %vm32_vm1, %v20448_v37 }
 0x100   :  { %17025 = vmatmul.mubr.msk.f32.gmra.mrb[34].mxu0 %vm32_vm1, %v20453_v38 }
 0x101   :  { %17027 = vmatprep.mubr.msk.f32.mxu0 %vm32_vm1, %v20455_v39 }
 0x104   :  { %17028 = vmatmul.mubr.msk.f32.gmra.mrb[36].mxu0 %vm32_vm1, %v20461_v40 }
 0x105   :  { %17030 = vmatprep.mubr.msk.f32.mxu0 %vm32_vm1, %v20463_v41 }
 0x108   :  { %17031 = vmatmul.mubr.msk.f32.gmra.mrb[38].mxu0 %vm32_vm1, %v20469_v42 }
 0x109   :  { %17033 = vmatprep.mubr.msk.f32.mxu0 %vm32_vm1, %v20471_v43 }
 0x10c   :  { %17034 = vmatmul.mubr.msk.f32.gmra.mrb[40].mxu0 %vm32_vm1, %v20477_v44 }
 0x10d   :  { %17036 = vmatprep.mubr.msk.f32.mxu0 %vm32_vm1, %v20479_v45 }
 0x110   :  { %17037 = vmatmul.mubr.msk.f32.gmra.mrb[42].mxu0 %vm32_vm1, %v20485_v46 }
 0x111   :  { %17039 = vmatprep.mubr.msk.f32.mxu0 %vm32_vm1, %v20487_v47 }
 0x114   :  { %17040 = vmatmul.mubr.msk.f32.gmra.mrb[44].mxu0 %vm32_vm1, %v20493_v48 }
 0x115   :  { %17042 = vmatprep.mubr.msk.f32.mxu0 %vm32_vm1, %v20495_v49 }
 0x118   :  { %17043 = vmatmul.mubr.msk.f32.gmra.mrb[46].mxu0 %vm32_vm1, %v20501_v50 }
 0x119   :  { %17045 = vmatprep.mubr.msk.f32.mxu0 %vm32_vm1, %v20503_v51 }
 0x11c   :  { %17046 = vmatmul.mubr.msk.f32.gmra.mrb[48].mxu0 %vm32_vm1, %v20509_v52 }
 0x11d   :  { %17048 = vmatprep.mubr.msk.f32.mxu0 %vm32_vm1, %v20511_v53 }
 0x120   :  { %17049 = vmatmul.mubr.msk.f32.gmra.mrb[50].mxu0 %vm32_vm1, %v20517_v54 }
 0x121   :  { %17051 = vmatprep.mubr.msk.f32.mxu0 %vm32_vm1, %v20519_v55 }
 0x124   :  { %17052 = vmatmul.mubr.msk.f32.gmra.mrb[52].mxu0 %vm32_vm1, %v20525_v56 }
 0x125   :  { %17054 = vmatprep.mubr.msk.f32.mxu0 %vm32_vm1, %v20527_v57 }
 0x128   :  { %17055 = vmatmul.mubr.msk.f32.gmra.mrb[54].mxu0 %vm32_vm1, %v20533_v58 }
 0x129   :  { %17057 = vmatprep.mubr.msk.f32.mxu0 %vm32_vm1, %v20535_v59 }
 0x12c   :  { %17058 = vmatmul.mubr.msk.f32.gmra.mrb[56].mxu0 %vm32_vm1, %v20541_v60 }
 0x12d   :  { %17060 = vmatprep.mubr.msk.f32.mxu0 %vm32_vm1, %v20543_v61 }
 0x130   :  { %17061 = vmatmul.mubr.msk.f32.gmra.mrb[58].mxu0 %vm32_vm1, %v20549_v62 }
 0x131   :  { %17063 = vmatprep.mubr.msk.f32.mxu0 %vm32_vm1, %v20551_v63  ;;  %v20575_v63 = vld [vmem:[%s26696_s1 + $0x10] sm:$0xf] }
 0x134   :  { %17064 = vmatmul.mubr.msk.f32.gmra.mrb[60].mxu0 %vm32_vm1, %v20557_v0  ;;  %v1595_v0 = vld [vmem:[#allocation2 + $0x1b2] sm:$0xff] }
 0x135   :  { %17066 = vmatprep.mubr.msk.f32.mxu0 %vm32_vm1, %v20559_v2  ;;  %v20582_v2 = vld [vmem:[#allocation2 + $0x22] sm:$0xff] }
 0x136   :  { %26940 = vst [vmem:[#allocation9_spill] sm:$0xff] %v20582_v2 }
 0x138   :  { %17067 = vmatmul.mubr.msk.f32.gmra.mrb[62].mxu0 %vm32_vm1, %v20565_v3  ;;  %v20584_v3 = vld [vmem:[#allocation2 + $0x32] sm:$0xff] }
 0x139   :  { %17071 = vmatprep.mubr.msk.f32.mxu0 %vm32_vm1, %v1563_v35  ;;  %26941 = vst [vmem:[#allocation10_spill] sm:$0xff] %v20584_v3  ;;  %v20592_v35 = vld [vmem:[#allocation2 + $0x3a] sm:$0xff] }
 0x13a   :  { %26942 = vst [vmem:[#allocation11_spill] sm:$0xff] %v20592_v35 }
 0x13c   :  { %17072 = vmatmul.mubr.msk.f32.vlgmr.msra.gmra.mrb[0].mxu0 %vm32_vm1, %v1564_v36  ;;  %v20594_v36 = vld [vmem:[#allocation2 + $0x4a] sm:$0xff] }
 0x13d   :  { %17168 = vmatpush3.msk.msra.mxu0 %vm594_vm0, %v20322_v5  ;;  %17074 = vmatprep.mubr.msk.f32.mxu0 %vm32_vm1, %v20570_v1  ;;  %26943 = vst [vmem:[#allocation12_spill] sm:$0xff] %v20594_v36  ;;  %v20600_v5 = vld [vmem:[#allocation2 + $0x52] sm:$0xff]  ;;  %v20602_v1 = vld [vmem:[#allocation2 + $0x62] sm:$0xff] }
 0x13e   :  { %17265 = vmatprep.subr.msk.mxu0 %vm594_vm0, %v20575_v63  ;;  %26944 = vst [vmem:[#allocation13_spill] sm:$0xff] %v20600_v5  ;;  %26945 = vst [vmem:[#allocation14_spill] sm:$0xff] %v20602_v1 }
 0x140   :  { %17075 = vmatmul.mubr.msk.f32.gmra.mrb[2].mxu0 %vm32_vm1, %v20582_v2  ;;  %v20610_v2 = vld [vmem:[#allocation2 + $0x7a] sm:$0xff] }
 0x141   :  { %17077 = vmatprep.mubr.msk.f32.mxu0 %vm32_vm1, %v20584_v3  ;;  %v20608_v3 = vld [vmem:[#allocation2 + $0x6a] sm:$0xff]  ;;  %26947 = vst [vmem:[#allocation16_spill] sm:$0xff] %v20610_v2 }
 0x142   :  { %26946 = vst [vmem:[#allocation15_spill] sm:$0xff] %v20608_v3 }
 0x144   :  { %17078 = vmatmul.mubr.msk.f32.gmra.mrb[4].mxu0 %vm32_vm1, %v20592_v35  ;;  %v20618_v35 = vld [vmem:[#allocation2 + $0x92] sm:$0xff] }
 0x145   :  { %17080 = vmatprep.mubr.msk.f32.mxu0 %vm32_vm1, %v20594_v36  ;;  %v20616_v36 = vld [vmem:[#allocation2 + $0x82] sm:$0xff]  ;;  %26949 = vst [vmem:[#allocation18_spill] sm:$0xff] %v20618_v35 }
 0x146   :  { %26948 = vst [vmem:[#allocation17_spill] sm:$0xff] %v20616_v36 }
 0x148   :  { %17081 = vmatmul.mubr.msk.f32.gmra.mrb[6].mxu0 %vm32_vm1, %v20600_v5  ;;  %v20626_v5 = vld [vmem:[#allocation2 + $0xaa] sm:$0xff] }
 0x149   :  { %17083 = vmatprep.mubr.msk.f32.mxu0 %vm32_vm1, %v20602_v1  ;;  %v20624_v1 = vld [vmem:[#allocation2 + $0x9a] sm:$0xff]  ;;  %26951 = vst [vmem:[#allocation20_spill] sm:$0xff] %v20626_v5 }
 0x14a   :  { %26950 = vst [vmem:[#allocation19_spill] sm:$0xff] %v20624_v1 }
 0x14c   :  { %17084 = vmatmul.mubr.msk.f32.gmra.mrb[8].mxu0 %vm32_vm1, %v20608_v3  ;;  %v20634_v3 = vld [vmem:[#allocation2 + $0xc2] sm:$0xff] }
 0x14d   :  { %17086 = vmatprep.mubr.msk.f32.mxu0 %vm32_vm1, %v20610_v2  ;;  %v20632_v2 = vld [vmem:[#allocation2 + $0xb2] sm:$0xff]  ;;  %26953 = vst [vmem:[#allocation22_spill] sm:$0xff] %v20634_v3 }
 0x14e   :  { %26952 = vst [vmem:[#allocation21_spill] sm:$0xff] %v20632_v2 }
 0x150   :  { %17087 = vmatmul.mubr.msk.f32.gmra.mrb[10].mxu0 %vm32_vm1, %v20616_v36  ;;  %v20642_v36 = vld [vmem:[#allocation2 + $0xda] sm:$0xff] }
 0x151   :  { %17089 = vmatprep.mubr.msk.f32.mxu0 %vm32_vm1, %v20618_v35  ;;  %v20640_v35 = vld [vmem:[#allocation2 + $0xca] sm:$0xff]  ;;  %26955 = vst [vmem:[#allocation24_spill] sm:$0xff] %v20642_v36 }
 0x152   :  { %26954 = vst [vmem:[#allocation23_spill] sm:$0xff] %v20640_v35 }
 0x154   :  { %17090 = vmatmul.mubr.msk.f32.gmra.mrb[12].mxu0 %vm32_vm1, %v20624_v1  ;;  %v20650_v1 = vld [vmem:[#allocation2 + $0xf2] sm:$0xff] }
 0x155   :  { %17092 = vmatprep.mubr.msk.f32.mxu0 %vm32_vm1, %v20626_v5  ;;  %v20648_v5 = vld [vmem:[#allocation2 + $0xe2] sm:$0xff]  ;;  %26957 = vst [vmem:[#allocation26_spill] sm:$0xff] %v20650_v1 }
 0x156   :  { %26956 = vst [vmem:[#allocation25_spill] sm:$0xff] %v20648_v5 }
 0x158   :  { %17093 = vmatmul.mubr.msk.f32.gmra.mrb[14].mxu0 %vm32_vm1, %v20632_v2  ;;  %v20658_v2 = vld [vmem:[#allocation2 + $0x10a] sm:$0xff] }
 0x159   :  { %17095 = vmatprep.mubr.msk.f32.mxu0 %vm32_vm1, %v20634_v3  ;;  %v20656_v3 = vld [vmem:[#allocation2 + $0xfa] sm:$0xff]  ;;  %26959 = vst [vmem:[#allocation28_spill] sm:$0xff] %v20658_v2 }
 0x15a   :  { %26958 = vst [vmem:[#allocation27_spill] sm:$0xff] %v20656_v3 }
 0x15c   :  { %17096 = vmatmul.mubr.msk.f32.gmra.mrb[16].mxu0 %vm32_vm1, %v20640_v35  ;;  %v20666_v35 = vld [vmem:[#allocation2 + $0x122] sm:$0xff] }
 0x15d   :  { %17098 = vmatprep.mubr.msk.f32.mxu0 %vm32_vm1, %v20642_v36  ;;  %v20664_v36 = vld [vmem:[#allocation2 + $0x112] sm:$0xff]  ;;  %26961 = vst [vmem:[#allocation30_spill] sm:$0xff] %v20666_v35 }
 0x15e   :  { %26960 = vst [vmem:[#allocation29_spill] sm:$0xff] %v20664_v36 }
 0x160   :  { %17099 = vmatmul.mubr.msk.f32.gmra.mrb[18].mxu0 %vm32_vm1, %v20648_v5  ;;  %v20674_v5 = vld [vmem:[#allocation2 + $0x13a] sm:$0xff] }
 0x161   :  { %17101 = vmatprep.mubr.msk.f32.mxu0 %vm32_vm1, %v20650_v1  ;;  %v20672_v1 = vld [vmem:[#allocation2 + $0x12a] sm:$0xff]  ;;  %26963 = vst [vmem:[#allocation32_spill] sm:$0xff] %v20674_v5 }
 0x162   :  { %26962 = vst [vmem:[#allocation31_spill] sm:$0xff] %v20672_v1 }
 0x164   :  { %17102 = vmatmul.mubr.msk.f32.gmra.mrb[20].mxu0 %vm32_vm1, %v20656_v3  ;;  %v20682_v3 = vld [vmem:[#allocation2 + $0x152] sm:$0xff] }
 0x165   :  { %17104 = vmatprep.mubr.msk.f32.mxu0 %vm32_vm1, %v20658_v2  ;;  %v20680_v2 = vld [vmem:[#allocation2 + $0x142] sm:$0xff]  ;;  %26965 = vst [vmem:[#allocation34_spill] sm:$0xff] %v20682_v3 }
 0x166   :  { %26964 = vst [vmem:[#allocation33_spill] sm:$0xff] %v20680_v2 }
 0x168   :  { %17105 = vmatmul.mubr.msk.f32.gmra.mrb[22].mxu0 %vm32_vm1, %v20664_v36  ;;  %v172_v36 = vld [vmem:[%s26697_s0 + $0xf0] sm:$0xff] }
 0x169   :  { %17107 = vmatprep.mubr.msk.f32.mxu0 %vm32_vm1, %v20666_v35  ;;  %237 = vst.msk [vmem:[#allocation2 + $0x181] sm:$0xff] %vm32_vm1, %v172_v36  ;;  %v173_v35 = vld [vmem:[%s26697_s0 + $0xf8] sm:$0xff] }
 0x16a   :  { %238 = vst.msk [vmem:[#allocation2 + $0x189] sm:$0xff] %vm32_vm1, %v173_v35  ;;  %v20704_v36 = vld [vmem:[#allocation2 + $0x172] sm:$0xff]  ;;  %v1596_v35 = vld [vmem:[#allocation2 + $0x1ba] sm:$0xff] }
 0x16b   :  { %26967 = vst [vmem:[#allocation36_spill] sm:$0xff] %v20704_v36 }
 0x16c   :  { %17108 = vmatmul.mubr.msk.f32.gmra.mrb[24].mxu0 %vm32_vm1, %v20672_v1  ;;  %v20698_v1 = vld [vmem:[#allocation2 + $0x16a] sm:$0xff] }
 0x16d   :  { %17110 = vmatprep.mubr.msk.f32.mxu0 %vm32_vm1, %v20674_v5  ;;  %v20696_v5 = vld [vmem:[#allocation2 + $0x15a] sm:$0xff] }
 0x16e   :  { %26966 = vst [vmem:[#allocation35_spill] sm:$0xff] %v20696_v5 }
 0x170   :  { %17111 = vmatmul.mubr.msk.f32.gmra.mrb[26].mxu0 %vm32_vm1, %v20680_v2  ;;  %v20716_v2 = vld [vmem:[#allocation2 + $0x1e2] sm:$0xff] }
 0x171   :  { %17113 = vmatprep.mubr.msk.f32.mxu0 %vm32_vm1, %v20682_v3  ;;  %v20709_v3 = vld [vmem:[#allocation2 + $0x1ca] sm:$0xff]  ;;  %26970 = vst [vmem:[#allocation39_spill] sm:$0xff] %v20716_v2 }
 0x172   :  { %26968 = vst [vmem:[#allocation37_spill] sm:$0xff] %v20709_v3 }
 0x174   :  { %17114 = vmatmul.mubr.msk.f32.gmra.mrb[28].mxu0 %vm32_vm1, %v20696_v5  ;;  %v20714_v5 = vld [vmem:[#allocation2 + $0x1d2] sm:$0xff] }
 0x175   :  { %17116 = vmatprep.mubr.msk.f32.mxu0 %vm32_vm1, %v20698_v1  ;;  %26969 = vst [vmem:[#allocation38_spill] sm:$0xff] %v20714_v5 }
 0x178   :  { %17117 = vmatmul.mubr.msk.f32.gmra.mrb[30].mxu0 %vm32_vm1, %v20704_v36  ;;  %v20722_v36 = vld [vmem:[#allocation2 + $0x1ea] sm:$0xff] }
 0x179   :  { %17119 = vmatprep.mubr.msk.f32.mxu0 %vm32_vm1, %v1595_v0  ;;  %26971 = vst [vmem:[#allocation40_spill] sm:$0xff] %v20722_v36  ;;  %v20724_v0 = vld [vmem:[#allocation2 + $0x1fa] sm:$0xff] }
 0x17a   :  { %26972 = vst [vmem:[#allocation41_spill] sm:$0xff] %v20724_v0 }
 0x17c   :  { %17120 = vmatmul.mubr.msk.f32.gmra.mrb[32].mxu0 %vm32_vm1, %v1596_v35  ;;  %v20730_v35 = vld [vmem:[#allocation2 + $0x202] sm:$0xff] }
 0x17d   :  { %17122 = vmatprep.mubr.msk.f32.mxu0 %vm32_vm1, %v20709_v3  ;;  %26973 = vst [vmem:[#allocation42_spill] sm:$0xff] %v20730_v35  ;;  %v20732_v3 = vld [vmem:[#allocation2 + $0x212] sm:$0xff] }
 0x17e   :  { %26974 = vst [vmem:[#allocation43_spill] sm:$0xff] %v20732_v3 }
 0x180   :  { %17123 = vmatmul.mubr.msk.f32.gmra.mrb[34].mxu0 %vm32_vm1, %v20714_v5  ;;  %v20740_v5 = vld [vmem:[#allocation2 + $0x22a] sm:$0xff] }
 0x181   :  { %17125 = vmatprep.mubr.msk.f32.mxu0 %vm32_vm1, %v20716_v2  ;;  %v20738_v2 = vld [vmem:[#allocation2 + $0x21a] sm:$0xff]  ;;  %26976 = vst [vmem:[#allocation45_spill] sm:$0xff] %v20740_v5 }
 0x182   :  { %26975 = vst [vmem:[#allocation44_spill] sm:$0xff] %v20738_v2 }
 0x184   :  { %17126 = vmatmul.mubr.msk.f32.gmra.mrb[36].mxu0 %vm32_vm1, %v20722_v36  ;;  %v20748_v36 = vld [vmem:[#allocation2 + $0x242] sm:$0xff] }
 0x185   :  { %17128 = vmatprep.mubr.msk.f32.mxu0 %vm32_vm1, %v20724_v0  ;;  %v20746_v0 = vld [vmem:[#allocation2 + $0x232] sm:$0xff]  ;;  %26978 = vst [vmem:[#allocation47_spill] sm:$0xff] %v20748_v36 }
 0x186   :  { %26977 = vst [vmem:[#allocation46_spill] sm:$0xff] %v20746_v0 }
 0x188   :  { %17129 = vmatmul.mubr.msk.f32.gmra.mrb[38].mxu0 %vm32_vm1, %v20730_v35  ;;  %v20756_v35 = vld [vmem:[#allocation2 + $0x25a] sm:$0xff] }
 0x189   :  { %17131 = vmatprep.mubr.msk.f32.mxu0 %vm32_vm1, %v20732_v3  ;;  %v20754_v3 = vld [vmem:[#allocation2 + $0x24a] sm:$0xff]  ;;  %26980 = vst [vmem:[#allocation49_spill] sm:$0xff] %v20756_v35 }
 0x18a   :  { %26979 = vst [vmem:[#allocation48_spill] sm:$0xff] %v20754_v3 }
 0x18c   :  { %17132 = vmatmul.mubr.msk.f32.gmra.mrb[40].mxu0 %vm32_vm1, %v20738_v2  ;;  %v20764_v2 = vld [vmem:[#allocation2 + $0x272] sm:$0xff] }
 0x18d   :  { %17134 = vmatprep.mubr.msk.f32.mxu0 %vm32_vm1, %v20740_v5  ;;  %v20762_v5 = vld [vmem:[#allocation2 + $0x262] sm:$0xff]  ;;  %26982 = vst [vmem:[#allocation51_spill] sm:$0xff] %v20764_v2 }
 0x18e   :  { %26981 = vst [vmem:[#allocation50_spill] sm:$0xff] %v20762_v5 }
 0x190   :  { %17135 = vmatmul.mubr.msk.f32.gmra.mrb[42].mxu0 %vm32_vm1, %v20746_v0  ;;  %v20772_v0 = vld [vmem:[#allocation2 + $0x28a] sm:$0xff] }
 0x191   :  { %17137 = vmatprep.mubr.msk.f32.mxu0 %vm32_vm1, %v20748_v36  ;;  %v20770_v36 = vld [vmem:[#allocation2 + $0x27a] sm:$0xff]  ;;  %26984 = vst [vmem:[#allocation53_spill] sm:$0xff] %v20772_v0 }
 0x192   :  { %26983 = vst [vmem:[#allocation52_spill] sm:$0xff] %v20770_v36 }
 0x194   :  { %17138 = vmatmul.mubr.msk.f32.gmra.mrb[44].mxu0 %vm32_vm1, %v20754_v3  ;;  %v20780_v3 = vld [vmem:[#allocation2 + $0x2a2] sm:$0xff] }
 0x195   :  { %17140 = vmatprep.mubr.msk.f32.mxu0 %vm32_vm1, %v20756_v35  ;;  %v20778_v35 = vld [vmem:[#allocation2 + $0x292] sm:$0xff]  ;;  %26986 = vst [vmem:[#allocation55_spill] sm:$0xff] %v20780_v3 }
 0x196   :  { %26985 = vst [vmem:[#allocation54_spill] sm:$0xff] %v20778_v35 }
 0x198   :  { %17141 = vmatmul.mubr.msk.f32.gmra.mrb[46].mxu0 %vm32_vm1, %v20762_v5  ;;  %v20788_v5 = vld [vmem:[#allocation2 + $0x2ba] sm:$0xff] }
 0x199   :  { %17143 = vmatprep.mubr.msk.f32.mxu0 %vm32_vm1, %v20764_v2  ;;  %v20786_v2 = vld [vmem:[#allocation2 + $0x2aa] sm:$0xff]  ;;  %26988 = vst [vmem:[#allocation57_spill] sm:$0xff] %v20788_v5 }
 0x19a   :  { %26987 = vst [vmem:[#allocation56_spill] sm:$0xff] %v20786_v2 }
 0x19c   :  { %17144 = vmatmul.mubr.msk.f32.gmra.mrb[48].mxu0 %vm32_vm1, %v20770_v36  ;;  %v20796_v36 = vld [vmem:[#allocation2 + $0x2d2] sm:$0xff] }
 0x19d   :  { %17146 = vmatprep.mubr.msk.f32.mxu0 %vm32_vm1, %v20772_v0  ;;  %v20794_v0 = vld [vmem:[#allocation2 + $0x2c2] sm:$0xff]  ;;  %26990 = vst [vmem:[#allocation59_spill] sm:$0xff] %v20796_v36 }
 0x19e   :  { %26989 = vst [vmem:[#allocation58_spill] sm:$0xff] %v20794_v0 }
 0x1a0   :  { %17147 = vmatmul.mubr.msk.f32.gmra.mrb[50].mxu0 %vm32_vm1, %v20778_v35  ;;  %v20804_v35 = vld [vmem:[#allocation2 + $0x2ea] sm:$0xff] }
 0x1a1   :  { %17149 = vmatprep.mubr.msk.f32.mxu0 %vm32_vm1, %v20780_v3  ;;  %v20802_v3 = vld [vmem:[#allocation2 + $0x2da] sm:$0xff]  ;;  %26992 = vst [vmem:[#allocation61_spill] sm:$0xff] %v20804_v35 }
 0x1a2   :  { %26991 = vst [vmem:[#allocation60_spill] sm:$0xff] %v20802_v3 }
 0x1a4   :  { %17150 = vmatmul.mubr.msk.f32.gmra.mrb[52].mxu0 %vm32_vm1, %v20786_v2  ;;  %v20812_v2 = vld [vmem:[#allocation2 + $0x302] sm:$0xff] }
 0x1a5   :  { %17152 = vmatprep.mubr.msk.f32.mxu0 %vm32_vm1, %v20788_v5  ;;  %v20810_v5 = vld [vmem:[#allocation2 + $0x2f2] sm:$0xff] }
 0x1a8   :  { %17153 = vmatmul.mubr.msk.f32.gmra.mrb[54].mxu0 %vm32_vm1, %v20794_v0  ;;  %v204_v0 = vld [vmem:[%s26697_s0 + $0x1f0] sm:$0xff] }
 0x1a9   :  { %17155 = vmatprep.mubr.msk.f32.mxu0 %vm32_vm1, %v20796_v36  ;;  %269 = vst.msk [vmem:[#allocation2 + $0x331] sm:$0xff] %vm32_vm1, %v204_v0  ;;  %v205_v36 = vld [vmem:[%s26697_s0 + $0x1f8] sm:$0xff]  ;;  %v20834_v0 = vld [vmem:[#allocation2 + $0x322] sm:$0xff] }
 0x1aa   :  { %270 = vst.msk [vmem:[#allocation2 + $0x339] sm:$0xff] %vm32_vm1, %v205_v36  ;;  %v20843_v36 = vld [vmem:[%s26696_s1 + $0x14] sm:$0xf] }
 0x1ac   :  { %17156 = vmatmul.mubr.msk.f32.gmra.mrb[56].mxu0 %vm32_vm1, %v20802_v3  ;;  %v20828_v3 = vld [vmem:[#allocation2 + $0x31a] sm:$0xff] }
 0x1ad   :  { %17158 = vmatprep.mubr.msk.f32.mxu0 %vm32_vm1, %v20804_v35  ;;  %v20826_v35 = vld [vmem:[#allocation2 + $0x30a] sm:$0xff] }
 0x1b0   :  { %17159 = vmatmul.mubr.msk.f32.gmra.mrb[58].mxu0 %vm32_vm1, %v20810_v5 }
 0x1b1   :  { %17161 = vmatprep.mubr.msk.f32.mxu0 %vm32_vm1, %v20812_v2 }
 0x1b4   :  { %17162 = vmatmul.mubr.msk.f32.gmra.mrb[60].mxu0 %vm32_vm1, %v20826_v35 }
 0x1b5   :  { %17164 = vmatprep.mubr.msk.f32.mxu0 %vm32_vm1, %v20828_v3 }
 0x1b8   :  { %17165 = vmatmul.mubr.msk.f32.gmra.mrb[62].mxu0 %vm32_vm1, %v20834_v0 }
 0x1b9   :  { %17169 = vmatprep.mubr.msk.f32.mxu0 %vm32_vm1, %v20317_v4  ;;  %v20905_v4 = vld [vmem:[#allocation2 + $0x180] sm:$0xff] }
 0x1bc   :  { %17170 = vmatmul.mubr.msk.f32.vlgmr.msra.gmra.mrb[0].mxu0 %vm32_vm1, %v20329_v6  ;;  %v20911_v6 = vld [vmem:[#allocation2 + $0x188] sm:$0xff] }
 0x1bd   :  { %17266 = vmatpush3.msk.msra.mxu0 %vm594_vm0, %v20575_v63  ;;  %17172 = vmatprep.mubr.msk.f32.mxu0 %vm32_vm1, %v20331_v7  ;;  %v26993_v7 = vld [vmem:[#allocation4_spill] sm:$0xff] }
 0x1be   :  { %17363 = vmatprep.subr.msk.mxu0 %vm594_vm0, %v20843_v36  ;;  %v21168_v63 = vld [vmem:[#allocation2 + $0x279] sm:$0xff] }
 0x1c0   :  { %17173 = vmatmul.mubr.msk.f32.gmra.mrb[2].mxu0 %vm32_vm1, %v20339_v8  ;;  %v26994_v8 = vld [vmem:[#allocation5_spill] sm:$0xff] }
 0x1c1   :  { %17175 = vmatprep.mubr.msk.f32.mxu0 %vm32_vm1, %v20341_v9  ;;  %v26995_v9 = vld [vmem:[#allocation6_spill] sm:$0xff] }
 0x1c4   :  { %17176 = vmatmul.mubr.msk.f32.gmra.mrb[4].mxu0 %vm32_vm1, %v20347_v10  ;;  %v20973_v10 = vld [vmem:[#allocation2 + $0x330] sm:$0xff] }
 0x1c5   :  { %17178 = vmatprep.mubr.msk.f32.mxu0 %vm32_vm1, %v20349_v11  ;;  %v26996_v11 = vld [vmem:[#allocation7_spill] sm:$0xff] }
 0x1c8   :  { %17179 = vmatmul.mubr.msk.f32.gmra.mrb[6].mxu0 %vm32_vm1, %v20355_v12  ;;  %v20979_v12 = vld [vmem:[#allocation2 + $0x338] sm:$0xff] }
 0x1c9   :  { %17181 = vmatprep.mubr.msk.f32.mxu0 %vm32_vm1, %v20357_v13  ;;  %v2983_v13 = vld [vmem:[#allocation2 + $0x19] sm:$0xff] }
 0x1cc   :  { %17182 = vmatmul.mubr.msk.f32.gmra.mrb[8].mxu0 %vm32_vm1, %v20363_v14  ;;  %v2984_v14 = vld [vmem:[#allocation2 + $0x21] sm:$0xff] }
 0x1cd   :  { %17184 = vmatprep.mubr.msk.f32.mxu0 %vm32_vm1, %v20365_v15  ;;  %v20984_v15 = vld [vmem:[#allocation2 + $0x31] sm:$0xff] }
 0x1d0   :  { %17185 = vmatmul.mubr.msk.f32.gmra.mrb[10].mxu0 %vm32_vm1, %v20371_v16  ;;  %v20989_v16 = vld [vmem:[%s26696_s1 + $0x18] sm:$0xf] }
 0x1d1   :  { %17187 = vmatprep.mubr.msk.f32.mxu0 %vm32_vm1, %v20373_v17  ;;  %v20996_v17 = vld [vmem:[#allocation2 + $0x39] sm:$0xff] }
 0x1d4   :  { %17188 = vmatmul.mubr.msk.f32.gmra.mrb[12].mxu0 %vm32_vm1, %v20379_v18  ;;  %v20998_v18 = vld [vmem:[#allocation2 + $0x49] sm:$0xff] }
 0x1d5   :  { %17190 = vmatprep.mubr.msk.f32.mxu0 %vm32_vm1, %v20381_v19  ;;  %v21006_v19 = vld [vmem:[#allocation2 + $0x51] sm:$0xff] }
 0x1d8   :  { %17191 = vmatmul.mubr.msk.f32.gmra.mrb[14].mxu0 %vm32_vm1, %v20387_v20  ;;  %v21008_v20 = vld [vmem:[#allocation2 + $0x61] sm:$0xff] }
 0x1d9   :  { %17193 = vmatprep.mubr.msk.f32.mxu0 %vm32_vm1, %v20389_v21  ;;  %v21014_v21 = vld [vmem:[#allocation2 + $0x69] sm:$0xff] }
 0x1dc   :  { %17194 = vmatmul.mubr.msk.f32.gmra.mrb[16].mxu0 %vm32_vm1, %v20395_v22  ;;  %v21016_v22 = vld [vmem:[#allocation2 + $0x79] sm:$0xff] }
 0x1dd   :  { %17196 = vmatprep.mubr.msk.f32.mxu0 %vm32_vm1, %v20397_v23  ;;  %v21022_v23 = vld [vmem:[#allocation2 + $0x81] sm:$0xff] }
 0x1e0   :  { %17197 = vmatmul.mubr.msk.f32.gmra.mrb[18].mxu0 %vm32_vm1, %v20403_v24  ;;  %v21024_v24 = vld [vmem:[#allocation2 + $0x91] sm:$0xff] }
 0x1e1   :  { %17199 = vmatprep.mubr.msk.f32.mxu0 %vm32_vm1, %v20405_v25  ;;  %v21030_v25 = vld [vmem:[#allocation2 + $0x99] sm:$0xff] }
 0x1e4   :  { %17200 = vmatmul.mubr.msk.f32.gmra.mrb[20].mxu0 %vm32_vm1, %v20411_v26  ;;  %v21032_v26 = vld [vmem:[#allocation2 + $0xa9] sm:$0xff] }
 0x1e5   :  { %17202 = vmatprep.mubr.msk.f32.mxu0 %vm32_vm1, %v20413_v27  ;;  %v21038_v27 = vld [vmem:[#allocation2 + $0xb1] sm:$0xff] }
 0x1e8   :  { %17203 = vmatmul.mubr.msk.f32.gmra.mrb[22].mxu0 %vm32_vm1, %v20419_v28  ;;  %v21040_v28 = vld [vmem:[#allocation2 + $0xc1] sm:$0xff] }
 0x1e9   :  { %17205 = vmatprep.mubr.msk.f32.mxu0 %vm32_vm1, %v20421_v29  ;;  %v21046_v29 = vld [vmem:[#allocation2 + $0xc9] sm:$0xff] }
 0x1ec   :  { %17206 = vmatmul.mubr.msk.f32.gmra.mrb[24].mxu0 %vm32_vm1, %v20427_v30  ;;  %v21048_v30 = vld [vmem:[#allocation2 + $0xd9] sm:$0xff] }
 0x1ed   :  { %17208 = vmatprep.mubr.msk.f32.mxu0 %vm32_vm1, %v20429_v31  ;;  %v21054_v31 = vld [vmem:[#allocation2 + $0xe1] sm:$0xff] }
 0x1f0   :  { %17209 = vmatmul.mubr.msk.f32.gmra.mrb[26].mxu0 %vm32_vm1, %v20435_v32  ;;  %v21056_v32 = vld [vmem:[#allocation2 + $0xf1] sm:$0xff] }
 0x1f1   :  { %17211 = vmatprep.mubr.msk.f32.mxu0 %vm32_vm1, %v20437_v33  ;;  %v21062_v33 = vld [vmem:[#allocation2 + $0xf9] sm:$0xff] }
 0x1f4   :  { %17212 = vmatmul.mubr.msk.f32.gmra.mrb[28].mxu0 %vm32_vm1, %v20443_v34  ;;  %v21064_v34 = vld [vmem:[#allocation2 + $0x109] sm:$0xff] }
 0x1f5   :  { %17214 = vmatprep.mubr.msk.f32.mxu0 %vm32_vm1, %v20905_v4 }
 0x1f8   :  { %17215 = vmatmul.mubr.msk.f32.gmra.mrb[30].mxu0 %vm32_vm1, %v20911_v6 }
 0x1f9   :  { %17217 = vmatprep.mubr.msk.f32.mxu0 %vm32_vm1, %v20448_v37  ;;  %v21070_v37 = vld [vmem:[#allocation2 + $0x111] sm:$0xff] }
 0x1fc   :  { %17218 = vmatmul.mubr.msk.f32.gmra.mrb[32].mxu0 %vm32_vm1, %v20453_v38  ;;  %v21072_v38 = vld [vmem:[#allocation2 + $0x121] sm:$0xff] }
 0x1fd   :  { %17220 = vmatprep.mubr.msk.f32.mxu0 %vm32_vm1, %v20455_v39  ;;  %v21078_v39 = vld [vmem:[#allocation2 + $0x129] sm:$0xff] }
 0x200   :  { %17221 = vmatmul.mubr.msk.f32.gmra.mrb[34].mxu0 %vm32_vm1, %v20461_v40  ;;  %v21080_v40 = vld [vmem:[#allocation2 + $0x139] sm:$0xff] }
 0x201   :  { %17223 = vmatprep.mubr.msk.f32.mxu0 %vm32_vm1, %v20463_v41  ;;  %v21086_v41 = vld [vmem:[#allocation2 + $0x141] sm:$0xff] }
 0x204   :  { %17224 = vmatmul.mubr.msk.f32.gmra.mrb[36].mxu0 %vm32_vm1, %v20469_v42  ;;  %v21088_v42 = vld [vmem:[#allocation2 + $0x151] sm:$0xff] }
 0x205   :  { %17226 = vmatprep.mubr.msk.f32.mxu0 %vm32_vm1, %v20471_v43  ;;  %v21094_v43 = vld [vmem:[#allocation2 + $0x159] sm:$0xff] }
 0x208   :  { %17227 = vmatmul.mubr.msk.f32.gmra.mrb[38].mxu0 %vm32_vm1, %v20477_v44  ;;  %v21096_v44 = vld [vmem:[#allocation2 + $0x169] sm:$0xff] }
 0x209   :  { %17229 = vmatprep.mubr.msk.f32.mxu0 %vm32_vm1, %v20479_v45  ;;  %v21102_v45 = vld [vmem:[#allocation2 + $0x171] sm:$0xff] }
 0x20c   :  { %17230 = vmatmul.mubr.msk.f32.gmra.mrb[40].mxu0 %vm32_vm1, %v20485_v46  ;;  %v21104_v46 = vld [vmem:[#allocation2 + $0x181] sm:$0xff] }
 0x20d   :  { %17232 = vmatprep.mubr.msk.f32.mxu0 %vm32_vm1, %v20487_v47  ;;  %v21110_v47 = vld [vmem:[#allocation2 + $0x189] sm:$0xff] }
 0x210   :  { %17233 = vmatmul.mubr.msk.f32.gmra.mrb[42].mxu0 %vm32_vm1, %v20493_v48  ;;  %v3015_v48 = vld [vmem:[#allocation2 + $0x1c9] sm:$0xff] }
 0x211   :  { %17235 = vmatprep.mubr.msk.f32.mxu0 %vm32_vm1, %v20495_v49  ;;  %v3016_v49 = vld [vmem:[#allocation2 + $0x1d1] sm:$0xff] }
 0x214   :  { %17236 = vmatmul.mubr.msk.f32.gmra.mrb[44].mxu0 %vm32_vm1, %v20501_v50  ;;  %v21115_v50 = vld [vmem:[#allocation2 + $0x1e1] sm:$0xff] }
 0x215   :  { %17238 = vmatprep.mubr.msk.f32.mxu0 %vm32_vm1, %v20503_v51  ;;  %v21120_v51 = vld [vmem:[#allocation2 + $0x1e9] sm:$0xff] }
 0x218   :  { %17239 = vmatmul.mubr.msk.f32.gmra.mrb[46].mxu0 %vm32_vm1, %v20509_v52  ;;  %v21122_v52 = vld [vmem:[#allocation2 + $0x1f9] sm:$0xff] }
 0x219   :  { %17241 = vmatprep.mubr.msk.f32.mxu0 %vm32_vm1, %v20511_v53  ;;  %v21128_v53 = vld [vmem:[#allocation2 + $0x201] sm:$0xff] }
 0x21c   :  { %17242 = vmatmul.mubr.msk.f32.gmra.mrb[48].mxu0 %vm32_vm1, %v20517_v54  ;;  %v21130_v54 = vld [vmem:[#allocation2 + $0x211] sm:$0xff] }
 0x21d   :  { %17244 = vmatprep.mubr.msk.f32.mxu0 %vm32_vm1, %v20519_v55  ;;  %v21136_v55 = vld [vmem:[#allocation2 + $0x219] sm:$0xff] }
 0x220   :  { %17245 = vmatmul.mubr.msk.f32.gmra.mrb[50].mxu0 %vm32_vm1, %v20525_v56  ;;  %v21138_v56 = vld [vmem:[#allocation2 + $0x229] sm:$0xff] }
 0x221   :  { %17247 = vmatprep.mubr.msk.f32.mxu0 %vm32_vm1, %v20527_v57  ;;  %v21144_v57 = vld [vmem:[#allocation2 + $0x231] sm:$0xff] }
 0x224   :  { %17248 = vmatmul.mubr.msk.f32.gmra.mrb[52].mxu0 %vm32_vm1, %v20533_v58  ;;  %v21146_v58 = vld [vmem:[#allocation2 + $0x241] sm:$0xff] }
 0x225   :  { %17250 = vmatprep.mubr.msk.f32.mxu0 %vm32_vm1, %v20535_v59  ;;  %v21152_v59 = vld [vmem:[#allocation2 + $0x249] sm:$0xff] }
 0x228   :  { %17251 = vmatmul.mubr.msk.f32.gmra.mrb[54].mxu0 %vm32_vm1, %v20541_v60  ;;  %v21154_v60 = vld [vmem:[#allocation2 + $0x259] sm:$0xff] }
 0x229   :  { %17253 = vmatprep.mubr.msk.f32.mxu0 %vm32_vm1, %v20543_v61  ;;  %v21160_v61 = vld [vmem:[#allocation2 + $0x261] sm:$0xff] }
 0x22c   :  { %17254 = vmatmul.mubr.msk.f32.gmra.mrb[56].mxu0 %vm32_vm1, %v20549_v62  ;;  %v21162_v62 = vld [vmem:[#allocation2 + $0x271] sm:$0xff] }
 0x22d   :  { %17256 = vmatprep.mubr.msk.f32.mxu0 %vm32_vm1, %v26993_v7  ;;  %v21176_v7 = vld [vmem:[#allocation2 + $0x291] sm:$0xff] }
 0x22e   :  { %26997 = vst [vmem:[#allocation4_spill] sm:$0xff] %v21176_v7 }
 0x230   :  { %17257 = vmatmul.mubr.msk.f32.gmra.mrb[58].mxu0 %vm32_vm1, %v26994_v8  ;;  %v21178_v8 = vld [vmem:[#allocation2 + $0x2a1] sm:$0xff] }
 0x231   :  { %17259 = vmatprep.mubr.msk.f32.mxu0 %vm32_vm1, %v26995_v9  ;;  %26998 = vst [vmem:[#allocation5_spill] sm:$0xff] %v21178_v8  ;;  %v21184_v9 = vld [vmem:[#allocation2 + $0x2a9] sm:$0xff] }
 0x232   :  { %26999 = vst [vmem:[#allocation6_spill] sm:$0xff] %v21184_v9 }
 0x234   :  { %17260 = vmatmul.mubr.msk.f32.gmra.mrb[60].mxu0 %vm32_vm1, %v26996_v11  ;;  %v21186_v11 = vld [vmem:[#allocation2 + $0x2b9] sm:$0xff] }
 0x235   :  { %17262 = vmatprep.mubr.msk.f32.mxu0 %vm32_vm1, %v20973_v10  ;;  %27000 = vst [vmem:[#allocation7_spill] sm:$0xff] %v21186_v11 }
 0x238   :  { %17263 = vmatmul.mubr.msk.f32.gmra.mrb[62].mxu0 %vm32_vm1, %v20979_v12 }
 0x239   :  { %17267 = vmatprep.mubr.msk.f32.mxu0 %vm32_vm1, %v2983_v13  ;;  %v21192_v13 = vld [vmem:[#allocation2 + $0x2c1] sm:$0xff] }
 0x23a   :  { %27001 = vst [vmem:[#allocation62_spill] sm:$0xff] %v21192_v13 }
 0x23c   :  { %17268 = vmatmul.mubr.msk.f32.vlgmr.msra.gmra.mrb[0].mxu0 %vm32_vm1, %v2984_v14  ;;  %v21194_v14 = vld [vmem:[#allocation2 + $0x2d1] sm:$0xff] }
 0x23d   :  { %17364 = vmatpush3.msk.msra.mxu0 %vm594_vm0, %v20843_v36  ;;  %17270 = vmatprep.mubr.msk.f32.mxu0 %vm32_vm1, %v20984_v15  ;;  %v21170_v36 = vld [vmem:[#allocation2 + $0x289] sm:$0xff]  ;;  %27002 = vst [vmem:[#allocation63_spill] sm:$0xff] %v21194_v14 }
 0x23e   :  { %17461 = vmatprep.subr.msk.mxu0 %vm594_vm0, %v20989_v16 }
 0x240   :  { %17271 = vmatmul.mubr.msk.f32.gmra.mrb[2].mxu0 %vm32_vm1, %v20996_v17 }
 0x241   :  { %17273 = vmatprep.mubr.msk.f32.mxu0 %vm32_vm1, %v20998_v18 }
 0x244   :  { %17274 = vmatmul.mubr.msk.f32.gmra.mrb[4].mxu0 %vm32_vm1, %v21006_v19 }
 0x245   :  { %17276 = vmatprep.mubr.msk.f32.mxu0 %vm32_vm1, %v21008_v20 }
 0x248   :  { %17277 = vmatmul.mubr.msk.f32.gmra.mrb[6].mxu0 %vm32_vm1, %v21014_v21 }
 0x249   :  { %17279 = vmatprep.mubr.msk.f32.mxu0 %vm32_vm1, %v21016_v22 }
 0x24c   :  { %17280 = vmatmul.mubr.msk.f32.gmra.mrb[8].mxu0 %vm32_vm1, %v21022_v23 }
 0x24d   :  { %17282 = vmatprep.mubr.msk.f32.mxu0 %vm32_vm1, %v21024_v24 }
 0x250   :  { %17283 = vmatmul.mubr.msk.f32.gmra.mrb[10].mxu0 %vm32_vm1, %v21030_v25 }
 0x251   :  { %17285 = vmatprep.mubr.msk.f32.mxu0 %vm32_vm1, %v21032_v26 }
 0x254   :  { %17286 = vmatmul.mubr.msk.f32.gmra.mrb[12].mxu0 %vm32_vm1, %v21038_v27 }
 0x255   :  { %17288 = vmatprep.mubr.msk.f32.mxu0 %vm32_vm1, %v21040_v28 }
 0x258   :  { %17289 = vmatmul.mubr.msk.f32.gmra.mrb[14].mxu0 %vm32_vm1, %v21046_v29 }
 0x259   :  { %17291 = vmatprep.mubr.msk.f32.mxu0 %vm32_vm1, %v21048_v30 }
 0x25c   :  { %17292 = vmatmul.mubr.msk.f32.gmra.mrb[16].mxu0 %vm32_vm1, %v21054_v31 }
 0x25d   :  { %17294 = vmatprep.mubr.msk.f32.mxu0 %vm32_vm1, %v21056_v32 }
 0x260   :  { %17295 = vmatmul.mubr.msk.f32.gmra.mrb[18].mxu0 %vm32_vm1, %v21062_v33 }
 0x261   :  { %17297 = vmatprep.mubr.msk.f32.mxu0 %vm32_vm1, %v21064_v34 }
 0x264   :  { %17298 = vmatmul.mubr.msk.f32.gmra.mrb[20].mxu0 %vm32_vm1, %v21070_v37 }
 0x265   :  { %17300 = vmatprep.mubr.msk.f32.mxu0 %vm32_vm1, %v21072_v38 }
 0x268   :  { %17301 = vmatmul.mubr.msk.f32.gmra.mrb[22].mxu0 %vm32_vm1, %v21078_v39 }
 0x269   :  { %17303 = vmatprep.mubr.msk.f32.mxu0 %vm32_vm1, %v21080_v40 }
 0x26c   :  { %17304 = vmatmul.mubr.msk.f32.gmra.mrb[24].mxu0 %vm32_vm1, %v21086_v41 }
 0x26d   :  { %17306 = vmatprep.mubr.msk.f32.mxu0 %vm32_vm1, %v21088_v42 }
 0x270   :  { %17307 = vmatmul.mubr.msk.f32.gmra.mrb[26].mxu0 %vm32_vm1, %v21094_v43 }
 0x271   :  { %17309 = vmatprep.mubr.msk.f32.mxu0 %vm32_vm1, %v21096_v44 }
 0x274   :  { %17310 = vmatmul.mubr.msk.f32.gmra.mrb[28].mxu0 %vm32_vm1, %v21102_v45 }
 0x275   :  { %17312 = vmatprep.mubr.msk.f32.mxu0 %vm32_vm1, %v21104_v46 }
 0x278   :  { %17313 = vmatmul.mubr.msk.f32.gmra.mrb[30].mxu0 %vm32_vm1, %v21110_v47 }
 0x279   :  { %17315 = vmatprep.mubr.msk.f32.mxu0 %vm32_vm1, %v3015_v48  ;;  %v21200_v48 = vld [vmem:[#allocation2 + $0x2d9] sm:$0xff] }
 0x27a   :  { %27003 = vst [vmem:[#allocation64_spill] sm:$0xff] %v21200_v48 }
 0x27c   :  { %17316 = vmatmul.mubr.msk.f32.gmra.mrb[32].mxu0 %vm32_vm1, %v3016_v49  ;;  %v21202_v49 = vld [vmem:[#allocation2 + $0x2e9] sm:$0xff] }
 0x27d   :  { %17318 = vmatprep.mubr.msk.f32.mxu0 %vm32_vm1, %v21115_v50  ;;  %27004 = vst [vmem:[#allocation65_spill] sm:$0xff] %v21202_v49 }
 0x280   :  { %17319 = vmatmul.mubr.msk.f32.gmra.mrb[34].mxu0 %vm32_vm1, %v21120_v51 }
 0x281   :  { %17321 = vmatprep.mubr.msk.f32.mxu0 %vm32_vm1, %v21122_v52 }
 0x284   :  { %17322 = vmatmul.mubr.msk.f32.gmra.mrb[36].mxu0 %vm32_vm1, %v21128_v53 }
 0x285   :  { %17324 = vmatprep.mubr.msk.f32.mxu0 %vm32_vm1, %v21130_v54 }
 0x288   :  { %17325 = vmatmul.mubr.msk.f32.gmra.mrb[38].mxu0 %vm32_vm1, %v21136_v55 }
 0x289   :  { %17327 = vmatprep.mubr.msk.f32.mxu0 %vm32_vm1, %v21138_v56 }
 0x28c   :  { %17328 = vmatmul.mubr.msk.f32.gmra.mrb[40].mxu0 %vm32_vm1, %v21144_v57 }
 0x28d   :  { %17330 = vmatprep.mubr.msk.f32.mxu0 %vm32_vm1, %v21146_v58 }
 0x290   :  { %17331 = vmatmul.mubr.msk.f32.gmra.mrb[42].mxu0 %vm32_vm1, %v21152_v59 }
 0x291   :  { %17333 = vmatprep.mubr.msk.f32.mxu0 %vm32_vm1, %v21154_v60 }
 0x294   :  { %17334 = vmatmul.mubr.msk.f32.gmra.mrb[44].mxu0 %vm32_vm1, %v21160_v61 }
 0x295   :  { %17336 = vmatprep.mubr.msk.f32.mxu0 %vm32_vm1, %v21162_v62 }
 0x298   :  { %17337 = vmatmul.mubr.msk.f32.gmra.mrb[46].mxu0 %vm32_vm1, %v21168_v63 }
 0x299   :  { %17339 = vmatprep.mubr.msk.f32.mxu0 %vm32_vm1, %v21170_v36 }
 0x29c   :  { %17340 = vmatmul.mubr.msk.f32.gmra.mrb[48].mxu0 %vm32_vm1, %v21176_v7  ;;  %v27022_v7 = vld [vmem:[#allocation18_spill] sm:$0xff] }
 0x29d   :  { %17342 = vmatprep.mubr.msk.f32.mxu0 %vm32_vm1, %v21178_v8  ;;  %v27018_v8 = vld [vmem:[#allocation14_spill] sm:$0xff] }
 0x2a0   :  { %17343 = vmatmul.mubr.msk.f32.gmra.mrb[50].mxu0 %vm32_vm1, %v21184_v9  ;;  %v21210_v9 = vld [vmem:[#allocation2 + $0x301] sm:$0xff] }
 0x2a1   :  { %17345 = vmatprep.mubr.msk.f32.mxu0 %vm32_vm1, %v21186_v11  ;;  %v21208_v11 = vld [vmem:[#allocation2 + $0x2f1] sm:$0xff]  ;;  %27006 = vst [vmem:[#allocation67_spill] sm:$0xff] %v21210_v9 }
 0x2a2   :  { %27005 = vst [vmem:[#allocation66_spill] sm:$0xff] %v21208_v11 }
 0x2a4   :  { %17346 = vmatmul.mubr.msk.f32.gmra.mrb[52].mxu0 %vm32_vm1, %v21192_v13  ;;  %v21218_v13 = vld [vmem:[#allocation2 + $0x319] sm:$0xff] }
 0x2a5   :  { %17348 = vmatprep.mubr.msk.f32.mxu0 %vm32_vm1, %v21194_v14  ;;  %v21216_v14 = vld [vmem:[#allocation2 + $0x309] sm:$0xff]  ;;  %27008 = vst [vmem:[#allocation69_spill] sm:$0xff] %v21218_v13 }
 0x2a6   :  { %27007 = vst [vmem:[#allocation68_spill] sm:$0xff] %v21216_v14 }
 0x2a8   :  { %17349 = vmatmul.mubr.msk.f32.gmra.mrb[54].mxu0 %vm32_vm1, %v21200_v48  ;;  %v21226_v48 = vld [vmem:[#allocation2 + $0x331] sm:$0xff] }
 0x2a9   :  { %17351 = vmatprep.mubr.msk.f32.mxu0 %vm32_vm1, %v21202_v49  ;;  %v21224_v49 = vld [vmem:[#allocation2 + $0x321] sm:$0xff]  ;;  %27010 = vst [vmem:[#allocation71_spill] sm:$0xff] %v21226_v48 }
 0x2aa   :  { %27009 = vst [vmem:[#allocation70_spill] sm:$0xff] %v21224_v49 }
 0x2ac   :  { %17352 = vmatmul.mubr.msk.f32.gmra.mrb[56].mxu0 %vm32_vm1, %v21208_v11  ;;  %v27012_v11 = vld [vmem:[#allocation8_spill] sm:$0xff] }
 0x2ad   :  { %17354 = vmatprep.mubr.msk.f32.mxu0 %vm32_vm1, %v21210_v9  ;;  %v21232_v9 = vld [vmem:[#allocation2 + $0x339] sm:$0xff] }
 0x2ae   :  { %27011 = vst [vmem:[#allocation72_spill] sm:$0xff] %v21232_v9 }
 0x2b0   :  { %17355 = vmatmul.mubr.msk.f32.gmra.mrb[58].mxu0 %vm32_vm1, %v21216_v14  ;;  %v27013_v14 = vld [vmem:[#allocation9_spill] sm:$0xff] }
 0x2b1   :  { %17357 = vmatprep.mubr.msk.f32.mxu0 %vm32_vm1, %v21218_v13  ;;  %v21241_v13 = vld [vmem:[%s26696_s1 + $0x1c] sm:$0xf] }
 0x2b4   :  { %17358 = vmatmul.mubr.msk.f32.gmra.mrb[60].mxu0 %vm32_vm1, %v21224_v49  ;;  %v27017_v49 = vld [vmem:[#allocation13_spill] sm:$0xff] }
 0x2b5   :  { %17360 = vmatprep.mubr.msk.f32.mxu0 %vm32_vm1, %v21226_v48  ;;  %v27014_v48 = vld [vmem:[#allocation10_spill] sm:$0xff] }
 0x2b8   :  { %17361 = vmatmul.mubr.msk.f32.gmra.mrb[62].mxu0 %vm32_vm1, %v21232_v9  ;;  %v27015_v9 = vld [vmem:[#allocation11_spill] sm:$0xff] }
 0x2b9   :  { %17365 = vmatprep.mubr.msk.f32.mxu0 %vm32_vm1, %v27012_v11  ;;  %v27016_v11 = vld [vmem:[#allocation12_spill] sm:$0xff] }
 0x2bc   :  { %17366 = vmatmul.mubr.msk.f32.vlgmr.msra.gmra.mrb[0].mxu0 %vm32_vm1, %v27013_v14  ;;  %v27019_v14 = vld [vmem:[#allocation15_spill] sm:$0xff] }
 0x2bd   :  { %17462 = vmatpush3.msk.msra.mxu0 %vm594_vm0, %v20989_v16  ;;  %17368 = vmatprep.mubr.msk.f32.mxu0 %vm32_vm1, %v27014_v48  ;;  %v27020_v16 = vld [vmem:[#allocation16_spill] sm:$0xff]  ;;  %v27021_v48 = vld [vmem:[#allocation17_spill] sm:$0xff] }
 0x2be   :  { %17559 = vmatprep.subr.msk.mxu0 %vm594_vm0, %v21241_v13 }
 0x2c0   :  { %17369 = vmatmul.mubr.msk.f32.gmra.mrb[2].mxu0 %vm32_vm1, %v27015_v9  ;;  %v27023_v9 = vld [vmem:[#allocation19_spill] sm:$0xff] }
 0x2c1   :  { %17371 = vmatprep.mubr.msk.f32.mxu0 %vm32_vm1, %v27016_v11  ;;  %v27024_v11 = vld [vmem:[#allocation20_spill] sm:$0xff] }
 0x2c4   :  { %17372 = vmatmul.mubr.msk.f32.gmra.mrb[4].mxu0 %vm32_vm1, %v27017_v49  ;;  %v27025_v49 = vld [vmem:[#allocation21_spill] sm:$0xff] }
 0x2c5   :  { %17374 = vmatprep.mubr.msk.f32.mxu0 %vm32_vm1, %v27018_v8  ;;  %v27026_v8 = vld [vmem:[#allocation22_spill] sm:$0xff] }
 0x2c8   :  { %17375 = vmatmul.mubr.msk.f32.gmra.mrb[6].mxu0 %vm32_vm1, %v27019_v14  ;;  %v27027_v14 = vld [vmem:[#allocation23_spill] sm:$0xff] }
 0x2c9   :  { %17377 = vmatprep.mubr.msk.f32.mxu0 %vm32_vm1, %v27020_v16  ;;  %v27028_v16 = vld [vmem:[#allocation24_spill] sm:$0xff] }
 0x2cc   :  { %17378 = vmatmul.mubr.msk.f32.gmra.mrb[8].mxu0 %vm32_vm1, %v27021_v48  ;;  %v27029_v48 = vld [vmem:[#allocation25_spill] sm:$0xff] }
 0x2cd   :  { %17380 = vmatprep.mubr.msk.f32.mxu0 %vm32_vm1, %v27022_v7  ;;  %v27030_v7 = vld [vmem:[#allocation26_spill] sm:$0xff] }
 0x2d0   :  { %17381 = vmatmul.mubr.msk.f32.gmra.mrb[10].mxu0 %vm32_vm1, %v27023_v9  ;;  %v27031_v9 = vld [vmem:[#allocation27_spill] sm:$0xff] }
 0x2d1   :  { %17383 = vmatprep.mubr.msk.f32.mxu0 %vm32_vm1, %v27024_v11  ;;  %v27032_v11 = vld [vmem:[#allocation28_spill] sm:$0xff] }
 0x2d4   :  { %17384 = vmatmul.mubr.msk.f32.gmra.mrb[12].mxu0 %vm32_vm1, %v27025_v49  ;;  %v27033_v49 = vld [vmem:[#allocation29_spill] sm:$0xff] }
 0x2d5   :  { %17386 = vmatprep.mubr.msk.f32.mxu0 %vm32_vm1, %v27026_v8  ;;  %v27034_v8 = vld [vmem:[#allocation30_spill] sm:$0xff] }
 0x2d8   :  { %17387 = vmatmul.mubr.msk.f32.gmra.mrb[14].mxu0 %vm32_vm1, %v27027_v14  ;;  %v27035_v14 = vld [vmem:[#allocation31_spill] sm:$0xff] }
 0x2d9   :  { %17389 = vmatprep.mubr.msk.f32.mxu0 %vm32_vm1, %v27028_v16  ;;  %v27036_v16 = vld [vmem:[#allocation32_spill] sm:$0xff] }
 0x2dc   :  { %17390 = vmatmul.mubr.msk.f32.gmra.mrb[16].mxu0 %vm32_vm1, %v27029_v48  ;;  %v27037_v48 = vld [vmem:[#allocation33_spill] sm:$0xff] }
 0x2dd   :  { %17392 = vmatprep.mubr.msk.f32.mxu0 %vm32_vm1, %v27030_v7  ;;  %v27038_v7 = vld [vmem:[#allocation34_spill] sm:$0xff] }
 0x2e0   :  { %17393 = vmatmul.mubr.msk.f32.gmra.mrb[18].mxu0 %vm32_vm1, %v27031_v9  ;;  %v27039_v9 = vld [vmem:[#allocation35_spill] sm:$0xff] }
 0x2e1   :  { %17395 = vmatprep.mubr.msk.f32.mxu0 %vm32_vm1, %v27032_v11  ;;  %v21303_v11 = vld [vmem:[#allocation2 + $0x182] sm:$0xff] }
 0x2e4   :  { %17396 = vmatmul.mubr.msk.f32.gmra.mrb[20].mxu0 %vm32_vm1, %v27033_v49  ;;  %v27040_v49 = vld [vmem:[#allocation36_spill] sm:$0xff] }
 0x2e5   :  { %17398 = vmatprep.mubr.msk.f32.mxu0 %vm32_vm1, %v27034_v8  ;;  %v21309_v8 = vld [vmem:[#allocation2 + $0x18a] sm:$0xff] }
 0x2e6   :  { %27041 = vst [vmem:[#allocation8_spill] sm:$0xff] %v21309_v8 }
 0x2e8   :  { %17399 = vmatmul.mubr.msk.f32.gmra.mrb[22].mxu0 %vm32_vm1, %v27035_v14  ;;  %v27042_v14 = vld [vmem:[#allocation37_spill] sm:$0xff] }
 0x2e9   :  { %17401 = vmatprep.mubr.msk.f32.mxu0 %vm32_vm1, %v27036_v16  ;;  %v27043_v16 = vld [vmem:[#allocation38_spill] sm:$0xff] }
 0x2ec   :  { %17402 = vmatmul.mubr.msk.f32.gmra.mrb[24].mxu0 %vm32_vm1, %v27037_v48  ;;  %v27045_v48 = vld [vmem:[#allocation40_spill] sm:$0xff] }
 0x2ed   :  { %17404 = vmatprep.mubr.msk.f32.mxu0 %vm32_vm1, %v27038_v7  ;;  %v27046_v7 = vld [vmem:[#allocation41_spill] sm:$0xff] }
 0x2f0   :  { %17405 = vmatmul.mubr.msk.f32.gmra.mrb[26].mxu0 %vm32_vm1, %v27039_v9  ;;  %v27047_v9 = vld [vmem:[#allocation42_spill] sm:$0xff] }
 0x2f1   :  { %17407 = vmatprep.mubr.msk.f32.mxu0 %vm32_vm1, %v20698_v1  ;;  %v27044_v1 = vld [vmem:[#allocation39_spill] sm:$0xff] }
 0x2f4   :  { %17408 = vmatmul.mubr.msk.f32.gmra.mrb[28].mxu0 %vm32_vm1, %v27040_v49  ;;  %v27048_v49 = vld [vmem:[#allocation43_spill] sm:$0xff] }
 0x2f5   :  { %17410 = vmatprep.mubr.msk.f32.mxu0 %vm32_vm1, %v21303_v11 }
 0x2f8   :  { %17411 = vmatmul.mubr.msk.f32.gmra.mrb[30].mxu0 %vm32_vm1, %v21309_v8  ;;  %v27049_v8 = vld [vmem:[#allocation44_spill] sm:$0xff] }
 0x2f9   :  { %17413 = vmatprep.mubr.msk.f32.mxu0 %vm32_vm1, %v27042_v14  ;;  %v27050_v14 = vld [vmem:[#allocation45_spill] sm:$0xff] }
 0x2fc   :  { %17414 = vmatmul.mubr.msk.f32.gmra.mrb[32].mxu0 %vm32_vm1, %v27043_v16  ;;  %v27051_v16 = vld [vmem:[#allocation46_spill] sm:$0xff] }
 0x2fd   :  { %17416 = vmatprep.mubr.msk.f32.mxu0 %vm32_vm1, %v27044_v1  ;;  %v27052_v1 = vld [vmem:[#allocation47_spill] sm:$0xff] }
 0x300   :  { %17417 = vmatmul.mubr.msk.f32.gmra.mrb[34].mxu0 %vm32_vm1, %v27045_v48  ;;  %v27053_v48 = vld [vmem:[#allocation48_spill] sm:$0xff] }
 0x301   :  { %17419 = vmatprep.mubr.msk.f32.mxu0 %vm32_vm1, %v27046_v7  ;;  %v27054_v7 = vld [vmem:[#allocation49_spill] sm:$0xff] }
 0x304   :  { %17420 = vmatmul.mubr.msk.f32.gmra.mrb[36].mxu0 %vm32_vm1, %v27047_v9  ;;  %v27055_v9 = vld [vmem:[#allocation50_spill] sm:$0xff] }
 0x305   :  { %17422 = vmatprep.mubr.msk.f32.mxu0 %vm32_vm1, %v27048_v49  ;;  %v27056_v49 = vld [vmem:[#allocation51_spill] sm:$0xff] }
 0x308   :  { %17423 = vmatmul.mubr.msk.f32.gmra.mrb[38].mxu0 %vm32_vm1, %v27049_v8  ;;  %v27057_v8 = vld [vmem:[#allocation52_spill] sm:$0xff] }
 0x309   :  { %17425 = vmatprep.mubr.msk.f32.mxu0 %vm32_vm1, %v27050_v14  ;;  %v27058_v14 = vld [vmem:[#allocation53_spill] sm:$0xff] }
 0x30c   :  { %17426 = vmatmul.mubr.msk.f32.gmra.mrb[40].mxu0 %vm32_vm1, %v27051_v16  ;;  %v27059_v16 = vld [vmem:[#allocation54_spill] sm:$0xff] }
 0x30d   :  { %17428 = vmatprep.mubr.msk.f32.mxu0 %vm32_vm1, %v27052_v1  ;;  %v27060_v1 = vld [vmem:[#allocation55_spill] sm:$0xff] }
 0x310   :  { %17429 = vmatmul.mubr.msk.f32.gmra.mrb[42].mxu0 %vm32_vm1, %v27053_v48  ;;  %v27061_v48 = vld [vmem:[#allocation56_spill] sm:$0xff] }
 0x311   :  { %17431 = vmatprep.mubr.msk.f32.mxu0 %vm32_vm1, %v27054_v7  ;;  %v27062_v7 = vld [vmem:[#allocation57_spill] sm:$0xff] }
 0x314   :  { %17432 = vmatmul.mubr.msk.f32.gmra.mrb[44].mxu0 %vm32_vm1, %v27055_v9  ;;  %v27063_v9 = vld [vmem:[#allocation58_spill] sm:$0xff] }
 0x315   :  { %17434 = vmatprep.mubr.msk.f32.mxu0 %vm32_vm1, %v27056_v49  ;;  %v27064_v49 = vld [vmem:[#allocation59_spill] sm:$0xff] }
 0x318   :  { %17435 = vmatmul.mubr.msk.f32.gmra.mrb[46].mxu0 %vm32_vm1, %v27057_v8  ;;  %v27065_v8 = vld [vmem:[#allocation60_spill] sm:$0xff] }
 0x319   :  { %17437 = vmatprep.mubr.msk.f32.mxu0 %vm32_vm1, %v27058_v14  ;;  %v27066_v14 = vld [vmem:[#allocation61_spill] sm:$0xff] }
 0x31c   :  { %17438 = vmatmul.mubr.msk.f32.gmra.mrb[48].mxu0 %vm32_vm1, %v27059_v16  ;;  %v21371_v16 = vld [vmem:[#allocation2 + $0x332] sm:$0xff] }
 0x31d   :  { %17440 = vmatprep.mubr.msk.f32.mxu0 %vm32_vm1, %v27060_v1  ;;  %v21377_v1 = vld [vmem:[#allocation2 + $0x33a] sm:$0xff] }
 0x320   :  { %17441 = vmatmul.mubr.msk.f32.gmra.mrb[50].mxu0 %vm32_vm1, %v27061_v48  ;;  %v4408_v48 = vld [vmem:[#allocation2 + $0x60] sm:$0xff] }
 0x321   :  { %17443 = vmatprep.mubr.msk.f32.mxu0 %vm32_vm1, %v27062_v7  ;;  %v4409_v7 = vld [vmem:[#allocation2 + $0x68] sm:$0xff] }
 0x324   :  { %17444 = vmatmul.mubr.msk.f32.gmra.mrb[52].mxu0 %vm32_vm1, %v27063_v9  ;;  %v4410_v9 = vld [vmem:[#allocation2 + $0x78] sm:$0xff] }
 0x325   :  { %17446 = vmatprep.mubr.msk.f32.mxu0 %vm32_vm1, %v27064_v49  ;;  %v4411_v49 = vld [vmem:[#allocation2 + $0x80] sm:$0xff] }
 0x328   :  { %17447 = vmatmul.mubr.msk.f32.gmra.mrb[54].mxu0 %vm32_vm1, %v27065_v8  ;;  %v4412_v8 = vld [vmem:[#allocation2 + $0x90] sm:$0xff] }
 0x329   :  { %17449 = vmatprep.mubr.msk.f32.mxu0 %vm32_vm1, %v27066_v14  ;;  %v4414_v14 = vld [vmem:[#allocation2 + $0xa8] sm:$0xff] }
 0x32c   :  { %17450 = vmatmul.mubr.msk.f32.gmra.mrb[56].mxu0 %vm32_vm1, %v20810_v5  ;;  %v4404_v5 = vld [vmem:[#allocation2 + $0x30] sm:$0xff] }
 0x32d   :  { %17452 = vmatprep.mubr.msk.f32.mxu0 %vm32_vm1, %v20812_v2  ;;  %v4405_v2 = vld [vmem:[#allocation2 + $0x38] sm:$0xff] }
 0x330   :  { %17453 = vmatmul.mubr.msk.f32.gmra.mrb[58].mxu0 %vm32_vm1, %v20826_v35  ;;  %v4406_v35 = vld [vmem:[#allocation2 + $0x48] sm:$0xff] }
 0x331   :  { %17455 = vmatprep.mubr.msk.f32.mxu0 %vm32_vm1, %v20828_v3  ;;  %v21385_v3 = vld [vmem:[%s26696_s1 + $0x20] sm:$0xf] }
 0x334   :  { %17456 = vmatmul.mubr.msk.f32.gmra.mrb[60].mxu0 %vm32_vm1, %v20834_v0  ;;  %v4407_v0 = vld [vmem:[#allocation2 + $0x50] sm:$0xff] }
 0x335   :  { %17458 = vmatprep.mubr.msk.f32.mxu0 %vm32_vm1, %v21371_v16 }
 0x338   :  { %17459 = vmatmul.mubr.msk.f32.gmra.mrb[62].mxu0 %vm32_vm1, %v21377_v1 }
 0x339   :  { %17463 = vmatprep.mubr.msk.f32.mxu0 %vm32_vm1, %v4404_v5  ;;  %v4415_v5 = vld [vmem:[#allocation2 + $0xb0] sm:$0xff] }
 0x33c   :  { %17464 = vmatmul.mubr.msk.f32.vlgmr.msra.gmra.mrb[0].mxu0 %vm32_vm1, %v4405_v2  ;;  %v4416_v2 = vld [vmem:[#allocation2 + $0xc0] sm:$0xff] }
 0x33d   :  { %17560 = vmatpush3.msk.msra.mxu0 %vm594_vm0, %v21241_v13  ;;  %17466 = vmatprep.mubr.msk.f32.mxu0 %vm32_vm1, %v4406_v35  ;;  %v4413_v13 = vld [vmem:[#allocation2 + $0x98] sm:$0xff]  ;;  %v4417_v35 = vld [vmem:[#allocation2 + $0xc8] sm:$0xff] }
 0x33e   :  { %17657 = vmatprep.subr.msk.mxu0 %vm594_vm0, %v21385_v3 }
 0x340   :  { %17467 = vmatmul.mubr.msk.f32.gmra.mrb[2].mxu0 %vm32_vm1, %v4407_v0  ;;  %v4418_v0 = vld [vmem:[#allocation2 + $0xd8] sm:$0xff] }
 0x341   :  { %17469 = vmatprep.mubr.msk.f32.mxu0 %vm32_vm1, %v4408_v48  ;;  %v4419_v48 = vld [vmem:[#allocation2 + $0xe0] sm:$0xff] }
 0x344   :  { %17470 = vmatmul.mubr.msk.f32.gmra.mrb[4].mxu0 %vm32_vm1, %v4409_v7  ;;  %v4420_v7 = vld [vmem:[#allocation2 + $0xf0] sm:$0xff] }
 0x345   :  { %17472 = vmatprep.mubr.msk.f32.mxu0 %vm32_vm1, %v4410_v9  ;;  %v4421_v9 = vld [vmem:[#allocation2 + $0xf8] sm:$0xff] }
 0x348   :  { %17473 = vmatmul.mubr.msk.f32.gmra.mrb[6].mxu0 %vm32_vm1, %v4411_v49  ;;  %v4422_v49 = vld [vmem:[#allocation2 + $0x108] sm:$0xff] }
 0x349   :  { %17475 = vmatprep.mubr.msk.f32.mxu0 %vm32_vm1, %v4412_v8  ;;  %v4423_v8 = vld [vmem:[#allocation2 + $0x110] sm:$0xff] }
 0x34c   :  { %17476 = vmatmul.mubr.msk.f32.gmra.mrb[8].mxu0 %vm32_vm1, %v4413_v13  ;;  %v4424_v13 = vld [vmem:[#allocation2 + $0x120] sm:$0xff] }
 0x34d   :  { %17478 = vmatprep.mubr.msk.f32.mxu0 %vm32_vm1, %v4414_v14  ;;  %v4425_v14 = vld [vmem:[#allocation2 + $0x128] sm:$0xff] }
 0x350   :  { %17479 = vmatmul.mubr.msk.f32.gmra.mrb[10].mxu0 %vm32_vm1, %v4415_v5  ;;  %v4426_v5 = vld [vmem:[#allocation2 + $0x138] sm:$0xff] }
 0x351   :  { %17481 = vmatprep.mubr.msk.f32.mxu0 %vm32_vm1, %v4416_v2  ;;  %v4427_v2 = vld [vmem:[#allocation2 + $0x140] sm:$0xff] }
 0x354   :  { %17482 = vmatmul.mubr.msk.f32.gmra.mrb[12].mxu0 %vm32_vm1, %v4417_v35  ;;  %v4428_v35 = vld [vmem:[#allocation2 + $0x150] sm:$0xff] }
 0x355   :  { %17484 = vmatprep.mubr.msk.f32.mxu0 %vm32_vm1, %v4418_v0  ;;  %v4429_v0 = vld [vmem:[#allocation2 + $0x158] sm:$0xff] }
 0x358   :  { %17485 = vmatmul.mubr.msk.f32.gmra.mrb[14].mxu0 %vm32_vm1, %v4419_v48  ;;  %v4430_v48 = vld [vmem:[#allocation2 + $0x168] sm:$0xff] }
 0x359   :  { %17487 = vmatprep.mubr.msk.f32.mxu0 %vm32_vm1, %v4420_v7  ;;  %v4431_v7 = vld [vmem:[#allocation2 + $0x170] sm:$0xff] }
 0x35c   :  { %17488 = vmatmul.mubr.msk.f32.gmra.mrb[16].mxu0 %vm32_vm1, %v4421_v9  ;;  %v4434_v9 = vld [vmem:[#allocation2 + $0x198] sm:$0xff] }
 0x35d   :  { %17490 = vmatprep.mubr.msk.f32.mxu0 %vm32_vm1, %v4422_v49  ;;  %v4435_v49 = vld [vmem:[#allocation2 + $0x1a0] sm:$0xff] }
 0x360   :  { %17491 = vmatmul.mubr.msk.f32.gmra.mrb[18].mxu0 %vm32_vm1, %v4423_v8  ;;  %v4436_v8 = vld [vmem:[#allocation2 + $0x1e0] sm:$0xff] }
 0x361   :  { %17493 = vmatprep.mubr.msk.f32.mxu0 %vm32_vm1, %v4424_v13  ;;  %v4437_v13 = vld [vmem:[#allocation2 + $0x1e8] sm:$0xff] }
 0x364   :  { %17494 = vmatmul.mubr.msk.f32.gmra.mrb[20].mxu0 %vm32_vm1, %v4425_v14  ;;  %v4438_v14 = vld [vmem:[#allocation2 + $0x1f8] sm:$0xff] }
 0x365   :  { %17496 = vmatprep.mubr.msk.f32.mxu0 %vm32_vm1, %v4426_v5  ;;  %v4439_v5 = vld [vmem:[#allocation2 + $0x200] sm:$0xff] }
 0x368   :  { %17497 = vmatmul.mubr.msk.f32.gmra.mrb[22].mxu0 %vm32_vm1, %v4427_v2  ;;  %v4442_v2 = vld [vmem:[#allocation2 + $0x228] sm:$0xff] }
 0x369   :  { %17499 = vmatprep.mubr.msk.f32.mxu0 %vm32_vm1, %v4428_v35  ;;  %v4443_v35 = vld [vmem:[#allocation2 + $0x230] sm:$0xff] }
 0x36c   :  { %17500 = vmatmul.mubr.msk.f32.gmra.mrb[24].mxu0 %vm32_vm1, %v4429_v0  ;;  %v4444_v0 = vld [vmem:[#allocation2 + $0x240] sm:$0xff] }
 0x36d   :  { %17502 = vmatprep.mubr.msk.f32.mxu0 %vm32_vm1, %v4430_v48  ;;  %v4445_v48 = vld [vmem:[#allocation2 + $0x248] sm:$0xff] }
 0x370   :  { %17503 = vmatmul.mubr.msk.f32.gmra.mrb[26].mxu0 %vm32_vm1, %v4431_v7  ;;  %v4446_v7 = vld [vmem:[#allocation2 + $0x258] sm:$0xff] }
 0x371   :  { %17505 = vmatprep.mubr.msk.f32.mxu0 %vm32_vm1, %v20905_v4  ;;  %v4440_v4 = vld [vmem:[#allocation2 + $0x210] sm:$0xff] }
 0x374   :  { %17506 = vmatmul.mubr.msk.f32.gmra.mrb[28].mxu0 %vm32_vm1, %v20911_v6  ;;  %v4441_v6 = vld [vmem:[#allocation2 + $0x218] sm:$0xff] }
 0x375   :  { %17508 = vmatprep.mubr.msk.f32.mxu0 %vm32_vm1, %v4434_v9  ;;  %v4447_v9 = vld [vmem:[#allocation2 + $0x260] sm:$0xff] }
 0x378   :  { %17509 = vmatmul.mubr.msk.f32.gmra.mrb[30].mxu0 %vm32_vm1, %v4435_v49  ;;  %v4448_v49 = vld [vmem:[#allocation2 + $0x270] sm:$0xff] }
 0x379   :  { %17511 = vmatprep.mubr.msk.f32.mxu0 %vm32_vm1, %v4436_v8  ;;  %v4449_v8 = vld [vmem:[#allocation2 + $0x278] sm:$0xff] }
 0x37c   :  { %17512 = vmatmul.mubr.msk.f32.gmra.mrb[32].mxu0 %vm32_vm1, %v4437_v13  ;;  %v4450_v13 = vld [vmem:[#allocation2 + $0x288] sm:$0xff] }
 0x37d   :  { %17514 = vmatprep.mubr.msk.f32.mxu0 %vm32_vm1, %v4438_v14  ;;  %v4451_v14 = vld [vmem:[#allocation2 + $0x290] sm:$0xff] }
 0x380   :  { %17515 = vmatmul.mubr.msk.f32.gmra.mrb[34].mxu0 %vm32_vm1, %v4439_v5  ;;  %v4452_v5 = vld [vmem:[#allocation2 + $0x2a0] sm:$0xff] }
 0x381   :  { %17517 = vmatprep.mubr.msk.f32.mxu0 %vm32_vm1, %v4440_v4  ;;  %v4453_v4 = vld [vmem:[#allocation2 + $0x2a8] sm:$0xff] }
 0x384   :  { %17518 = vmatmul.mubr.msk.f32.gmra.mrb[36].mxu0 %vm32_vm1, %v4441_v6  ;;  %v4454_v6 = vld [vmem:[#allocation2 + $0x2b8] sm:$0xff] }
 0x385   :  { %17520 = vmatprep.mubr.msk.f32.mxu0 %vm32_vm1, %v4442_v2  ;;  %v4455_v2 = vld [vmem:[#allocation2 + $0x2c0] sm:$0xff] }
 0x388   :  { %17521 = vmatmul.mubr.msk.f32.gmra.mrb[38].mxu0 %vm32_vm1, %v4443_v35  ;;  %v4456_v35 = vld [vmem:[#allocation2 + $0x2d0] sm:$0xff] }
 0x389   :  { %17523 = vmatprep.mubr.msk.f32.mxu0 %vm32_vm1, %v4444_v0  ;;  %v4457_v0 = vld [vmem:[#allocation2 + $0x2d8] sm:$0xff] }
 0x38c   :  { %17524 = vmatmul.mubr.msk.f32.gmra.mrb[40].mxu0 %vm32_vm1, %v4445_v48  ;;  %v4458_v48 = vld [vmem:[#allocation2 + $0x2e8] sm:$0xff] }
 0x38d   :  { %17526 = vmatprep.mubr.msk.f32.mxu0 %vm32_vm1, %v4446_v7  ;;  %v4459_v7 = vld [vmem:[#allocation2 + $0x2f0] sm:$0xff] }
 0x390   :  { %17527 = vmatmul.mubr.msk.f32.gmra.mrb[42].mxu0 %vm32_vm1, %v4447_v9  ;;  %v4460_v9 = vld [vmem:[#allocation2 + $0x300] sm:$0xff] }
 0x391   :  { %17529 = vmatprep.mubr.msk.f32.mxu0 %vm32_vm1, %v4448_v49  ;;  %v4461_v49 = vld [vmem:[#allocation2 + $0x308] sm:$0xff] }
 0x394   :  { %17530 = vmatmul.mubr.msk.f32.gmra.mrb[44].mxu0 %vm32_vm1, %v4449_v8  ;;  %v4462_v8 = vld [vmem:[#allocation2 + $0x318] sm:$0xff] }
 0x395   :  { %17532 = vmatprep.mubr.msk.f32.mxu0 %vm32_vm1, %v4450_v13  ;;  %v4463_v13 = vld [vmem:[#allocation2 + $0x320] sm:$0xff] }
 0x398   :  { %17533 = vmatmul.mubr.msk.f32.gmra.mrb[46].mxu0 %vm32_vm1, %v4451_v14  ;;  %v4466_v14 = vld [vmem:[#allocation2 + $0x348] sm:$0xff] }
 0x399   :  { %17535 = vmatprep.mubr.msk.f32.mxu0 %vm32_vm1, %v4452_v5  ;;  %v4467_v5 = vld [vmem:[#allocation2 + $0x350] sm:$0xff] }
 0x39c   :  { %17536 = vmatmul.mubr.msk.f32.gmra.mrb[48].mxu0 %vm32_vm1, %v4453_v4  ;;  %v27082_v4 = vld [vmem:[#allocation8_spill] sm:$0xff] }
 0x39d   :  { %17538 = vmatprep.mubr.msk.f32.mxu0 %vm32_vm1, %v4454_v6  ;;  %v5855_v6 = vld [vmem:[#allocation2 + $0x1a2] sm:$0xff] }
 0x3a0   :  { %17539 = vmatmul.mubr.msk.f32.gmra.mrb[50].mxu0 %vm32_vm1, %v4455_v2  ;;  %v5856_v2 = vld [vmem:[#allocation2 + $0x1e2] sm:$0xff] }
 0x3a1   :  { %17541 = vmatprep.mubr.msk.f32.mxu0 %vm32_vm1, %v4456_v35  ;;  %v5857_v35 = vld [vmem:[#allocation2 + $0x1ea] sm:$0xff] }
 0x3a4   :  { %17542 = vmatmul.mubr.msk.f32.gmra.mrb[52].mxu0 %vm32_vm1, %v4457_v0  ;;  %v5858_v0 = vld [vmem:[#allocation2 + $0x1fa] sm:$0xff] }
 0x3a5   :  { %17544 = vmatprep.mubr.msk.f32.mxu0 %vm32_vm1, %v4458_v48  ;;  %v5859_v48 = vld [vmem:[#allocation2 + $0x202] sm:$0xff] }
 0x3a8   :  { %17545 = vmatmul.mubr.msk.f32.gmra.mrb[54].mxu0 %vm32_vm1, %v4459_v7  ;;  %v5861_v7 = vld [vmem:[#allocation2 + $0x21a] sm:$0xff] }
 0x3a9   :  { %17547 = vmatprep.mubr.msk.f32.mxu0 %vm32_vm1, %v4460_v9  ;;  %v5862_v9 = vld [vmem:[#allocation2 + $0x22a] sm:$0xff] }
 0x3ac   :  { %17548 = vmatmul.mubr.msk.f32.gmra.mrb[56].mxu0 %vm32_vm1, %v4461_v49  ;;  %v5863_v49 = vld [vmem:[#allocation2 + $0x232] sm:$0xff] }
 0x3ad   :  { %17550 = vmatprep.mubr.msk.f32.mxu0 %vm32_vm1, %v4462_v8  ;;  %v5864_v8 = vld [vmem:[#allocation2 + $0x242] sm:$0xff] }
 0x3b0   :  { %17551 = vmatmul.mubr.msk.f32.gmra.mrb[58].mxu0 %vm32_vm1, %v4463_v13  ;;  %v5865_v13 = vld [vmem:[#allocation2 + $0x24a] sm:$0xff] }
 0x3b1   :  { %17553 = vmatprep.mubr.msk.f32.mxu0 %vm32_vm1, %v20973_v10  ;;  %v5144_v10 = vld [vmem:[#allocation2 + $0x199] sm:$0xff] }
 0x3b4   :  { %17554 = vmatmul.mubr.msk.f32.gmra.mrb[60].mxu0 %vm32_vm1, %v20979_v12  ;;  %v5145_v12 = vld [vmem:[#allocation2 + $0x1a1] sm:$0xff] }
 0x3b5   :  { %17556 = vmatprep.mubr.msk.f32.mxu0 %vm32_vm1, %v4466_v14  ;;  %v5866_v14 = vld [vmem:[#allocation2 + $0x25a] sm:$0xff] }
 0x3b8   :  { %17557 = vmatmul.mubr.msk.f32.gmra.mrb[62].mxu0 %vm32_vm1, %v4467_v5  ;;  %v5867_v5 = vld [vmem:[#allocation2 + $0x262] sm:$0xff] }
 0x3b9   :  { %17561 = vmatprep.mubr.msk.f32.mxu0 %vm32_vm1, %v20984_v15  ;;  %v27067_v15 = vld [vmem:[#allocation4_spill] sm:$0xff] }
 0x3bc   :  { %17562 = vmatmul.mubr.msk.f32.vlgmr.msra.gmra.mrb[0].mxu0 %vm32_vm1, %v20996_v17  ;;  %v27068_v17 = vld [vmem:[#allocation5_spill] sm:$0xff] }
 0x3bd   :  { %17658 = vmatpush3.msk.msra.mxu0 %vm594_vm0, %v21385_v3  ;;  %17564 = vmatprep.mubr.msk.f32.mxu0 %vm32_vm1, %v20998_v18  ;;  %v27069_v18 = vld [vmem:[#allocation6_spill] sm:$0xff]  ;;  %v5854_v3 = vld [vmem:[#allocation2 + $0x19a] sm:$0xff] }
 0x3c0   :  { %17565 = vmatmul.mubr.msk.f32.gmra.mrb[2].mxu0 %vm32_vm1, %v21006_v19  ;;  %v27070_v19 = vld [vmem:[#allocation7_spill] sm:$0xff] }
 0x3c1   :  { %17567 = vmatprep.mubr.msk.f32.mxu0 %vm32_vm1, %v21008_v20  ;;  %v27071_v20 = vld [vmem:[#allocation62_spill] sm:$0xff] }
 0x3c4   :  { %17568 = vmatmul.mubr.msk.f32.gmra.mrb[4].mxu0 %vm32_vm1, %v21014_v21  ;;  %v27072_v21 = vld [vmem:[#allocation63_spill] sm:$0xff] }
 0x3c5   :  { %17570 = vmatprep.mubr.msk.f32.mxu0 %vm32_vm1, %v21016_v22  ;;  %v27073_v22 = vld [vmem:[#allocation64_spill] sm:$0xff] }
 0x3c8   :  { %17571 = vmatmul.mubr.msk.f32.gmra.mrb[6].mxu0 %vm32_vm1, %v21022_v23  ;;  %v27074_v23 = vld [vmem:[#allocation65_spill] sm:$0xff] }
 0x3c9   :  { %17573 = vmatprep.mubr.msk.f32.mxu0 %vm32_vm1, %v21024_v24  ;;  %v27075_v24 = vld [vmem:[#allocation66_spill] sm:$0xff] }
 0x3cc   :  { %17574 = vmatmul.mubr.msk.f32.gmra.mrb[8].mxu0 %vm32_vm1, %v21030_v25  ;;  %v27076_v25 = vld [vmem:[#allocation67_spill] sm:$0xff] }
 0x3cd   :  { %17576 = vmatprep.mubr.msk.f32.mxu0 %vm32_vm1, %v21032_v26  ;;  %v27077_v26 = vld [vmem:[#allocation68_spill] sm:$0xff] }
 0x3d0   :  { %17577 = vmatmul.mubr.msk.f32.gmra.mrb[10].mxu0 %vm32_vm1, %v21038_v27  ;;  %v27078_v27 = vld [vmem:[#allocation69_spill] sm:$0xff] }
 0x3d1   :  { %17579 = vmatprep.mubr.msk.f32.mxu0 %vm32_vm1, %v21040_v28  ;;  %v27079_v28 = vld [vmem:[#allocation70_spill] sm:$0xff] }
 0x3d4   :  { %17580 = vmatmul.mubr.msk.f32.gmra.mrb[12].mxu0 %vm32_vm1, %v21046_v29  ;;  %v27080_v29 = vld [vmem:[#allocation71_spill] sm:$0xff] }
 0x3d5   :  { %17582 = vmatprep.mubr.msk.f32.mxu0 %vm32_vm1, %v21048_v30  ;;  %v5176_v30 = vld [vmem:[#allocation2 + $0x349] sm:$0xff] }
 0x3d8   :  { %17583 = vmatmul.mubr.msk.f32.gmra.mrb[14].mxu0 %vm32_vm1, %v21054_v31  ;;  %v27081_v31 = vld [vmem:[#allocation72_spill] sm:$0xff] }
 0x3d9   :  { %17585 = vmatprep.mubr.msk.f32.mxu0 %vm32_vm1, %v21056_v32  ;;  %v5177_v32 = vld [vmem:[#allocation2 + $0x351] sm:$0xff] }
 0x3dc   :  { %17586 = vmatmul.mubr.msk.f32.gmra.mrb[16].mxu0 %vm32_vm1, %v21062_v33  ;;  %v5824_v33 = vld [vmem:[#allocation2 + $0x32] sm:$0xff] }
 0x3dd   :  { %17588 = vmatprep.mubr.msk.f32.mxu0 %vm32_vm1, %v21064_v34  ;;  %v5825_v34 = vld [vmem:[#allocation2 + $0x3a] sm:$0xff] }
 0x3e0   :  { %17589 = vmatmul.mubr.msk.f32.gmra.mrb[18].mxu0 %vm32_vm1, %v21070_v37  ;;  %v5826_v37 = vld [vmem:[#allocation2 + $0x4a] sm:$0xff] }
 0x3e1   :  { %17591 = vmatprep.mubr.msk.f32.mxu0 %vm32_vm1, %v21072_v38  ;;  %v5827_v38 = vld [vmem:[#allocation2 + $0x52] sm:$0xff] }
 0x3e4   :  { %17592 = vmatmul.mubr.msk.f32.gmra.mrb[20].mxu0 %vm32_vm1, %v21078_v39  ;;  %v5828_v39 = vld [vmem:[#allocation2 + $0x62] sm:$0xff] }
 0x3e5   :  { %17594 = vmatprep.mubr.msk.f32.mxu0 %vm32_vm1, %v21080_v40  ;;  %v5829_v40 = vld [vmem:[#allocation2 + $0x6a] sm:$0xff] }
 0x3e8   :  { %17595 = vmatmul.mubr.msk.f32.gmra.mrb[22].mxu0 %vm32_vm1, %v21086_v41  ;;  %v5830_v41 = vld [vmem:[#allocation2 + $0x7a] sm:$0xff] }
 0x3e9   :  { %17597 = vmatprep.mubr.msk.f32.mxu0 %vm32_vm1, %v21088_v42  ;;  %v5831_v42 = vld [vmem:[#allocation2 + $0x82] sm:$0xff] }
 0x3ec   :  { %17598 = vmatmul.mubr.msk.f32.gmra.mrb[24].mxu0 %vm32_vm1, %v21094_v43  ;;  %v5832_v43 = vld [vmem:[#allocation2 + $0x92] sm:$0xff] }
 0x3ed   :  { %17600 = vmatprep.mubr.msk.f32.mxu0 %vm32_vm1, %v21096_v44  ;;  %v5833_v44 = vld [vmem:[#allocation2 + $0x9a] sm:$0xff] }
 0x3f0   :  { %17601 = vmatmul.mubr.msk.f32.gmra.mrb[26].mxu0 %vm32_vm1, %v21102_v45  ;;  %v5834_v45 = vld [vmem:[#allocation2 + $0xaa] sm:$0xff] }
 0x3f1   :  { %17603 = vmatprep.mubr.msk.f32.mxu0 %vm32_vm1, %v21104_v46  ;;  %v5835_v46 = vld [vmem:[#allocation2 + $0xb2] sm:$0xff] }
 0x3f4   :  { %17604 = vmatmul.mubr.msk.f32.gmra.mrb[28].mxu0 %vm32_vm1, %v21110_v47  ;;  %v5836_v47 = vld [vmem:[#allocation2 + $0xc2] sm:$0xff] }
 0x3f5   :  { %17606 = vmatprep.mubr.msk.f32.mxu0 %vm32_vm1, %v5144_v10  ;;  %v5868_v10 = vld [vmem:[#allocation2 + $0x272] sm:$0xff] }
 0x3f8   :  { %17607 = vmatmul.mubr.msk.f32.gmra.mrb[30].mxu0 %vm32_vm1, %v5145_v12  ;;  %v21631_v12 = vld [vmem:[#allocation2 + $0x27a] sm:$0xff] }
 0x3f9   :  { %17609 = vmatprep.mubr.msk.f32.mxu0 %vm32_vm1, %v21115_v50  ;;  %v5837_v50 = vld [vmem:[#allocation2 + $0xca] sm:$0xff] }
 0x3fc   :  { %17610 = vmatmul.mubr.msk.f32.gmra.mrb[32].mxu0 %vm32_vm1, %v21120_v51  ;;  %v5838_v51 = vld [vmem:[#allocation2 + $0xda] sm:$0xff] }
 0x3fd   :  { %17612 = vmatprep.mubr.msk.f32.mxu0 %vm32_vm1, %v21122_v52  ;;  %v5839_v52 = vld [vmem:[#allocation2 + $0xe2] sm:$0xff] }
 0x400   :  { %17613 = vmatmul.mubr.msk.f32.gmra.mrb[34].mxu0 %vm32_vm1, %v21128_v53  ;;  %v5840_v53 = vld [vmem:[#allocation2 + $0xf2] sm:$0xff] }
 0x401   :  { %17615 = vmatprep.mubr.msk.f32.mxu0 %vm32_vm1, %v21130_v54  ;;  %v5841_v54 = vld [vmem:[#allocation2 + $0xfa] sm:$0xff] }
 0x404   :  { %17616 = vmatmul.mubr.msk.f32.gmra.mrb[36].mxu0 %vm32_vm1, %v21136_v55  ;;  %v5842_v55 = vld [vmem:[#allocation2 + $0x10a] sm:$0xff] }
 0x405   :  { %17618 = vmatprep.mubr.msk.f32.mxu0 %vm32_vm1, %v21138_v56  ;;  %v5843_v56 = vld [vmem:[#allocation2 + $0x112] sm:$0xff] }
 0x408   :  { %17619 = vmatmul.mubr.msk.f32.gmra.mrb[38].mxu0 %vm32_vm1, %v21144_v57  ;;  %v5844_v57 = vld [vmem:[#allocation2 + $0x122] sm:$0xff] }
 0x409   :  { %17621 = vmatprep.mubr.msk.f32.mxu0 %vm32_vm1, %v21146_v58  ;;  %v5845_v58 = vld [vmem:[#allocation2 + $0x12a] sm:$0xff] }
 0x40c   :  { %17622 = vmatmul.mubr.msk.f32.gmra.mrb[40].mxu0 %vm32_vm1, %v21152_v59  ;;  %v5846_v59 = vld [vmem:[#allocation2 + $0x13a] sm:$0xff] }
 0x40d   :  { %17624 = vmatprep.mubr.msk.f32.mxu0 %vm32_vm1, %v21154_v60  ;;  %v5847_v60 = vld [vmem:[#allocation2 + $0x142] sm:$0xff] }
 0x410   :  { %17625 = vmatmul.mubr.msk.f32.gmra.mrb[42].mxu0 %vm32_vm1, %v21160_v61  ;;  %v5848_v61 = vld [vmem:[#allocation2 + $0x152] sm:$0xff] }
 0x411   :  { %17627 = vmatprep.mubr.msk.f32.mxu0 %vm32_vm1, %v21162_v62  ;;  %v5849_v62 = vld [vmem:[#allocation2 + $0x15a] sm:$0xff] }
 0x414   :  { %17628 = vmatmul.mubr.msk.f32.gmra.mrb[44].mxu0 %vm32_vm1, %v21168_v63  ;;  %v5850_v63 = vld [vmem:[#allocation2 + $0x16a] sm:$0xff] }
 0x415   :  { %17630 = vmatprep.mubr.msk.f32.mxu0 %vm32_vm1, %v21170_v36  ;;  %v5851_v36 = vld [vmem:[#allocation2 + $0x172] sm:$0xff] }
 0x418   :  { %17631 = vmatmul.mubr.msk.f32.gmra.mrb[46].mxu0 %vm32_vm1, %v27067_v15  ;;  %v27083_v15 = vmov 0.0  }
 0x419   :  { %17633 = vmatprep.mubr.msk.f32.mxu0 %vm32_vm1, %v27068_v17  ;;  %7281 = vst.msk [vmem:[#allocation3 + $0x20] sm:$0xff] %vm6605_vm3, %v27083_v15  ;;  %7276 = vst.msk [vmem:[#allocation3] sm:$0xff] %vm6605_vm3, %v27083_v15  ;;  %v5870_v17 = vld [vmem:[#allocation2 + $0x28a] sm:$0xff] }
 0x41a   :  { %7277 = vst.msk [vmem:[#allocation3 + $0x8] sm:$0xff] %vm6605_vm3, %v27083_v15  ;;  %7280 = vst.msk [vmem:[#allocation3 + $0x18] sm:$0xff] %vm6605_vm3, %v27083_v15 }
 0x41b   :  { %7283 = vst.msk [vmem:[#allocation3 + $0x30] sm:$0xff] %vm6605_vm3, %v27083_v15  ;;  %7284 = vst.msk [vmem:[#allocation3 + $0x38] sm:$0xff] %vm6605_vm3, %v27083_v15 }
 0x41c   :  { %17634 = vmatmul.mubr.msk.f32.gmra.mrb[48].mxu0 %vm32_vm1, %v27069_v18  ;;  %7286 = vst.msk [vmem:[#allocation3 + $0x48] sm:$0xff] %vm6605_vm3, %v27083_v15  ;;  %7287 = vst.msk [vmem:[#allocation3 + $0x50] sm:$0xff] %vm6605_vm3, %v27083_v15  ;;  %v5871_v18 = vld [vmem:[#allocation2 + $0x292] sm:$0xff] }
 0x41d   :  { %17636 = vmatprep.mubr.msk.f32.mxu0 %vm32_vm1, %v27070_v19  ;;  %7289 = vst.msk [vmem:[#allocation3 + $0x60] sm:$0xff] %vm6605_vm3, %v27083_v15  ;;  %7290 = vst.msk [vmem:[#allocation3 + $0x68] sm:$0xff] %vm6605_vm3, %v27083_v15  ;;  %v5872_v19 = vld [vmem:[#allocation2 + $0x2a2] sm:$0xff] }
 0x41e   :  { %7292 = vst.msk [vmem:[#allocation3 + $0x78] sm:$0xff] %vm6605_vm3, %v27083_v15  ;;  %7293 = vst.msk [vmem:[#allocation3 + $0x80] sm:$0xff] %vm6605_vm3, %v27083_v15 }
 0x41f   :  { %7295 = vst.msk [vmem:[#allocation3 + $0x90] sm:$0xff] %vm6605_vm3, %v27083_v15  ;;  %7296 = vst.msk [vmem:[#allocation3 + $0x98] sm:$0xff] %vm6605_vm3, %v27083_v15 }
 0x420   :  { %17637 = vmatmul.mubr.msk.f32.gmra.mrb[50].mxu0 %vm32_vm1, %v27071_v20  ;;  %7298 = vst.msk [vmem:[#allocation3 + $0xa8] sm:$0xff] %vm6605_vm3, %v27083_v15  ;;  %7299 = vst.msk [vmem:[#allocation3 + $0xb0] sm:$0xff] %vm6605_vm3, %v27083_v15  ;;  %v5873_v20 = vld [vmem:[#allocation2 + $0x2aa] sm:$0xff] }
 0x421   :  { %17639 = vmatprep.mubr.msk.f32.mxu0 %vm32_vm1, %v27072_v21  ;;  %7301 = vst.msk [vmem:[#allocation3 + $0xc0] sm:$0xff] %vm6605_vm3, %v27083_v15  ;;  %7302 = vst.msk [vmem:[#allocation3 + $0xc8] sm:$0xff] %vm6605_vm3, %v27083_v15  ;;  %v5874_v21 = vld [vmem:[#allocation2 + $0x2ba] sm:$0xff] }
 0x422   :  { %7304 = vst.msk [vmem:[#allocation3 + $0xd8] sm:$0xff] %vm6605_vm3, %v27083_v15  ;;  %7305 = vst.msk [vmem:[#allocation3 + $0xe0] sm:$0xff] %vm6605_vm3, %v27083_v15 }
 0x423   :  { %7307 = vst.msk [vmem:[#allocation3 + $0xf0] sm:$0xff] %vm6605_vm3, %v27083_v15  ;;  %7308 = vst.msk [vmem:[#allocation3 + $0xf8] sm:$0xff] %vm6605_vm3, %v27083_v15 }
 0x424   :  { %17640 = vmatmul.mubr.msk.f32.gmra.mrb[52].mxu0 %vm32_vm1, %v27073_v22  ;;  %7310 = vst.msk [vmem:[#allocation3 + $0x108] sm:$0xff] %vm6605_vm3, %v27083_v15  ;;  %7311 = vst.msk [vmem:[#allocation3 + $0x110] sm:$0xff] %vm6605_vm3, %v27083_v15  ;;  %v5875_v22 = vld [vmem:[#allocation2 + $0x2c2] sm:$0xff] }
 0x425   :  { %17642 = vmatprep.mubr.msk.f32.mxu0 %vm32_vm1, %v27074_v23  ;;  %7313 = vst.msk [vmem:[#allocation3 + $0x120] sm:$0xff] %vm6605_vm3, %v27083_v15  ;;  %7314 = vst.msk [vmem:[#allocation3 + $0x128] sm:$0xff] %vm6605_vm3, %v27083_v15  ;;  %v5876_v23 = vld [vmem:[#allocation2 + $0x2d2] sm:$0xff] }
 0x426   :  { %7316 = vst.msk [vmem:[#allocation3 + $0x138] sm:$0xff] %vm6605_vm3, %v27083_v15  ;;  %7317 = vst.msk [vmem:[#allocation3 + $0x140] sm:$0xff] %vm6605_vm3, %v27083_v15 }
 0x427   :  { %7319 = vst.msk [vmem:[#allocation3 + $0x150] sm:$0xff] %vm6605_vm3, %v27083_v15  ;;  %7320 = vst.msk [vmem:[#allocation3 + $0x158] sm:$0xff] %vm6605_vm3, %v27083_v15 }
 0x428   :  { %17643 = vmatmul.mubr.msk.f32.gmra.mrb[54].mxu0 %vm32_vm1, %v27075_v24  ;;  %7322 = vst.msk [vmem:[#allocation3 + $0x168] sm:$0xff] %vm6605_vm3, %v27083_v15  ;;  %7323 = vst.msk [vmem:[#allocation3 + $0x170] sm:$0xff] %vm6605_vm3, %v27083_v15  ;;  %v5877_v24 = vld [vmem:[#allocation2 + $0x2da] sm:$0xff] }
 0x429   :  { %17645 = vmatprep.mubr.msk.f32.mxu0 %vm32_vm1, %v27076_v25  ;;  %7325 = vst.msk [vmem:[#allocation3 + $0x180] sm:$0xff] %vm6605_vm3, %v27083_v15  ;;  %7326 = vst.msk [vmem:[#allocation3 + $0x188] sm:$0xff] %vm6605_vm3, %v27083_v15  ;;  %v5878_v25 = vld [vmem:[#allocation2 + $0x2ea] sm:$0xff] }
 0x42a   :  { %7328 = vst.msk [vmem:[#allocation3 + $0x198] sm:$0xff] %vm6605_vm3, %v27083_v15  ;;  %7329 = vst.msk [vmem:[#allocation3 + $0x1a0] sm:$0xff] %vm6605_vm3, %v27083_v15 }
 0x42b   :  { %7331 = vst.msk [vmem:[#allocation3 + $0x1b0] sm:$0xff] %vm6605_vm3, %v27083_v15  ;;  %7332 = vst.msk [vmem:[#allocation3 + $0x1b8] sm:$0xff] %vm6605_vm3, %v27083_v15 }
 0x42c   :  { %17646 = vmatmul.mubr.msk.f32.gmra.mrb[56].mxu0 %vm32_vm1, %v27077_v26  ;;  %7334 = vst.msk [vmem:[#allocation3 + $0x1c8] sm:$0xff] %vm6605_vm3, %v27083_v15  ;;  %7335 = vst.msk [vmem:[#allocation3 + $0x1d0] sm:$0xff] %vm6605_vm3, %v27083_v15  ;;  %v5879_v26 = vld [vmem:[#allocation2 + $0x2f2] sm:$0xff] }
 0x42d   :  { %17648 = vmatprep.mubr.msk.f32.mxu0 %vm32_vm1, %v27078_v27  ;;  %7337 = vst.msk [vmem:[#allocation3 + $0x1e0] sm:$0xff] %vm6605_vm3, %v27083_v15  ;;  %7338 = vst.msk [vmem:[#allocation3 + $0x1e8] sm:$0xff] %vm6605_vm3, %v27083_v15  ;;  %v5880_v27 = vld [vmem:[#allocation2 + $0x302] sm:$0xff] }
 0x42e   :  { %7340 = vst.msk [vmem:[#allocation3 + $0x1f8] sm:$0xff] %vm6605_vm3, %v27083_v15  ;;  %7341 = vst.msk [vmem:[#allocation3 + $0x200] sm:$0xff] %vm6605_vm3, %v27083_v15 }
 0x42f   :  { %7343 = vst.msk [vmem:[#allocation3 + $0x210] sm:$0xff] %vm6605_vm3, %v27083_v15  ;;  %7344 = vst.msk [vmem:[#allocation3 + $0x218] sm:$0xff] %vm6605_vm3, %v27083_v15 }
 0x430   :  { %17649 = vmatmul.mubr.msk.f32.gmra.mrb[58].mxu0 %vm32_vm1, %v27079_v28  ;;  %7346 = vst.msk [vmem:[#allocation3 + $0x228] sm:$0xff] %vm6605_vm3, %v27083_v15  ;;  %7347 = vst.msk [vmem:[#allocation3 + $0x230] sm:$0xff] %vm6605_vm3, %v27083_v15  ;;  %v5881_v28 = vld [vmem:[#allocation2 + $0x30a] sm:$0xff] }
 0x431   :  { %17651 = vmatprep.mubr.msk.f32.mxu0 %vm32_vm1, %v27080_v29  ;;  %7349 = vst.msk [vmem:[#allocation3 + $0x240] sm:$0xff] %vm6605_vm3, %v27083_v15  ;;  %7350 = vst.msk [vmem:[#allocation3 + $0x248] sm:$0xff] %vm6605_vm3, %v27083_v15  ;;  %v5882_v29 = vld [vmem:[#allocation2 + $0x31a] sm:$0xff] }
 0x432   :  { %7352 = vst.msk [vmem:[#allocation3 + $0x258] sm:$0xff] %vm6605_vm3, %v27083_v15  ;;  %7353 = vst.msk [vmem:[#allocation3 + $0x260] sm:$0xff] %vm6605_vm3, %v27083_v15 }
 0x433   :  { %7355 = vst.msk [vmem:[#allocation3 + $0x270] sm:$0xff] %vm6605_vm3, %v27083_v15  ;;  %7356 = vst.msk [vmem:[#allocation3 + $0x278] sm:$0xff] %vm6605_vm3, %v27083_v15 }
 0x434   :  { %17652 = vmatmul.mubr.msk.f32.gmra.mrb[60].mxu0 %vm32_vm1, %v27081_v31  ;;  %7358 = vst.msk [vmem:[#allocation3 + $0x288] sm:$0xff] %vm6605_vm3, %v27083_v15  ;;  %7359 = vst.msk [vmem:[#allocation3 + $0x290] sm:$0xff] %vm6605_vm3, %v27083_v15  ;;  %v5886_v31 = vld [vmem:[#allocation2 + $0x34a] sm:$0xff] }
 0x435   :  { %17654 = vmatprep.mubr.msk.f32.mxu0 %vm32_vm1, %v5176_v30  ;;  %7361 = vst.msk [vmem:[#allocation3 + $0x2a0] sm:$0xff] %vm6605_vm3, %v27083_v15  ;;  %7362 = vst.msk [vmem:[#allocation3 + $0x2a8] sm:$0xff] %vm6605_vm3, %v27083_v15  ;;  %v5883_v30 = vld [vmem:[#allocation2 + $0x322] sm:$0xff] }
 0x436   :  { %7364 = vst.msk [vmem:[#allocation3 + $0x2b8] sm:$0xff] %vm6605_vm3, %v27083_v15  ;;  %7365 = vst.msk [vmem:[#allocation3 + $0x2c0] sm:$0xff] %vm6605_vm3, %v27083_v15 }
 0x437   :  { %7367 = vst.msk [vmem:[#allocation3 + $0x2d0] sm:$0xff] %vm6605_vm3, %v27083_v15  ;;  %7368 = vst.msk [vmem:[#allocation3 + $0x2d8] sm:$0xff] %vm6605_vm3, %v27083_v15 }
 0x438   :  { %17655 = vmatmul.mubr.msk.f32.gmra.mrb[62].mxu0 %vm32_vm1, %v5177_v32  ;;  %7370 = vst.msk [vmem:[#allocation3 + $0x2e8] sm:$0xff] %vm6605_vm3, %v27083_v15  ;;  %7371 = vst.msk [vmem:[#allocation3 + $0x2f0] sm:$0xff] %vm6605_vm3, %v27083_v15  ;;  %v5887_v32 = vld [vmem:[#allocation2 + $0x352] sm:$0xff] }
 0x439   :  { %17659 = vmatprep.mubr.msk.f32.mxu0 %vm32_vm1, %v5824_v33  ;;  %7373 = vst.msk [vmem:[#allocation3 + $0x300] sm:$0xff] %vm6605_vm3, %v27083_v15  ;;  %7374 = vst.msk [vmem:[#allocation3 + $0x308] sm:$0xff] %vm6605_vm3, %v27083_v15  ;;  %v21874_v33 = vld [vmem:[%s26698_s2] ss:$0 sm:$0xff] }
 0x43a   :  { %7376 = vst.msk [vmem:[#allocation3 + $0x318] sm:$0xff] %vm6605_vm3, %v27083_v15  ;;  %7377 = vst.msk [vmem:[#allocation3 + $0x320] sm:$0xff] %vm6605_vm3, %v27083_v15 }
 0x43b   :  { %7379 = vst.msk [vmem:[#allocation3 + $0x330] sm:$0xff] %vm6605_vm3, %v27083_v15  ;;  %7380 = vst.msk [vmem:[#allocation3 + $0x338] sm:$0xff] %vm6605_vm3, %v27083_v15 }
 0x43c   :  { %17660 = vmatmul.mubr.msk.f32.vlgmr.msra.gmra.mrb[0].mxu0 %vm32_vm1, %v5825_v34  ;;  %7382 = vst.msk [vmem:[#allocation3 + $0x348] sm:$0xff] %vm6605_vm3, %v27083_v15  ;;  %7383 = vst.msk [vmem:[#allocation3 + $0x350] sm:$0xff] %vm6605_vm3, %v27083_v15 }
 0x43d   :  { %17662 = vmatprep.mubr.msk.f32.mxu0 %vm32_vm1, %v5826_v37  ;;  %7282 = vst.msk [vmem:[#allocation3 + $0x28] sm:$0x3] %vm7278_vm4, %v27083_v15  ;;  %7279 = vst.msk [vmem:[#allocation3 + $0x10] sm:$0x3] %vm7278_vm4, %v27083_v15 }
 0x43e   :  { %7285 = vst.msk [vmem:[#allocation3 + $0x40] sm:$0x3] %vm7278_vm4, %v27083_v15  ;;  %7288 = vst.msk [vmem:[#allocation3 + $0x58] sm:$0x3] %vm7278_vm4, %v27083_v15 }
 0x43f   :  { %7291 = vst.msk [vmem:[#allocation3 + $0x70] sm:$0x3] %vm7278_vm4, %v27083_v15  ;;  %7294 = vst.msk [vmem:[#allocation3 + $0x88] sm:$0x3] %vm7278_vm4, %v27083_v15 }
 0x440   :  { %17663 = vmatmul.mubr.msk.f32.gmra.mrb[2].mxu0 %vm32_vm1, %v5827_v38  ;;  %7297 = vst.msk [vmem:[#allocation3 + $0xa0] sm:$0x3] %vm7278_vm4, %v27083_v15  ;;  %7300 = vst.msk [vmem:[#allocation3 + $0xb8] sm:$0x3] %vm7278_vm4, %v27083_v15 }
 0x441   :  { %17665 = vmatprep.mubr.msk.f32.mxu0 %vm32_vm1, %v5828_v39  ;;  %7303 = vst.msk [vmem:[#allocation3 + $0xd0] sm:$0x3] %vm7278_vm4, %v27083_v15  ;;  %7306 = vst.msk [vmem:[#allocation3 + $0xe8] sm:$0x3] %vm7278_vm4, %v27083_v15 }
 0x442   :  { %7309 = vst.msk [vmem:[#allocation3 + $0x100] sm:$0x3] %vm7278_vm4, %v27083_v15  ;;  %7312 = vst.msk [vmem:[#allocation3 + $0x118] sm:$0x3] %vm7278_vm4, %v27083_v15 }
 0x443   :  { %7315 = vst.msk [vmem:[#allocation3 + $0x130] sm:$0x3] %vm7278_vm4, %v27083_v15  ;;  %7318 = vst.msk [vmem:[#allocation3 + $0x148] sm:$0x3] %vm7278_vm4, %v27083_v15 }
 0x444   :  { %17666 = vmatmul.mubr.msk.f32.gmra.mrb[4].mxu0 %vm32_vm1, %v5829_v40  ;;  %7321 = vst.msk [vmem:[#allocation3 + $0x160] sm:$0x3] %vm7278_vm4, %v27083_v15  ;;  %7324 = vst.msk [vmem:[#allocation3 + $0x178] sm:$0x3] %vm7278_vm4, %v27083_v15 }
 0x445   :  { %17668 = vmatprep.mubr.msk.f32.mxu0 %vm32_vm1, %v5830_v41  ;;  %7327 = vst.msk [vmem:[#allocation3 + $0x190] sm:$0x3] %vm7278_vm4, %v27083_v15  ;;  %7330 = vst.msk [vmem:[#allocation3 + $0x1a8] sm:$0x3] %vm7278_vm4, %v27083_v15 }
 0x446   :  { %7333 = vst.msk [vmem:[#allocation3 + $0x1c0] sm:$0x3] %vm7278_vm4, %v27083_v15  ;;  %7336 = vst.msk [vmem:[#allocation3 + $0x1d8] sm:$0x3] %vm7278_vm4, %v27083_v15 }
 0x447   :  { %7339 = vst.msk [vmem:[#allocation3 + $0x1f0] sm:$0x3] %vm7278_vm4, %v27083_v15  ;;  %7342 = vst.msk [vmem:[#allocation3 + $0x208] sm:$0x3] %vm7278_vm4, %v27083_v15 }
 0x448   :  { %17669 = vmatmul.mubr.msk.f32.gmra.mrb[6].mxu0 %vm32_vm1, %v5831_v42  ;;  %7345 = vst.msk [vmem:[#allocation3 + $0x220] sm:$0x3] %vm7278_vm4, %v27083_v15  ;;  %7348 = vst.msk [vmem:[#allocation3 + $0x238] sm:$0x3] %vm7278_vm4, %v27083_v15 }
 0x449   :  { %17671 = vmatprep.mubr.msk.f32.mxu0 %vm32_vm1, %v5832_v43  ;;  %7351 = vst.msk [vmem:[#allocation3 + $0x250] sm:$0x3] %vm7278_vm4, %v27083_v15  ;;  %7354 = vst.msk [vmem:[#allocation3 + $0x268] sm:$0x3] %vm7278_vm4, %v27083_v15 }
 0x44a   :  { %7357 = vst.msk [vmem:[#allocation3 + $0x280] sm:$0x3] %vm7278_vm4, %v27083_v15  ;;  %7360 = vst.msk [vmem:[#allocation3 + $0x298] sm:$0x3] %vm7278_vm4, %v27083_v15 }
 0x44b   :  { %7363 = vst.msk [vmem:[#allocation3 + $0x2b0] sm:$0x3] %vm7278_vm4, %v27083_v15  ;;  %7366 = vst.msk [vmem:[#allocation3 + $0x2c8] sm:$0x3] %vm7278_vm4, %v27083_v15 }
 0x44c   :  { %17672 = vmatmul.mubr.msk.f32.gmra.mrb[8].mxu0 %vm32_vm1, %v5833_v44  ;;  %7369 = vst.msk [vmem:[#allocation3 + $0x2e0] sm:$0x3] %vm7278_vm4, %v27083_v15  ;;  %7372 = vst.msk [vmem:[#allocation3 + $0x2f8] sm:$0x3] %vm7278_vm4, %v27083_v15 }
 0x44d   :  { %17674 = vmatprep.mubr.msk.f32.mxu0 %vm32_vm1, %v5834_v45  ;;  %7375 = vst.msk [vmem:[#allocation3 + $0x310] sm:$0x3] %vm7278_vm4, %v27083_v15  ;;  %7378 = vst.msk [vmem:[#allocation3 + $0x328] sm:$0x3] %vm7278_vm4, %v27083_v15 }
 0x44e   :  { %7381 = vst.msk [vmem:[#allocation3 + $0x340] sm:$0x3] %vm7278_vm4, %v27083_v15  ;;  %7384 = vst.msk [vmem:[#allocation3 + $0x358] sm:$0x3] %vm7278_vm4, %v27083_v15 }
 0x450   :  { %17675 = vmatmul.mubr.msk.f32.gmra.mrb[10].mxu0 %vm32_vm1, %v5835_v46 }
 0x451   :  { %17677 = vmatprep.mubr.msk.f32.mxu0 %vm32_vm1, %v5836_v47 }
 0x454   :  { %17678 = vmatmul.mubr.msk.f32.gmra.mrb[12].mxu0 %vm32_vm1, %v5837_v50 }
 0x455   :  { %17680 = vmatprep.mubr.msk.f32.mxu0 %vm32_vm1, %v5838_v51 }
 0x458   :  { %17681 = vmatmul.mubr.msk.f32.gmra.mrb[14].mxu0 %vm32_vm1, %v5839_v52 }
 0x459   :  { %17683 = vmatprep.mubr.msk.f32.mxu0 %vm32_vm1, %v5840_v53 }
 0x45c   :  { %17684 = vmatmul.mubr.msk.f32.gmra.mrb[16].mxu0 %vm32_vm1, %v5841_v54 }
 0x45d   :  { %17686 = vmatprep.mubr.msk.f32.mxu0 %vm32_vm1, %v5842_v55 }
 0x460   :  { %17687 = vmatmul.mubr.msk.f32.gmra.mrb[18].mxu0 %vm32_vm1, %v5843_v56 }
 0x461   :  { %17689 = vmatprep.mubr.msk.f32.mxu0 %vm32_vm1, %v5844_v57 }
 0x464   :  { %17690 = vmatmul.mubr.msk.f32.gmra.mrb[20].mxu0 %vm32_vm1, %v5845_v58 }
 0x465   :  { %17692 = vmatprep.mubr.msk.f32.mxu0 %vm32_vm1, %v5846_v59 }
 0x468   :  { %17693 = vmatmul.mubr.msk.f32.gmra.mrb[22].mxu0 %vm32_vm1, %v5847_v60 }
 0x469   :  { %17695 = vmatprep.mubr.msk.f32.mxu0 %vm32_vm1, %v5848_v61 }
 0x46c   :  { %17696 = vmatmul.mubr.msk.f32.gmra.mrb[24].mxu0 %vm32_vm1, %v5849_v62 }
 0x46d   :  { %17698 = vmatprep.mubr.msk.f32.mxu0 %vm32_vm1, %v5850_v63 }
 0x470   :  { %17699 = vmatmul.mubr.msk.f32.gmra.mrb[26].mxu0 %vm32_vm1, %v5851_v36 }
 0x471   :  { %17701 = vmatprep.mubr.msk.f32.mxu0 %vm32_vm1, %v21303_v11  ;;  %v5860_v11 = vld [vmem:[#allocation2 + $0x212] sm:$0xff] }
 0x474   :  { %17702 = vmatmul.mubr.msk.f32.gmra.mrb[28].mxu0 %vm32_vm1, %v27082_v4 }
 0x475   :  { %17704 = vmatprep.mubr.msk.f32.mxu0 %vm32_vm1, %v5854_v3 }
 0x478   :  { %17705 = vmatmul.mubr.msk.f32.gmra.mrb[30].mxu0 %vm32_vm1, %v5855_v6 }
 0x479   :  { %17707 = vmatprep.mubr.msk.f32.mxu0 %vm32_vm1, %v5856_v2 }
 0x47c   :  { %17708 = vmatmul.mubr.msk.f32.gmra.mrb[32].mxu0 %vm32_vm1, %v5857_v35 }
 0x47d   :  { %17710 = vmatprep.mubr.msk.f32.mxu0 %vm32_vm1, %v5858_v0 }
 0x480   :  { %17711 = vmatmul.mubr.msk.f32.gmra.mrb[34].mxu0 %vm32_vm1, %v5859_v48 }
 0x481   :  { %17713 = vmatprep.mubr.msk.f32.mxu0 %vm32_vm1, %v5860_v11 }
 0x484   :  { %17714 = vmatmul.mubr.msk.f32.gmra.mrb[36].mxu0 %vm32_vm1, %v5861_v7 }
 0x485   :  { %17716 = vmatprep.mubr.msk.f32.mxu0 %vm32_vm1, %v5862_v9 }
 0x488   :  { %17717 = vmatmul.mubr.msk.f32.gmra.mrb[38].mxu0 %vm32_vm1, %v5863_v49 }
 0x489   :  { %17719 = vmatprep.mubr.msk.f32.mxu0 %vm32_vm1, %v5864_v8 }
 0x48c   :  { %17720 = vmatmul.mubr.msk.f32.gmra.mrb[40].mxu0 %vm32_vm1, %v5865_v13 }
 0x48d   :  { %17722 = vmatprep.mubr.msk.f32.mxu0 %vm32_vm1, %v5866_v14 }
 0x490   :  { %17723 = vmatmul.mubr.msk.f32.gmra.mrb[42].mxu0 %vm32_vm1, %v5867_v5 }
 0x491   :  { %17725 = vmatprep.mubr.msk.f32.mxu0 %vm32_vm1, %v5868_v10 }
 0x494   :  { %17726 = vmatmul.mubr.msk.f32.gmra.mrb[44].mxu0 %vm32_vm1, %v21631_v12 }
 0x495   :  { %17728 = vmatprep.mubr.msk.f32.mxu0 %vm32_vm1, %v5870_v17 }
 0x498   :  { %17729 = vmatmul.mubr.msk.f32.gmra.mrb[46].mxu0 %vm32_vm1, %v5871_v18 }
 0x499   :  { %17731 = vmatprep.mubr.msk.f32.mxu0 %vm32_vm1, %v5872_v19 }
 0x49c   :  { %17732 = vmatmul.mubr.msk.f32.gmra.mrb[48].mxu0 %vm32_vm1, %v5873_v20 }
 0x49d   :  { %17734 = vmatprep.mubr.msk.f32.mxu0 %vm32_vm1, %v5874_v21 }
 0x4a0   :  { %17735 = vmatmul.mubr.msk.f32.gmra.mrb[50].mxu0 %vm32_vm1, %v5875_v22 }
 0x4a1   :  { %17737 = vmatprep.mubr.msk.f32.mxu0 %vm32_vm1, %v5876_v23 }
 0x4a4   :  { %17738 = vmatmul.mubr.msk.f32.gmra.mrb[52].mxu0 %vm32_vm1, %v5877_v24 }
 0x4a5   :  { %17740 = vmatprep.mubr.msk.f32.mxu0 %vm32_vm1, %v5878_v25 }
 0x4a8   :  { %17741 = vmatmul.mubr.msk.f32.gmra.mrb[54].mxu0 %vm32_vm1, %v5879_v26 }
 0x4a9   :  { %17743 = vmatprep.mubr.msk.f32.mxu0 %vm32_vm1, %v5880_v27 }
 0x4ac   :  { %17744 = vmatmul.mubr.msk.f32.gmra.mrb[56].mxu0 %vm32_vm1, %v5881_v28 }
 0x4ad   :  { %17746 = vmatprep.mubr.msk.f32.mxu0 %vm32_vm1, %v5882_v29 }
 0x4b0   :  { %17747 = vmatmul.mubr.msk.f32.gmra.mrb[58].mxu0 %vm32_vm1, %v5883_v30 }
 0x4b1   :  { %17749 = vmatprep.mubr.msk.f32.mxu0 %vm32_vm1, %v21371_v16 }
 0x4b4   :  { %17750 = vmatmul.mubr.msk.f32.gmra.mrb[60].mxu0 %vm32_vm1, %v21377_v1 }
 0x4b5   :  { %17752 = vmatprep.mubr.msk.f32.mxu0 %vm32_vm1, %v5886_v31 }
 0x4b8   :  { %17753 = vmatmul.mubr.msk.f32.gmra.mrb[62].mxu0 %vm32_vm1, %v5887_v32 }
 0x50f   :  { %v17661_v34 = vpop.f32.mrb[0].mxu0 }
 0x510   :  { %v21877_v37 = vadd.f32 %v17661_v34, %v21874_v33  ;;  %v6151_v38 = vpop.f32.mrb[1].mxu0 }
 0x511   :  { %v21880_v16 = vadd.f32 %v21874_v33, %v6151_v38 }
 0x512   :  { %v6740_v1 = vmul.f32 %v21877_v37, %v21877_v37  ;;  %v6607_v39 = vsel %vm6605_vm3, %v21877_v37, 0.0 }
 0x513   :  { %v6606_v40 = vsel %vm6605_vm3, %v21880_v16, 0.0  ;;  %v6739_v41 = vmul.f32 %v21880_v16, %v21880_v16  ;;  %v17664_v42 = vpop.f32.mrb[2].mxu0 }
 0x514   :  { %v21891_v43 = vadd.f32 %v17664_v42, %v21874_v33  ;;  %v6161_v44 = vpop.f32.mrb[3].mxu0  ;;  %v6804_v45 = vsel %vm6605_vm3, %v6740_v1, 0.0  ;;  %v6608_v50 = vadd.f32 %v6607_v39, %v6606_v40 }
 0x515   :  { %v6803_v46 = vsel %vm6605_vm3, %v6739_v41, 0.0  ;;  %v21896_v47 = vadd.f32 %v21874_v33, %v6161_v44 }
 0x516   :  { %v6742_v51 = vmul.f32 %v21891_v43, %v21891_v43  ;;  %v6805_v55 = vadd.f32 %v6804_v45, %v6803_v46  ;;  %v6611_v59 = vsel %vm6605_vm3, %v21891_v43, 0.0 }
 0x517   :  { %v6609_v52 = vsel %vm6605_vm3, %v21896_v47, 0.0  ;;  %v6741_v53 = vmul.f32 %v21896_v47, %v21896_v47  ;;  %v17667_v54 = vpop.f32.mrb[4].mxu0 }
 0x518   :  { %v6610_v56 = vadd.f32 %v6609_v52, %v6608_v50  ;;  %v21905_v57 = vadd.f32 %v17667_v54, %v21874_v33  ;;  %v6171_v58 = vpop.f32.mrb[5].mxu0  ;;  %v6808_v36 = vsel %vm6605_vm3, %v6742_v51, 0.0 }
 0x519   :  { %v6806_v60 = vsel %vm6605_vm3, %v6741_v53, 0.0  ;;  %v21911_v61 = vadd.f32 %v21874_v33, %v6171_v58 }
 0x51a   :  { %v6612_v62 = vadd.f32 %v6611_v59, %v6610_v56  ;;  %v6807_v63 = vadd.f32 %v6806_v60, %v6805_v55  ;;  %v6744_v3 = vmul.f32 %v21905_v57, %v21905_v57  ;;  %v6615_v7 = vsel %vm6605_vm3, %v21905_v57, 0.0 }
 0x51b   :  { %v6613_v4 = vsel %vm6605_vm3, %v21911_v61, 0.0  ;;  %v6743_v6 = vmul.f32 %v21911_v61, %v21911_v61  ;;  %v17670_v2 = vpop.f32.mrb[6].mxu0 }
 0x51c   :  { %v6809_v35 = vadd.f32 %v6808_v36, %v6807_v63  ;;  %v6614_v0 = vadd.f32 %v6613_v4, %v6612_v62  ;;  %v21921_v48 = vadd.f32 %v17670_v2, %v21874_v33  ;;  %v6181_v11 = vpop.f32.mrb[7].mxu0  ;;  %v6812_v14 = vsel %vm6605_vm3, %v6744_v3, 0.0 }
 0x51d   :  { %v6810_v9 = vsel %vm6605_vm3, %v6743_v6, 0.0  ;;  %v21927_v49 = vadd.f32 %v21874_v33, %v6181_v11 }
 0x51e   :  { %v6811_v8 = vadd.f32 %v6810_v9, %v6809_v35  ;;  %v6616_v13 = vadd.f32 %v6615_v7, %v6614_v0  ;;  %v6746_v5 = vmul.f32 %v21921_v48, %v21921_v48  ;;  %v6619_v21 = vsel %vm6605_vm3, %v21921_v48, 0.0 }
 0x51f   :  { %v6617_v10 = vsel %vm6605_vm3, %v21927_v49, 0.0  ;;  %v6745_v12 = vmul.f32 %v21927_v49, %v21927_v49  ;;  %v17673_v15 = vpop.f32.mrb[8].mxu0 }
 0x520   :  { %v6618_v17 = vadd.f32 %v6617_v10, %v6616_v13  ;;  %v6813_v18 = vadd.f32 %v6812_v14, %v6811_v8  ;;  %v21937_v19 = vadd.f32 %v17673_v15, %v21874_v33  ;;  %v6191_v20 = vpop.f32.mrb[9].mxu0  ;;  %v6816_v26 = vsel %vm6605_vm3, %v6746_v5, 0.0 }
 0x521   :  { %v6814_v22 = vsel %vm6605_vm3, %v6745_v12, 0.0  ;;  %v21943_v23 = vadd.f32 %v21874_v33, %v6191_v20 }
 0x522   :  { %v6815_v24 = vadd.f32 %v6814_v22, %v6813_v18  ;;  %v6620_v25 = vadd.f32 %v6619_v21, %v6618_v17  ;;  %v6748_v27 = vmul.f32 %v21937_v19, %v21937_v19  ;;  %v6623_v1 = vsel %vm6605_vm3, %v21937_v19, 0.0 }
 0x523   :  { %v6621_v28 = vsel %vm6605_vm3, %v21943_v23, 0.0  ;;  %v6747_v29 = vmul.f32 %v21943_v23, %v21943_v23  ;;  %v17676_v30 = vpop.f32.mrb[10].mxu0 }
 0x524   :  { %v6622_v31 = vadd.f32 %v6621_v28, %v6620_v25  ;;  %v6817_v32 = vadd.f32 %v6816_v26, %v6815_v24  ;;  %v21953_v34 = vadd.f32 %v17676_v30, %v21874_v33  ;;  %v6201_v38 = vpop.f32.mrb[11].mxu0  ;;  %v6820_v44 = vsel %vm6605_vm3, %v6748_v27, 0.0 }
 0x525   :  { %v6818_v39 = vsel %vm6605_vm3, %v6747_v29, 0.0  ;;  %v21959_v40 = vadd.f32 %v21874_v33, %v6201_v38 }
 0x526   :  { %v6819_v41 = vadd.f32 %v6818_v39, %v6817_v32  ;;  %v6624_v42 = vadd.f32 %v6623_v1, %v6622_v31  ;;  %v6750_v45 = vmul.f32 %v21953_v34, %v21953_v34  ;;  %v6627_v56 = vsel %vm6605_vm3, %v21953_v34, 0.0 }
 0x527   :  { %v6625_v46 = vsel %vm6605_vm3, %v21959_v40, 0.0  ;;  %v6749_v50 = vmul.f32 %v21959_v40, %v21959_v40  ;;  %v17679_v51 = vpop.f32.mrb[12].mxu0 }
 0x528   :  { %v6626_v52 = vadd.f32 %v6625_v46, %v6624_v42  ;;  %v6821_v53 = vadd.f32 %v6820_v44, %v6819_v41  ;;  %v21969_v54 = vadd.f32 %v17679_v51, %v21874_v33  ;;  %v6211_v55 = vpop.f32.mrb[13].mxu0  ;;  %v6824_v63 = vsel %vm6605_vm3, %v6750_v45, 0.0 }
 0x529   :  { %v6822_v58 = vsel %vm6605_vm3, %v6749_v50, 0.0  ;;  %v21975_v59 = vadd.f32 %v21874_v33, %v6211_v55 }
 0x52a   :  { %v6823_v60 = vadd.f32 %v6822_v58, %v6821_v53  ;;  %v6628_v62 = vadd.f32 %v6627_v56, %v6626_v52  ;;  %v6752_v36 = vmul.f32 %v21969_v54, %v21969_v54  ;;  %v6631_v7 = vsel %vm6605_vm3, %v21969_v54, 0.0 }
 0x52b   :  { %v6629_v3 = vsel %vm6605_vm3, %v21975_v59, 0.0  ;;  %v6751_v4 = vmul.f32 %v21975_v59, %v21975_v59  ;;  %v17682_v6 = vpop.f32.mrb[14].mxu0 }
 0x52c   :  { %v6630_v2 = vadd.f32 %v6629_v3, %v6628_v62  ;;  %v6825_v35 = vadd.f32 %v6824_v63, %v6823_v60  ;;  %v21985_v0 = vadd.f32 %v17682_v6, %v21874_v33  ;;  %v6221_v11 = vpop.f32.mrb[15].mxu0  ;;  %v6828_v5 = vsel %vm6605_vm3, %v6752_v36, 0.0 }
 0x52d   :  { %v6826_v9 = vsel %vm6605_vm3, %v6751_v4, 0.0  ;;  %v21991_v8 = vadd.f32 %v21874_v33, %v6221_v11 }
 0x52e   :  { %v6827_v13 = vadd.f32 %v6826_v9, %v6825_v35  ;;  %v6632_v14 = vadd.f32 %v6631_v7, %v6630_v2  ;;  %v6754_v10 = vmul.f32 %v21985_v0, %v21985_v0  ;;  %v6635_v24 = vsel %vm6605_vm3, %v21985_v0, 0.0 }
 0x52f   :  { %v6633_v12 = vsel %vm6605_vm3, %v21991_v8, 0.0  ;;  %v6753_v15 = vmul.f32 %v21991_v8, %v21991_v8  ;;  %v17685_v17 = vpop.f32.mrb[16].mxu0 }
 0x530   :  { %v6634_v18 = vadd.f32 %v6633_v12, %v6632_v14  ;;  %v6829_v20 = vadd.f32 %v6828_v5, %v6827_v13  ;;  %v22001_v21 = vadd.f32 %v17685_v17, %v21874_v33  ;;  %v6231_v22 = vpop.f32.mrb[17].mxu0  ;;  %v6832_v29 = vsel %vm6605_vm3, %v6754_v10, 0.0 }
 0x531   :  { %v6830_v25 = vsel %vm6605_vm3, %v6753_v15, 0.0  ;;  %v22007_v26 = vadd.f32 %v21874_v33, %v6231_v22 }
 0x532   :  { %v6831_v27 = vadd.f32 %v6830_v25, %v6829_v20  ;;  %v6636_v28 = vadd.f32 %v6635_v24, %v6634_v18  ;;  %v6756_v30 = vmul.f32 %v22001_v21, %v22001_v21  ;;  %v6639_v44 = vsel %vm6605_vm3, %v22001_v21, 0.0 }
 0x533   :  { %v6637_v31 = vsel %vm6605_vm3, %v22007_v26, 0.0  ;;  %v6755_v32 = vmul.f32 %v22007_v26, %v22007_v26  ;;  %v17688_v38 = vpop.f32.mrb[18].mxu0 }
 0x534   :  { %v6638_v1 = vadd.f32 %v6637_v31, %v6636_v28  ;;  %v6833_v39 = vadd.f32 %v6832_v29, %v6831_v27  ;;  %v22017_v41 = vadd.f32 %v17688_v38, %v21874_v33  ;;  %v6241_v42 = vpop.f32.mrb[19].mxu0  ;;  %v6836_v52 = vsel %vm6605_vm3, %v6756_v30, 0.0 }
 0x535   :  { %v6834_v45 = vsel %vm6605_vm3, %v6755_v32, 0.0  ;;  %v22023_v46 = vadd.f32 %v21874_v33, %v6241_v42 }
 0x536   :  { %v6835_v50 = vadd.f32 %v6834_v45, %v6833_v39  ;;  %v6640_v51 = vadd.f32 %v6639_v44, %v6638_v1  ;;  %v6758_v53 = vmul.f32 %v22017_v41, %v22017_v41  ;;  %v6643_v3 = vsel %vm6605_vm3, %v22017_v41, 0.0 }
 0x537   :  { %v6641_v55 = vsel %vm6605_vm3, %v22023_v46, 0.0  ;;  %v6757_v56 = vmul.f32 %v22023_v46, %v22023_v46  ;;  %v17691_v58 = vpop.f32.mrb[20].mxu0 }
 0x538   :  { %v6642_v60 = vadd.f32 %v6641_v55, %v6640_v51  ;;  %v6837_v62 = vadd.f32 %v6836_v52, %v6835_v50  ;;  %v22033_v63 = vadd.f32 %v17691_v58, %v21874_v33  ;;  %v6251_v36 = vpop.f32.mrb[21].mxu0  ;;  %v6840_v11 = vsel %vm6605_vm3, %v6758_v53, 0.0 }
 0x539   :  { %v6838_v4 = vsel %vm6605_vm3, %v6757_v56, 0.0  ;;  %v22039_v6 = vadd.f32 %v21874_v33, %v6251_v36 }
 0x53a   :  { %v6839_v2 = vadd.f32 %v6838_v4, %v6837_v62  ;;  %v6644_v35 = vadd.f32 %v6643_v3, %v6642_v60  ;;  %v6760_v7 = vmul.f32 %v22033_v63, %v22033_v63  ;;  %v6647_v17 = vsel %vm6605_vm3, %v22033_v63, 0.0 }
 0x53b   :  { %v6645_v9 = vsel %vm6605_vm3, %v22039_v6, 0.0  ;;  %v6759_v13 = vmul.f32 %v22039_v6, %v22039_v6  ;;  %v17694_v14 = vpop.f32.mrb[22].mxu0 }
 0x53c   :  { %v6646_v5 = vadd.f32 %v6645_v9, %v6644_v35  ;;  %v6841_v10 = vadd.f32 %v6840_v11, %v6839_v2  ;;  %v22049_v12 = vadd.f32 %v17694_v14, %v21874_v33  ;;  %v6261_v15 = vpop.f32.mrb[23].mxu0  ;;  %v6844_v25 = vsel %vm6605_vm3, %v6760_v7, 0.0 }
 0x53d   :  { %v6842_v18 = vsel %vm6605_vm3, %v6759_v13, 0.0  ;;  %v22055_v20 = vadd.f32 %v21874_v33, %v6261_v15 }
 0x53e   :  { %v6843_v22 = vadd.f32 %v6842_v18, %v6841_v10  ;;  %v6648_v24 = vadd.f32 %v6647_v17, %v6646_v5  ;;  %v6762_v27 = vmul.f32 %v22049_v12, %v22049_v12  ;;  %v6651_v39 = vsel %vm6605_vm3, %v22049_v12, 0.0 }
 0x53f   :  { %v6649_v28 = vsel %vm6605_vm3, %v22055_v20, 0.0  ;;  %v6761_v29 = vmul.f32 %v22055_v20, %v22055_v20  ;;  %v17697_v30 = vpop.f32.mrb[24].mxu0 }
 0x540   :  { %v6650_v31 = vadd.f32 %v6649_v28, %v6648_v24  ;;  %v6845_v32 = vadd.f32 %v6844_v25, %v6843_v22  ;;  %v22065_v38 = vadd.f32 %v17697_v30, %v21874_v33  ;;  %v6271_v1 = vpop.f32.mrb[25].mxu0  ;;  %v6848_v51 = vsel %vm6605_vm3, %v6762_v27, 0.0 }
 0x541   :  { %v6846_v42 = vsel %vm6605_vm3, %v6761_v29, 0.0  ;;  %v22071_v44 = vadd.f32 %v21874_v33, %v6271_v1 }
 0x542   :  { %v6847_v45 = vadd.f32 %v6846_v42, %v6845_v32  ;;  %v6652_v50 = vadd.f32 %v6651_v39, %v6650_v31  ;;  %v6764_v52 = vmul.f32 %v22065_v38, %v22065_v38  ;;  %v6655_v3 = vsel %vm6605_vm3, %v22065_v38, 0.0 }
 0x543   :  { %v6653_v53 = vsel %vm6605_vm3, %v22071_v44, 0.0  ;;  %v6763_v55 = vmul.f32 %v22071_v44, %v22071_v44  ;;  %v17700_v56 = vpop.f32.mrb[26].mxu0 }
 0x544   :  { %v6654_v58 = vadd.f32 %v6653_v53, %v6652_v50  ;;  %v6849_v60 = vadd.f32 %v6848_v51, %v6847_v45  ;;  %v22081_v62 = vadd.f32 %v17700_v56, %v21874_v33  ;;  %v6281_v36 = vpop.f32.mrb[27].mxu0  ;;  %v6852_v7 = vsel %vm6605_vm3, %v6764_v52, 0.0 }
 0x545   :  { %v6850_v4 = vsel %vm6605_vm3, %v6763_v55, 0.0  ;;  %v22087_v2 = vadd.f32 %v21874_v33, %v6281_v36 }
 0x546   :  { %v6851_v35 = vadd.f32 %v6850_v4, %v6849_v60  ;;  %v6656_v11 = vadd.f32 %v6655_v3, %v6654_v58  ;;  %v6766_v9 = vmul.f32 %v22081_v62, %v22081_v62  ;;  %v6659_v22 = vsel %vm6605_vm3, %v22081_v62, 0.0 }
 0x547   :  { %v6657_v13 = vsel %vm6605_vm3, %v22087_v2, 0.0  ;;  %v6765_v14 = vmul.f32 %v22087_v2, %v22087_v2  ;;  %v17703_v5 = vpop.f32.mrb[28].mxu0 }
 0x548   :  { %v6658_v10 = vadd.f32 %v6657_v13, %v6656_v11  ;;  %v6853_v15 = vadd.f32 %v6852_v7, %v6851_v35  ;;  %v22097_v17 = vadd.f32 %v17703_v5, %v21874_v33  ;;  %v6291_v18 = vpop.f32.mrb[29].mxu0  ;;  %v6856_v29 = vsel %vm6605_vm3, %v6766_v9, 0.0 }
 0x549   :  { %v6854_v24 = vsel %vm6605_vm3, %v6765_v14, 0.0  ;;  %v22103_v25 = vadd.f32 %v21874_v33, %v6291_v18 }
 0x54a   :  { %v6855_v27 = vadd.f32 %v6854_v24, %v6853_v15  ;;  %v6660_v28 = vadd.f32 %v6659_v22, %v6658_v10  ;;  %v6768_v30 = vmul.f32 %v22097_v17, %v22097_v17  ;;  %v6663_v51 = vsel %vm6605_vm3, %v22097_v17, 0.0 }
 0x54b   :  { %v6661_v31 = vsel %vm6605_vm3, %v22103_v25, 0.0  ;;  %v6767_v32 = vmul.f32 %v22103_v25, %v22103_v25  ;;  %v17706_v1 = vpop.f32.mrb[30].mxu0 }
 0x54c   :  { %v6662_v39 = vadd.f32 %v6661_v31, %v6660_v28  ;;  %v6857_v42 = vadd.f32 %v6856_v29, %v6855_v27  ;;  %v22113_v45 = vadd.f32 %v17706_v1, %v21874_v33  ;;  %v6301_v50 = vpop.f32.mrb[31].mxu0  ;;  %v6860_v58 = vsel %vm6605_vm3, %v6768_v30, 0.0 }
 0x54d   :  { %v6858_v52 = vsel %vm6605_vm3, %v6767_v32, 0.0  ;;  %v22119_v53 = vadd.f32 %v21874_v33, %v6301_v50 }
 0x54e   :  { %v6859_v55 = vadd.f32 %v6858_v52, %v6857_v42  ;;  %v6664_v56 = vadd.f32 %v6663_v51, %v6662_v39  ;;  %v6770_v60 = vmul.f32 %v22113_v45, %v22113_v45  ;;  %v6667_v13 = vsel %vm6605_vm3, %v22113_v45, 0.0 }
 0x54f   :  { %v6665_v36 = vsel %vm6605_vm3, %v22119_v53, 0.0  ;;  %v6769_v3 = vmul.f32 %v22119_v53, %v22119_v53  ;;  %v17709_v4 = vpop.f32.mrb[32].mxu0 }
 0x550   :  { %v6666_v35 = vadd.f32 %v6665_v36, %v6664_v56  ;;  %v6861_v11 = vadd.f32 %v6860_v58, %v6859_v55  ;;  %v22129_v7 = vadd.f32 %v17709_v4, %v21874_v33  ;;  %v6311_v9 = vpop.f32.mrb[33].mxu0  ;;  %v6864_v18 = vsel %vm6605_vm3, %v6770_v60, 0.0 }
 0x551   :  { %v6862_v14 = vsel %vm6605_vm3, %v6769_v3, 0.0  ;;  %v22135_v5 = vadd.f32 %v21874_v33, %v6311_v9 }
 0x552   :  { %v6863_v10 = vadd.f32 %v6862_v14, %v6861_v11  ;;  %v6668_v15 = vadd.f32 %v6667_v13, %v6666_v35  ;;  %v6772_v22 = vmul.f32 %v22129_v7, %v22129_v7  ;;  %v6671_v1 = vsel %vm6605_vm3, %v22129_v7, 0.0 }
 0x553   :  { %v6669_v24 = vsel %vm6605_vm3, %v22135_v5, 0.0  ;;  %v6771_v27 = vmul.f32 %v22135_v5, %v22135_v5  ;;  %v17712_v28 = vpop.f32.mrb[34].mxu0 }
 0x554   :  { %v6670_v29 = vadd.f32 %v6669_v24, %v6668_v15  ;;  %v6865_v30 = vadd.f32 %v6864_v18, %v6863_v10  ;;  %v22145_v31 = vadd.f32 %v17712_v28, %v21874_v33  ;;  %v6321_v32 = vpop.f32.mrb[35].mxu0  ;;  %v6868_v52 = vsel %vm6605_vm3, %v6772_v22, 0.0 }
 0x555   :  { %v6866_v39 = vsel %vm6605_vm3, %v6771_v27, 0.0  ;;  %v22151_v42 = vadd.f32 %v21874_v33, %v6321_v32 }
 0x556   :  { %v6867_v50 = vadd.f32 %v6866_v39, %v6865_v30  ;;  %v6672_v51 = vadd.f32 %v6671_v1, %v6670_v29  ;;  %v6774_v55 = vmul.f32 %v22145_v31, %v22145_v31  ;;  %v6675_v11 = vsel %vm6605_vm3, %v22145_v31, 0.0 }
 0x557   :  { %v6673_v56 = vsel %vm6605_vm3, %v22151_v42, 0.0  ;;  %v6773_v58 = vmul.f32 %v22151_v42, %v22151_v42  ;;  %v17715_v60 = vpop.f32.mrb[36].mxu0 }
 0x558   :  { %v6674_v36 = vadd.f32 %v6673_v56, %v6672_v51  ;;  %v6869_v3 = vadd.f32 %v6868_v52, %v6867_v50  ;;  %v22161_v4 = vadd.f32 %v17715_v60, %v21874_v33  ;;  %v6331_v35 = vpop.f32.mrb[37].mxu0  ;;  %v6872_v15 = vsel %vm6605_vm3, %v6774_v55, 0.0 }
 0x559   :  { %v6870_v9 = vsel %vm6605_vm3, %v6773_v58, 0.0  ;;  %v22167_v13 = vadd.f32 %v21874_v33, %v6331_v35 }
 0x55a   :  { %v6871_v14 = vadd.f32 %v6870_v9, %v6869_v3  ;;  %v6676_v10 = vadd.f32 %v6675_v11, %v6674_v36  ;;  %v6776_v18 = vmul.f32 %v22161_v4, %v22161_v4  ;;  %v6679_v1 = vsel %vm6605_vm3, %v22161_v4, 0.0 }
 0x55b   :  { %v6677_v22 = vsel %vm6605_vm3, %v22167_v13, 0.0  ;;  %v6775_v24 = vmul.f32 %v22167_v13, %v22167_v13  ;;  %v17718_v27 = vpop.f32.mrb[38].mxu0 }
 0x55c   :  { %v6678_v28 = vadd.f32 %v6677_v22, %v6676_v10  ;;  %v6873_v29 = vadd.f32 %v6872_v15, %v6871_v14  ;;  %v22177_v30 = vadd.f32 %v17718_v27, %v21874_v33  ;;  %v6341_v32 = vpop.f32.mrb[39].mxu0  ;;  %v6876_v55 = vsel %vm6605_vm3, %v6776_v18, 0.0 }
 0x55d   :  { %v6874_v39 = vsel %vm6605_vm3, %v6775_v24, 0.0  ;;  %v22183_v50 = vadd.f32 %v21874_v33, %v6341_v32 }
 0x55e   :  { %v6875_v51 = vadd.f32 %v6874_v39, %v6873_v29  ;;  %v6680_v52 = vadd.f32 %v6679_v1, %v6678_v28  ;;  %v6778_v56 = vmul.f32 %v22177_v30, %v22177_v30  ;;  %v6683_v14 = vsel %vm6605_vm3, %v22177_v30, 0.0 }
 0x55f   :  { %v6681_v58 = vsel %vm6605_vm3, %v22183_v50, 0.0  ;;  %v6777_v60 = vmul.f32 %v22183_v50, %v22183_v50  ;;  %v17721_v36 = vpop.f32.mrb[40].mxu0 }
 0x560   :  { %v6682_v3 = vadd.f32 %v6681_v58, %v6680_v52  ;;  %v6877_v35 = vadd.f32 %v6876_v55, %v6875_v51  ;;  %v22193_v11 = vadd.f32 %v17721_v36, %v21874_v33  ;;  %v6351_v9 = vpop.f32.mrb[41].mxu0  ;;  %v6880_v24 = vsel %vm6605_vm3, %v6778_v56, 0.0 }
 0x561   :  { %v6878_v10 = vsel %vm6605_vm3, %v6777_v60, 0.0  ;;  %v22199_v15 = vadd.f32 %v21874_v33, %v6351_v9 }
 0x562   :  { %27084 = vst [vmem:[#allocation9_spill] sm:$0xff] %v22193_v11  ;;  %v6879_v18 = vadd.f32 %v6878_v10, %v6877_v35  ;;  %v6684_v22 = vadd.f32 %v6683_v14, %v6682_v3  ;;  %v6780_v27 = vmul.f32 %v22193_v11, %v22193_v11  ;;  %v6687_v55 = vsel %vm6605_vm3, %v22193_v11, 0.0 }
 0x563   :  { %27085 = vst [vmem:[#allocation10_spill] sm:$0xff] %v22199_v15  ;;  %v6685_v28 = vsel %vm6605_vm3, %v22199_v15, 0.0  ;;  %v6779_v29 = vmul.f32 %v22199_v15, %v22199_v15  ;;  %v17724_v32 = vpop.f32.mrb[42].mxu0 }
 0x564   :  { %v6686_v1 = vadd.f32 %v6685_v28, %v6684_v22  ;;  %v6881_v39 = vadd.f32 %v6880_v24, %v6879_v18  ;;  %v22209_v51 = vadd.f32 %v17724_v32, %v21874_v33  ;;  %v6361_v52 = vpop.f32.mrb[43].mxu0  ;;  %v6884_v3 = vsel %vm6605_vm3, %v6780_v27, 0.0 }
 0x565   :  { %v6882_v56 = vsel %vm6605_vm3, %v6779_v29, 0.0  ;;  %v22215_v58 = vadd.f32 %v21874_v33, %v6361_v52 }
 0x566   :  { %27086 = vst [vmem:[#allocation11_spill] sm:$0xff] %v22209_v51  ;;  %v6883_v60 = vadd.f32 %v6882_v56, %v6881_v39  ;;  %v6688_v36 = vadd.f32 %v6687_v55, %v6686_v1  ;;  %v6782_v35 = vmul.f32 %v22209_v51, %v22209_v51  ;;  %v6691_v29 = vsel %vm6605_vm3, %v22209_v51, 0.0  ;;  %v7514_v51 = vld [vmem:[%s26699_s5] sm:$0xff] }
 0x567   :  { %27087 = vst [vmem:[#allocation12_spill] sm:$0xff] %v22215_v58  ;;  %v6689_v9 = vsel %vm6605_vm3, %v22215_v58, 0.0  ;;  %v6781_v14 = vmul.f32 %v22215_v58, %v22215_v58  ;;  %v17727_v10 = vpop.f32.mrb[44].mxu0 }
 0x568   :  { %v6690_v18 = vadd.f32 %v6689_v9, %v6688_v36  ;;  %v6885_v22 = vadd.f32 %v6884_v3, %v6883_v60  ;;  %v22225_v24 = vadd.f32 %v17727_v10, %v21874_v33  ;;  %v6371_v28 = vpop.f32.mrb[45].mxu0  ;;  %v6888_v52 = vsel %vm6605_vm3, %v6782_v35, 0.0 }
 0x569   :  { %v6886_v27 = vsel %vm6605_vm3, %v6781_v14, 0.0  ;;  %v22231_v32 = vadd.f32 %v21874_v33, %v6371_v28 }
 0x56a   :  { %27088 = vst [vmem:[#allocation13_spill] sm:$0xff] %v22225_v24  ;;  %v6887_v1 = vadd.f32 %v6886_v27, %v6885_v22  ;;  %v6692_v39 = vadd.f32 %v6691_v29, %v6690_v18  ;;  %v6784_v55 = vmul.f32 %v22225_v24, %v22225_v24  ;;  %v6695_v18 = vsel %vm6605_vm3, %v22225_v24, 0.0 }
 0x56b   :  { %27089 = vst [vmem:[#allocation14_spill] sm:$0xff] %v22231_v32  ;;  %v6693_v56 = vsel %vm6605_vm3, %v22231_v32, 0.0  ;;  %v6783_v60 = vmul.f32 %v22231_v32, %v22231_v32  ;;  %v17730_v36 = vpop.f32.mrb[46].mxu0  ;;  %v7516_v32 = vld [vmem:[#allocation3 + $0x1] sm:$0xff] }
 0x56c   :  { %v6694_v3 = vadd.f32 %v6693_v56, %v6692_v39  ;;  %v6889_v9 = vadd.f32 %v6888_v52, %v6887_v1  ;;  %v22241_v14 = vadd.f32 %v17730_v36, %v21874_v33  ;;  %v6381_v10 = vpop.f32.mrb[47].mxu0  ;;  %v6892_v27 = vsel %vm6605_vm3, %v6784_v55, 0.0  ;;  %17759 = vmatprep.mubr.msk.f32.mxu1 %vm6605_vm3, %v7516_v32  ;;  %v7517_v32 = vld [vmem:[#allocation3 + $0x9] sm:$0xff] }
 0x56d   :  { %v6890_v35 = vsel %vm6605_vm3, %v6783_v60, 0.0  ;;  %v22247_v22 = vadd.f32 %v21874_v33, %v6381_v10 }
 0x56e   :  { %27090 = vst [vmem:[#allocation15_spill] sm:$0xff] %v22241_v14  ;;  %v6891_v28 = vadd.f32 %v6890_v35, %v6889_v9  ;;  %v6696_v29 = vadd.f32 %v6695_v18, %v6694_v3  ;;  %v6786_v39 = vmul.f32 %v22241_v14, %v22241_v14  ;;  %v6699_v3 = vsel %vm6605_vm3, %v22241_v14, 0.0 }
 0x56f   :  { %27091 = vst [vmem:[#allocation16_spill] sm:$0xff] %v22247_v22  ;;  %v6697_v1 = vsel %vm6605_vm3, %v22247_v22, 0.0  ;;  %v6785_v52 = vmul.f32 %v22247_v22, %v22247_v22  ;;  %v17733_v56 = vpop.f32.mrb[48].mxu0 }
 0x570   :  { %v6698_v36 = vadd.f32 %v6697_v1, %v6696_v29  ;;  %v6893_v24 = vadd.f32 %v6892_v27, %v6891_v28  ;;  %v22257_v60 = vadd.f32 %v17733_v56, %v21874_v33  ;;  %v6391_v10 = vpop.f32.mrb[49].mxu0  ;;  %v6896_v29 = vsel %vm6605_vm3, %v6786_v39, 0.0 }
 0x571   :  { %v6894_v55 = vsel %vm6605_vm3, %v6785_v52, 0.0  ;;  %v22263_v9 = vadd.f32 %v21874_v33, %v6391_v10  ;;  %v15099_v52 = vld [vmem:[%s26699_s5 + $0x10] sm:$0xff] }
 0x572   :  { %27092 = vst [vmem:[#allocation17_spill] sm:$0xff] %v22257_v60  ;;  %v6895_v18 = vadd.f32 %v6894_v55, %v6893_v24  ;;  %v6788_v35 = vmul.f32 %v22257_v60, %v22257_v60  ;;  %v6700_v22 = vadd.f32 %v6699_v3, %v6698_v36  ;;  %v15100_v24 = vld [vmem:[%s26699_s5 + $0x18] sm:$0xff]  ;;  %v6703_v3 = vsel %vm6605_vm3, %v22257_v60, 0.0 }
 0x573   :  { %27093 = vst [vmem:[#allocation18_spill] sm:$0xff] %v22263_v9  ;;  %v6701_v28 = vsel %vm6605_vm3, %v22263_v9, 0.0  ;;  %v6787_v27 = vmul.f32 %v22263_v9, %v22263_v9  ;;  %v17736_v1 = vpop.f32.mrb[50].mxu0  ;;  %v18655_v14 = vpack.c.bf16 %v15100_v24, %v15099_v52 }
 0x574   :  { %v6702_v56 = vadd.f32 %v6701_v28, %v6700_v22  ;;  %v6897_v10 = vadd.f32 %v6896_v29, %v6895_v18  ;;  %v22279_v36 = vadd.f32 %v17736_v1, %v21874_v33  ;;  %v6401_v39 = vpop.f32.mrb[51].mxu0  ;;  %v7515_v22 = vld [vmem:[%s26699_s5 + $0x8] sm:$0xff]  ;;  %v6900_v18 = vsel %vm6605_vm3, %v6788_v35, 0.0 }
 0x575   :  { %v6898_v55 = vsel %vm6605_vm3, %v6787_v27, 0.0  ;;  %v22285_v9 = vadd.f32 %v21874_v33, %v6401_v39  ;;  %18656 = vmatprep.subr.bf16.mxu1 %v18655_v14  ;;  %v18659_v39 = vpack.c.bf16 %v7515_v22, %v7514_v51 }
 0x576   :  { %27094 = vst [vmem:[#allocation19_spill] sm:$0xff] %v22279_v36  ;;  %v6899_v29 = vadd.f32 %v6898_v55, %v6897_v10  ;;  %v6704_v28 = vadd.f32 %v6703_v3, %v6702_v56  ;;  %v6790_v27 = vmul.f32 %v22279_v36, %v22279_v36  ;;  %18658 = vmatpush3.bf16.msra.mxu1 %v18655_v14  ;;  %v6707_v10 = vsel %vm6605_vm3, %v22279_v36, 0.0 }
 0x577   :  { %27095 = vst [vmem:[#allocation20_spill] sm:$0xff] %v22285_v9  ;;  %v6705_v1 = vsel %vm6605_vm3, %v22285_v9, 0.0  ;;  %v6789_v52 = vmul.f32 %v22285_v9, %v22285_v9  ;;  %v17739_v24 = vpop.f32.mrb[52].mxu0  ;;  %18660 = vmatprep.subr.bf16.mxu1 %v18659_v39 }
 0x578   :  { %v6706_v60 = vadd.f32 %v6705_v1, %v6704_v28  ;;  %v6901_v58 = vadd.f32 %v6900_v18, %v6899_v29  ;;  %v22302_v35 = vadd.f32 %v17739_v24, %v21874_v33  ;;  %v6411_v56 = vpop.f32.mrb[53].mxu0  ;;  %v6904_v51 = vsel %vm6605_vm3, %v6790_v27, 0.0 }
 0x579   :  { %v6902_v3 = vsel %vm6605_vm3, %v6789_v52, 0.0  ;;  %v22308_v55 = vadd.f32 %v21874_v33, %v6411_v56  ;;  %17760 = vmatmul.mubr.msk.f32.vlgmr.msra.gmra.mrb[0].mxu1 %vm6605_vm3, %v7517_v32 }
 0x57a   :  { %27096 = vst [vmem:[#allocation21_spill] sm:$0xff] %v22302_v35  ;;  %v6903_v9 = vadd.f32 %v6902_v3, %v6901_v58  ;;  %v6708_v11 = vadd.f32 %v6707_v10, %v6706_v60  ;;  %v6792_v22 = vmul.f32 %v22302_v35, %v22302_v35  ;;  %18662 = vmatpush3.bf16.msra.mxu1 %v18659_v39  ;;  %v6711_v60 = vsel %vm6605_vm3, %v22302_v35, 0.0 }
 0x57b   :  { %27097 = vst [vmem:[#allocation22_spill] sm:$0xff] %v22308_v55  ;;  %v6709_v14 = vsel %vm6605_vm3, %v22308_v55, 0.0  ;;  %v6791_v18 = vmul.f32 %v22308_v55, %v22308_v55  ;;  %v17742_v29 = vpop.f32.mrb[54].mxu0 }
 0x57c   :  { %v6710_v28 = vadd.f32 %v6709_v14, %v6708_v11  ;;  %v6905_v1 = vadd.f32 %v6904_v51, %v6903_v9  ;;  %v22319_v52 = vadd.f32 %v17742_v29, %v21874_v33  ;;  %v6421_v58 = vpop.f32.mrb[55].mxu0  ;;  %v6908_v3 = vsel %vm6605_vm3, %v6792_v22, 0.0 }
 0x57d   :  { %v6906_v27 = vsel %vm6605_vm3, %v6791_v18, 0.0  ;;  %v22325_v24 = vadd.f32 %v21874_v33, %v6421_v58 }
 0x57e   :  { %27098 = vst [vmem:[#allocation23_spill] sm:$0xff] %v22319_v52  ;;  %v6907_v56 = vadd.f32 %v6906_v27, %v6905_v1  ;;  %v6712_v10 = vadd.f32 %v6711_v60, %v6710_v28  ;;  %v6794_v11 = vmul.f32 %v22319_v52, %v22319_v52  ;;  %v6715_v28 = vsel %vm6605_vm3, %v22319_v52, 0.0 }
 0x57f   :  { %27099 = vst [vmem:[#allocation24_spill] sm:$0xff] %v22325_v24  ;;  %v6713_v9 = vsel %vm6605_vm3, %v22325_v24, 0.0  ;;  %v6793_v39 = vmul.f32 %v22325_v24, %v22325_v24  ;;  %v17745_v32 = vpop.f32.mrb[56].mxu0 }
 0x580   :  { %v6714_v51 = vadd.f32 %v6713_v9, %v6712_v10  ;;  %v6909_v14 = vadd.f32 %v6908_v3, %v6907_v56  ;;  %v22335_v18 = vadd.f32 %v17745_v32, %v21874_v33  ;;  %v6431_v29 = vpop.f32.mrb[57].mxu0  ;;  %v6912_v27 = vsel %vm6605_vm3, %v6794_v11, 0.0 }
 0x581   :  { %v6910_v22 = vsel %vm6605_vm3, %v6793_v39, 0.0  ;;  %v22341_v1 = vadd.f32 %v21874_v33, %v6431_v29 }
 0x582   :  { %27100 = vst [vmem:[#allocation25_spill] sm:$0xff] %v22335_v18  ;;  %v6911_v58 = vadd.f32 %v6910_v22, %v6909_v14  ;;  %v6716_v60 = vadd.f32 %v6715_v28, %v6714_v51  ;;  %v6796_v10 = vmul.f32 %v22335_v18, %v22335_v18  ;;  %v6719_v51 = vsel %vm6605_vm3, %v22335_v18, 0.0 }
 0x583   :  { %27101 = vst [vmem:[#allocation26_spill] sm:$0xff] %v22341_v1  ;;  %v6717_v56 = vsel %vm6605_vm3, %v22341_v1, 0.0  ;;  %v6795_v3 = vmul.f32 %v22341_v1, %v22341_v1  ;;  %v17748_v9 = vpop.f32.mrb[58].mxu0 }
 0x584   :  { %v6718_v32 = vadd.f32 %v6717_v56, %v6716_v60  ;;  %v6913_v52 = vadd.f32 %v6912_v27, %v6911_v58  ;;  %v22351_v39 = vadd.f32 %v17748_v9, %v21874_v33  ;;  %v6441_v29 = vpop.f32.mrb[59].mxu0  ;;  %v6916_v24 = vsel %vm6605_vm3, %v6796_v10, 0.0 }
 0x585   :  { %v6914_v11 = vsel %vm6605_vm3, %v6795_v3, 0.0  ;;  %v22357_v14 = vadd.f32 %v21874_v33, %v6441_v29 }
 0x586   :  { %27102 = vst [vmem:[#allocation27_spill] sm:$0xff] %v22351_v39  ;;  %v6915_v28 = vadd.f32 %v6914_v11, %v6913_v52  ;;  %v6720_v22 = vadd.f32 %v6719_v51, %v6718_v32  ;;  %v6798_v60 = vmul.f32 %v22351_v39, %v22351_v39  ;;  %v6723_v52 = vsel %vm6605_vm3, %v22351_v39, 0.0 }
 0x587   :  { %27103 = vst [vmem:[#allocation28_spill] sm:$0xff] %v22357_v14  ;;  %v6721_v58 = vsel %vm6605_vm3, %v22357_v14, 0.0  ;;  %v6797_v27 = vmul.f32 %v22357_v14, %v22357_v14  ;;  %v17751_v56 = vpop.f32.mrb[60].mxu0 }
 0x588   :  { %v6722_v9 = vadd.f32 %v6721_v58, %v6720_v22  ;;  %v6917_v18 = vadd.f32 %v6916_v24, %v6915_v28  ;;  %v22367_v3 = vadd.f32 %v17751_v56, %v21874_v33  ;;  %v6451_v29 = vpop.f32.mrb[61].mxu0  ;;  %v6920_v1 = vsel %vm6605_vm3, %v6798_v60, 0.0 }
 0x589   :  { %v6918_v10 = vsel %vm6605_vm3, %v6797_v27, 0.0  ;;  %v22373_v32 = vadd.f32 %v21874_v33, %v6451_v29 }
 0x58a   :  { %27104 = vst [vmem:[#allocation29_spill] sm:$0xff] %v22367_v3  ;;  %v6919_v51 = vadd.f32 %v6918_v10, %v6917_v18  ;;  %v6724_v11 = vadd.f32 %v6723_v52, %v6722_v9  ;;  %v6800_v22 = vmul.f32 %v22367_v3, %v22367_v3  ;;  %v6727_v18 = vsel %vm6605_vm3, %v22367_v3, 0.0 }
 0x58b   :  { %27105 = vst [vmem:[#allocation30_spill] sm:$0xff] %v22373_v32  ;;  %v6725_v24 = vsel %vm6605_vm3, %v22373_v32, 0.0  ;;  %v6799_v28 = vmul.f32 %v22373_v32, %v22373_v32  ;;  %v17754_v58 = vpop.f32.mrb[62].mxu0 }
 0x58c   :  { %v6726_v56 = vadd.f32 %v6725_v24, %v6724_v11  ;;  %v6921_v39 = vadd.f32 %v6920_v1, %v6919_v51  ;;  %v22383_v27 = vadd.f32 %v17754_v58, %v21874_v33  ;;  %v6461_v29 = vpop.f32.mrb[63].mxu0  ;;  %v6924_v14 = vsel %vm6605_vm3, %v6800_v22, 0.0 }
 0x58d   :  { %v6922_v60 = vsel %vm6605_vm3, %v6799_v28, 0.0  ;;  %v22389_v9 = vadd.f32 %v21874_v33, %v6461_v29 }
 0x58e   :  { %27106 = vst [vmem:[#allocation31_spill] sm:$0xff] %v22383_v27  ;;  %v6923_v52 = vadd.f32 %v6922_v60, %v6921_v39  ;;  %v6728_v10 = vadd.f32 %v6727_v18, %v6726_v56  ;;  %v6802_v11 = vmul.f32 %v22383_v27, %v22383_v27  ;;  %v6731_v28 = vsel %vm6605_vm3, %v22383_v27, 0.0 }
 0x58f   :  { %v6729_v1 = vsel %vm6605_vm3, %v22389_v9, 0.0  ;;  %v6801_v51 = vmul.f32 %v22389_v9, %v22389_v9 }
 0x590   :  { %v6730_v24 = vadd.f32 %v6729_v1, %v6728_v10  ;;  %v6925_v58 = vadd.f32 %v6924_v14, %v6923_v52  ;;  %v6928_v22 = vsel %vm6605_vm3, %v6802_v11, 0.0  ;;  %v27126_v11 = vld [vmem:[#allocation27_spill] sm:$0xff] }
 0x591   :  { %v6926_v33 = vsel %vm6605_vm3, %v6801_v51, 0.0 }
 0x592   :  { %v6732_v39 = vadd.f32 %v6731_v28, %v6730_v24  ;;  %v6927_v56 = vadd.f32 %v6926_v33, %v6925_v58 }
 0x594   :  { %v6733_v29 = vrot.slane %v6732_v39, 4  ;;  %v6929_v18 = vadd.f32 %v6928_v22, %v6927_v56  ;;  %v27118_v56 = vld [vmem:[#allocation19_spill] sm:$0xff] }
 0x595   :  { %v27130_v33 = vld [vmem:[#allocation31_spill] sm:$0xff] }
 0x596   :  { %v6734_v60 = vadd.f32 %v6733_v29, %v6732_v39  ;;  %v6930_v3 = vrot.slane %v6929_v18, 4  ;;  %v27128_v29 = vld [vmem:[#allocation29_spill] sm:$0xff] }
 0x598   :  { %v6735_v32 = vrot.slane %v6734_v60, 2  ;;  %v6931_v35 = vadd.f32 %v6930_v3, %v6929_v18  ;;  %v22529_v3 = vld [vmem:[%s26700_s3] ss:$0 sm:$0xff] }
 0x59a   :  { %v6736_v55 = vadd.f32 %v6735_v32, %v6734_v60  ;;  %v6932_v36 = vrot.slane %v6931_v35, 2  ;;  %v27127_v60 = vld [vmem:[#allocation30_spill] sm:$0xff] }
 0x59c   :  { %v6737_v15 = vrot.slane %v6736_v55, 1  ;;  %v6933_v10 = vadd.f32 %v6932_v36, %v6931_v35 }
 0x59e   :  { %v6738_v14 = vadd.f32 %v6737_v15, %v6736_v55  ;;  %v6934_v52 = vrot.slane %v6933_v10, 1 }
 0x5a0   :  { %v6935_v1 = vadd.f32 %v6934_v52, %v6933_v10  ;;  %v22402_v27 = vmul.f32 0.001953125, %v6738_v14  ;;  %v27108_v10 = vld [vmem:[#allocation9_spill] sm:$0xff]  ;;  %v27109_v14 = vld [vmem:[#allocation12_spill] sm:$0xff]  ;;  %v27110_v52 = vld [vmem:[#allocation11_spill] sm:$0xff] }
 0x5a2   :  { %v6937_v51 = vmul.f32 0.001953125, %v6935_v1  ;;  %v6938_v24 = vmul.f32 %v22402_v27, %v22402_v27  ;;  %v27111_v1 = vld [vmem:[#allocation14_spill] sm:$0xff]  ;;  %v27129_v22 = vsub.f32 %v22389_v9, %v22402_v27  ;;  %v27131_v15 = vsub.f32 %v21880_v16, %v22402_v27  ;;  %v22560_v9 = vld [vmem:[%s26701_s4] ss:$0 sm:$0xff] }
 0x5a3   :  { %v27132_v32 = vsub.f32 %v21877_v37, %v22402_v27  ;;  %27133 = vst [vmem:[#allocation32_spill] sm:$0xff] %v22560_v9  ;;  %v27135_v16 = vsub.f32 %v21891_v43, %v22402_v27  ;;  %v27136_v37 = vsub.f32 %v21911_v61, %v22402_v27  ;;  %v27137_v35 = vsub.f32 %v21905_v57, %v22402_v27 }
 0x5a4   :  { %v6939_v55 = vsub.f32 %v6937_v51, %v6938_v24  ;;  %v27112_v51 = vld [vmem:[#allocation13_spill] sm:$0xff]  ;;  %v27138_v43 = vsub.f32 %v21927_v49, %v22402_v27  ;;  %v27139_v61 = vsub.f32 %v21921_v48, %v22402_v27  ;;  %v27140_v57 = vsub.f32 %v21943_v23, %v22402_v27 }
 0x5a6   :  { %v7004_v18 = vadd.f32 1e-05, %v6939_v55  ;;  %v27107_v55 = vld [vmem:[#allocation10_spill] sm:$0xff] }
 0x5a8   :  { %19716 = vrsqrt.f32 %v7004_v18  ;;  %v27113_v18 = vld [vmem:[#allocation16_spill] sm:$0xff] }
 0x5b2   :  { %v22524_v24 = vpop.eup %19716 }
 0x5b3   :  { %v7068_v36 = vmul.f32 %v22524_v24, %v27129_v22  ;;  %v22549_v58 = vmul.f32 %v22524_v24, %v27131_v15  ;;  %v22555_v28 = vmul.f32 %v22524_v24, %v27132_v32  ;;  %v27134_v22 = vsub.f32 %v21896_v47, %v22402_v27 }
 0x5b4   :  { %v22572_v15 = vmul.f32 %v22524_v24, %v27135_v16  ;;  %v22578_v32 = vmul.f32 %v22524_v24, %v27136_v37  ;;  %v22584_v47 = vmul.f32 %v22524_v24, %v27137_v35  ;;  %v22591_v16 = vmul.f32 %v22524_v24, %v27138_v43 }
 0x5b5   :  { %v22566_v39 = vmul.f32 %v22524_v24, %v27134_v22  ;;  %v7139_v22 = vmul.f32 %v22529_v3, %v7068_v36  ;;  %v22597_v37 = vmul.f32 %v22524_v24, %v27139_v61  ;;  %v22603_v35 = vmul.f32 %v22524_v24, %v27140_v57 }
 0x5b6   :  { %v27141_v36 = vsub.f32 %v21937_v19, %v22402_v27  ;;  %v27142_v43 = vsub.f32 %v21959_v40, %v22402_v27  ;;  %v27143_v61 = vsub.f32 %v21953_v34, %v22402_v27  ;;  %v27144_v57 = vsub.f32 %v21975_v59, %v22402_v27 }
 0x5b7   :  { %v27145_v40 = vsub.f32 %v21969_v54, %v22402_v27  ;;  %v27146_v34 = vsub.f32 %v21991_v8, %v22402_v27  ;;  %v27147_v59 = vsub.f32 %v21985_v0, %v22402_v27 }
 0x5b8   :  { %v22609_v49 = vmul.f32 %v22524_v24, %v27141_v36  ;;  %v22615_v48 = vmul.f32 %v22524_v24, %v27142_v43  ;;  %v22621_v23 = vmul.f32 %v22524_v24, %v27143_v61  ;;  %v22627_v19 = vmul.f32 %v22524_v24, %v27144_v57 }
 0x5b9   :  { %v7210_v36 = vadd.f32 %v22560_v9, %v7139_v22  ;;  %v22634_v43 = vmul.f32 %v22524_v24, %v27145_v40  ;;  %v22640_v61 = vmul.f32 %v22524_v24, %v27146_v34  ;;  %v22646_v57 = vmul.f32 %v22524_v24, %v27147_v59 }
 0x5ba   :  { %v27148_v22 = vsub.f32 %v22007_v26, %v22402_v27  ;;  %v27149_v40 = vsub.f32 %v22001_v21, %v22402_v27  ;;  %v27150_v34 = vsub.f32 %v22023_v46, %v22402_v27  ;;  %v27151_v59 = vsub.f32 %v22017_v41, %v22402_v27 }
 0x5bb   :  { %v27152_v9 = vsub.f32 %v22039_v6, %v22402_v27 }
 0x5bc   :  { %v22652_v54 = vmul.f32 %v22524_v24, %v27148_v22  ;;  %v22658_v8 = vmul.f32 %v22524_v24, %v27149_v40  ;;  %v22664_v0 = vmul.f32 %v22524_v24, %v27150_v34  ;;  %v22670_v26 = vmul.f32 %v22524_v24, %v27151_v59 }
 0x5bd   :  { %v7274_v22 = vmax.f32 %v7210_v36, 0.0  ;;  %v22676_v21 = vmul.f32 %v22524_v24, %v27152_v9  ;;  %v27153_v40 = vsub.f32 %v22033_v63, %v22402_v27  ;;  %v27154_v34 = vsub.f32 %v22055_v20, %v22402_v27 }
 0x5be   :  { %v27155_v36 = vsub.f32 %v22049_v12, %v22402_v27  ;;  %v27156_v9 = vsub.f32 %v22071_v44, %v22402_v27  ;;  %v27157_v59 = vsub.f32 %v22065_v38, %v22402_v27  ;;  %v27159_v44 = vsub.f32 %v22081_v62, %v22402_v27 }
 0x5bf   :  { %v22682_v46 = vmul.f32 %v22524_v24, %v27153_v40  ;;  %v22688_v41 = vmul.f32 %v22524_v24, %v27154_v34  ;;  %v27158_v40 = vsub.f32 %v22087_v2, %v22402_v27  ;;  %7448 = vst.msk [vmem:[#allocation3 + $0x331] sm:$0xff] %vm6605_vm3, %v7274_v22  ;;  %v27160_v38 = vsub.f32 %v22103_v25, %v22402_v27 }
 0x5c0   :  { %v22694_v6 = vmul.f32 %v22524_v24, %v27155_v36  ;;  %v22700_v63 = vmul.f32 %v22524_v24, %v27156_v9  ;;  %v22706_v20 = vmul.f32 %v22524_v24, %v27157_v59  ;;  %v22719_v34 = vmul.f32 %v22524_v24, %v27159_v44 }
 0x5c1   :  { %v22712_v12 = vmul.f32 %v22524_v24, %v27158_v40  ;;  %v22725_v36 = vmul.f32 %v22524_v24, %v27160_v38  ;;  %v27161_v2 = vsub.f32 %v22097_v17, %v22402_v27  ;;  %v27162_v22 = vsub.f32 %v22119_v53, %v22402_v27 }
 0x5c2   :  { %v27163_v59 = vsub.f32 %v22113_v45, %v22402_v27  ;;  %v27164_v40 = vsub.f32 %v22135_v5, %v22402_v27  ;;  %v27165_v44 = vsub.f32 %v22129_v7, %v22402_v27  ;;  %v27166_v38 = vsub.f32 %v22151_v42, %v22402_v27 }
 0x5c3   :  { %v22731_v9 = vmul.f32 %v22524_v24, %v27161_v2  ;;  %v22737_v62 = vmul.f32 %v22524_v24, %v27162_v22  ;;  %v27167_v2 = vsub.f32 %v22145_v31, %v22402_v27  ;;  %v27168_v22 = vsub.f32 %v22167_v13, %v22402_v27 }
 0x5c4   :  { %v22743_v25 = vmul.f32 %v22524_v24, %v27163_v59  ;;  %v22749_v17 = vmul.f32 %v22524_v24, %v27164_v40  ;;  %v22755_v53 = vmul.f32 %v22524_v24, %v27165_v44  ;;  %v22761_v45 = vmul.f32 %v22524_v24, %v27166_v38 }
 0x5c5   :  { %v22767_v5 = vmul.f32 %v22524_v24, %v27167_v2  ;;  %v22773_v7 = vmul.f32 %v22524_v24, %v27168_v22  ;;  %v27169_v59 = vsub.f32 %v22161_v4, %v22402_v27  ;;  %v27170_v40 = vsub.f32 %v22183_v50, %v22402_v27 }
 0x5c6   :  { %v27171_v44 = vsub.f32 %v22177_v30, %v22402_v27  ;;  %v27172_v38 = vsub.f32 %v27107_v55, %v22402_v27  ;;  %v27173_v2 = vsub.f32 %v27108_v10, %v22402_v27  ;;  %v27174_v22 = vsub.f32 %v27109_v14, %v22402_v27 }
 0x5c7   :  { %v22779_v42 = vmul.f32 %v22524_v24, %v27169_v59  ;;  %v22785_v31 = vmul.f32 %v22524_v24, %v27170_v40  ;;  %v27175_v59 = vsub.f32 %v27110_v52, %v22402_v27  ;;  %v27176_v40 = vsub.f32 %v27111_v1, %v22402_v27 }
 0x5c8   :  { %v22791_v13 = vmul.f32 %v22524_v24, %v27171_v44  ;;  %v22797_v4 = vmul.f32 %v22524_v24, %v27172_v38  ;;  %v22803_v50 = vmul.f32 %v22524_v24, %v27173_v2  ;;  %v22809_v30 = vmul.f32 %v22524_v24, %v27174_v22  ;;  %v27181_v2 = vld [vmem:[#allocation15_spill] sm:$0xff] }
 0x5c9   :  { %v22815_v55 = vmul.f32 %v22524_v24, %v27175_v59  ;;  %v22821_v10 = vmul.f32 %v22524_v24, %v27176_v40  ;;  %v27177_v44 = vsub.f32 %v27112_v51, %v22402_v27  ;;  %v27179_v38 = vsub.f32 %v27113_v18, %v22402_v27  ;;  %v27183_v59 = vld [vmem:[#allocation18_spill] sm:$0xff] }
 0x5ca   :  { %v27182_v22 = vsub.f32 %v27181_v2, %v22402_v27  ;;  %v27184_v40 = vsub.f32 %v27183_v59, %v22402_v27 }
 0x5cb   :  { %v22827_v14 = vmul.f32 %v22524_v24, %v27177_v44  ;;  %v22833_v52 = vmul.f32 %v22524_v24, %v27179_v38  ;;  %v27186_v44 = vld [vmem:[#allocation17_spill] sm:$0xff]  ;;  %v27189_v38 = vld [vmem:[#allocation20_spill] sm:$0xff] }
 0x5cc   :  { %v22839_v1 = vmul.f32 %v22524_v24, %v27182_v22  ;;  %v22845_v51 = vmul.f32 %v22524_v24, %v27184_v40  ;;  %v27192_v22 = vsub.f32 %v27118_v56, %v22402_v27  ;;  %v27194_v40 = vld [vmem:[#allocation22_spill] sm:$0xff] }
 0x5cd   :  { %27178 = vst [vmem:[#allocation33_spill] sm:$0xff] %v22827_v14  ;;  %27180 = vst [vmem:[#allocation34_spill] sm:$0xff] %v22833_v52  ;;  %v27187_v14 = vsub.f32 %v27186_v44, %v22402_v27  ;;  %v27190_v52 = vsub.f32 %v27189_v38, %v22402_v27 }
 0x5ce   :  { %27185 = vst [vmem:[#allocation35_spill] sm:$0xff] %v22845_v51  ;;  %v22863_v59 = vmul.f32 %v22524_v24, %v27192_v22  ;;  %v27195_v51 = vsub.f32 %v27194_v40, %v22402_v27  ;;  %v27203_v22 = vld [vmem:[#allocation23_spill] sm:$0xff] }
 0x5cf   :  { %v22851_v18 = vmul.f32 %v22524_v24, %v27187_v14  ;;  %v22857_v2 = vmul.f32 %v22524_v24, %v27190_v52  ;;  %v27197_v14 = vld [vmem:[#allocation21_spill] sm:$0xff]  ;;  %v27200_v52 = vld [vmem:[#allocation24_spill] sm:$0xff] }
 0x5d0   :  { %27193 = vst [vmem:[#allocation38_spill] sm:$0xff] %v22863_v59  ;;  %v22869_v44 = vmul.f32 %v22524_v24, %v27195_v51  ;;  %v27204_v59 = vsub.f32 %v27203_v22, %v22402_v27  ;;  %v27205_v51 = vld [vmem:[#allocation26_spill] sm:$0xff] }
 0x5d1   :  { %27188 = vst [vmem:[#allocation36_spill] sm:$0xff] %v22851_v18  ;;  %27191 = vst [vmem:[#allocation37_spill] sm:$0xff] %v22857_v2  ;;  %v27198_v18 = vsub.f32 %v27197_v14, %v22402_v27  ;;  %v27201_v2 = vsub.f32 %v27200_v52, %v22402_v27 }
 0x5d2   :  { %27196 = vst [vmem:[#allocation39_spill] sm:$0xff] %v22869_v44  ;;  %v22887_v40 = vmul.f32 %v22524_v24, %v27204_v59  ;;  %v27206_v44 = vsub.f32 %v27205_v51, %v22402_v27  ;;  %v27211_v59 = vsub.f32 %v27126_v11, %v22402_v27 }
 0x5d3   :  { %v22875_v38 = vmul.f32 %v22524_v24, %v27198_v18  ;;  %v22881_v56 = vmul.f32 %v22524_v24, %v27201_v2  ;;  %v27207_v18 = vld [vmem:[#allocation25_spill] sm:$0xff]  ;;  %v27209_v2 = vld [vmem:[#allocation28_spill] sm:$0xff] }
 0x5d4   :  { %v22893_v14 = vmul.f32 %v22524_v24, %v27206_v44  ;;  %v22911_v51 = vmul.f32 %v22524_v24, %v27211_v59  ;;  %v27212_v44 = vsub.f32 %v27127_v60, %v22402_v27  ;;  %v22933_v59 = vmul.f32 %v22529_v3, %v22549_v58 }
 0x5d5   :  { %27199 = vst [vmem:[#allocation40_spill] sm:$0xff] %v22875_v38  ;;  %27202 = vst [vmem:[#allocation41_spill] sm:$0xff] %v22881_v56  ;;  %v27208_v38 = vsub.f32 %v27207_v18, %v22402_v27  ;;  %v27210_v56 = vsub.f32 %v27209_v2, %v22402_v27  ;;  %v22937_v60 = vmul.f32 %v22529_v3, %v22555_v28 }
 0x5d6   :  { %v22917_v18 = vmul.f32 %v22524_v24, %v27212_v44  ;;  %v22945_v44 = vmul.f32 %v22529_v3, %v22572_v15  ;;  %v22953_v58 = vmul.f32 %v22529_v3, %v22584_v47  ;;  %v22957_v28 = vmul.f32 %v22529_v3, %v22591_v16 }
 0x5d7   :  { %v22899_v52 = vmul.f32 %v22524_v24, %v27208_v38  ;;  %v22905_v22 = vmul.f32 %v22524_v24, %v27210_v56  ;;  %v27213_v38 = vsub.f32 %v27128_v29, %v22402_v27  ;;  %v27214_v56 = vsub.f32 %v27130_v33, %v22402_v27 }
 0x5d8   :  { %v22941_v29 = vmul.f32 %v22529_v3, %v22566_v39  ;;  %v22949_v27 = vmul.f32 %v22529_v3, %v22578_v32  ;;  %v22961_v33 = vmul.f32 %v22529_v3, %v22597_v37  ;;  %v22965_v39 = vmul.f32 %v22529_v3, %v22603_v35 }
 0x5d9   :  { %v22923_v2 = vmul.f32 %v22524_v24, %v27213_v38  ;;  %v22929_v11 = vmul.f32 %v22524_v24, %v27214_v56  ;;  %v22969_v24 = vmul.f32 %v22529_v3, %v22609_v49  ;;  %v22973_v15 = vmul.f32 %v22529_v3, %v22615_v48  ;;  %v27221_v38 = vld [vmem:[#allocation35_spill] sm:$0xff]  ;;  %v27223_v56 = vld [vmem:[#allocation36_spill] sm:$0xff] }
 0x5da   :  { %v22977_v32 = vmul.f32 %v22529_v3, %v22621_v23  ;;  %v22981_v47 = vmul.f32 %v22529_v3, %v22627_v19  ;;  %v22985_v16 = vmul.f32 %v22529_v3, %v22634_v43  ;;  %v22989_v37 = vmul.f32 %v22529_v3, %v22640_v61 }
 0x5db   :  { %v22993_v35 = vmul.f32 %v22529_v3, %v22646_v57  ;;  %v22997_v49 = vmul.f32 %v22529_v3, %v22652_v54  ;;  %v23001_v48 = vmul.f32 %v22529_v3, %v22658_v8  ;;  %v23005_v23 = vmul.f32 %v22529_v3, %v22664_v0 }
 0x5dc   :  { %v23009_v19 = vmul.f32 %v22529_v3, %v22670_v26  ;;  %v23013_v43 = vmul.f32 %v22529_v3, %v22676_v21  ;;  %v23017_v61 = vmul.f32 %v22529_v3, %v22682_v46  ;;  %v23021_v57 = vmul.f32 %v22529_v3, %v22688_v41 }
 0x5dd   :  { %v23025_v54 = vmul.f32 %v22529_v3, %v22694_v6  ;;  %v23029_v8 = vmul.f32 %v22529_v3, %v22700_v63  ;;  %v23033_v0 = vmul.f32 %v22529_v3, %v22706_v20  ;;  %v23037_v26 = vmul.f32 %v22529_v3, %v22712_v12 }
 0x5de   :  { %v23041_v21 = vmul.f32 %v22529_v3, %v22719_v34  ;;  %v23045_v46 = vmul.f32 %v22529_v3, %v22725_v36  ;;  %v23049_v41 = vmul.f32 %v22529_v3, %v22731_v9  ;;  %v23053_v6 = vmul.f32 %v22529_v3, %v22737_v62 }
 0x5df   :  { %v23057_v63 = vmul.f32 %v22529_v3, %v22743_v25  ;;  %v23061_v20 = vmul.f32 %v22529_v3, %v22749_v17  ;;  %v23065_v12 = vmul.f32 %v22529_v3, %v22755_v53  ;;  %v23069_v34 = vmul.f32 %v22529_v3, %v22761_v45 }
 0x5e0   :  { %v23073_v36 = vmul.f32 %v22529_v3, %v22767_v5  ;;  %v23077_v9 = vmul.f32 %v22529_v3, %v22773_v7  ;;  %v23081_v62 = vmul.f32 %v22529_v3, %v22779_v42  ;;  %v23085_v25 = vmul.f32 %v22529_v3, %v22785_v31  ;;  %v27216_v31 = vld [vmem:[#allocation33_spill] sm:$0xff] }
 0x5e1   :  { %v23089_v17 = vmul.f32 %v22529_v3, %v22791_v13  ;;  %v23093_v53 = vmul.f32 %v22529_v3, %v22797_v4  ;;  %v23097_v45 = vmul.f32 %v22529_v3, %v22803_v50  ;;  %v23101_v5 = vmul.f32 %v22529_v3, %v22809_v30  ;;  %v27218_v4 = vld [vmem:[#allocation34_spill] sm:$0xff] }
 0x5e2   :  { %v23105_v7 = vmul.f32 %v22529_v3, %v22815_v55  ;;  %v23109_v42 = vmul.f32 %v22529_v3, %v22821_v10  ;;  %v23113_v13 = vmul.f32 %v22529_v3, %v27216_v31  ;;  %v23117_v50 = vmul.f32 %v22529_v3, %v27218_v4 }
 0x5e3   :  { %v23121_v30 = vmul.f32 %v22529_v3, %v22839_v1  ;;  %v23125_v55 = vmul.f32 %v22529_v3, %v27221_v38  ;;  %v23129_v10 = vmul.f32 %v22529_v3, %v27223_v56 }
 0x5e4   :  { %27215 = vst [vmem:[#allocation42_spill] sm:$0xff] %v23109_v42  ;;  %27217 = vst [vmem:[#allocation43_spill] sm:$0xff] %v23113_v13  ;;  %v27224_v42 = vld [vmem:[#allocation37_spill] sm:$0xff]  ;;  %v27225_v13 = vld [vmem:[#allocation38_spill] sm:$0xff] }
 0x5e5   :  { %27219 = vst [vmem:[#allocation44_spill] sm:$0xff] %v23117_v50  ;;  %27220 = vst [vmem:[#allocation45_spill] sm:$0xff] %v23121_v30  ;;  %v23133_v31 = vmul.f32 %v22529_v3, %v27224_v42  ;;  %v23137_v4 = vmul.f32 %v22529_v3, %v27225_v13  ;;  %v27226_v50 = vld [vmem:[#allocation39_spill] sm:$0xff]  ;;  %v27227_v30 = vld [vmem:[#allocation40_spill] sm:$0xff]  ;;  %v23153_v42 = vmul.f32 %v22529_v3, %v22887_v40 }
 0x5e6   :  { %27222 = vst [vmem:[#allocation46_spill] sm:$0xff] %v23125_v55  ;;  %v23141_v1 = vmul.f32 %v22529_v3, %v27226_v50  ;;  %v23145_v38 = vmul.f32 %v22529_v3, %v27227_v30  ;;  %v27228_v55 = vld [vmem:[#allocation41_spill] sm:$0xff]  ;;  %v23157_v13 = vmul.f32 %v22529_v3, %v22893_v14  ;;  %v23161_v50 = vmul.f32 %v22529_v3, %v22899_v52 }
 0x5e7   :  { %v23149_v56 = vmul.f32 %v22529_v3, %v27228_v55  ;;  %v23165_v30 = vmul.f32 %v22529_v3, %v22905_v22  ;;  %v23169_v55 = vmul.f32 %v22529_v3, %v22911_v51  ;;  %v23173_v40 = vmul.f32 %v22529_v3, %v22917_v18 }
 0x5e8   :  { %27229 = vst [vmem:[#allocation47_spill] sm:$0xff] %v23161_v50  ;;  %v23177_v14 = vmul.f32 %v22529_v3, %v22923_v2  ;;  %v23181_v52 = vmul.f32 %v22529_v3, %v22929_v11  ;;  %v27230_v50 = vld [vmem:[#allocation32_spill] sm:$0xff] }
 0x5e9   :  { %v23185_v22 = vadd.f32 %v27230_v50, %v22933_v59  ;;  %v23189_v51 = vadd.f32 %v27230_v50, %v22937_v60  ;;  %v23193_v18 = vadd.f32 %v27230_v50, %v22941_v29  ;;  %v23197_v2 = vadd.f32 %v27230_v50, %v22945_v44 }
 0x5ea   :  { %v23201_v3 = vadd.f32 %v27230_v50, %v22949_v27  ;;  %v23205_v11 = vadd.f32 %v27230_v50, %v22953_v58  ;;  %v23209_v59 = vadd.f32 %v27230_v50, %v22957_v28  ;;  %v23213_v60 = vadd.f32 %v27230_v50, %v22961_v33 }
 0x5eb   :  { %v23217_v29 = vadd.f32 %v27230_v50, %v22965_v39  ;;  %v23221_v44 = vadd.f32 %v27230_v50, %v22969_v24  ;;  %v23225_v27 = vadd.f32 %v27230_v50, %v22973_v15  ;;  %v23229_v58 = vadd.f32 %v27230_v50, %v22977_v32 }
 0x5ec   :  { %v23233_v28 = vadd.f32 %v27230_v50, %v22981_v47  ;;  %v23237_v33 = vadd.f32 %v27230_v50, %v22985_v16  ;;  %v23241_v39 = vadd.f32 %v27230_v50, %v22989_v37  ;;  %v23245_v24 = vadd.f32 %v27230_v50, %v22993_v35 }
 0x5ed   :  { %v23249_v15 = vadd.f32 %v27230_v50, %v22997_v49  ;;  %v23253_v32 = vadd.f32 %v27230_v50, %v23001_v48  ;;  %v23257_v47 = vadd.f32 %v27230_v50, %v23005_v23  ;;  %v23261_v16 = vadd.f32 %v27230_v50, %v23009_v19 }
 0x5ee   :  { %v23265_v37 = vadd.f32 %v27230_v50, %v23013_v43  ;;  %v23269_v35 = vadd.f32 %v27230_v50, %v23017_v61  ;;  %v23273_v49 = vadd.f32 %v27230_v50, %v23021_v57  ;;  %v23277_v48 = vadd.f32 %v27230_v50, %v23025_v54 }
 0x5ef   :  { %v23281_v23 = vadd.f32 %v27230_v50, %v23029_v8  ;;  %v23285_v19 = vadd.f32 %v27230_v50, %v23033_v0  ;;  %v23289_v43 = vadd.f32 %v27230_v50, %v23037_v26  ;;  %v23293_v61 = vadd.f32 %v27230_v50, %v23041_v21 }
 0x5f0   :  { %v23297_v57 = vadd.f32 %v27230_v50, %v23045_v46  ;;  %v23301_v54 = vadd.f32 %v27230_v50, %v23049_v41  ;;  %v23305_v8 = vadd.f32 %v27230_v50, %v23053_v6  ;;  %v23309_v0 = vadd.f32 %v27230_v50, %v23057_v63 }
 0x5f1   :  { %v23313_v26 = vadd.f32 %v27230_v50, %v23061_v20  ;;  %v23317_v21 = vadd.f32 %v27230_v50, %v23065_v12  ;;  %v23321_v46 = vadd.f32 %v27230_v50, %v23069_v34  ;;  %v23325_v41 = vadd.f32 %v27230_v50, %v23073_v36 }
 0x5f2   :  { %v23329_v6 = vadd.f32 %v27230_v50, %v23077_v9  ;;  %v23333_v63 = vadd.f32 %v27230_v50, %v23081_v62  ;;  %v23337_v20 = vadd.f32 %v27230_v50, %v23085_v25  ;;  %v23341_v12 = vadd.f32 %v27230_v50, %v23089_v17  ;;  %v27235_v25 = vld [vmem:[#allocation42_spill] sm:$0xff] }
 0x5f3   :  { %v23345_v34 = vadd.f32 %v27230_v50, %v23093_v53  ;;  %v23349_v36 = vadd.f32 %v27230_v50, %v23097_v45  ;;  %v23353_v9 = vadd.f32 %v27230_v50, %v23101_v5  ;;  %v23357_v62 = vadd.f32 %v27230_v50, %v23105_v7 }
 0x5f4   :  { %27231 = vst [vmem:[#allocation48_spill] sm:$0xff] %v23341_v12  ;;  %v23361_v17 = vadd.f32 %v27230_v50, %v27235_v25  ;;  %v27236_v12 = vld [vmem:[#allocation43_spill] sm:$0xff]  ;;  %v23381_v25 = vadd.f32 %v27230_v50, %v23129_v10  ;;  %v23401_v10 = vadd.f32 %v27230_v50, %v23149_v56  ;;  %v23421_v56 = vadd.f32 %v27230_v50, %v23169_v55 }
 0x5f5   :  { %27232 = vst [vmem:[#allocation49_spill] sm:$0xff] %v23345_v34  ;;  %27233 = vst [vmem:[#allocation50_spill] sm:$0xff] %v23349_v36  ;;  %v23365_v53 = vadd.f32 %v27230_v50, %v27236_v12  ;;  %v27237_v34 = vld [vmem:[#allocation44_spill] sm:$0xff]  ;;  %v27238_v36 = vld [vmem:[#allocation45_spill] sm:$0xff]  ;;  %v23385_v12 = vadd.f32 %v27230_v50, %v23133_v31  ;;  %v23405_v31 = vadd.f32 %v27230_v50, %v23153_v42  ;;  %v7215_v55 = vmax.f32 %v23197_v2, 0.0 }
 0x5f6   :  { %27234 = vst [vmem:[#allocation51_spill] sm:$0xff] %v23353_v9  ;;  %v23369_v45 = vadd.f32 %v27230_v50, %v27237_v34  ;;  %v23373_v5 = vadd.f32 %v27230_v50, %v27238_v36  ;;  %v27239_v9 = vld [vmem:[#allocation46_spill] sm:$0xff]  ;;  %v23389_v34 = vadd.f32 %v27230_v50, %v23137_v4  ;;  %v23393_v36 = vadd.f32 %v27230_v50, %v23141_v1 }
 0x5f7   :  { %v23377_v7 = vadd.f32 %v27230_v50, %v27239_v9  ;;  %v23397_v9 = vadd.f32 %v27230_v50, %v23145_v38  ;;  %v23409_v4 = vadd.f32 %v27230_v50, %v23157_v13  ;;  %v23417_v38 = vadd.f32 %v27230_v50, %v23165_v30  ;;  %27244 = vst [vmem:[#allocation55_spill] sm:$0xff] %v23421_v56 }
 0x5f8   :  { %27240 = vst [vmem:[#allocation52_spill] sm:$0xff] %v23389_v34  ;;  %v27241_v34 = vld [vmem:[#allocation47_spill] sm:$0xff]  ;;  %v23425_v42 = vadd.f32 %v27230_v50, %v23173_v40  ;;  %v23429_v13 = vadd.f32 %v27230_v50, %v23177_v14  ;;  %v7213_v30 = vmax.f32 %v23189_v51, 0.0  ;;  %v7216_v56 = vmax.f32 %v23201_v3, 0.0  ;;  %7389 = vst.msk [vmem:[#allocation3 + $0x39] sm:$0xff] %vm6605_vm3, %v7215_v55 }
 0x5f9   :  { %v23413_v1 = vadd.f32 %v27230_v50, %v27241_v34  ;;  %27243 = vst [vmem:[#allocation54_spill] sm:$0xff] %v23417_v38  ;;  %v23433_v34 = vadd.f32 %v27230_v50, %v23181_v52  ;;  %v7214_v38 = vmax.f32 %v23193_v18, 0.0  ;;  %v7217_v40 = vmax.f32 %v23205_v11, 0.0 }
 0x5fa   :  { %27245 = vst [vmem:[#allocation56_spill] sm:$0xff] %v23425_v42  ;;  %27246 = vst [vmem:[#allocation57_spill] sm:$0xff] %v23429_v13  ;;  %v7218_v42 = vmax.f32 %v23209_v59, 0.0  ;;  %v7219_v14 = vmax.f32 %v23213_v60, 0.0  ;;  %v7220_v13 = vmax.f32 %v23217_v29, 0.0  ;;  %v7221_v50 = vmax.f32 %v23221_v44, 0.0 }
 0x5fb   :  { %27242 = vst [vmem:[#allocation53_spill] sm:$0xff] %v23413_v1  ;;  %v7212_v1 = vmax.f32 %v23185_v22, 0.0  ;;  %7387 = vst.msk [vmem:[#allocation3 + $0x21] sm:$0xff] %vm6605_vm3, %v7213_v30  ;;  %v7222_v52 = vmax.f32 %v23225_v27, 0.0  ;;  %v7223_v22 = vmax.f32 %v23229_v58, 0.0  ;;  %v7224_v51 = vmax.f32 %v23233_v28, 0.0 }
 0x5fc   :  { %v7225_v18 = vmax.f32 %v23237_v33, 0.0  ;;  %7388 = vst.msk [vmem:[#allocation3 + $0x31] sm:$0xff] %vm6605_vm3, %v7214_v38  ;;  %7390 = vst.msk [vmem:[#allocation3 + $0x49] sm:$0xff] %vm6605_vm3, %v7216_v56  ;;  %v7226_v2 = vmax.f32 %v23241_v39, 0.0  ;;  %v7227_v3 = vmax.f32 %v23245_v24, 0.0  ;;  %v7228_v11 = vmax.f32 %v23249_v15, 0.0 }
 0x5fd   :  { %7386 = vst.msk [vmem:[#allocation3 + $0x19] sm:$0xff] %vm6605_vm3, %v7212_v1  ;;  %7391 = vst.msk [vmem:[#allocation3 + $0x51] sm:$0xff] %vm6605_vm3, %v7217_v40  ;;  %v7229_v59 = vmax.f32 %v23253_v32, 0.0  ;;  %v7230_v60 = vmax.f32 %v23257_v47, 0.0  ;;  %v7231_v29 = vmax.f32 %v23261_v16, 0.0  ;;  %v7232_v44 = vmax.f32 %v23265_v37, 0.0 }
 0x5fe   :  { %7392 = vst.msk [vmem:[#allocation3 + $0x61] sm:$0xff] %vm6605_vm3, %v7218_v42  ;;  %7393 = vst.msk [vmem:[#allocation3 + $0x69] sm:$0xff] %vm6605_vm3, %v7219_v14  ;;  %v7233_v27 = vmax.f32 %v23269_v35, 0.0  ;;  %v7234_v58 = vmax.f32 %v23273_v49, 0.0  ;;  %v7235_v28 = vmax.f32 %v23277_v48, 0.0  ;;  %v7236_v33 = vmax.f32 %v23281_v23, 0.0 }
 0x5ff   :  { %7394 = vst.msk [vmem:[#allocation3 + $0x79] sm:$0xff] %vm6605_vm3, %v7220_v13  ;;  %7395 = vst.msk [vmem:[#allocation3 + $0x81] sm:$0xff] %vm6605_vm3, %v7221_v50  ;;  %v7237_v39 = vmax.f32 %v23285_v19, 0.0  ;;  %v7238_v24 = vmax.f32 %v23289_v43, 0.0  ;;  %v7239_v15 = vmax.f32 %v23293_v61, 0.0  ;;  %v7240_v32 = vmax.f32 %v23297_v57, 0.0 }
 0x600   :  { %7396 = vst.msk [vmem:[#allocation3 + $0x91] sm:$0xff] %vm6605_vm3, %v7222_v52  ;;  %7397 = vst.msk [vmem:[#allocation3 + $0x99] sm:$0xff] %vm6605_vm3, %v7223_v22  ;;  %v7241_v47 = vmax.f32 %v23301_v54, 0.0  ;;  %v7242_v16 = vmax.f32 %v23305_v8, 0.0  ;;  %v7243_v37 = vmax.f32 %v23309_v0, 0.0  ;;  %v7244_v35 = vmax.f32 %v23313_v26, 0.0 }
 0x601   :  { %7398 = vst.msk [vmem:[#allocation3 + $0xa9] sm:$0xff] %vm6605_vm3, %v7224_v51  ;;  %7399 = vst.msk [vmem:[#allocation3 + $0xb1] sm:$0xff] %vm6605_vm3, %v7225_v18  ;;  %v7245_v49 = vmax.f32 %v23317_v21, 0.0  ;;  %v7246_v48 = vmax.f32 %v23321_v46, 0.0  ;;  %v7247_v23 = vmax.f32 %v23325_v41, 0.0  ;;  %v7248_v19 = vmax.f32 %v23329_v6, 0.0 }
 0x602   :  { %7400 = vst.msk [vmem:[#allocation3 + $0xc1] sm:$0xff] %vm6605_vm3, %v7226_v2  ;;  %7401 = vst.msk [vmem:[#allocation3 + $0xc9] sm:$0xff] %vm6605_vm3, %v7227_v3  ;;  %v7249_v43 = vmax.f32 %v23333_v63, 0.0  ;;  %v7519_v57 = vld [vmem:[#allocation3 + $0x21] sm:$0xff]  ;;  %v7250_v54 = vmax.f32 %v23337_v20, 0.0  ;;  %v27249_v46 = vld [vmem:[#allocation50_spill] sm:$0xff] }
 0x603   :  { %7402 = vst.msk [vmem:[#allocation3 + $0xd9] sm:$0xff] %vm6605_vm3, %v7228_v11  ;;  %7403 = vst.msk [vmem:[#allocation3 + $0xe1] sm:$0xff] %vm6605_vm3, %v7229_v59  ;;  %v27247_v8 = vld [vmem:[#allocation48_spill] sm:$0xff]  ;;  %v27248_v26 = vld [vmem:[#allocation49_spill] sm:$0xff]  ;;  %v7253_v41 = vmax.f32 %v27249_v46, 0.0  ;;  %v7255_v20 = vmax.f32 %v23357_v62, 0.0 }
 0x604   :  { %7404 = vst.msk [vmem:[#allocation3 + $0xf1] sm:$0xff] %vm6605_vm3, %v7230_v60  ;;  %7405 = vst.msk [vmem:[#allocation3 + $0xf9] sm:$0xff] %vm6605_vm3, %v7231_v29  ;;  %v7518_v61 = vld [vmem:[#allocation3 + $0x19] sm:$0xff]  ;;  %v7251_v0 = vmax.f32 %v27247_v8, 0.0  ;;  %v7252_v21 = vmax.f32 %v27248_v26, 0.0  ;;  %v7256_v1 = vmax.f32 %v23361_v17, 0.0 }
 0x605   :  { %7406 = vst.msk [vmem:[#allocation3 + $0x109] sm:$0xff] %vm6605_vm3, %v7232_v44  ;;  %7407 = vst.msk [vmem:[#allocation3 + $0x111] sm:$0xff] %vm6605_vm3, %v7233_v27  ;;  %17762 = vmatprep.mubr.msk.f32.mxu1 %vm6605_vm3, %v7518_v61  ;;  %v27250_v6 = vld [vmem:[#allocation51_spill] sm:$0xff]  ;;  %v7257_v38 = vmax.f32 %v23365_v53, 0.0  ;;  %v7258_v42 = vmax.f32 %v23369_v45, 0.0  ;;  %v7259_v13 = vmax.f32 %v23373_v5, 0.0 }
 0x606   :  { %7408 = vst.msk [vmem:[#allocation3 + $0x121] sm:$0xff] %vm6605_vm3, %v7234_v58  ;;  %7409 = vst.msk [vmem:[#allocation3 + $0x129] sm:$0xff] %vm6605_vm3, %v7235_v28  ;;  %v7254_v63 = vmax.f32 %v27250_v6, 0.0  ;;  %17763 = vmatmul.mubr.msk.f32.gmra.mrb[2].mxu1 %vm6605_vm3, %v7519_v57  ;;  %v7520_v56 = vld [vmem:[#allocation3 + $0x31] sm:$0xff]  ;;  %v7260_v62 = vmax.f32 %v23377_v7, 0.0  ;;  %v7261_v17 = vmax.f32 %v23381_v25, 0.0 }
 0x607   :  { %7410 = vst.msk [vmem:[#allocation3 + $0x139] sm:$0xff] %vm6605_vm3, %v7236_v33  ;;  %7411 = vst.msk [vmem:[#allocation3 + $0x141] sm:$0xff] %vm6605_vm3, %v7237_v39  ;;  %17765 = vmatprep.mubr.msk.f32.mxu1 %vm6605_vm3, %v7520_v56  ;;  %v7262_v53 = vmax.f32 %v23385_v12, 0.0  ;;  %v27251_v30 = vld [vmem:[#allocation52_spill] sm:$0xff]  ;;  %v7264_v5 = vmax.f32 %v23393_v36, 0.0  ;;  %v7265_v7 = vmax.f32 %v23397_v9, 0.0 }
 0x608   :  { %7412 = vst.msk [vmem:[#allocation3 + $0x151] sm:$0xff] %vm6605_vm3, %v7238_v24  ;;  %7413 = vst.msk [vmem:[#allocation3 + $0x159] sm:$0xff] %vm6605_vm3, %v7239_v15  ;;  %v7263_v45 = vmax.f32 %v27251_v30, 0.0  ;;  %v15229_v25 = vld [vmem:[%s26699_s5 + $0x20] sm:$0xff]  ;;  %v15230_v12 = vld [vmem:[%s26699_s5 + $0x28] sm:$0xff]  ;;  %v7266_v36 = vmax.f32 %v23401_v10, 0.0 }
 0x609   :  { %7414 = vst.msk [vmem:[#allocation3 + $0x169] sm:$0xff] %vm6605_vm3, %v7240_v32  ;;  %7415 = vst.msk [vmem:[#allocation3 + $0x171] sm:$0xff] %vm6605_vm3, %v7241_v47  ;;  %v7267_v9 = vmax.f32 %v23405_v31, 0.0  ;;  %v7268_v55 = vmax.f32 %v23409_v4, 0.0  ;;  %v27252_v40 = vld [vmem:[#allocation53_spill] sm:$0xff]  ;;  %v7521_v50 = vld [vmem:[#allocation3 + $0x39] sm:$0xff]  ;;  %v23567_v59 = vpack.c.bf16 %v15230_v12, %v15229_v25 }
 0x60a   :  { %7416 = vst.msk [vmem:[#allocation3 + $0x181] sm:$0xff] %vm6605_vm3, %v7242_v16  ;;  %7417 = vst.msk [vmem:[#allocation3 + $0x189] sm:$0xff] %vm6605_vm3, %v7243_v37  ;;  %v7269_v14 = vmax.f32 %v27252_v40, 0.0  ;;  %v27253_v52 = vld [vmem:[#allocation54_spill] sm:$0xff]  ;;  %v27254_v51 = vld [vmem:[#allocation55_spill] sm:$0xff]  ;;  %17766 = vmatmul.mubr.msk.f32.gmra.mrb[4].mxu1 %vm6605_vm3, %v7521_v50  ;;  %v7275_v11 = vmax.f32 %v23433_v34, 0.0 }
 0x60b   :  { %7418 = vst.msk [vmem:[#allocation3 + $0x1c9] sm:$0xff] %vm6605_vm3, %v7244_v35  ;;  %7419 = vst.msk [vmem:[#allocation3 + $0x1d1] sm:$0xff] %vm6605_vm3, %v7245_v49  ;;  %v7270_v22 = vmax.f32 %v27253_v52, 0.0  ;;  %v7271_v18 = vmax.f32 %v27254_v51, 0.0  ;;  %v27255_v10 = vld [vmem:[#allocation56_spill] sm:$0xff]  ;;  %v27256_v31 = vld [vmem:[#allocation57_spill] sm:$0xff]  ;;  %18664 = vmatprep.subr.bf16.mxu1 %v23567_v59 }
 0x60c   :  { %7420 = vst.msk [vmem:[#allocation3 + $0x1e1] sm:$0xff] %vm6605_vm3, %v7246_v48  ;;  %7421 = vst.msk [vmem:[#allocation3 + $0x1e9] sm:$0xff] %vm6605_vm3, %v7247_v23  ;;  %v7272_v2 = vmax.f32 %v27255_v10, 0.0  ;;  %v7273_v3 = vmax.f32 %v27256_v31, 0.0  ;;  %v7522_v4 = vld [vmem:[#allocation3 + $0x49] sm:$0xff]  ;;  %v7523_v34 = vld [vmem:[#allocation3 + $0x51] sm:$0xff] }
 0x60d   :  { %7422 = vst.msk [vmem:[#allocation3 + $0x1f9] sm:$0xff] %vm6605_vm3, %v7248_v19  ;;  %7423 = vst.msk [vmem:[#allocation3 + $0x201] sm:$0xff] %vm6605_vm3, %v7249_v43  ;;  %17768 = vmatprep.mubr.msk.f32.mxu1 %vm6605_vm3, %v7522_v4  ;;  %v7524_v60 = vld [vmem:[#allocation3 + $0x61] sm:$0xff]  ;;  %v7525_v29 = vld [vmem:[#allocation3 + $0x69] sm:$0xff] }
 0x60e   :  { %7424 = vst.msk [vmem:[#allocation3 + $0x211] sm:$0xff] %vm6605_vm3, %v7250_v54  ;;  %7425 = vst.msk [vmem:[#allocation3 + $0x219] sm:$0xff] %vm6605_vm3, %v7251_v0  ;;  %17769 = vmatmul.mubr.msk.f32.gmra.mrb[6].mxu1 %vm6605_vm3, %v7523_v34  ;;  %v7526_v44 = vld [vmem:[#allocation3 + $0x79] sm:$0xff]  ;;  %v7527_v27 = vld [vmem:[#allocation3 + $0x81] sm:$0xff] }
 0x60f   :  { %7426 = vst.msk [vmem:[#allocation3 + $0x229] sm:$0xff] %vm6605_vm3, %v7252_v21  ;;  %7427 = vst.msk [vmem:[#allocation3 + $0x231] sm:$0xff] %vm6605_vm3, %v7253_v41  ;;  %17771 = vmatprep.mubr.msk.f32.mxu1 %vm6605_vm3, %v7524_v60  ;;  %v7528_v58 = vld [vmem:[#allocation3 + $0x91] sm:$0xff]  ;;  %v7529_v28 = vld [vmem:[#allocation3 + $0x99] sm:$0xff] }
 0x610   :  { %7428 = vst.msk [vmem:[#allocation3 + $0x241] sm:$0xff] %vm6605_vm3, %v7254_v63  ;;  %7429 = vst.msk [vmem:[#allocation3 + $0x249] sm:$0xff] %vm6605_vm3, %v7255_v20  ;;  %v7530_v33 = vld [vmem:[#allocation3 + $0xa9] sm:$0xff]  ;;  %v7531_v39 = vld [vmem:[#allocation3 + $0xb1] sm:$0xff] }
 0x611   :  { %7430 = vst.msk [vmem:[#allocation3 + $0x259] sm:$0xff] %vm6605_vm3, %v7256_v1  ;;  %7431 = vst.msk [vmem:[#allocation3 + $0x261] sm:$0xff] %vm6605_vm3, %v7257_v38  ;;  %v7532_v24 = vld [vmem:[#allocation3 + $0xc1] sm:$0xff]  ;;  %v7533_v15 = vld [vmem:[#allocation3 + $0xc9] sm:$0xff] }
 0x612   :  { %7432 = vst.msk [vmem:[#allocation3 + $0x271] sm:$0xff] %vm6605_vm3, %v7258_v42  ;;  %7433 = vst.msk [vmem:[#allocation3 + $0x279] sm:$0xff] %vm6605_vm3, %v7259_v13  ;;  %17772 = vmatmul.mubr.msk.f32.gmra.mrb[8].mxu1 %vm6605_vm3, %v7525_v29  ;;  %v7534_v32 = vld [vmem:[#allocation3 + $0xd9] sm:$0xff]  ;;  %v7535_v47 = vld [vmem:[#allocation3 + $0xe1] sm:$0xff] }
 0x613   :  { %7434 = vst.msk [vmem:[#allocation3 + $0x289] sm:$0xff] %vm6605_vm3, %v7260_v62  ;;  %7435 = vst.msk [vmem:[#allocation3 + $0x291] sm:$0xff] %vm6605_vm3, %v7261_v17  ;;  %17774 = vmatprep.mubr.msk.f32.mxu1 %vm6605_vm3, %v7526_v44  ;;  %v7536_v16 = vld [vmem:[#allocation3 + $0xf1] sm:$0xff]  ;;  %v7537_v37 = vld [vmem:[#allocation3 + $0xf9] sm:$0xff] }
 0x614   :  { %7436 = vst.msk [vmem:[#allocation3 + $0x2a1] sm:$0xff] %vm6605_vm3, %v7262_v53  ;;  %7437 = vst.msk [vmem:[#allocation3 + $0x2a9] sm:$0xff] %vm6605_vm3, %v7263_v45  ;;  %v7538_v35 = vld [vmem:[#allocation3 + $0x109] sm:$0xff]  ;;  %v7539_v49 = vld [vmem:[#allocation3 + $0x111] sm:$0xff] }
 0x615   :  { %7438 = vst.msk [vmem:[#allocation3 + $0x2b9] sm:$0xff] %vm6605_vm3, %v7264_v5  ;;  %7439 = vst.msk [vmem:[#allocation3 + $0x2c1] sm:$0xff] %vm6605_vm3, %v7265_v7  ;;  %v7540_v48 = vld [vmem:[#allocation3 + $0x121] sm:$0xff]  ;;  %v7541_v23 = vld [vmem:[#allocation3 + $0x129] sm:$0xff] }
 0x616   :  { %7440 = vst.msk [vmem:[#allocation3 + $0x2d1] sm:$0xff] %vm6605_vm3, %v7266_v36  ;;  %7441 = vst.msk [vmem:[#allocation3 + $0x2d9] sm:$0xff] %vm6605_vm3, %v7267_v9  ;;  %17775 = vmatmul.mubr.msk.f32.gmra.mrb[10].mxu1 %vm6605_vm3, %v7527_v27  ;;  %v7542_v19 = vld [vmem:[#allocation3 + $0x139] sm:$0xff]  ;;  %v7543_v43 = vld [vmem:[#allocation3 + $0x141] sm:$0xff] }
 0x617   :  { %7442 = vst.msk [vmem:[#allocation3 + $0x2e9] sm:$0xff] %vm6605_vm3, %v7268_v55  ;;  %7443 = vst.msk [vmem:[#allocation3 + $0x2f1] sm:$0xff] %vm6605_vm3, %v7269_v14  ;;  %17777 = vmatprep.mubr.msk.f32.mxu1 %vm6605_vm3, %v7528_v58  ;;  %v7544_v61 = vld [vmem:[#allocation3 + $0x151] sm:$0xff]  ;;  %v7545_v57 = vld [vmem:[#allocation3 + $0x159] sm:$0xff] }
 0x618   :  { %7444 = vst.msk [vmem:[#allocation3 + $0x301] sm:$0xff] %vm6605_vm3, %v7270_v22  ;;  %7445 = vst.msk [vmem:[#allocation3 + $0x309] sm:$0xff] %vm6605_vm3, %v7271_v18  ;;  %v7546_v54 = vld [vmem:[#allocation3 + $0x169] sm:$0xff]  ;;  %v7548_v8 = vld [vmem:[#allocation3 + $0x1b1] sm:$0xff] }
 0x619   :  { %7446 = vst.msk [vmem:[#allocation3 + $0x319] sm:$0xff] %vm6605_vm3, %v7272_v2  ;;  %7447 = vst.msk [vmem:[#allocation3 + $0x321] sm:$0xff] %vm6605_vm3, %v7273_v3  ;;  %v7547_v0 = vld [vmem:[#allocation3 + $0x171] sm:$0xff]  ;;  %v7549_v26 = vld [vmem:[#allocation3 + $0x1b9] sm:$0xff] }
 0x61a   :  { %7449 = vst.msk [vmem:[#allocation3 + $0x339] sm:$0xff] %vm6605_vm3, %v7275_v11  ;;  %17778 = vmatmul.mubr.msk.f32.gmra.mrb[12].mxu1 %vm6605_vm3, %v7529_v28  ;;  %v7550_v21 = vld [vmem:[#allocation3 + $0x1c9] sm:$0xff]  ;;  %v7551_v46 = vld [vmem:[#allocation3 + $0x1d1] sm:$0xff]  ;;  %v7552_v41 = vld [vmem:[#allocation3 + $0x1e1] sm:$0xff] }
 0x61b   :  { %17780 = vmatprep.mubr.msk.f32.mxu1 %vm6605_vm3, %v7530_v33  ;;  %v7553_v6 = vld [vmem:[#allocation3 + $0x1e9] sm:$0xff]  ;;  %v7554_v63 = vld [vmem:[#allocation3 + $0x1f9] sm:$0xff]  ;;  %v7555_v20 = vld [vmem:[#allocation3 + $0x201] sm:$0xff] }
 0x61c   :  { %v7556_v1 = vld [vmem:[#allocation3 + $0x211] sm:$0xff]  ;;  %v7557_v38 = vld [vmem:[#allocation3 + $0x219] sm:$0xff]  ;;  %v7558_v56 = vld [vmem:[#allocation3 + $0x229] sm:$0xff] }
 0x61d   :  { %v7559_v42 = vld [vmem:[#allocation3 + $0x231] sm:$0xff]  ;;  %v7560_v13 = vld [vmem:[#allocation3 + $0x241] sm:$0xff]  ;;  %v7561_v62 = vld [vmem:[#allocation3 + $0x249] sm:$0xff] }
 0x61e   :  { %17781 = vmatmul.mubr.msk.f32.gmra.mrb[14].mxu1 %vm6605_vm3, %v7531_v39  ;;  %v7562_v17 = vld [vmem:[#allocation3 + $0x259] sm:$0xff]  ;;  %v7563_v53 = vld [vmem:[#allocation3 + $0x261] sm:$0xff]  ;;  %v7564_v30 = vld [vmem:[#allocation3 + $0x271] sm:$0xff] }
 0x61f   :  { %17783 = vmatprep.mubr.msk.f32.mxu1 %vm6605_vm3, %v7532_v24  ;;  %v7565_v45 = vld [vmem:[#allocation3 + $0x279] sm:$0xff]  ;;  %v7566_v5 = vld [vmem:[#allocation3 + $0x289] sm:$0xff]  ;;  %v7567_v7 = vld [vmem:[#allocation3 + $0x291] sm:$0xff] }
 0x620   :  { %v7568_v25 = vld [vmem:[#allocation3 + $0x2a1] sm:$0xff]  ;;  %v7569_v12 = vld [vmem:[#allocation3 + $0x2a9] sm:$0xff]  ;;  %v7570_v36 = vld [vmem:[#allocation3 + $0x2b9] sm:$0xff] }
 0x621   :  { %v7571_v9 = vld [vmem:[#allocation3 + $0x2c1] sm:$0xff]  ;;  %v7572_v55 = vld [vmem:[#allocation3 + $0x2d1] sm:$0xff]  ;;  %v7573_v40 = vld [vmem:[#allocation3 + $0x2d9] sm:$0xff] }
 0x622   :  { %17784 = vmatmul.mubr.msk.f32.gmra.mrb[16].mxu1 %vm6605_vm3, %v7533_v15  ;;  %v7574_v14 = vld [vmem:[#allocation3 + $0x2e9] sm:$0xff]  ;;  %v7575_v50 = vld [vmem:[#allocation3 + $0x2f1] sm:$0xff]  ;;  %v7576_v52 = vld [vmem:[#allocation3 + $0x301] sm:$0xff] }
 0x623   :  { %17786 = vmatprep.mubr.msk.f32.mxu1 %vm6605_vm3, %v7534_v32  ;;  %v7577_v22 = vld [vmem:[#allocation3 + $0x309] sm:$0xff]  ;;  %v7578_v51 = vld [vmem:[#allocation3 + $0x319] sm:$0xff]  ;;  %v7579_v10 = vld [vmem:[#allocation3 + $0x321] sm:$0xff] }
 0x624   :  { %v7450_v18 = vld [vmem:[#allocation3] sm:$0xff]  ;;  %v7451_v2 = vld [vmem:[#allocation3 + $0x8] sm:$0xff]  ;;  %v15295_v31 = vld [vmem:[%s26699_s5 + $0x30] sm:$0xff] }
 0x625   :  { %v15296_v3 = vld [vmem:[%s26699_s5 + $0x38] sm:$0xff]  ;;  %v23648_v34 = vld [vmem:[#allocation3 + $0x20] sm:$0xff]  ;;  %v23652_v60 = vld [vmem:[#allocation3 + $0x30] sm:$0xff] }
 0x626   :  { %17787 = vmatmul.mubr.msk.f32.gmra.mrb[18].mxu1 %vm6605_vm3, %v7535_v47  ;;  %v23639_v4 = vpack.c.bf16 %v15296_v3, %v15295_v31  ;;  %v23642_v11 = vld [vmem:[#allocation3 + $0x18] sm:$0xff]  ;;  %v23664_v44 = vld [vmem:[#allocation3 + $0x50] sm:$0xff]  ;;  %v23668_v27 = vld [vmem:[#allocation3 + $0x60] sm:$0xff] }
 0x627   :  { %17789 = vmatprep.mubr.msk.f32.mxu1 %vm6605_vm3, %v7536_v16  ;;  %v23656_v29 = vld [vmem:[#allocation3 + $0x38] sm:$0xff]  ;;  %v23672_v58 = vld [vmem:[#allocation3 + $0x68] sm:$0xff]  ;;  %v23680_v33 = vld [vmem:[#allocation3 + $0x80] sm:$0xff] }
 0x628   :  { %v23676_v28 = vld [vmem:[#allocation3 + $0x78] sm:$0xff]  ;;  %v23684_v39 = vld [vmem:[#allocation3 + $0x90] sm:$0xff]  ;;  %v23692_v15 = vld [vmem:[#allocation3 + $0xa8] sm:$0xff] }
 0x629   :  { %v23688_v24 = vld [vmem:[#allocation3 + $0x98] sm:$0xff]  ;;  %v23696_v32 = vld [vmem:[#allocation3 + $0xb0] sm:$0xff]  ;;  %v23700_v47 = vld [vmem:[#allocation3 + $0xc0] sm:$0xff] }
 0x62a   :  { %17790 = vmatmul.mubr.msk.f32.gmra.mrb[20].mxu1 %vm6605_vm3, %v7537_v37  ;;  %v23704_v16 = vld [vmem:[#allocation3 + $0xc8] sm:$0xff]  ;;  %v23708_v37 = vld [vmem:[#allocation3 + $0xd8] sm:$0xff]  ;;  %v23882_v3 = vld [vmem:[#allocation3 + $0x320] sm:$0xff] }
 0x62b   :  { %17792 = vmatprep.mubr.msk.f32.mxu1 %vm6605_vm3, %v7538_v35  ;;  %v23712_v35 = vld [vmem:[#allocation3 + $0xe0] sm:$0xff]  ;;  %27260 = vst [vmem:[#allocation61_spill] sm:$0xff] %v23882_v3 }
 0x62c   :  { %v8737_v31 = vld [vmem:[#allocation3 + $0x2] sm:$0xff] }
 0x62e   :  { %17793 = vmatmul.mubr.msk.f32.gmra.mrb[22].mxu1 %vm6605_vm3, %v7539_v49  ;;  %v23716_v49 = vld [vmem:[#allocation3 + $0xf0] sm:$0xff] }
 0x62f   :  { %17795 = vmatprep.mubr.msk.f32.mxu1 %vm6605_vm3, %v7540_v48  ;;  %v23720_v48 = vld [vmem:[#allocation3 + $0xf8] sm:$0xff] }
 0x632   :  { %17796 = vmatmul.mubr.msk.f32.gmra.mrb[24].mxu1 %vm6605_vm3, %v7541_v23  ;;  %v23724_v23 = vld [vmem:[#allocation3 + $0x108] sm:$0xff] }
 0x633   :  { %17798 = vmatprep.mubr.msk.f32.mxu1 %vm6605_vm3, %v7542_v19  ;;  %v23728_v19 = vld [vmem:[#allocation3 + $0x110] sm:$0xff] }
 0x636   :  { %17799 = vmatmul.mubr.msk.f32.gmra.mrb[26].mxu1 %vm6605_vm3, %v7543_v43  ;;  %v23732_v43 = vld [vmem:[#allocation3 + $0x120] sm:$0xff] }
 0x637   :  { %17801 = vmatprep.mubr.msk.f32.mxu1 %vm6605_vm3, %v7544_v61  ;;  %v23736_v61 = vld [vmem:[#allocation3 + $0x128] sm:$0xff] }
 0x63a   :  { %17802 = vmatmul.mubr.msk.f32.gmra.mrb[28].mxu1 %vm6605_vm3, %v7545_v57  ;;  %v23740_v57 = vld [vmem:[#allocation3 + $0x138] sm:$0xff] }
 0x63b   :  { %17804 = vmatprep.mubr.msk.f32.mxu1 %vm6605_vm3, %v7546_v54  ;;  %v23744_v54 = vld [vmem:[#allocation3 + $0x140] sm:$0xff] }
 0x63e   :  { %17805 = vmatmul.mubr.msk.f32.gmra.mrb[30].mxu1 %vm6605_vm3, %v7547_v0  ;;  %v23752_v0 = vld [vmem:[#allocation3 + $0x158] sm:$0xff] }
 0x63f   :  { %17807 = vmatprep.mubr.msk.f32.mxu1 %vm6605_vm3, %v7548_v8  ;;  %v23748_v8 = vld [vmem:[#allocation3 + $0x150] sm:$0xff] }
 0x642   :  { %17808 = vmatmul.mubr.msk.f32.gmra.mrb[32].mxu1 %vm6605_vm3, %v7549_v26  ;;  %v23756_v26 = vld [vmem:[#allocation3 + $0x168] sm:$0xff] }
 0x643   :  { %17810 = vmatprep.mubr.msk.f32.mxu1 %vm6605_vm3, %v7550_v21  ;;  %v7482_v21 = vld [vmem:[#allocation3 + $0x1b0] sm:$0xff] }
 0x646   :  { %17811 = vmatmul.mubr.msk.f32.gmra.mrb[34].mxu1 %vm6605_vm3, %v7551_v46  ;;  %v23760_v46 = vld [vmem:[#allocation3 + $0x170] sm:$0xff] }
 0x647   :  { %17813 = vmatprep.mubr.msk.f32.mxu1 %vm6605_vm3, %v7552_v41  ;;  %v7483_v41 = vld [vmem:[#allocation3 + $0x1b8] sm:$0xff] }
 0x64a   :  { %17814 = vmatmul.mubr.msk.f32.gmra.mrb[36].mxu1 %vm6605_vm3, %v7553_v6  ;;  %v23766_v6 = vld [vmem:[#allocation3 + $0x1c8] sm:$0xff] }
 0x64b   :  { %17816 = vmatprep.mubr.msk.f32.mxu1 %vm6605_vm3, %v7554_v63  ;;  %v23770_v63 = vld [vmem:[#allocation3 + $0x1d0] sm:$0xff] }
 0x64e   :  { %17817 = vmatmul.mubr.msk.f32.gmra.mrb[38].mxu1 %vm6605_vm3, %v7555_v20  ;;  %v23774_v20 = vld [vmem:[#allocation3 + $0x1e0] sm:$0xff] }
 0x64f   :  { %17819 = vmatprep.mubr.msk.f32.mxu1 %vm6605_vm3, %v7556_v1  ;;  %v23778_v1 = vld [vmem:[#allocation3 + $0x1e8] sm:$0xff] }
 0x652   :  { %17820 = vmatmul.mubr.msk.f32.gmra.mrb[40].mxu1 %vm6605_vm3, %v7557_v38  ;;  %v23782_v38 = vld [vmem:[#allocation3 + $0x1f8] sm:$0xff] }
 0x653   :  { %17822 = vmatprep.mubr.msk.f32.mxu1 %vm6605_vm3, %v7558_v56  ;;  %v23786_v56 = vld [vmem:[#allocation3 + $0x200] sm:$0xff] }
 0x656   :  { %17823 = vmatmul.mubr.msk.f32.gmra.mrb[42].mxu1 %vm6605_vm3, %v7559_v42  ;;  %v23790_v42 = vld [vmem:[#allocation3 + $0x210] sm:$0xff] }
 0x657   :  { %17825 = vmatprep.mubr.msk.f32.mxu1 %vm6605_vm3, %v7560_v13  ;;  %v23794_v13 = vld [vmem:[#allocation3 + $0x218] sm:$0xff] }
 0x65a   :  { %17826 = vmatmul.mubr.msk.f32.gmra.mrb[44].mxu1 %vm6605_vm3, %v7561_v62  ;;  %v23798_v62 = vld [vmem:[#allocation3 + $0x228] sm:$0xff] }
 0x65b   :  { %17828 = vmatprep.mubr.msk.f32.mxu1 %vm6605_vm3, %v7562_v17  ;;  %v23802_v17 = vld [vmem:[#allocation3 + $0x230] sm:$0xff] }
 0x65e   :  { %17829 = vmatmul.mubr.msk.f32.gmra.mrb[46].mxu1 %vm6605_vm3, %v7563_v53  ;;  %v23806_v53 = vld [vmem:[#allocation3 + $0x240] sm:$0xff] }
 0x65f   :  { %17831 = vmatprep.mubr.msk.f32.mxu1 %vm6605_vm3, %v7564_v30  ;;  %v23810_v30 = vld [vmem:[#allocation3 + $0x248] sm:$0xff] }
 0x662   :  { %17832 = vmatmul.mubr.msk.f32.gmra.mrb[48].mxu1 %vm6605_vm3, %v7565_v45  ;;  %v23814_v45 = vld [vmem:[#allocation3 + $0x258] sm:$0xff] }
 0x663   :  { %17834 = vmatprep.mubr.msk.f32.mxu1 %vm6605_vm3, %v7566_v5  ;;  %v23818_v5 = vld [vmem:[#allocation3 + $0x260] sm:$0xff] }
 0x666   :  { %17835 = vmatmul.mubr.msk.f32.gmra.mrb[50].mxu1 %vm6605_vm3, %v7567_v7  ;;  %v23822_v7 = vld [vmem:[#allocation3 + $0x270] sm:$0xff] }
 0x667   :  { %17837 = vmatprep.mubr.msk.f32.mxu1 %vm6605_vm3, %v7568_v25  ;;  %v23826_v25 = vld [vmem:[#allocation3 + $0x278] sm:$0xff] }
 0x66a   :  { %17838 = vmatmul.mubr.msk.f32.gmra.mrb[52].mxu1 %vm6605_vm3, %v7569_v12  ;;  %v23830_v12 = vld [vmem:[#allocation3 + $0x288] sm:$0xff] }
 0x66b   :  { %17840 = vmatprep.mubr.msk.f32.mxu1 %vm6605_vm3, %v7570_v36  ;;  %v23834_v36 = vld [vmem:[#allocation3 + $0x290] sm:$0xff] }
 0x66e   :  { %17841 = vmatmul.mubr.msk.f32.gmra.mrb[54].mxu1 %vm6605_vm3, %v7571_v9  ;;  %v23838_v9 = vld [vmem:[#allocation3 + $0x2a0] sm:$0xff] }
 0x66f   :  { %17843 = vmatprep.mubr.msk.f32.mxu1 %vm6605_vm3, %v7572_v55  ;;  %v23842_v55 = vld [vmem:[#allocation3 + $0x2a8] sm:$0xff] }
 0x672   :  { %17844 = vmatmul.mubr.msk.f32.gmra.mrb[56].mxu1 %vm6605_vm3, %v7573_v40  ;;  %v23846_v40 = vld [vmem:[#allocation3 + $0x2b8] sm:$0xff] }
 0x673   :  { %17846 = vmatprep.mubr.msk.f32.mxu1 %vm6605_vm3, %v7574_v14  ;;  %v23850_v14 = vld [vmem:[#allocation3 + $0x2c0] sm:$0xff] }
 0x676   :  { %17847 = vmatmul.mubr.msk.f32.gmra.mrb[58].mxu1 %vm6605_vm3, %v7575_v50  ;;  %v23854_v50 = vld [vmem:[#allocation3 + $0x2d0] sm:$0xff] }
 0x677   :  { %17849 = vmatprep.mubr.msk.f32.mxu1 %vm6605_vm3, %v7576_v52  ;;  %v23858_v52 = vld [vmem:[#allocation3 + $0x2d8] sm:$0xff] }
 0x67a   :  { %17850 = vmatmul.mubr.msk.f32.gmra.mrb[60].mxu1 %vm6605_vm3, %v7577_v22  ;;  %v23862_v22 = vld [vmem:[#allocation3 + $0x2e8] sm:$0xff] }
 0x67b   :  { %17852 = vmatprep.mubr.msk.f32.mxu1 %vm6605_vm3, %v7578_v51  ;;  %v23866_v51 = vld [vmem:[#allocation3 + $0x2f0] sm:$0xff] }
 0x67e   :  { %17853 = vmatmul.mubr.msk.f32.gmra.mrb[62].mxu1 %vm6605_vm3, %v7579_v10  ;;  %v23874_v10 = vld [vmem:[#allocation3 + $0x308] sm:$0xff] }
 0x67f   :  { %17859 = vmatprep.mubr.msk.f32.mxu1 %vm6605_vm3, %v7450_v18  ;;  %v23870_v18 = vld [vmem:[#allocation3 + $0x300] sm:$0xff]  ;;  %27258 = vst [vmem:[#allocation59_spill] sm:$0xff] %v23874_v10 }
 0x680   :  { %27257 = vst [vmem:[#allocation58_spill] sm:$0xff] %v23870_v18 }
 0x682   :  { %17860 = vmatmul.mubr.msk.f32.vlgmr.msra.gmra.mrb[0].mxu1 %vm6605_vm3, %v7451_v2  ;;  %v23878_v2 = vld [vmem:[#allocation3 + $0x318] sm:$0xff] }
 0x683   :  { %18666 = vmatpush3.bf16.msra.mxu1 %v23567_v59  ;;  %17862 = vmatprep.mubr.msk.f32.mxu1 %vm6605_vm3, %v23642_v11  ;;  %v23660_v59 = vld [vmem:[#allocation3 + $0x48] sm:$0xff]  ;;  %27259 = vst [vmem:[#allocation60_spill] sm:$0xff] %v23878_v2 }
 0x684   :  { %18668 = vmatprep.subr.bf16.mxu1 %v23639_v4 }
 0x686   :  { %17863 = vmatmul.mubr.msk.f32.gmra.mrb[2].mxu1 %vm6605_vm3, %v23648_v34 }
 0x687   :  { %17865 = vmatprep.mubr.msk.f32.mxu1 %vm6605_vm3, %v23652_v60 }
 0x68a   :  { %17866 = vmatmul.mubr.msk.f32.gmra.mrb[4].mxu1 %vm6605_vm3, %v23656_v29 }
 0x68b   :  { %17868 = vmatprep.mubr.msk.f32.mxu1 %vm6605_vm3, %v23660_v59 }
 0x68e   :  { %17869 = vmatmul.mubr.msk.f32.gmra.mrb[6].mxu1 %vm6605_vm3, %v23664_v44 }
 0x68f   :  { %17871 = vmatprep.mubr.msk.f32.mxu1 %vm6605_vm3, %v23668_v27 }
 0x692   :  { %17872 = vmatmul.mubr.msk.f32.gmra.mrb[8].mxu1 %vm6605_vm3, %v23672_v58 }
 0x693   :  { %17874 = vmatprep.mubr.msk.f32.mxu1 %vm6605_vm3, %v23676_v28 }
 0x696   :  { %17875 = vmatmul.mubr.msk.f32.gmra.mrb[10].mxu1 %vm6605_vm3, %v23680_v33 }
 0x697   :  { %17877 = vmatprep.mubr.msk.f32.mxu1 %vm6605_vm3, %v23684_v39 }
 0x69a   :  { %17878 = vmatmul.mubr.msk.f32.gmra.mrb[12].mxu1 %vm6605_vm3, %v23688_v24 }
 0x69b   :  { %17880 = vmatprep.mubr.msk.f32.mxu1 %vm6605_vm3, %v23692_v15 }
 0x69e   :  { %17881 = vmatmul.mubr.msk.f32.gmra.mrb[14].mxu1 %vm6605_vm3, %v23696_v32 }
 0x69f   :  { %17883 = vmatprep.mubr.msk.f32.mxu1 %vm6605_vm3, %v23700_v47 }
 0x6a2   :  { %17884 = vmatmul.mubr.msk.f32.gmra.mrb[16].mxu1 %vm6605_vm3, %v23704_v16 }
 0x6a3   :  { %17886 = vmatprep.mubr.msk.f32.mxu1 %vm6605_vm3, %v23708_v37 }
 0x6a6   :  { %17887 = vmatmul.mubr.msk.f32.gmra.mrb[18].mxu1 %vm6605_vm3, %v23712_v35 }
 0x6a7   :  { %17889 = vmatprep.mubr.msk.f32.mxu1 %vm6605_vm3, %v23716_v49 }
 0x6aa   :  { %17890 = vmatmul.mubr.msk.f32.gmra.mrb[20].mxu1 %vm6605_vm3, %v23720_v48 }
 0x6ab   :  { %17892 = vmatprep.mubr.msk.f32.mxu1 %vm6605_vm3, %v23724_v23 }
 0x6ae   :  { %17893 = vmatmul.mubr.msk.f32.gmra.mrb[22].mxu1 %vm6605_vm3, %v23728_v19 }
 0x6af   :  { %17895 = vmatprep.mubr.msk.f32.mxu1 %vm6605_vm3, %v23732_v43 }
 0x6b2   :  { %17896 = vmatmul.mubr.msk.f32.gmra.mrb[24].mxu1 %vm6605_vm3, %v23736_v61 }
 0x6b3   :  { %17898 = vmatprep.mubr.msk.f32.mxu1 %vm6605_vm3, %v23740_v57 }
 0x6b6   :  { %17899 = vmatmul.mubr.msk.f32.gmra.mrb[26].mxu1 %vm6605_vm3, %v23744_v54 }
 0x6b7   :  { %17901 = vmatprep.mubr.msk.f32.mxu1 %vm6605_vm3, %v23748_v8 }
 0x6ba   :  { %17902 = vmatmul.mubr.msk.f32.gmra.mrb[28].mxu1 %vm6605_vm3, %v23752_v0 }
 0x6bb   :  { %17904 = vmatprep.mubr.msk.f32.mxu1 %vm6605_vm3, %v23756_v26 }
 0x6be   :  { %17905 = vmatmul.mubr.msk.f32.gmra.mrb[30].mxu1 %vm6605_vm3, %v23760_v46 }
 0x6bf   :  { %17907 = vmatprep.mubr.msk.f32.mxu1 %vm6605_vm3, %v7482_v21  ;;  %v8738_v21 = vld [vmem:[#allocation3 + $0xa] sm:$0xff] }
 0x6c2   :  { %17908 = vmatmul.mubr.msk.f32.gmra.mrb[32].mxu1 %vm6605_vm3, %v7483_v41  ;;  %v15361_v41 = vld [vmem:[%s26699_s5 + $0x40] sm:$0xff] }
 0x6c3   :  { %17910 = vmatprep.mubr.msk.f32.mxu1 %vm6605_vm3, %v23766_v6 }
 0x6c6   :  { %17911 = vmatmul.mubr.msk.f32.gmra.mrb[34].mxu1 %vm6605_vm3, %v23770_v63 }
 0x6c7   :  { %17913 = vmatprep.mubr.msk.f32.mxu1 %vm6605_vm3, %v23774_v20 }
 0x6ca   :  { %17914 = vmatmul.mubr.msk.f32.gmra.mrb[36].mxu1 %vm6605_vm3, %v23778_v1 }
 0x6cb   :  { %17916 = vmatprep.mubr.msk.f32.mxu1 %vm6605_vm3, %v23782_v38 }
 0x6ce   :  { %17917 = vmatmul.mubr.msk.f32.gmra.mrb[38].mxu1 %vm6605_vm3, %v23786_v56 }
 0x6cf   :  { %17919 = vmatprep.mubr.msk.f32.mxu1 %vm6605_vm3, %v23790_v42 }
 0x6d2   :  { %17920 = vmatmul.mubr.msk.f32.gmra.mrb[40].mxu1 %vm6605_vm3, %v23794_v13 }
 0x6d3   :  { %17922 = vmatprep.mubr.msk.f32.mxu1 %vm6605_vm3, %v23798_v62 }
 0x6d6   :  { %17923 = vmatmul.mubr.msk.f32.gmra.mrb[42].mxu1 %vm6605_vm3, %v23802_v17 }
 0x6d7   :  { %17925 = vmatprep.mubr.msk.f32.mxu1 %vm6605_vm3, %v23806_v53 }
 0x6da   :  { %17926 = vmatmul.mubr.msk.f32.gmra.mrb[44].mxu1 %vm6605_vm3, %v23810_v30 }
 0x6db   :  { %17928 = vmatprep.mubr.msk.f32.mxu1 %vm6605_vm3, %v23814_v45 }
 0x6de   :  { %17929 = vmatmul.mubr.msk.f32.gmra.mrb[46].mxu1 %vm6605_vm3, %v23818_v5 }
 0x6df   :  { %17931 = vmatprep.mubr.msk.f32.mxu1 %vm6605_vm3, %v23822_v7 }
 0x6e2   :  { %17932 = vmatmul.mubr.msk.f32.gmra.mrb[48].mxu1 %vm6605_vm3, %v23826_v25 }
 0x6e3   :  { %17934 = vmatprep.mubr.msk.f32.mxu1 %vm6605_vm3, %v23830_v12 }
 0x6e6   :  { %17935 = vmatmul.mubr.msk.f32.gmra.mrb[50].mxu1 %vm6605_vm3, %v23834_v36 }
 0x6e7   :  { %17937 = vmatprep.mubr.msk.f32.mxu1 %vm6605_vm3, %v23838_v9 }
 0x6ea   :  { %17938 = vmatmul.mubr.msk.f32.gmra.mrb[52].mxu1 %vm6605_vm3, %v23842_v55 }
 0x6eb   :  { %17940 = vmatprep.mubr.msk.f32.mxu1 %vm6605_vm3, %v23846_v40 }
 0x6ee   :  { %17941 = vmatmul.mubr.msk.f32.gmra.mrb[54].mxu1 %vm6605_vm3, %v23850_v14 }
 0x6ef   :  { %17943 = vmatprep.mubr.msk.f32.mxu1 %vm6605_vm3, %v23854_v50 }
 0x6f2   :  { %17944 = vmatmul.mubr.msk.f32.gmra.mrb[56].mxu1 %vm6605_vm3, %v23858_v52 }
 0x6f3   :  { %17946 = vmatprep.mubr.msk.f32.mxu1 %vm6605_vm3, %v23862_v22 }
 0x6f6   :  { %17947 = vmatmul.mubr.msk.f32.gmra.mrb[58].mxu1 %vm6605_vm3, %v23866_v51 }
 0x6f7   :  { %17949 = vmatprep.mubr.msk.f32.mxu1 %vm6605_vm3, %v23870_v18 }
 0x6fa   :  { %17950 = vmatmul.mubr.msk.f32.gmra.mrb[60].mxu1 %vm6605_vm3, %v23874_v10  ;;  %v15362_v10 = vld [vmem:[%s26699_s5 + $0x48] sm:$0xff] }
 0x6fb   :  { %17952 = vmatprep.mubr.msk.f32.mxu1 %vm6605_vm3, %v23878_v2  ;;  %v23893_v18 = vpack.c.bf16 %v15362_v10, %v15361_v41  ;;  %v23896_v2 = vld [vmem:[#allocation3 + $0x1a] sm:$0xff]  ;;  %v23922_v41 = vld [vmem:[#allocation3 + $0x62] sm:$0xff] }
 0x6fc   :  { %v23910_v10 = vld [vmem:[#allocation3 + $0x3a] sm:$0xff]  ;;  %27266 = vst [vmem:[#allocation63_spill] sm:$0xff] %v23922_v41 }
 0x6fd   :  { %27263 = vst [vmem:[#allocation6_spill] sm:$0xff] %v23910_v10 }
 0x6fe   :  { %17953 = vmatmul.mubr.msk.f32.gmra.mrb[62].mxu1 %vm6605_vm3, %v23882_v3  ;;  %v23906_v3 = vld [vmem:[#allocation3 + $0x32] sm:$0xff] }
 0x6ff   :  { %17959 = vmatprep.mubr.msk.f32.mxu1 %vm6605_vm3, %v8737_v31  ;;  %v23902_v31 = vld [vmem:[#allocation3 + $0x22] sm:$0xff]  ;;  %27262 = vst [vmem:[#allocation5_spill] sm:$0xff] %v23906_v3 }
 0x700   :  { %27261 = vst [vmem:[#allocation4_spill] sm:$0xff] %v23902_v31 }
 0x702   :  { %17960 = vmatmul.mubr.msk.f32.vlgmr.msra.gmra.mrb[0].mxu1 %vm6605_vm3, %v8738_v21  ;;  %v23918_v21 = vld [vmem:[#allocation3 + $0x52] sm:$0xff] }
 0x703   :  { %18670 = vmatpush3.bf16.msra.mxu1 %v23639_v4  ;;  %17962 = vmatprep.mubr.msk.f32.mxu1 %vm6605_vm3, %v23896_v2  ;;  %v23914_v4 = vld [vmem:[#allocation3 + $0x4a] sm:$0xff]  ;;  %27265 = vst [vmem:[#allocation62_spill] sm:$0xff] %v23918_v21 }
 0x704   :  { %18672 = vmatprep.subr.bf16.mxu1 %v23893_v18  ;;  %27264 = vst [vmem:[#allocation7_spill] sm:$0xff] %v23914_v4 }
 0x706   :  { %17963 = vmatmul.mubr.msk.f32.gmra.mrb[2].mxu1 %vm6605_vm3, %v23902_v31  ;;  %v24014_v31 = vld [vmem:[#allocation3 + $0x172] sm:$0xff] }
 0x707   :  { %17965 = vmatprep.mubr.msk.f32.mxu1 %vm6605_vm3, %v23906_v3  ;;  %v23926_v3 = vld [vmem:[#allocation3 + $0x6a] sm:$0xff]  ;;  %27289 = vst [vmem:[#allocation15_spill] sm:$0xff] %v24014_v31 }
 0x708   :  { %27267 = vst [vmem:[#allocation64_spill] sm:$0xff] %v23926_v3 }
 0x70a   :  { %17966 = vmatmul.mubr.msk.f32.gmra.mrb[4].mxu1 %vm6605_vm3, %v23910_v10  ;;  %v23930_v10 = vld [vmem:[#allocation3 + $0x7a] sm:$0xff] }
 0x70b   :  { %17968 = vmatprep.mubr.msk.f32.mxu1 %vm6605_vm3, %v23914_v4  ;;  %27268 = vst [vmem:[#allocation65_spill] sm:$0xff] %v23930_v10  ;;  %v23934_v4 = vld [vmem:[#allocation3 + $0x82] sm:$0xff] }
 0x70c   :  { %27269 = vst [vmem:[#allocation66_spill] sm:$0xff] %v23934_v4 }
 0x70e   :  { %17969 = vmatmul.mubr.msk.f32.gmra.mrb[6].mxu1 %vm6605_vm3, %v23918_v21  ;;  %v23938_v21 = vld [vmem:[#allocation3 + $0x92] sm:$0xff] }
 0x70f   :  { %17971 = vmatprep.mubr.msk.f32.mxu1 %vm6605_vm3, %v23922_v41  ;;  %27270 = vst [vmem:[#allocation67_spill] sm:$0xff] %v23938_v21  ;;  %v23942_v41 = vld [vmem:[#allocation3 + $0x9a] sm:$0xff] }
 0x710   :  { %27271 = vst [vmem:[#allocation68_spill] sm:$0xff] %v23942_v41 }
 0x712   :  { %17972 = vmatmul.mubr.msk.f32.gmra.mrb[8].mxu1 %vm6605_vm3, %v23926_v3  ;;  %v23946_v3 = vld [vmem:[#allocation3 + $0xaa] sm:$0xff] }
 0x713   :  { %17974 = vmatprep.mubr.msk.f32.mxu1 %vm6605_vm3, %v23930_v10  ;;  %27272 = vst [vmem:[#allocation69_spill] sm:$0xff] %v23946_v3  ;;  %v23950_v10 = vld [vmem:[#allocation3 + $0xb2] sm:$0xff] }
 0x714   :  { %27273 = vst [vmem:[#allocation70_spill] sm:$0xff] %v23950_v10 }
 0x716   :  { %17975 = vmatmul.mubr.msk.f32.gmra.mrb[10].mxu1 %vm6605_vm3, %v23934_v4  ;;  %v23954_v4 = vld [vmem:[#allocation3 + $0xc2] sm:$0xff] }
 0x717   :  { %17977 = vmatprep.mubr.msk.f32.mxu1 %vm6605_vm3, %v23938_v21  ;;  %27274 = vst [vmem:[#allocation71_spill] sm:$0xff] %v23954_v4  ;;  %v23958_v21 = vld [vmem:[#allocation3 + $0xca] sm:$0xff] }
 0x718   :  { %27275 = vst [vmem:[#allocation72_spill] sm:$0xff] %v23958_v21 }
 0x71a   :  { %17978 = vmatmul.mubr.msk.f32.gmra.mrb[12].mxu1 %vm6605_vm3, %v23942_v41  ;;  %v23962_v41 = vld [vmem:[#allocation3 + $0xda] sm:$0xff] }
 0x71b   :  { %17980 = vmatprep.mubr.msk.f32.mxu1 %vm6605_vm3, %v23946_v3  ;;  %27276 = vst [vmem:[#allocation8_spill] sm:$0xff] %v23962_v41  ;;  %v23966_v3 = vld [vmem:[#allocation3 + $0xe2] sm:$0xff] }
 0x71c   :  { %27277 = vst [vmem:[#allocation10_spill] sm:$0xff] %v23966_v3 }
 0x71e   :  { %17981 = vmatmul.mubr.msk.f32.gmra.mrb[14].mxu1 %vm6605_vm3, %v23950_v10  ;;  %v23970_v10 = vld [vmem:[#allocation3 + $0xf2] sm:$0xff] }
 0x71f   :  { %17983 = vmatprep.mubr.msk.f32.mxu1 %vm6605_vm3, %v23954_v4  ;;  %27278 = vst [vmem:[#allocation9_spill] sm:$0xff] %v23970_v10  ;;  %v23974_v4 = vld [vmem:[#allocation3 + $0xfa] sm:$0xff] }
 0x720   :  { %27279 = vst [vmem:[#allocation12_spill] sm:$0xff] %v23974_v4 }
 0x722   :  { %17984 = vmatmul.mubr.msk.f32.gmra.mrb[16].mxu1 %vm6605_vm3, %v23958_v21  ;;  %v23978_v21 = vld [vmem:[#allocation3 + $0x10a] sm:$0xff] }
 0x723   :  { %17986 = vmatprep.mubr.msk.f32.mxu1 %vm6605_vm3, %v23962_v41  ;;  %27280 = vst [vmem:[#allocation11_spill] sm:$0xff] %v23978_v21  ;;  %v23982_v41 = vld [vmem:[#allocation3 + $0x112] sm:$0xff] }
 0x724   :  { %27281 = vst [vmem:[#allocation14_spill] sm:$0xff] %v23982_v41 }
 0x726   :  { %17987 = vmatmul.mubr.msk.f32.gmra.mrb[18].mxu1 %vm6605_vm3, %v23966_v3  ;;  %v23986_v3 = vld [vmem:[#allocation3 + $0x122] sm:$0xff] }
 0x727   :  { %17989 = vmatprep.mubr.msk.f32.mxu1 %vm6605_vm3, %v23970_v10  ;;  %27282 = vst [vmem:[#allocation13_spill] sm:$0xff] %v23986_v3  ;;  %v23990_v10 = vld [vmem:[#allocation3 + $0x12a] sm:$0xff] }
 0x728   :  { %27283 = vst [vmem:[#allocation16_spill] sm:$0xff] %v23990_v10 }
 0x72a   :  { %17990 = vmatmul.mubr.msk.f32.gmra.mrb[20].mxu1 %vm6605_vm3, %v23974_v4  ;;  %v23994_v4 = vld [vmem:[#allocation3 + $0x13a] sm:$0xff] }
 0x72b   :  { %17992 = vmatprep.mubr.msk.f32.mxu1 %vm6605_vm3, %v23978_v21  ;;  %27284 = vst [vmem:[#allocation19_spill] sm:$0xff] %v23994_v4  ;;  %v23998_v21 = vld [vmem:[#allocation3 + $0x142] sm:$0xff] }
 0x72c   :  { %27285 = vst [vmem:[#allocation27_spill] sm:$0xff] %v23998_v21 }
 0x72e   :  { %17993 = vmatmul.mubr.msk.f32.gmra.mrb[22].mxu1 %vm6605_vm3, %v23982_v41  ;;  %v24002_v41 = vld [vmem:[#allocation3 + $0x152] sm:$0xff] }
 0x72f   :  { %17995 = vmatprep.mubr.msk.f32.mxu1 %vm6605_vm3, %v23986_v3  ;;  %27286 = vst [vmem:[#allocation30_spill] sm:$0xff] %v24002_v41  ;;  %v24006_v3 = vld [vmem:[#allocation3 + $0x15a] sm:$0xff] }
 0x730   :  { %27287 = vst [vmem:[#allocation29_spill] sm:$0xff] %v24006_v3 }
 0x732   :  { %17996 = vmatmul.mubr.msk.f32.gmra.mrb[24].mxu1 %vm6605_vm3, %v23990_v10  ;;  %v24010_v10 = vld [vmem:[#allocation3 + $0x16a] sm:$0xff] }
 0x733   :  { %17998 = vmatprep.mubr.msk.f32.mxu1 %vm6605_vm3, %v23994_v4  ;;  %27288 = vst [vmem:[#allocation31_spill] sm:$0xff] %v24010_v10  ;;  %v8769_v4 = vld [vmem:[#allocation3 + $0x1b2] sm:$0xff] }
 0x736   :  { %17999 = vmatmul.mubr.msk.f32.gmra.mrb[26].mxu1 %vm6605_vm3, %v23998_v21  ;;  %v8770_v21 = vld [vmem:[#allocation3 + $0x1ba] sm:$0xff] }
 0x737   :  { %18001 = vmatprep.mubr.msk.f32.mxu1 %vm6605_vm3, %v24002_v41  ;;  %v24020_v41 = vld [vmem:[#allocation3 + $0x1ca] sm:$0xff] }
 0x73a   :  { %18002 = vmatmul.mubr.msk.f32.gmra.mrb[28].mxu1 %vm6605_vm3, %v24006_v3  ;;  %v24024_v3 = vld [vmem:[#allocation3 + $0x1d2] sm:$0xff] }
 0x73b   :  { %18004 = vmatprep.mubr.msk.f32.mxu1 %vm6605_vm3, %v24010_v10  ;;  %27290 = vst [vmem:[#allocation18_spill] sm:$0xff] %v24024_v3  ;;  %v24028_v10 = vld [vmem:[#allocation3 + $0x1e2] sm:$0xff] }
 0x73c   :  { %27291 = vst [vmem:[#allocation17_spill] sm:$0xff] %v24028_v10 }
 0x73e   :  { %18005 = vmatmul.mubr.msk.f32.gmra.mrb[30].mxu1 %vm6605_vm3, %v24014_v31  ;;  %v24032_v31 = vld [vmem:[#allocation3 + $0x1ea] sm:$0xff] }
 0x73f   :  { %18007 = vmatprep.mubr.msk.f32.mxu1 %vm6605_vm3, %v8769_v4  ;;  %27292 = vst [vmem:[#allocation20_spill] sm:$0xff] %v24032_v31  ;;  %v24036_v4 = vld [vmem:[#allocation3 + $0x1fa] sm:$0xff] }
 0x740   :  { %27293 = vst [vmem:[#allocation22_spill] sm:$0xff] %v24036_v4 }
 0x742   :  { %18008 = vmatmul.mubr.msk.f32.gmra.mrb[32].mxu1 %vm6605_vm3, %v8770_v21  ;;  %v24040_v21 = vld [vmem:[#allocation3 + $0x202] sm:$0xff] }
 0x743   :  { %18010 = vmatprep.mubr.msk.f32.mxu1 %vm6605_vm3, %v24020_v41  ;;  %27294 = vst [vmem:[#allocation21_spill] sm:$0xff] %v24040_v21 }
 0x746   :  { %18011 = vmatmul.mubr.msk.f32.gmra.mrb[34].mxu1 %vm6605_vm3, %v24024_v3  ;;  %v24044_v3 = vld [vmem:[#allocation3 + $0x212] sm:$0xff] }
 0x747   :  { %18013 = vmatprep.mubr.msk.f32.mxu1 %vm6605_vm3, %v24028_v10  ;;  %27295 = vst [vmem:[#allocation24_spill] sm:$0xff] %v24044_v3  ;;  %v24048_v10 = vld [vmem:[#allocation3 + $0x21a] sm:$0xff] }
 0x748   :  { %27296 = vst [vmem:[#allocation23_spill] sm:$0xff] %v24048_v10 }
 0x74a   :  { %18014 = vmatmul.mubr.msk.f32.gmra.mrb[36].mxu1 %vm6605_vm3, %v24032_v31  ;;  %v24052_v31 = vld [vmem:[#allocation3 + $0x22a] sm:$0xff] }
 0x74b   :  { %18016 = vmatprep.mubr.msk.f32.mxu1 %vm6605_vm3, %v24036_v4  ;;  %27297 = vst [vmem:[#allocation26_spill] sm:$0xff] %v24052_v31  ;;  %v24056_v4 = vld [vmem:[#allocation3 + $0x232] sm:$0xff] }
 0x74c   :  { %27298 = vst [vmem:[#allocation25_spill] sm:$0xff] %v24056_v4 }
 0x74e   :  { %18017 = vmatmul.mubr.msk.f32.gmra.mrb[38].mxu1 %vm6605_vm3, %v24040_v21  ;;  %v24060_v21 = vld [vmem:[#allocation3 + $0x242] sm:$0xff] }
 0x74f   :  { %18019 = vmatprep.mubr.msk.f32.mxu1 %vm6605_vm3, %v24044_v3  ;;  %27299 = vst [vmem:[#allocation28_spill] sm:$0xff] %v24060_v21  ;;  %v24064_v3 = vld [vmem:[#allocation3 + $0x24a] sm:$0xff] }
 0x750   :  { %27300 = vst [vmem:[#allocation33_spill] sm:$0xff] %v24064_v3 }
 0x752   :  { %18020 = vmatmul.mubr.msk.f32.gmra.mrb[40].mxu1 %vm6605_vm3, %v24048_v10  ;;  %v24068_v10 = vld [vmem:[#allocation3 + $0x25a] sm:$0xff] }
 0x753   :  { %18022 = vmatprep.mubr.msk.f32.mxu1 %vm6605_vm3, %v24052_v31  ;;  %27301 = vst [vmem:[#allocation34_spill] sm:$0xff] %v24068_v10  ;;  %v24072_v31 = vld [vmem:[#allocation3 + $0x262] sm:$0xff] }
 0x754   :  { %27302 = vst [vmem:[#allocation35_spill] sm:$0xff] %v24072_v31 }
 0x756   :  { %18023 = vmatmul.mubr.msk.f32.gmra.mrb[42].mxu1 %vm6605_vm3, %v24056_v4  ;;  %v24076_v4 = vld [vmem:[#allocation3 + $0x272] sm:$0xff] }
 0x757   :  { %18025 = vmatprep.mubr.msk.f32.mxu1 %vm6605_vm3, %v24060_v21  ;;  %27303 = vst [vmem:[#allocation36_spill] sm:$0xff] %v24076_v4  ;;  %v24080_v21 = vld [vmem:[#allocation3 + $0x27a] sm:$0xff] }
 0x758   :  { %27304 = vst [vmem:[#allocation37_spill] sm:$0xff] %v24080_v21 }
 0x75a   :  { %18026 = vmatmul.mubr.msk.f32.gmra.mrb[44].mxu1 %vm6605_vm3, %v24064_v3  ;;  %v24084_v3 = vld [vmem:[#allocation3 + $0x28a] sm:$0xff] }
 0x75b   :  { %18028 = vmatprep.mubr.msk.f32.mxu1 %vm6605_vm3, %v24068_v10  ;;  %27305 = vst [vmem:[#allocation38_spill] sm:$0xff] %v24084_v3  ;;  %v24088_v10 = vld [vmem:[#allocation3 + $0x292] sm:$0xff] }
 0x75c   :  { %27306 = vst [vmem:[#allocation39_spill] sm:$0xff] %v24088_v10 }
 0x75e   :  { %18029 = vmatmul.mubr.msk.f32.gmra.mrb[46].mxu1 %vm6605_vm3, %v24072_v31  ;;  %v24092_v31 = vld [vmem:[#allocation3 + $0x2a2] sm:$0xff] }
 0x75f   :  { %18031 = vmatprep.mubr.msk.f32.mxu1 %vm6605_vm3, %v24076_v4  ;;  %27307 = vst [vmem:[#allocation40_spill] sm:$0xff] %v24092_v31  ;;  %v24096_v4 = vld [vmem:[#allocation3 + $0x2aa] sm:$0xff] }
 0x760   :  { %27308 = vst [vmem:[#allocation41_spill] sm:$0xff] %v24096_v4 }
 0x762   :  { %18032 = vmatmul.mubr.msk.f32.gmra.mrb[48].mxu1 %vm6605_vm3, %v24080_v21  ;;  %v24100_v21 = vld [vmem:[#allocation3 + $0x2ba] sm:$0xff] }
 0x763   :  { %18034 = vmatprep.mubr.msk.f32.mxu1 %vm6605_vm3, %v24084_v3  ;;  %27309 = vst [vmem:[#allocation32_spill] sm:$0xff] %v24100_v21  ;;  %v24104_v3 = vld [vmem:[#allocation3 + $0x2c2] sm:$0xff] }
 0x764   :  { %27310 = vst [vmem:[#allocation42_spill] sm:$0xff] %v24104_v3 }
 0x766   :  { %18035 = vmatmul.mubr.msk.f32.gmra.mrb[50].mxu1 %vm6605_vm3, %v24088_v10  ;;  %v24108_v10 = vld [vmem:[#allocation3 + $0x2d2] sm:$0xff] }
 0x767   :  { %18037 = vmatprep.mubr.msk.f32.mxu1 %vm6605_vm3, %v24092_v31  ;;  %27311 = vst [vmem:[#allocation43_spill] sm:$0xff] %v24108_v10  ;;  %v24112_v31 = vld [vmem:[#allocation3 + $0x2da] sm:$0xff] }
 0x768   :  { %27312 = vst [vmem:[#allocation44_spill] sm:$0xff] %v24112_v31 }
 0x76a   :  { %18038 = vmatmul.mubr.msk.f32.gmra.mrb[52].mxu1 %vm6605_vm3, %v24096_v4  ;;  %v24116_v4 = vld [vmem:[#allocation3 + $0x2ea] sm:$0xff] }
 0x76b   :  { %18040 = vmatprep.mubr.msk.f32.mxu1 %vm6605_vm3, %v24100_v21  ;;  %27313 = vst [vmem:[#allocation45_spill] sm:$0xff] %v24116_v4  ;;  %v24120_v21 = vld [vmem:[#allocation3 + $0x2f2] sm:$0xff] }
 0x76c   :  { %27314 = vst [vmem:[#allocation46_spill] sm:$0xff] %v24120_v21 }
 0x76e   :  { %18041 = vmatmul.mubr.msk.f32.gmra.mrb[54].mxu1 %vm6605_vm3, %v24104_v3  ;;  %v24124_v3 = vld [vmem:[#allocation3 + $0x302] sm:$0xff] }
 0x76f   :  { %18043 = vmatprep.mubr.msk.f32.mxu1 %vm6605_vm3, %v24108_v10  ;;  %27315 = vst [vmem:[#allocation47_spill] sm:$0xff] %v24124_v3  ;;  %v24128_v10 = vld [vmem:[#allocation3 + $0x30a] sm:$0xff] }
 0x770   :  { %27316 = vst [vmem:[#allocation48_spill] sm:$0xff] %v24128_v10 }
 0x772   :  { %18044 = vmatmul.mubr.msk.f32.gmra.mrb[56].mxu1 %vm6605_vm3, %v24112_v31  ;;  %v24132_v31 = vld [vmem:[#allocation3 + $0x31a] sm:$0xff] }
 0x773   :  { %18046 = vmatprep.mubr.msk.f32.mxu1 %vm6605_vm3, %v24116_v4  ;;  %v24136_v4 = vld [vmem:[#allocation3 + $0x322] sm:$0xff] }
 0x776   :  { %18047 = vmatmul.mubr.msk.f32.gmra.mrb[58].mxu1 %vm6605_vm3, %v24120_v21 }
 0x777   :  { %18049 = vmatprep.mubr.msk.f32.mxu1 %vm6605_vm3, %v24124_v3  ;;  %v15427_v3 = vld [vmem:[%s26699_s5 + $0x50] sm:$0xff] }
 0x77a   :  { %18050 = vmatmul.mubr.msk.f32.gmra.mrb[60].mxu1 %vm6605_vm3, %v24128_v10  ;;  %v15428_v10 = vld [vmem:[%s26699_s5 + $0x58] sm:$0xff] }
 0x77b   :  { %18052 = vmatprep.mubr.msk.f32.mxu1 %vm6605_vm3, %v24132_v31  ;;  %v24148_v21 = vpack.c.bf16 %v15428_v10, %v15427_v3  ;;  %v24468_v3 = vld [vmem:[#allocation3 + $0x271] sm:$0xff]  ;;  %v24472_v10 = vld [vmem:[#allocation3 + $0x279] sm:$0xff] }
 0x77e   :  { %18053 = vmatmul.mubr.msk.f32.gmra.mrb[62].mxu1 %vm6605_vm3, %v24136_v4 }
 0x77f   :  { %18059 = vmatprep.mubr.msk.f32.mxu1 %vm6605_vm3, %v23642_v11  ;;  %v24210_v11 = vld [vmem:[#allocation3 + $0x180] sm:$0xff] }
 0x782   :  { %18060 = vmatmul.mubr.msk.f32.vlgmr.msra.gmra.mrb[0].mxu1 %vm6605_vm3, %v23648_v34  ;;  %v24214_v34 = vld [vmem:[#allocation3 + $0x188] sm:$0xff] }
 0x783   :  { %18674 = vmatpush3.bf16.msra.mxu1 %v23893_v18  ;;  %18062 = vmatprep.mubr.msk.f32.mxu1 %vm6605_vm3, %v23652_v60  ;;  %v27317_v60 = vld [vmem:[#allocation58_spill] sm:$0xff]  ;;  %v24464_v18 = vld [vmem:[#allocation3 + $0x261] sm:$0xff] }
 0x784   :  { %18676 = vmatprep.subr.bf16.mxu1 %v24148_v21 }
 0x786   :  { %18063 = vmatmul.mubr.msk.f32.gmra.mrb[2].mxu1 %vm6605_vm3, %v23656_v29  ;;  %v27318_v29 = vld [vmem:[#allocation59_spill] sm:$0xff] }
 0x787   :  { %18065 = vmatprep.mubr.msk.f32.mxu1 %vm6605_vm3, %v23660_v59  ;;  %v27319_v59 = vld [vmem:[#allocation60_spill] sm:$0xff] }
 0x78a   :  { %18066 = vmatmul.mubr.msk.f32.gmra.mrb[4].mxu1 %vm6605_vm3, %v23664_v44  ;;  %v27320_v44 = vld [vmem:[#allocation61_spill] sm:$0xff] }
 0x78b   :  { %18068 = vmatprep.mubr.msk.f32.mxu1 %vm6605_vm3, %v23668_v27  ;;  %v24278_v27 = vld [vmem:[#allocation3 + $0x330] sm:$0xff] }
 0x78e   :  { %18069 = vmatmul.mubr.msk.f32.gmra.mrb[6].mxu1 %vm6605_vm3, %v23672_v58  ;;  %v24282_v58 = vld [vmem:[#allocation3 + $0x338] sm:$0xff] }
 0x78f   :  { %18071 = vmatprep.mubr.msk.f32.mxu1 %vm6605_vm3, %v23676_v28  ;;  %v10153_v28 = vld [vmem:[#allocation3 + $0x19] sm:$0xff] }
 0x792   :  { %18072 = vmatmul.mubr.msk.f32.gmra.mrb[8].mxu1 %vm6605_vm3, %v23680_v33  ;;  %v15493_v33 = vld [vmem:[%s26699_s5 + $0x60] sm:$0xff] }
 0x793   :  { %18074 = vmatprep.mubr.msk.f32.mxu1 %vm6605_vm3, %v23684_v39  ;;  %v15494_v39 = vld [vmem:[%s26699_s5 + $0x68] sm:$0xff] }
 0x796   :  { %18075 = vmatmul.mubr.msk.f32.gmra.mrb[10].mxu1 %vm6605_vm3, %v23688_v24  ;;  %v24293_v24 = vpack.c.bf16 %v15494_v39, %v15493_v33  ;;  %v24500_v33 = vld [vmem:[#allocation3 + $0x2d1] sm:$0xff]  ;;  %v24504_v39 = vld [vmem:[#allocation3 + $0x2d9] sm:$0xff] }
 0x797   :  { %18077 = vmatprep.mubr.msk.f32.mxu1 %vm6605_vm3, %v23692_v15  ;;  %v10154_v15 = vld [vmem:[#allocation3 + $0x21] sm:$0xff]  ;;  %27323 = vst [vmem:[#allocation51_spill] sm:$0xff] %v24500_v33  ;;  %27324 = vst [vmem:[#allocation52_spill] sm:$0xff] %v24504_v39 }
 0x79a   :  { %18078 = vmatmul.mubr.msk.f32.gmra.mrb[12].mxu1 %vm6605_vm3, %v23696_v32  ;;  %v24296_v32 = vld [vmem:[#allocation3 + $0x31] sm:$0xff] }
 0x79b   :  { %18080 = vmatprep.mubr.msk.f32.mxu1 %vm6605_vm3, %v23700_v47  ;;  %v24302_v47 = vld [vmem:[#allocation3 + $0x39] sm:$0xff] }
 0x79e   :  { %18081 = vmatmul.mubr.msk.f32.gmra.mrb[14].mxu1 %vm6605_vm3, %v23704_v16  ;;  %v24306_v16 = vld [vmem:[#allocation3 + $0x49] sm:$0xff] }
 0x79f   :  { %18083 = vmatprep.mubr.msk.f32.mxu1 %vm6605_vm3, %v23708_v37  ;;  %v24310_v37 = vld [vmem:[#allocation3 + $0x51] sm:$0xff] }
 0x7a2   :  { %18084 = vmatmul.mubr.msk.f32.gmra.mrb[16].mxu1 %vm6605_vm3, %v23712_v35  ;;  %v24314_v35 = vld [vmem:[#allocation3 + $0x61] sm:$0xff] }
 0x7a3   :  { %18086 = vmatprep.mubr.msk.f32.mxu1 %vm6605_vm3, %v23716_v49  ;;  %v24318_v49 = vld [vmem:[#allocation3 + $0x69] sm:$0xff] }
 0x7a6   :  { %18087 = vmatmul.mubr.msk.f32.gmra.mrb[18].mxu1 %vm6605_vm3, %v23720_v48  ;;  %v24322_v48 = vld [vmem:[#allocation3 + $0x79] sm:$0xff] }
 0x7a7   :  { %18089 = vmatprep.mubr.msk.f32.mxu1 %vm6605_vm3, %v23724_v23  ;;  %v24326_v23 = vld [vmem:[#allocation3 + $0x81] sm:$0xff] }
 0x7aa   :  { %18090 = vmatmul.mubr.msk.f32.gmra.mrb[20].mxu1 %vm6605_vm3, %v23728_v19  ;;  %v24330_v19 = vld [vmem:[#allocation3 + $0x91] sm:$0xff] }
 0x7ab   :  { %18092 = vmatprep.mubr.msk.f32.mxu1 %vm6605_vm3, %v23732_v43  ;;  %v24334_v43 = vld [vmem:[#allocation3 + $0x99] sm:$0xff] }
 0x7ae   :  { %18093 = vmatmul.mubr.msk.f32.gmra.mrb[22].mxu1 %vm6605_vm3, %v23736_v61  ;;  %v24338_v61 = vld [vmem:[#allocation3 + $0xa9] sm:$0xff] }
 0x7af   :  { %18095 = vmatprep.mubr.msk.f32.mxu1 %vm6605_vm3, %v23740_v57  ;;  %v24342_v57 = vld [vmem:[#allocation3 + $0xb1] sm:$0xff] }
 0x7b2   :  { %18096 = vmatmul.mubr.msk.f32.gmra.mrb[24].mxu1 %vm6605_vm3, %v23744_v54  ;;  %v24346_v54 = vld [vmem:[#allocation3 + $0xc1] sm:$0xff] }
 0x7b3   :  { %18098 = vmatprep.mubr.msk.f32.mxu1 %vm6605_vm3, %v23748_v8  ;;  %v24350_v8 = vld [vmem:[#allocation3 + $0xc9] sm:$0xff] }
 0x7b6   :  { %18099 = vmatmul.mubr.msk.f32.gmra.mrb[26].mxu1 %vm6605_vm3, %v23752_v0  ;;  %v24354_v0 = vld [vmem:[#allocation3 + $0xd9] sm:$0xff] }
 0x7b7   :  { %18101 = vmatprep.mubr.msk.f32.mxu1 %vm6605_vm3, %v23756_v26  ;;  %v24358_v26 = vld [vmem:[#allocation3 + $0xe1] sm:$0xff] }
 0x7ba   :  { %18102 = vmatmul.mubr.msk.f32.gmra.mrb[28].mxu1 %vm6605_vm3, %v23760_v46  ;;  %v24362_v46 = vld [vmem:[#allocation3 + $0xf1] sm:$0xff] }
 0x7bb   :  { %18104 = vmatprep.mubr.msk.f32.mxu1 %vm6605_vm3, %v24210_v11 }
 0x7be   :  { %18105 = vmatmul.mubr.msk.f32.gmra.mrb[30].mxu1 %vm6605_vm3, %v24214_v34 }
 0x7bf   :  { %18107 = vmatprep.mubr.msk.f32.mxu1 %vm6605_vm3, %v23766_v6  ;;  %v24366_v6 = vld [vmem:[#allocation3 + $0xf9] sm:$0xff] }
 0x7c2   :  { %18108 = vmatmul.mubr.msk.f32.gmra.mrb[32].mxu1 %vm6605_vm3, %v23770_v63  ;;  %v24370_v63 = vld [vmem:[#allocation3 + $0x109] sm:$0xff] }
 0x7c3   :  { %18110 = vmatprep.mubr.msk.f32.mxu1 %vm6605_vm3, %v23774_v20  ;;  %v24374_v20 = vld [vmem:[#allocation3 + $0x111] sm:$0xff] }
 0x7c6   :  { %18111 = vmatmul.mubr.msk.f32.gmra.mrb[34].mxu1 %vm6605_vm3, %v23778_v1  ;;  %v24378_v1 = vld [vmem:[#allocation3 + $0x121] sm:$0xff] }
 0x7c7   :  { %18113 = vmatprep.mubr.msk.f32.mxu1 %vm6605_vm3, %v23782_v38  ;;  %v24382_v38 = vld [vmem:[#allocation3 + $0x129] sm:$0xff] }
 0x7ca   :  { %18114 = vmatmul.mubr.msk.f32.gmra.mrb[36].mxu1 %vm6605_vm3, %v23786_v56  ;;  %v24386_v56 = vld [vmem:[#allocation3 + $0x139] sm:$0xff] }
 0x7cb   :  { %18116 = vmatprep.mubr.msk.f32.mxu1 %vm6605_vm3, %v23790_v42  ;;  %v24390_v42 = vld [vmem:[#allocation3 + $0x141] sm:$0xff] }
 0x7ce   :  { %18117 = vmatmul.mubr.msk.f32.gmra.mrb[38].mxu1 %vm6605_vm3, %v23794_v13  ;;  %v24394_v13 = vld [vmem:[#allocation3 + $0x151] sm:$0xff] }
 0x7cf   :  { %18119 = vmatprep.mubr.msk.f32.mxu1 %vm6605_vm3, %v23798_v62  ;;  %v24398_v62 = vld [vmem:[#allocation3 + $0x159] sm:$0xff] }
 0x7d2   :  { %18120 = vmatmul.mubr.msk.f32.gmra.mrb[40].mxu1 %vm6605_vm3, %v23802_v17  ;;  %v24402_v17 = vld [vmem:[#allocation3 + $0x169] sm:$0xff] }
 0x7d3   :  { %18122 = vmatprep.mubr.msk.f32.mxu1 %vm6605_vm3, %v23806_v53  ;;  %v24406_v53 = vld [vmem:[#allocation3 + $0x171] sm:$0xff] }
 0x7d6   :  { %18123 = vmatmul.mubr.msk.f32.gmra.mrb[42].mxu1 %vm6605_vm3, %v23810_v30  ;;  %v24410_v30 = vld [vmem:[#allocation3 + $0x181] sm:$0xff] }
 0x7d7   :  { %18125 = vmatprep.mubr.msk.f32.mxu1 %vm6605_vm3, %v23814_v45  ;;  %v24414_v45 = vld [vmem:[#allocation3 + $0x189] sm:$0xff] }
 0x7da   :  { %18126 = vmatmul.mubr.msk.f32.gmra.mrb[44].mxu1 %vm6605_vm3, %v23818_v5  ;;  %v10185_v5 = vld [vmem:[#allocation3 + $0x1c9] sm:$0xff] }
 0x7db   :  { %18128 = vmatprep.mubr.msk.f32.mxu1 %vm6605_vm3, %v23822_v7  ;;  %v10186_v7 = vld [vmem:[#allocation3 + $0x1d1] sm:$0xff] }
 0x7de   :  { %18129 = vmatmul.mubr.msk.f32.gmra.mrb[46].mxu1 %vm6605_vm3, %v23826_v25  ;;  %v24420_v25 = vld [vmem:[#allocation3 + $0x1e1] sm:$0xff] }
 0x7df   :  { %18131 = vmatprep.mubr.msk.f32.mxu1 %vm6605_vm3, %v23830_v12  ;;  %v24424_v12 = vld [vmem:[#allocation3 + $0x1e9] sm:$0xff] }
 0x7e2   :  { %18132 = vmatmul.mubr.msk.f32.gmra.mrb[48].mxu1 %vm6605_vm3, %v23834_v36  ;;  %v24428_v36 = vld [vmem:[#allocation3 + $0x1f9] sm:$0xff] }
 0x7e3   :  { %18134 = vmatprep.mubr.msk.f32.mxu1 %vm6605_vm3, %v23838_v9  ;;  %v24432_v9 = vld [vmem:[#allocation3 + $0x201] sm:$0xff] }
 0x7e6   :  { %18135 = vmatmul.mubr.msk.f32.gmra.mrb[50].mxu1 %vm6605_vm3, %v23842_v55  ;;  %v24436_v55 = vld [vmem:[#allocation3 + $0x211] sm:$0xff] }
 0x7e7   :  { %18137 = vmatprep.mubr.msk.f32.mxu1 %vm6605_vm3, %v23846_v40  ;;  %v24440_v40 = vld [vmem:[#allocation3 + $0x219] sm:$0xff] }
 0x7ea   :  { %18138 = vmatmul.mubr.msk.f32.gmra.mrb[52].mxu1 %vm6605_vm3, %v23850_v14  ;;  %v24444_v14 = vld [vmem:[#allocation3 + $0x229] sm:$0xff] }
 0x7eb   :  { %18140 = vmatprep.mubr.msk.f32.mxu1 %vm6605_vm3, %v23854_v50  ;;  %v24448_v50 = vld [vmem:[#allocation3 + $0x231] sm:$0xff] }
 0x7ee   :  { %18141 = vmatmul.mubr.msk.f32.gmra.mrb[54].mxu1 %vm6605_vm3, %v23858_v52  ;;  %v24452_v52 = vld [vmem:[#allocation3 + $0x241] sm:$0xff] }
 0x7ef   :  { %18143 = vmatprep.mubr.msk.f32.mxu1 %vm6605_vm3, %v23862_v22  ;;  %v24456_v22 = vld [vmem:[#allocation3 + $0x249] sm:$0xff] }
 0x7f2   :  { %18144 = vmatmul.mubr.msk.f32.gmra.mrb[56].mxu1 %vm6605_vm3, %v23866_v51  ;;  %v24460_v51 = vld [vmem:[#allocation3 + $0x259] sm:$0xff] }
 0x7f3   :  { %18146 = vmatprep.mubr.msk.f32.mxu1 %vm6605_vm3, %v27317_v60  ;;  %v24480_v60 = vld [vmem:[#allocation3 + $0x291] sm:$0xff] }
 0x7f6   :  { %18147 = vmatmul.mubr.msk.f32.gmra.mrb[58].mxu1 %vm6605_vm3, %v27318_v29  ;;  %v24484_v29 = vld [vmem:[#allocation3 + $0x2a1] sm:$0xff] }
 0x7f7   :  { %18149 = vmatprep.mubr.msk.f32.mxu1 %vm6605_vm3, %v27319_v59  ;;  %v24488_v59 = vld [vmem:[#allocation3 + $0x2a9] sm:$0xff] }
 0x7fa   :  { %18150 = vmatmul.mubr.msk.f32.gmra.mrb[60].mxu1 %vm6605_vm3, %v27320_v44  ;;  %v24492_v44 = vld [vmem:[#allocation3 + $0x2b9] sm:$0xff] }
 0x7fb   :  { %18152 = vmatprep.mubr.msk.f32.mxu1 %vm6605_vm3, %v24278_v27  ;;  %27321 = vst [vmem:[#allocation49_spill] sm:$0xff] %v24492_v44 }
 0x7fe   :  { %18153 = vmatmul.mubr.msk.f32.gmra.mrb[62].mxu1 %vm6605_vm3, %v24282_v58 }
 0x7ff   :  { %18159 = vmatprep.mubr.msk.f32.mxu1 %vm6605_vm3, %v10153_v28  ;;  %v24496_v28 = vld [vmem:[#allocation3 + $0x2c1] sm:$0xff] }
 0x800   :  { %27322 = vst [vmem:[#allocation50_spill] sm:$0xff] %v24496_v28 }
 0x802   :  { %18160 = vmatmul.mubr.msk.f32.vlgmr.msra.gmra.mrb[0].mxu1 %vm6605_vm3, %v10154_v15  ;;  %v24508_v15 = vld [vmem:[#allocation3 + $0x2e9] sm:$0xff] }
 0x803   :  { %18678 = vmatpush3.bf16.msra.mxu1 %v24148_v21  ;;  %18162 = vmatprep.mubr.msk.f32.mxu1 %vm6605_vm3, %v24296_v32  ;;  %v24476_v21 = vld [vmem:[#allocation3 + $0x289] sm:$0xff]  ;;  %27325 = vst [vmem:[#allocation53_spill] sm:$0xff] %v24508_v15 }
 0x804   :  { %18680 = vmatprep.subr.bf16.mxu1 %v24293_v24 }
 0x806   :  { %18163 = vmatmul.mubr.msk.f32.gmra.mrb[2].mxu1 %vm6605_vm3, %v24302_v47 }
 0x807   :  { %18165 = vmatprep.mubr.msk.f32.mxu1 %vm6605_vm3, %v24306_v16 }
 0x80a   :  { %18166 = vmatmul.mubr.msk.f32.gmra.mrb[4].mxu1 %vm6605_vm3, %v24310_v37 }
 0x80b   :  { %18168 = vmatprep.mubr.msk.f32.mxu1 %vm6605_vm3, %v24314_v35 }
 0x80e   :  { %18169 = vmatmul.mubr.msk.f32.gmra.mrb[6].mxu1 %vm6605_vm3, %v24318_v49 }
 0x80f   :  { %18171 = vmatprep.mubr.msk.f32.mxu1 %vm6605_vm3, %v24322_v48 }
 0x812   :  { %18172 = vmatmul.mubr.msk.f32.gmra.mrb[8].mxu1 %vm6605_vm3, %v24326_v23 }
 0x813   :  { %18174 = vmatprep.mubr.msk.f32.mxu1 %vm6605_vm3, %v24330_v19 }
 0x816   :  { %18175 = vmatmul.mubr.msk.f32.gmra.mrb[10].mxu1 %vm6605_vm3, %v24334_v43 }
 0x817   :  { %18177 = vmatprep.mubr.msk.f32.mxu1 %vm6605_vm3, %v24338_v61 }
 0x81a   :  { %18178 = vmatmul.mubr.msk.f32.gmra.mrb[12].mxu1 %vm6605_vm3, %v24342_v57 }
 0x81b   :  { %18180 = vmatprep.mubr.msk.f32.mxu1 %vm6605_vm3, %v24346_v54 }
 0x81e   :  { %18181 = vmatmul.mubr.msk.f32.gmra.mrb[14].mxu1 %vm6605_vm3, %v24350_v8 }
 0x81f   :  { %18183 = vmatprep.mubr.msk.f32.mxu1 %vm6605_vm3, %v24354_v0 }
 0x822   :  { %18184 = vmatmul.mubr.msk.f32.gmra.mrb[16].mxu1 %vm6605_vm3, %v24358_v26 }
 0x823   :  { %18186 = vmatprep.mubr.msk.f32.mxu1 %vm6605_vm3, %v24362_v46 }
 0x826   :  { %18187 = vmatmul.mubr.msk.f32.gmra.mrb[18].mxu1 %vm6605_vm3, %v24366_v6 }
 0x827   :  { %18189 = vmatprep.mubr.msk.f32.mxu1 %vm6605_vm3, %v24370_v63 }
 0x82a   :  { %18190 = vmatmul.mubr.msk.f32.gmra.mrb[20].mxu1 %vm6605_vm3, %v24374_v20 }
 0x82b   :  { %18192 = vmatprep.mubr.msk.f32.mxu1 %vm6605_vm3, %v24378_v1 }
 0x82e   :  { %18193 = vmatmul.mubr.msk.f32.gmra.mrb[22].mxu1 %vm6605_vm3, %v24382_v38 }
 0x82f   :  { %18195 = vmatprep.mubr.msk.f32.mxu1 %vm6605_vm3, %v24386_v56 }
 0x832   :  { %18196 = vmatmul.mubr.msk.f32.gmra.mrb[24].mxu1 %vm6605_vm3, %v24390_v42 }
 0x833   :  { %18198 = vmatprep.mubr.msk.f32.mxu1 %vm6605_vm3, %v24394_v13 }
 0x836   :  { %18199 = vmatmul.mubr.msk.f32.gmra.mrb[26].mxu1 %vm6605_vm3, %v24398_v62 }
 0x837   :  { %18201 = vmatprep.mubr.msk.f32.mxu1 %vm6605_vm3, %v24402_v17 }
 0x83a   :  { %18202 = vmatmul.mubr.msk.f32.gmra.mrb[28].mxu1 %vm6605_vm3, %v24406_v53 }
 0x83b   :  { %18204 = vmatprep.mubr.msk.f32.mxu1 %vm6605_vm3, %v24410_v30 }
 0x83e   :  { %18205 = vmatmul.mubr.msk.f32.gmra.mrb[30].mxu1 %vm6605_vm3, %v24414_v45 }
 0x83f   :  { %18207 = vmatprep.mubr.msk.f32.mxu1 %vm6605_vm3, %v10185_v5  ;;  %v24512_v5 = vld [vmem:[#allocation3 + $0x2f1] sm:$0xff] }
 0x840   :  { %27326 = vst [vmem:[#allocation54_spill] sm:$0xff] %v24512_v5 }
 0x842   :  { %18208 = vmatmul.mubr.msk.f32.gmra.mrb[32].mxu1 %vm6605_vm3, %v10186_v7  ;;  %v24516_v7 = vld [vmem:[#allocation3 + $0x301] sm:$0xff] }
 0x843   :  { %18210 = vmatprep.mubr.msk.f32.mxu1 %vm6605_vm3, %v24420_v25  ;;  %27327 = vst [vmem:[#allocation55_spill] sm:$0xff] %v24516_v7 }
 0x846   :  { %18211 = vmatmul.mubr.msk.f32.gmra.mrb[34].mxu1 %vm6605_vm3, %v24424_v12 }
 0x847   :  { %18213 = vmatprep.mubr.msk.f32.mxu1 %vm6605_vm3, %v24428_v36 }
 0x84a   :  { %18214 = vmatmul.mubr.msk.f32.gmra.mrb[36].mxu1 %vm6605_vm3, %v24432_v9 }
 0x84b   :  { %18216 = vmatprep.mubr.msk.f32.mxu1 %vm6605_vm3, %v24436_v55 }
 0x84e   :  { %18217 = vmatmul.mubr.msk.f32.gmra.mrb[38].mxu1 %vm6605_vm3, %v24440_v40 }
 0x84f   :  { %18219 = vmatprep.mubr.msk.f32.mxu1 %vm6605_vm3, %v24444_v14 }
 0x852   :  { %18220 = vmatmul.mubr.msk.f32.gmra.mrb[40].mxu1 %vm6605_vm3, %v24448_v50 }
 0x853   :  { %18222 = vmatprep.mubr.msk.f32.mxu1 %vm6605_vm3, %v24452_v52 }
 0x856   :  { %18223 = vmatmul.mubr.msk.f32.gmra.mrb[42].mxu1 %vm6605_vm3, %v24456_v22 }
 0x857   :  { %18225 = vmatprep.mubr.msk.f32.mxu1 %vm6605_vm3, %v24460_v51 }
 0x85a   :  { %18226 = vmatmul.mubr.msk.f32.gmra.mrb[44].mxu1 %vm6605_vm3, %v24464_v18 }
 0x85b   :  { %18228 = vmatprep.mubr.msk.f32.mxu1 %vm6605_vm3, %v24468_v3 }
 0x85e   :  { %18229 = vmatmul.mubr.msk.f32.gmra.mrb[46].mxu1 %vm6605_vm3, %v24472_v10 }
 0x85f   :  { %18231 = vmatprep.mubr.msk.f32.mxu1 %vm6605_vm3, %v24476_v21 }
 0x862   :  { %18232 = vmatmul.mubr.msk.f32.gmra.mrb[48].mxu1 %vm6605_vm3, %v24480_v60 }
 0x863   :  { %18234 = vmatprep.mubr.msk.f32.mxu1 %vm6605_vm3, %v24484_v29 }
 0x866   :  { %18235 = vmatmul.mubr.msk.f32.gmra.mrb[50].mxu1 %vm6605_vm3, %v24488_v59 }
 0x867   :  { %18237 = vmatprep.mubr.msk.f32.mxu1 %vm6605_vm3, %v24492_v44  ;;  %v27337_v44 = vld [vmem:[#allocation62_spill] sm:$0xff] }
 0x86a   :  { %18238 = vmatmul.mubr.msk.f32.gmra.mrb[52].mxu1 %vm6605_vm3, %v24496_v28  ;;  %v27333_v28 = vld [vmem:[#allocation4_spill] sm:$0xff] }
 0x86b   :  { %18240 = vmatprep.mubr.msk.f32.mxu1 %vm6605_vm3, %v24500_v33  ;;  %v24520_v33 = vld [vmem:[#allocation3 + $0x309] sm:$0xff] }
 0x86c   :  { %27328 = vst [vmem:[#allocation56_spill] sm:$0xff] %v24520_v33 }
 0x86e   :  { %18241 = vmatmul.mubr.msk.f32.gmra.mrb[54].mxu1 %vm6605_vm3, %v24504_v39  ;;  %v24524_v39 = vld [vmem:[#allocation3 + $0x319] sm:$0xff] }
 0x86f   :  { %18243 = vmatprep.mubr.msk.f32.mxu1 %vm6605_vm3, %v24508_v15  ;;  %27329 = vst [vmem:[#allocation57_spill] sm:$0xff] %v24524_v39  ;;  %v24528_v15 = vld [vmem:[#allocation3 + $0x321] sm:$0xff] }
 0x870   :  { %27330 = vst [vmem:[#allocation58_spill] sm:$0xff] %v24528_v15 }
 0x872   :  { %18244 = vmatmul.mubr.msk.f32.gmra.mrb[56].mxu1 %vm6605_vm3, %v24512_v5  ;;  %v24532_v5 = vld [vmem:[#allocation3 + $0x331] sm:$0xff] }
 0x873   :  { %18246 = vmatprep.mubr.msk.f32.mxu1 %vm6605_vm3, %v24516_v7  ;;  %27331 = vst [vmem:[#allocation59_spill] sm:$0xff] %v24532_v5  ;;  %v24536_v7 = vld [vmem:[#allocation3 + $0x339] sm:$0xff] }
 0x874   :  { %27332 = vst [vmem:[#allocation60_spill] sm:$0xff] %v24536_v7 }
 0x876   :  { %18247 = vmatmul.mubr.msk.f32.gmra.mrb[58].mxu1 %vm6605_vm3, %v24520_v33 }
 0x877   :  { %18249 = vmatprep.mubr.msk.f32.mxu1 %vm6605_vm3, %v24524_v39  ;;  %v15559_v39 = vld [vmem:[%s26699_s5 + $0x70] sm:$0xff] }
 0x87a   :  { %18250 = vmatmul.mubr.msk.f32.gmra.mrb[60].mxu1 %vm6605_vm3, %v24528_v15  ;;  %v15560_v15 = vld [vmem:[%s26699_s5 + $0x78] sm:$0xff] }
 0x87b   :  { %18252 = vmatprep.mubr.msk.f32.mxu1 %vm6605_vm3, %v24532_v5  ;;  %v24548_v33 = vpack.c.bf16 %v15560_v15, %v15559_v39  ;;  %v27334_v5 = vld [vmem:[#allocation5_spill] sm:$0xff]  ;;  %v27338_v39 = vld [vmem:[#allocation63_spill] sm:$0xff]  ;;  %v27341_v15 = vld [vmem:[#allocation66_spill] sm:$0xff] }
 0x87e   :  { %18253 = vmatmul.mubr.msk.f32.gmra.mrb[62].mxu1 %vm6605_vm3, %v24536_v7  ;;  %v27336_v7 = vld [vmem:[#allocation7_spill] sm:$0xff] }
 0x87f   :  { %18259 = vmatprep.mubr.msk.f32.mxu1 %vm6605_vm3, %v23896_v2  ;;  %v27335_v2 = vld [vmem:[#allocation6_spill] sm:$0xff] }
 0x882   :  { %18260 = vmatmul.mubr.msk.f32.vlgmr.msra.gmra.mrb[0].mxu1 %vm6605_vm3, %v27333_v28  ;;  %v27339_v28 = vld [vmem:[#allocation64_spill] sm:$0xff] }
 0x883   :  { %18682 = vmatpush3.bf16.msra.mxu1 %v24293_v24  ;;  %18262 = vmatprep.mubr.msk.f32.mxu1 %vm6605_vm3, %v27334_v5  ;;  %v27340_v24 = vld [vmem:[#allocation65_spill] sm:$0xff]  ;;  %v27342_v5 = vld [vmem:[#allocation67_spill] sm:$0xff] }
 0x884   :  { %18684 = vmatprep.subr.bf16.mxu1 %v24548_v33 }
 0x886   :  { %18263 = vmatmul.mubr.msk.f32.gmra.mrb[2].mxu1 %vm6605_vm3, %v27335_v2  ;;  %v27343_v2 = vld [vmem:[#allocation68_spill] sm:$0xff] }
 0x887   :  { %18265 = vmatprep.mubr.msk.f32.mxu1 %vm6605_vm3, %v27336_v7  ;;  %v27344_v7 = vld [vmem:[#allocation69_spill] sm:$0xff] }
 0x88a   :  { %18266 = vmatmul.mubr.msk.f32.gmra.mrb[4].mxu1 %vm6605_vm3, %v27337_v44  ;;  %v27345_v44 = vld [vmem:[#allocation70_spill] sm:$0xff] }
 0x88b   :  { %18268 = vmatprep.mubr.msk.f32.mxu1 %vm6605_vm3, %v27338_v39  ;;  %v27346_v39 = vld [vmem:[#allocation71_spill] sm:$0xff] }
 0x88e   :  { %18269 = vmatmul.mubr.msk.f32.gmra.mrb[6].mxu1 %vm6605_vm3, %v27339_v28  ;;  %v27347_v28 = vld [vmem:[#allocation72_spill] sm:$0xff] }
 0x88f   :  { %18271 = vmatprep.mubr.msk.f32.mxu1 %vm6605_vm3, %v27340_v24  ;;  %v27348_v24 = vld [vmem:[#allocation8_spill] sm:$0xff] }
 0x892   :  { %18272 = vmatmul.mubr.msk.f32.gmra.mrb[8].mxu1 %vm6605_vm3, %v27341_v15  ;;  %v27349_v15 = vld [vmem:[#allocation10_spill] sm:$0xff] }
 0x893   :  { %18274 = vmatprep.mubr.msk.f32.mxu1 %vm6605_vm3, %v27342_v5  ;;  %v27350_v5 = vld [vmem:[#allocation9_spill] sm:$0xff] }
 0x896   :  { %18275 = vmatmul.mubr.msk.f32.gmra.mrb[10].mxu1 %vm6605_vm3, %v27343_v2  ;;  %v27351_v2 = vld [vmem:[#allocation12_spill] sm:$0xff] }
 0x897   :  { %18277 = vmatprep.mubr.msk.f32.mxu1 %vm6605_vm3, %v27344_v7  ;;  %v27352_v7 = vld [vmem:[#allocation11_spill] sm:$0xff] }
 0x89a   :  { %18278 = vmatmul.mubr.msk.f32.gmra.mrb[12].mxu1 %vm6605_vm3, %v27345_v44  ;;  %v27353_v44 = vld [vmem:[#allocation14_spill] sm:$0xff] }
 0x89b   :  { %18280 = vmatprep.mubr.msk.f32.mxu1 %vm6605_vm3, %v27346_v39  ;;  %v27354_v39 = vld [vmem:[#allocation13_spill] sm:$0xff] }
 0x89e   :  { %18281 = vmatmul.mubr.msk.f32.gmra.mrb[14].mxu1 %vm6605_vm3, %v27347_v28  ;;  %v27355_v28 = vld [vmem:[#allocation16_spill] sm:$0xff] }
 0x89f   :  { %18283 = vmatprep.mubr.msk.f32.mxu1 %vm6605_vm3, %v27348_v24  ;;  %v27356_v24 = vld [vmem:[#allocation19_spill] sm:$0xff] }
 0x8a2   :  { %18284 = vmatmul.mubr.msk.f32.gmra.mrb[16].mxu1 %vm6605_vm3, %v27349_v15  ;;  %v27357_v15 = vld [vmem:[#allocation27_spill] sm:$0xff] }
 0x8a3   :  { %18286 = vmatprep.mubr.msk.f32.mxu1 %vm6605_vm3, %v27350_v5  ;;  %v27358_v5 = vld [vmem:[#allocation30_spill] sm:$0xff] }
 0x8a6   :  { %18287 = vmatmul.mubr.msk.f32.gmra.mrb[18].mxu1 %vm6605_vm3, %v27351_v2  ;;  %v27359_v2 = vld [vmem:[#allocation29_spill] sm:$0xff] }
 0x8a7   :  { %18289 = vmatprep.mubr.msk.f32.mxu1 %vm6605_vm3, %v27352_v7  ;;  %v27360_v7 = vld [vmem:[#allocation31_spill] sm:$0xff] }
 0x8aa   :  { %18290 = vmatmul.mubr.msk.f32.gmra.mrb[20].mxu1 %vm6605_vm3, %v27353_v44  ;;  %v27361_v44 = vld [vmem:[#allocation15_spill] sm:$0xff] }
 0x8ab   :  { %18292 = vmatprep.mubr.msk.f32.mxu1 %vm6605_vm3, %v27354_v39  ;;  %v24610_v39 = vld [vmem:[#allocation3 + $0x182] sm:$0xff] }
 0x8ae   :  { %18293 = vmatmul.mubr.msk.f32.gmra.mrb[22].mxu1 %vm6605_vm3, %v27355_v28  ;;  %v24614_v28 = vld [vmem:[#allocation3 + $0x18a] sm:$0xff] }
 0x8af   :  { %18295 = vmatprep.mubr.msk.f32.mxu1 %vm6605_vm3, %v27356_v24  ;;  %27362 = vst [vmem:[#allocation61_spill] sm:$0xff] %v24614_v28  ;;  %v27363_v24 = vld [vmem:[#allocation18_spill] sm:$0xff] }
 0x8b2   :  { %18296 = vmatmul.mubr.msk.f32.gmra.mrb[24].mxu1 %vm6605_vm3, %v27357_v15  ;;  %v27364_v15 = vld [vmem:[#allocation17_spill] sm:$0xff] }
 0x8b3   :  { %18298 = vmatprep.mubr.msk.f32.mxu1 %vm6605_vm3, %v27358_v5  ;;  %v27365_v5 = vld [vmem:[#allocation20_spill] sm:$0xff] }
 0x8b6   :  { %18299 = vmatmul.mubr.msk.f32.gmra.mrb[26].mxu1 %vm6605_vm3, %v27359_v2  ;;  %v27366_v2 = vld [vmem:[#allocation22_spill] sm:$0xff] }
 0x8b7   :  { %18301 = vmatprep.mubr.msk.f32.mxu1 %vm6605_vm3, %v27360_v7  ;;  %v27367_v7 = vld [vmem:[#allocation21_spill] sm:$0xff] }
 0x8ba   :  { %18302 = vmatmul.mubr.msk.f32.gmra.mrb[28].mxu1 %vm6605_vm3, %v27361_v44  ;;  %v27368_v44 = vld [vmem:[#allocation24_spill] sm:$0xff] }
 0x8bb   :  { %18304 = vmatprep.mubr.msk.f32.mxu1 %vm6605_vm3, %v24610_v39 }
 0x8be   :  { %18305 = vmatmul.mubr.msk.f32.gmra.mrb[30].mxu1 %vm6605_vm3, %v24614_v28  ;;  %v27369_v28 = vld [vmem:[#allocation23_spill] sm:$0xff] }
 0x8bf   :  { %18307 = vmatprep.mubr.msk.f32.mxu1 %vm6605_vm3, %v24020_v41  ;;  %v27370_v41 = vld [vmem:[#allocation26_spill] sm:$0xff] }
 0x8c2   :  { %18308 = vmatmul.mubr.msk.f32.gmra.mrb[32].mxu1 %vm6605_vm3, %v27363_v24  ;;  %v27371_v24 = vld [vmem:[#allocation25_spill] sm:$0xff] }
 0x8c3   :  { %18310 = vmatprep.mubr.msk.f32.mxu1 %vm6605_vm3, %v27364_v15  ;;  %v27372_v15 = vld [vmem:[#allocation28_spill] sm:$0xff] }
 0x8c6   :  { %18311 = vmatmul.mubr.msk.f32.gmra.mrb[34].mxu1 %vm6605_vm3, %v27365_v5  ;;  %v27373_v5 = vld [vmem:[#allocation33_spill] sm:$0xff] }
 0x8c7   :  { %18313 = vmatprep.mubr.msk.f32.mxu1 %vm6605_vm3, %v27366_v2  ;;  %v27374_v2 = vld [vmem:[#allocation34_spill] sm:$0xff] }
 0x8ca   :  { %18314 = vmatmul.mubr.msk.f32.gmra.mrb[36].mxu1 %vm6605_vm3, %v27367_v7  ;;  %v27375_v7 = vld [vmem:[#allocation35_spill] sm:$0xff] }
 0x8cb   :  { %18316 = vmatprep.mubr.msk.f32.mxu1 %vm6605_vm3, %v27368_v44  ;;  %v27376_v44 = vld [vmem:[#allocation36_spill] sm:$0xff] }
 0x8ce   :  { %18317 = vmatmul.mubr.msk.f32.gmra.mrb[38].mxu1 %vm6605_vm3, %v27369_v28  ;;  %v27377_v28 = vld [vmem:[#allocation37_spill] sm:$0xff] }
 0x8cf   :  { %18319 = vmatprep.mubr.msk.f32.mxu1 %vm6605_vm3, %v27370_v41  ;;  %v27378_v41 = vld [vmem:[#allocation38_spill] sm:$0xff] }
 0x8d2   :  { %18320 = vmatmul.mubr.msk.f32.gmra.mrb[40].mxu1 %vm6605_vm3, %v27371_v24  ;;  %v27379_v24 = vld [vmem:[#allocation39_spill] sm:$0xff] }
 0x8d3   :  { %18322 = vmatprep.mubr.msk.f32.mxu1 %vm6605_vm3, %v27372_v15  ;;  %v27380_v15 = vld [vmem:[#allocation40_spill] sm:$0xff] }
 0x8d6   :  { %18323 = vmatmul.mubr.msk.f32.gmra.mrb[42].mxu1 %vm6605_vm3, %v27373_v5  ;;  %v27381_v5 = vld [vmem:[#allocation41_spill] sm:$0xff] }
 0x8d7   :  { %18325 = vmatprep.mubr.msk.f32.mxu1 %vm6605_vm3, %v27374_v2  ;;  %v27382_v2 = vld [vmem:[#allocation32_spill] sm:$0xff] }
 0x8da   :  { %18326 = vmatmul.mubr.msk.f32.gmra.mrb[44].mxu1 %vm6605_vm3, %v27375_v7  ;;  %v27383_v7 = vld [vmem:[#allocation42_spill] sm:$0xff] }
 0x8db   :  { %18328 = vmatprep.mubr.msk.f32.mxu1 %vm6605_vm3, %v27376_v44  ;;  %v27384_v44 = vld [vmem:[#allocation43_spill] sm:$0xff] }
 0x8de   :  { %18329 = vmatmul.mubr.msk.f32.gmra.mrb[46].mxu1 %vm6605_vm3, %v27377_v28  ;;  %v27385_v28 = vld [vmem:[#allocation44_spill] sm:$0xff] }
 0x8df   :  { %18331 = vmatprep.mubr.msk.f32.mxu1 %vm6605_vm3, %v27378_v41  ;;  %v27386_v41 = vld [vmem:[#allocation45_spill] sm:$0xff] }
 0x8e2   :  { %18332 = vmatmul.mubr.msk.f32.gmra.mrb[48].mxu1 %vm6605_vm3, %v27379_v24  ;;  %v27387_v24 = vld [vmem:[#allocation46_spill] sm:$0xff] }
 0x8e3   :  { %18334 = vmatprep.mubr.msk.f32.mxu1 %vm6605_vm3, %v27380_v15  ;;  %v27388_v15 = vld [vmem:[#allocation47_spill] sm:$0xff] }
 0x8e6   :  { %18335 = vmatmul.mubr.msk.f32.gmra.mrb[50].mxu1 %vm6605_vm3, %v27381_v5  ;;  %v27389_v5 = vld [vmem:[#allocation48_spill] sm:$0xff] }
 0x8e7   :  { %18337 = vmatprep.mubr.msk.f32.mxu1 %vm6605_vm3, %v27382_v2  ;;  %v24678_v2 = vld [vmem:[#allocation3 + $0x332] sm:$0xff] }
 0x8ea   :  { %18338 = vmatmul.mubr.msk.f32.gmra.mrb[52].mxu1 %vm6605_vm3, %v27383_v7  ;;  %v24682_v7 = vld [vmem:[#allocation3 + $0x33a] sm:$0xff] }
 0x8eb   :  { %18340 = vmatprep.mubr.msk.f32.mxu1 %vm6605_vm3, %v27384_v44  ;;  %v11570_v44 = vld [vmem:[#allocation3 + $0x30] sm:$0xff] }
 0x8ee   :  { %18341 = vmatmul.mubr.msk.f32.gmra.mrb[54].mxu1 %vm6605_vm3, %v27385_v28 }
 0x8ef   :  { %18343 = vmatprep.mubr.msk.f32.mxu1 %vm6605_vm3, %v27386_v41  ;;  %v11571_v41 = vld [vmem:[#allocation3 + $0x38] sm:$0xff] }
 0x8f2   :  { %18344 = vmatmul.mubr.msk.f32.gmra.mrb[56].mxu1 %vm6605_vm3, %v27387_v24  ;;  %v11572_v24 = vld [vmem:[#allocation3 + $0x48] sm:$0xff] }
 0x8f3   :  { %18346 = vmatprep.mubr.msk.f32.mxu1 %vm6605_vm3, %v27388_v15  ;;  %v11573_v15 = vld [vmem:[#allocation3 + $0x50] sm:$0xff] }
 0x8f6   :  { %18347 = vmatmul.mubr.msk.f32.gmra.mrb[58].mxu1 %vm6605_vm3, %v27389_v5  ;;  %v11574_v5 = vld [vmem:[#allocation3 + $0x60] sm:$0xff] }
 0x8f7   :  { %18349 = vmatprep.mubr.msk.f32.mxu1 %vm6605_vm3, %v24132_v31  ;;  %v15625_v31 = vld [vmem:[%s26699_s5 + $0x80] sm:$0xff] }
 0x8fa   :  { %18350 = vmatmul.mubr.msk.f32.gmra.mrb[60].mxu1 %vm6605_vm3, %v24136_v4  ;;  %v15626_v4 = vld [vmem:[%s26699_s5 + $0x88] sm:$0xff] }
 0x8fb   :  { %18352 = vmatprep.mubr.msk.f32.mxu1 %vm6605_vm3, %v24678_v2  ;;  %v24693_v28 = vpack.c.bf16 %v15626_v4, %v15625_v31  ;;  %v11576_v31 = vld [vmem:[#allocation3 + $0x78] sm:$0xff]  ;;  %v11577_v4 = vld [vmem:[#allocation3 + $0x80] sm:$0xff] }
 0x8fe   :  { %18353 = vmatmul.mubr.msk.f32.gmra.mrb[62].mxu1 %vm6605_vm3, %v24682_v7 }
 0x8ff   :  { %18359 = vmatprep.mubr.msk.f32.mxu1 %vm6605_vm3, %v11570_v44  ;;  %v11575_v44 = vld [vmem:[#allocation3 + $0x68] sm:$0xff] }
 0x902   :  { %18360 = vmatmul.mubr.msk.f32.vlgmr.msra.gmra.mrb[0].mxu1 %vm6605_vm3, %v11571_v41  ;;  %v11579_v41 = vld [vmem:[#allocation3 + $0x98] sm:$0xff] }
 0x903   :  { %18686 = vmatpush3.bf16.msra.mxu1 %v24548_v33  ;;  %18362 = vmatprep.mubr.msk.f32.mxu1 %vm6605_vm3, %v11572_v24  ;;  %v11578_v33 = vld [vmem:[#allocation3 + $0x90] sm:$0xff]  ;;  %v11580_v24 = vld [vmem:[#allocation3 + $0xa8] sm:$0xff] }
 0x904   :  { %18688 = vmatprep.subr.bf16.mxu1 %v24693_v28 }
 0x906   :  { %18363 = vmatmul.mubr.msk.f32.gmra.mrb[2].mxu1 %vm6605_vm3, %v11573_v15  ;;  %v11581_v15 = vld [vmem:[#allocation3 + $0xb0] sm:$0xff] }
 0x907   :  { %18365 = vmatprep.mubr.msk.f32.mxu1 %vm6605_vm3, %v11574_v5  ;;  %v11582_v5 = vld [vmem:[#allocation3 + $0xc0] sm:$0xff] }
 0x90a   :  { %18366 = vmatmul.mubr.msk.f32.gmra.mrb[4].mxu1 %vm6605_vm3, %v11575_v44  ;;  %v11583_v44 = vld [vmem:[#allocation3 + $0xc8] sm:$0xff] }
 0x90b   :  { %18368 = vmatprep.mubr.msk.f32.mxu1 %vm6605_vm3, %v11576_v31  ;;  %v11584_v31 = vld [vmem:[#allocation3 + $0xd8] sm:$0xff] }
 0x90e   :  { %18369 = vmatmul.mubr.msk.f32.gmra.mrb[6].mxu1 %vm6605_vm3, %v11577_v4  ;;  %v11585_v4 = vld [vmem:[#allocation3 + $0xe0] sm:$0xff] }
 0x90f   :  { %18371 = vmatprep.mubr.msk.f32.mxu1 %vm6605_vm3, %v11578_v33  ;;  %v11586_v33 = vld [vmem:[#allocation3 + $0xf0] sm:$0xff] }
 0x912   :  { %18372 = vmatmul.mubr.msk.f32.gmra.mrb[8].mxu1 %vm6605_vm3, %v11579_v41  ;;  %v11587_v41 = vld [vmem:[#allocation3 + $0xf8] sm:$0xff] }
 0x913   :  { %18374 = vmatprep.mubr.msk.f32.mxu1 %vm6605_vm3, %v11580_v24  ;;  %v11588_v24 = vld [vmem:[#allocation3 + $0x108] sm:$0xff] }
 0x916   :  { %18375 = vmatmul.mubr.msk.f32.gmra.mrb[10].mxu1 %vm6605_vm3, %v11581_v15  ;;  %v11589_v15 = vld [vmem:[#allocation3 + $0x110] sm:$0xff] }
 0x917   :  { %18377 = vmatprep.mubr.msk.f32.mxu1 %vm6605_vm3, %v11582_v5  ;;  %v11590_v5 = vld [vmem:[#allocation3 + $0x120] sm:$0xff] }
 0x91a   :  { %18378 = vmatmul.mubr.msk.f32.gmra.mrb[12].mxu1 %vm6605_vm3, %v11583_v44  ;;  %v11591_v44 = vld [vmem:[#allocation3 + $0x128] sm:$0xff] }
 0x91b   :  { %18380 = vmatprep.mubr.msk.f32.mxu1 %vm6605_vm3, %v11584_v31  ;;  %v11592_v31 = vld [vmem:[#allocation3 + $0x138] sm:$0xff] }
 0x91e   :  { %18381 = vmatmul.mubr.msk.f32.gmra.mrb[14].mxu1 %vm6605_vm3, %v11585_v4  ;;  %v11593_v4 = vld [vmem:[#allocation3 + $0x140] sm:$0xff] }
 0x91f   :  { %18383 = vmatprep.mubr.msk.f32.mxu1 %vm6605_vm3, %v11586_v33  ;;  %v11594_v33 = vld [vmem:[#allocation3 + $0x150] sm:$0xff] }
 0x922   :  { %18384 = vmatmul.mubr.msk.f32.gmra.mrb[16].mxu1 %vm6605_vm3, %v11587_v41  ;;  %v11595_v41 = vld [vmem:[#allocation3 + $0x158] sm:$0xff] }
 0x923   :  { %18386 = vmatprep.mubr.msk.f32.mxu1 %vm6605_vm3, %v11588_v24  ;;  %v11596_v24 = vld [vmem:[#allocation3 + $0x168] sm:$0xff] }
 0x926   :  { %18387 = vmatmul.mubr.msk.f32.gmra.mrb[18].mxu1 %vm6605_vm3, %v11589_v15  ;;  %v11597_v15 = vld [vmem:[#allocation3 + $0x170] sm:$0xff] }
 0x927   :  { %18389 = vmatprep.mubr.msk.f32.mxu1 %vm6605_vm3, %v11590_v5  ;;  %v11600_v5 = vld [vmem:[#allocation3 + $0x198] sm:$0xff] }
 0x92a   :  { %18390 = vmatmul.mubr.msk.f32.gmra.mrb[20].mxu1 %vm6605_vm3, %v11591_v44  ;;  %v11601_v44 = vld [vmem:[#allocation3 + $0x1a0] sm:$0xff] }
 0x92b   :  { %18392 = vmatprep.mubr.msk.f32.mxu1 %vm6605_vm3, %v11592_v31  ;;  %v11602_v31 = vld [vmem:[#allocation3 + $0x1e0] sm:$0xff] }
 0x92e   :  { %18393 = vmatmul.mubr.msk.f32.gmra.mrb[22].mxu1 %vm6605_vm3, %v11593_v4  ;;  %v11603_v4 = vld [vmem:[#allocation3 + $0x1e8] sm:$0xff] }
 0x92f   :  { %18395 = vmatprep.mubr.msk.f32.mxu1 %vm6605_vm3, %v11594_v33  ;;  %v11604_v33 = vld [vmem:[#allocation3 + $0x1f8] sm:$0xff] }
 0x932   :  { %18396 = vmatmul.mubr.msk.f32.gmra.mrb[24].mxu1 %vm6605_vm3, %v11595_v41  ;;  %v11605_v41 = vld [vmem:[#allocation3 + $0x200] sm:$0xff] }
 0x933   :  { %18398 = vmatprep.mubr.msk.f32.mxu1 %vm6605_vm3, %v11596_v24  ;;  %v11608_v24 = vld [vmem:[#allocation3 + $0x228] sm:$0xff] }
 0x936   :  { %18399 = vmatmul.mubr.msk.f32.gmra.mrb[26].mxu1 %vm6605_vm3, %v11597_v15  ;;  %v11609_v15 = vld [vmem:[#allocation3 + $0x230] sm:$0xff] }
 0x937   :  { %18401 = vmatprep.mubr.msk.f32.mxu1 %vm6605_vm3, %v24210_v11  ;;  %v11606_v11 = vld [vmem:[#allocation3 + $0x210] sm:$0xff] }
 0x93a   :  { %18402 = vmatmul.mubr.msk.f32.gmra.mrb[28].mxu1 %vm6605_vm3, %v24214_v34  ;;  %v11607_v34 = vld [vmem:[#allocation3 + $0x218] sm:$0xff] }
 0x93b   :  { %18404 = vmatprep.mubr.msk.f32.mxu1 %vm6605_vm3, %v11600_v5  ;;  %v11610_v5 = vld [vmem:[#allocation3 + $0x240] sm:$0xff] }
 0x93e   :  { %18405 = vmatmul.mubr.msk.f32.gmra.mrb[30].mxu1 %vm6605_vm3, %v11601_v44  ;;  %v11611_v44 = vld [vmem:[#allocation3 + $0x248] sm:$0xff] }
 0x93f   :  { %18407 = vmatprep.mubr.msk.f32.mxu1 %vm6605_vm3, %v11602_v31  ;;  %v11612_v31 = vld [vmem:[#allocation3 + $0x258] sm:$0xff] }
 0x942   :  { %18408 = vmatmul.mubr.msk.f32.gmra.mrb[32].mxu1 %vm6605_vm3, %v11603_v4  ;;  %v11613_v4 = vld [vmem:[#allocation3 + $0x260] sm:$0xff] }
 0x943   :  { %18410 = vmatprep.mubr.msk.f32.mxu1 %vm6605_vm3, %v11604_v33  ;;  %v11614_v33 = vld [vmem:[#allocation3 + $0x270] sm:$0xff] }
 0x946   :  { %18411 = vmatmul.mubr.msk.f32.gmra.mrb[34].mxu1 %vm6605_vm3, %v11605_v41  ;;  %v11615_v41 = vld [vmem:[#allocation3 + $0x278] sm:$0xff] }
 0x947   :  { %18413 = vmatprep.mubr.msk.f32.mxu1 %vm6605_vm3, %v11606_v11  ;;  %v11616_v11 = vld [vmem:[#allocation3 + $0x288] sm:$0xff] }
 0x94a   :  { %18414 = vmatmul.mubr.msk.f32.gmra.mrb[36].mxu1 %vm6605_vm3, %v11607_v34  ;;  %v11617_v34 = vld [vmem:[#allocation3 + $0x290] sm:$0xff] }
 0x94b   :  { %18416 = vmatprep.mubr.msk.f32.mxu1 %vm6605_vm3, %v11608_v24  ;;  %v11618_v24 = vld [vmem:[#allocation3 + $0x2a0] sm:$0xff] }
 0x94e   :  { %18417 = vmatmul.mubr.msk.f32.gmra.mrb[38].mxu1 %vm6605_vm3, %v11609_v15  ;;  %v11619_v15 = vld [vmem:[#allocation3 + $0x2a8] sm:$0xff] }
 0x94f   :  { %18419 = vmatprep.mubr.msk.f32.mxu1 %vm6605_vm3, %v11610_v5  ;;  %v11620_v5 = vld [vmem:[#allocation3 + $0x2b8] sm:$0xff] }
 0x952   :  { %18420 = vmatmul.mubr.msk.f32.gmra.mrb[40].mxu1 %vm6605_vm3, %v11611_v44  ;;  %v11621_v44 = vld [vmem:[#allocation3 + $0x2c0] sm:$0xff] }
 0x953   :  { %18422 = vmatprep.mubr.msk.f32.mxu1 %vm6605_vm3, %v11612_v31  ;;  %v11622_v31 = vld [vmem:[#allocation3 + $0x2d0] sm:$0xff] }
 0x956   :  { %18423 = vmatmul.mubr.msk.f32.gmra.mrb[42].mxu1 %vm6605_vm3, %v11613_v4  ;;  %v11623_v4 = vld [vmem:[#allocation3 + $0x2d8] sm:$0xff] }
 0x957   :  { %18425 = vmatprep.mubr.msk.f32.mxu1 %vm6605_vm3, %v11614_v33  ;;  %v11624_v33 = vld [vmem:[#allocation3 + $0x2e8] sm:$0xff] }
 0x95a   :  { %18426 = vmatmul.mubr.msk.f32.gmra.mrb[44].mxu1 %vm6605_vm3, %v11615_v41  ;;  %v11625_v41 = vld [vmem:[#allocation3 + $0x2f0] sm:$0xff] }
 0x95b   :  { %18428 = vmatprep.mubr.msk.f32.mxu1 %vm6605_vm3, %v11616_v11  ;;  %v11626_v11 = vld [vmem:[#allocation3 + $0x300] sm:$0xff] }
 0x95e   :  { %18429 = vmatmul.mubr.msk.f32.gmra.mrb[46].mxu1 %vm6605_vm3, %v11617_v34  ;;  %v11627_v34 = vld [vmem:[#allocation3 + $0x308] sm:$0xff] }
 0x95f   :  { %18431 = vmatprep.mubr.msk.f32.mxu1 %vm6605_vm3, %v11618_v24  ;;  %v11628_v24 = vld [vmem:[#allocation3 + $0x318] sm:$0xff] }
 0x962   :  { %18432 = vmatmul.mubr.msk.f32.gmra.mrb[48].mxu1 %vm6605_vm3, %v11619_v15  ;;  %v11629_v15 = vld [vmem:[#allocation3 + $0x320] sm:$0xff] }
 0x963   :  { %18434 = vmatprep.mubr.msk.f32.mxu1 %vm6605_vm3, %v11620_v5  ;;  %v11632_v5 = vld [vmem:[#allocation3 + $0x348] sm:$0xff] }
 0x966   :  { %18435 = vmatmul.mubr.msk.f32.gmra.mrb[50].mxu1 %vm6605_vm3, %v11621_v44  ;;  %v11633_v44 = vld [vmem:[#allocation3 + $0x350] sm:$0xff] }
 0x967   :  { %18437 = vmatprep.mubr.msk.f32.mxu1 %vm6605_vm3, %v11622_v31  ;;  %v13023_v31 = vld [vmem:[#allocation3 + $0x21a] sm:$0xff] }
 0x96a   :  { %18438 = vmatmul.mubr.msk.f32.gmra.mrb[52].mxu1 %vm6605_vm3, %v11623_v4  ;;  %v13024_v4 = vld [vmem:[#allocation3 + $0x22a] sm:$0xff] }
 0x96b   :  { %18440 = vmatprep.mubr.msk.f32.mxu1 %vm6605_vm3, %v11624_v33  ;;  %v13025_v33 = vld [vmem:[#allocation3 + $0x232] sm:$0xff] }
 0x96e   :  { %18441 = vmatmul.mubr.msk.f32.gmra.mrb[54].mxu1 %vm6605_vm3, %v11625_v41  ;;  %v13026_v41 = vld [vmem:[#allocation3 + $0x242] sm:$0xff] }
 0x96f   :  { %18443 = vmatprep.mubr.msk.f32.mxu1 %vm6605_vm3, %v11626_v11  ;;  %v13027_v11 = vld [vmem:[#allocation3 + $0x24a] sm:$0xff] }
 0x972   :  { %18444 = vmatmul.mubr.msk.f32.gmra.mrb[56].mxu1 %vm6605_vm3, %v11627_v34  ;;  %v13028_v34 = vld [vmem:[#allocation3 + $0x25a] sm:$0xff] }
 0x973   :  { %18446 = vmatprep.mubr.msk.f32.mxu1 %vm6605_vm3, %v11628_v24  ;;  %v13029_v24 = vld [vmem:[#allocation3 + $0x262] sm:$0xff] }
 0x976   :  { %18447 = vmatmul.mubr.msk.f32.gmra.mrb[58].mxu1 %vm6605_vm3, %v11629_v15  ;;  %v13030_v15 = vld [vmem:[#allocation3 + $0x272] sm:$0xff] }
 0x977   :  { %18449 = vmatprep.mubr.msk.f32.mxu1 %vm6605_vm3, %v24278_v27  ;;  %v12308_v27 = vld [vmem:[#allocation3 + $0x199] sm:$0xff] }
 0x97a   :  { %18450 = vmatmul.mubr.msk.f32.gmra.mrb[60].mxu1 %vm6605_vm3, %v24282_v58  ;;  %v12309_v58 = vld [vmem:[#allocation3 + $0x1a1] sm:$0xff] }
 0x97b   :  { %18452 = vmatprep.mubr.msk.f32.mxu1 %vm6605_vm3, %v11632_v5  ;;  %v13031_v5 = vld [vmem:[#allocation3 + $0x27a] sm:$0xff] }
 0x97e   :  { %18453 = vmatmul.mubr.msk.f32.gmra.mrb[62].mxu1 %vm6605_vm3, %v11633_v44  ;;  %v13032_v44 = vld [vmem:[#allocation3 + $0x28a] sm:$0xff] }
 0x97f   :  { %18459 = vmatprep.mubr.msk.f32.mxu1 %vm6605_vm3, %v24296_v32  ;;  %v27390_v32 = vld [vmem:[#allocation49_spill] sm:$0xff] }
 0x982   :  { %18460 = vmatmul.mubr.msk.f32.vlgmr.msra.gmra.mrb[0].mxu1 %vm6605_vm3, %v24302_v47  ;;  %v27391_v47 = vld [vmem:[#allocation50_spill] sm:$0xff] }
 0x983   :  { %18690 = vmatpush3.bf16.msra.mxu1 %v24693_v28  ;;  %18462 = vmatprep.mubr.msk.f32.mxu1 %vm6605_vm3, %v24306_v16  ;;  %v27392_v16 = vld [vmem:[#allocation51_spill] sm:$0xff]  ;;  %v13021_v28 = vld [vmem:[#allocation3 + $0x202] sm:$0xff] }
 0x986   :  { %18463 = vmatmul.mubr.msk.f32.gmra.mrb[2].mxu1 %vm6605_vm3, %v24310_v37  ;;  %v27393_v37 = vld [vmem:[#allocation52_spill] sm:$0xff] }
 0x987   :  { %18465 = vmatprep.mubr.msk.f32.mxu1 %vm6605_vm3, %v24314_v35  ;;  %v27394_v35 = vld [vmem:[#allocation53_spill] sm:$0xff] }
 0x98a   :  { %18466 = vmatmul.mubr.msk.f32.gmra.mrb[4].mxu1 %vm6605_vm3, %v24318_v49  ;;  %v27395_v49 = vld [vmem:[#allocation54_spill] sm:$0xff] }
 0x98b   :  { %18468 = vmatprep.mubr.msk.f32.mxu1 %vm6605_vm3, %v24322_v48  ;;  %v27396_v48 = vld [vmem:[#allocation55_spill] sm:$0xff] }
 0x98e   :  { %18469 = vmatmul.mubr.msk.f32.gmra.mrb[6].mxu1 %vm6605_vm3, %v24326_v23  ;;  %v27397_v23 = vld [vmem:[#allocation56_spill] sm:$0xff] }
 0x98f   :  { %18471 = vmatprep.mubr.msk.f32.mxu1 %vm6605_vm3, %v24330_v19  ;;  %v27398_v19 = vld [vmem:[#allocation57_spill] sm:$0xff] }
 0x992   :  { %18472 = vmatmul.mubr.msk.f32.gmra.mrb[8].mxu1 %vm6605_vm3, %v24334_v43  ;;  %v27399_v43 = vld [vmem:[#allocation58_spill] sm:$0xff] }
 0x993   :  { %18474 = vmatprep.mubr.msk.f32.mxu1 %vm6605_vm3, %v24338_v61  ;;  %v27400_v61 = vld [vmem:[#allocation59_spill] sm:$0xff] }
 0x996   :  { %18475 = vmatmul.mubr.msk.f32.gmra.mrb[10].mxu1 %vm6605_vm3, %v24342_v57  ;;  %v12340_v57 = vld [vmem:[#allocation3 + $0x349] sm:$0xff] }
 0x997   :  { %18477 = vmatprep.mubr.msk.f32.mxu1 %vm6605_vm3, %v24346_v54  ;;  %v27401_v54 = vld [vmem:[#allocation60_spill] sm:$0xff] }
 0x99a   :  { %18478 = vmatmul.mubr.msk.f32.gmra.mrb[12].mxu1 %vm6605_vm3, %v24350_v8  ;;  %v12341_v8 = vld [vmem:[#allocation3 + $0x351] sm:$0xff] }
 0x99b   :  { %18480 = vmatprep.mubr.msk.f32.mxu1 %vm6605_vm3, %v24354_v0  ;;  %v12986_v0 = vld [vmem:[#allocation3 + $0x32] sm:$0xff] }
 0x99e   :  { %18481 = vmatmul.mubr.msk.f32.gmra.mrb[14].mxu1 %vm6605_vm3, %v24358_v26  ;;  %v12987_v26 = vld [vmem:[#allocation3 + $0x3a] sm:$0xff] }
 0x99f   :  { %18483 = vmatprep.mubr.msk.f32.mxu1 %vm6605_vm3, %v24362_v46  ;;  %v12988_v46 = vld [vmem:[#allocation3 + $0x4a] sm:$0xff] }
 0x9a2   :  { %18484 = vmatmul.mubr.msk.f32.gmra.mrb[16].mxu1 %vm6605_vm3, %v24366_v6  ;;  %v12989_v6 = vld [vmem:[#allocation3 + $0x52] sm:$0xff] }
 0x9a3   :  { %18486 = vmatprep.mubr.msk.f32.mxu1 %vm6605_vm3, %v24370_v63  ;;  %v12990_v63 = vld [vmem:[#allocation3 + $0x62] sm:$0xff] }
 0x9a6   :  { %18487 = vmatmul.mubr.msk.f32.gmra.mrb[18].mxu1 %vm6605_vm3, %v24374_v20  ;;  %v12991_v20 = vld [vmem:[#allocation3 + $0x6a] sm:$0xff] }
 0x9a7   :  { %18489 = vmatprep.mubr.msk.f32.mxu1 %vm6605_vm3, %v24378_v1  ;;  %v12992_v1 = vld [vmem:[#allocation3 + $0x7a] sm:$0xff] }
 0x9aa   :  { %18490 = vmatmul.mubr.msk.f32.gmra.mrb[20].mxu1 %vm6605_vm3, %v24382_v38  ;;  %v12993_v38 = vld [vmem:[#allocation3 + $0x82] sm:$0xff] }
 0x9ab   :  { %18492 = vmatprep.mubr.msk.f32.mxu1 %vm6605_vm3, %v24386_v56  ;;  %v12994_v56 = vld [vmem:[#allocation3 + $0x92] sm:$0xff] }
 0x9ae   :  { %18493 = vmatmul.mubr.msk.f32.gmra.mrb[22].mxu1 %vm6605_vm3, %v24390_v42  ;;  %v12995_v42 = vld [vmem:[#allocation3 + $0x9a] sm:$0xff] }
 0x9af   :  { %18495 = vmatprep.mubr.msk.f32.mxu1 %vm6605_vm3, %v24394_v13  ;;  %v12996_v13 = vld [vmem:[#allocation3 + $0xaa] sm:$0xff] }
 0x9b2   :  { %18496 = vmatmul.mubr.msk.f32.gmra.mrb[24].mxu1 %vm6605_vm3, %v24398_v62  ;;  %v12997_v62 = vld [vmem:[#allocation3 + $0xb2] sm:$0xff] }
 0x9b3   :  { %18498 = vmatprep.mubr.msk.f32.mxu1 %vm6605_vm3, %v24402_v17  ;;  %v12998_v17 = vld [vmem:[#allocation3 + $0xc2] sm:$0xff] }
 0x9b6   :  { %18499 = vmatmul.mubr.msk.f32.gmra.mrb[26].mxu1 %vm6605_vm3, %v24406_v53  ;;  %v12999_v53 = vld [vmem:[#allocation3 + $0xca] sm:$0xff] }
 0x9b7   :  { %18501 = vmatprep.mubr.msk.f32.mxu1 %vm6605_vm3, %v24410_v30  ;;  %v13000_v30 = vld [vmem:[#allocation3 + $0xda] sm:$0xff] }
 0x9ba   :  { %18502 = vmatmul.mubr.msk.f32.gmra.mrb[28].mxu1 %vm6605_vm3, %v24414_v45  ;;  %v13001_v45 = vld [vmem:[#allocation3 + $0xe2] sm:$0xff] }
 0x9bb   :  { %18504 = vmatprep.mubr.msk.f32.mxu1 %vm6605_vm3, %v12308_v27  ;;  %v13033_v27 = vld [vmem:[#allocation3 + $0x292] sm:$0xff] }
 0x9be   :  { %18505 = vmatmul.mubr.msk.f32.gmra.mrb[30].mxu1 %vm6605_vm3, %v12309_v58  ;;  %v13034_v58 = vld [vmem:[#allocation3 + $0x2a2] sm:$0xff] }
 0x9bf   :  { %18507 = vmatprep.mubr.msk.f32.mxu1 %vm6605_vm3, %v24420_v25  ;;  %v13002_v25 = vld [vmem:[#allocation3 + $0xf2] sm:$0xff] }
 0x9c2   :  { %18508 = vmatmul.mubr.msk.f32.gmra.mrb[32].mxu1 %vm6605_vm3, %v24424_v12  ;;  %v13003_v12 = vld [vmem:[#allocation3 + $0xfa] sm:$0xff] }
 0x9c3   :  { %18510 = vmatprep.mubr.msk.f32.mxu1 %vm6605_vm3, %v24428_v36  ;;  %v13004_v36 = vld [vmem:[#allocation3 + $0x10a] sm:$0xff] }
 0x9c6   :  { %18511 = vmatmul.mubr.msk.f32.gmra.mrb[34].mxu1 %vm6605_vm3, %v24432_v9  ;;  %v13005_v9 = vld [vmem:[#allocation3 + $0x112] sm:$0xff] }
 0x9c7   :  { %18513 = vmatprep.mubr.msk.f32.mxu1 %vm6605_vm3, %v24436_v55  ;;  %v13006_v55 = vld [vmem:[#allocation3 + $0x122] sm:$0xff] }
 0x9ca   :  { %18514 = vmatmul.mubr.msk.f32.gmra.mrb[36].mxu1 %vm6605_vm3, %v24440_v40  ;;  %v13007_v40 = vld [vmem:[#allocation3 + $0x12a] sm:$0xff] }
 0x9cb   :  { %18516 = vmatprep.mubr.msk.f32.mxu1 %vm6605_vm3, %v24444_v14  ;;  %v13008_v14 = vld [vmem:[#allocation3 + $0x13a] sm:$0xff] }
 0x9ce   :  { %18517 = vmatmul.mubr.msk.f32.gmra.mrb[38].mxu1 %vm6605_vm3, %v24448_v50  ;;  %v13009_v50 = vld [vmem:[#allocation3 + $0x142] sm:$0xff] }
 0x9cf   :  { %18519 = vmatprep.mubr.msk.f32.mxu1 %vm6605_vm3, %v24452_v52  ;;  %v13010_v52 = vld [vmem:[#allocation3 + $0x152] sm:$0xff] }
 0x9d2   :  { %18520 = vmatmul.mubr.msk.f32.gmra.mrb[40].mxu1 %vm6605_vm3, %v24456_v22  ;;  %v13011_v22 = vld [vmem:[#allocation3 + $0x15a] sm:$0xff] }
 0x9d3   :  { %18522 = vmatprep.mubr.msk.f32.mxu1 %vm6605_vm3, %v24460_v51  ;;  %v13012_v51 = vld [vmem:[#allocation3 + $0x16a] sm:$0xff] }
 0x9d6   :  { %18523 = vmatmul.mubr.msk.f32.gmra.mrb[42].mxu1 %vm6605_vm3, %v24464_v18  ;;  %v13013_v18 = vld [vmem:[#allocation3 + $0x172] sm:$0xff] }
 0x9d7   :  { %18525 = vmatprep.mubr.msk.f32.mxu1 %vm6605_vm3, %v24468_v3  ;;  %v13016_v3 = vld [vmem:[#allocation3 + $0x19a] sm:$0xff] }
 0x9da   :  { %18526 = vmatmul.mubr.msk.f32.gmra.mrb[44].mxu1 %vm6605_vm3, %v24472_v10  ;;  %v27402_v10 = vld [vmem:[#allocation61_spill] sm:$0xff] }
 0x9db   :  { %18528 = vmatprep.mubr.msk.f32.mxu1 %vm6605_vm3, %v24476_v21  ;;  %v13017_v21 = vld [vmem:[#allocation3 + $0x1a2] sm:$0xff] }
 0x9de   :  { %18529 = vmatmul.mubr.msk.f32.gmra.mrb[46].mxu1 %vm6605_vm3, %v24480_v60  ;;  %v13018_v60 = vld [vmem:[#allocation3 + $0x1e2] sm:$0xff] }
 0x9df   :  { %18531 = vmatprep.mubr.msk.f32.mxu1 %vm6605_vm3, %v24484_v29  ;;  %v13019_v29 = vld [vmem:[#allocation3 + $0x1ea] sm:$0xff] }
 0x9e2   :  { %18532 = vmatmul.mubr.msk.f32.gmra.mrb[48].mxu1 %vm6605_vm3, %v24488_v59  ;;  %v13020_v59 = vld [vmem:[#allocation3 + $0x1fa] sm:$0xff] }
 0x9e3   :  { %18534 = vmatprep.mubr.msk.f32.mxu1 %vm6605_vm3, %v27390_v32  ;;  %v13035_v32 = vld [vmem:[#allocation3 + $0x2aa] sm:$0xff] }
 0x9e6   :  { %18535 = vmatmul.mubr.msk.f32.gmra.mrb[50].mxu1 %vm6605_vm3, %v27391_v47  ;;  %v13036_v47 = vld [vmem:[#allocation3 + $0x2ba] sm:$0xff] }
 0x9e7   :  { %18537 = vmatprep.mubr.msk.f32.mxu1 %vm6605_vm3, %v27392_v16  ;;  %v13037_v16 = vld [vmem:[#allocation3 + $0x2c2] sm:$0xff] }
 0x9ea   :  { %18538 = vmatmul.mubr.msk.f32.gmra.mrb[52].mxu1 %vm6605_vm3, %v27393_v37  ;;  %v13038_v37 = vld [vmem:[#allocation3 + $0x2d2] sm:$0xff] }
 0x9eb   :  { %18540 = vmatprep.mubr.msk.f32.mxu1 %vm6605_vm3, %v27394_v35  ;;  %v13039_v35 = vld [vmem:[#allocation3 + $0x2da] sm:$0xff] }
 0x9ee   :  { %18541 = vmatmul.mubr.msk.f32.gmra.mrb[54].mxu1 %vm6605_vm3, %v27395_v49  ;;  %v13040_v49 = vld [vmem:[#allocation3 + $0x2ea] sm:$0xff] }
 0x9ef   :  { %18543 = vmatprep.mubr.msk.f32.mxu1 %vm6605_vm3, %v27396_v48  ;;  %v13041_v48 = vld [vmem:[#allocation3 + $0x2f2] sm:$0xff] }
 0x9f2   :  { %18544 = vmatmul.mubr.msk.f32.gmra.mrb[56].mxu1 %vm6605_vm3, %v27397_v23  ;;  %v13042_v23 = vld [vmem:[#allocation3 + $0x302] sm:$0xff] }
 0x9f3   :  { %18546 = vmatprep.mubr.msk.f32.mxu1 %vm6605_vm3, %v27398_v19  ;;  %v13043_v19 = vld [vmem:[#allocation3 + $0x30a] sm:$0xff] }
 0x9f6   :  { %18547 = vmatmul.mubr.msk.f32.gmra.mrb[58].mxu1 %vm6605_vm3, %v27399_v43  ;;  %v13044_v43 = vld [vmem:[#allocation3 + $0x31a] sm:$0xff] }
 0x9f7   :  { %18549 = vmatprep.mubr.msk.f32.mxu1 %vm6605_vm3, %v27400_v61  ;;  %v13045_v61 = vld [vmem:[#allocation3 + $0x322] sm:$0xff] }
 0x9fa   :  { %18550 = vmatmul.mubr.msk.f32.gmra.mrb[60].mxu1 %vm6605_vm3, %v27401_v54  ;;  %v13049_v54 = vld [vmem:[#allocation3 + $0x352] sm:$0xff] }
 0x9fb   :  { %18552 = vmatprep.mubr.msk.f32.mxu1 %vm6605_vm3, %v12340_v57  ;;  %v13048_v57 = vld [vmem:[#allocation3 + $0x34a] sm:$0xff] }
 0x9fe   :  { %18553 = vmatmul.mubr.msk.f32.gmra.mrb[62].mxu1 %vm6605_vm3, %v12341_v8  ;;  %v24960_v8 = vld [vmem:[%s26702_s6] ss:$0 sm:$0xff] }
 0x9ff   :  { %18559 = vmatprep.mubr.msk.f32.mxu1 %vm6605_vm3, %v12986_v0 }
 0xa02   :  { %18560 = vmatmul.mubr.msk.f32.vlgmr.msra.gmra.mrb[0].mxu1 %vm6605_vm3, %v12987_v26 }
 0xa03   :  { %18562 = vmatprep.mubr.msk.f32.mxu1 %vm6605_vm3, %v12988_v46 }
 0xa06   :  { %18563 = vmatmul.mubr.msk.f32.gmra.mrb[2].mxu1 %vm6605_vm3, %v12989_v6 }
 0xa07   :  { %18565 = vmatprep.mubr.msk.f32.mxu1 %vm6605_vm3, %v12990_v63 }
 0xa0a   :  { %18566 = vmatmul.mubr.msk.f32.gmra.mrb[4].mxu1 %vm6605_vm3, %v12991_v20 }
 0xa0b   :  { %18568 = vmatprep.mubr.msk.f32.mxu1 %vm6605_vm3, %v12992_v1 }
 0xa0e   :  { %18569 = vmatmul.mubr.msk.f32.gmra.mrb[6].mxu1 %vm6605_vm3, %v12993_v38 }
 0xa0f   :  { %18571 = vmatprep.mubr.msk.f32.mxu1 %vm6605_vm3, %v12994_v56 }
 0xa12   :  { %18572 = vmatmul.mubr.msk.f32.gmra.mrb[8].mxu1 %vm6605_vm3, %v12995_v42 }
 0xa13   :  { %18574 = vmatprep.mubr.msk.f32.mxu1 %vm6605_vm3, %v12996_v13 }
 0xa16   :  { %18575 = vmatmul.mubr.msk.f32.gmra.mrb[10].mxu1 %vm6605_vm3, %v12997_v62 }
 0xa17   :  { %18577 = vmatprep.mubr.msk.f32.mxu1 %vm6605_vm3, %v12998_v17 }
 0xa1a   :  { %18578 = vmatmul.mubr.msk.f32.gmra.mrb[12].mxu1 %vm6605_vm3, %v12999_v53 }
 0xa1b   :  { %18580 = vmatprep.mubr.msk.f32.mxu1 %vm6605_vm3, %v13000_v30 }
 0xa1e   :  { %18581 = vmatmul.mubr.msk.f32.gmra.mrb[14].mxu1 %vm6605_vm3, %v13001_v45 }
 0xa1f   :  { %18583 = vmatprep.mubr.msk.f32.mxu1 %vm6605_vm3, %v13002_v25 }
 0xa22   :  { %18584 = vmatmul.mubr.msk.f32.gmra.mrb[16].mxu1 %vm6605_vm3, %v13003_v12 }
 0xa23   :  { %18586 = vmatprep.mubr.msk.f32.mxu1 %vm6605_vm3, %v13004_v36 }
 0xa26   :  { %18587 = vmatmul.mubr.msk.f32.gmra.mrb[18].mxu1 %vm6605_vm3, %v13005_v9 }
 0xa27   :  { %18589 = vmatprep.mubr.msk.f32.mxu1 %vm6605_vm3, %v13006_v55 }
 0xa2a   :  { %18590 = vmatmul.mubr.msk.f32.gmra.mrb[20].mxu1 %vm6605_vm3, %v13007_v40 }
 0xa2b   :  { %18592 = vmatprep.mubr.msk.f32.mxu1 %vm6605_vm3, %v13008_v14 }
 0xa2e   :  { %18593 = vmatmul.mubr.msk.f32.gmra.mrb[22].mxu1 %vm6605_vm3, %v13009_v50 }
 0xa2f   :  { %18595 = vmatprep.mubr.msk.f32.mxu1 %vm6605_vm3, %v13010_v52 }
 0xa32   :  { %18596 = vmatmul.mubr.msk.f32.gmra.mrb[24].mxu1 %vm6605_vm3, %v13011_v22 }
 0xa33   :  { %18598 = vmatprep.mubr.msk.f32.mxu1 %vm6605_vm3, %v13012_v51 }
 0xa36   :  { %18599 = vmatmul.mubr.msk.f32.gmra.mrb[26].mxu1 %vm6605_vm3, %v13013_v18 }
 0xa37   :  { %18601 = vmatprep.mubr.msk.f32.mxu1 %vm6605_vm3, %v24610_v39  ;;  %v13022_v39 = vld [vmem:[#allocation3 + $0x212] sm:$0xff] }
 0xa3a   :  { %18602 = vmatmul.mubr.msk.f32.gmra.mrb[28].mxu1 %vm6605_vm3, %v27402_v10 }
 0xa3b   :  { %18604 = vmatprep.mubr.msk.f32.mxu1 %vm6605_vm3, %v13016_v3 }
 0xa3e   :  { %18605 = vmatmul.mubr.msk.f32.gmra.mrb[30].mxu1 %vm6605_vm3, %v13017_v21 }
 0xa3f   :  { %18607 = vmatprep.mubr.msk.f32.mxu1 %vm6605_vm3, %v13018_v60 }
 0xa42   :  { %18608 = vmatmul.mubr.msk.f32.gmra.mrb[32].mxu1 %vm6605_vm3, %v13019_v29 }
 0xa43   :  { %18610 = vmatprep.mubr.msk.f32.mxu1 %vm6605_vm3, %v13020_v59 }
 0xa46   :  { %18611 = vmatmul.mubr.msk.f32.gmra.mrb[34].mxu1 %vm6605_vm3, %v13021_v28 }
 0xa47   :  { %18613 = vmatprep.mubr.msk.f32.mxu1 %vm6605_vm3, %v13022_v39 }
 0xa4a   :  { %18614 = vmatmul.mubr.msk.f32.gmra.mrb[36].mxu1 %vm6605_vm3, %v13023_v31 }
 0xa4b   :  { %18616 = vmatprep.mubr.msk.f32.mxu1 %vm6605_vm3, %v13024_v4 }
 0xa4e   :  { %18617 = vmatmul.mubr.msk.f32.gmra.mrb[38].mxu1 %vm6605_vm3, %v13025_v33 }
 0xa4f   :  { %18619 = vmatprep.mubr.msk.f32.mxu1 %vm6605_vm3, %v13026_v41 }
 0xa52   :  { %18620 = vmatmul.mubr.msk.f32.gmra.mrb[40].mxu1 %vm6605_vm3, %v13027_v11 }
 0xa53   :  { %18622 = vmatprep.mubr.msk.f32.mxu1 %vm6605_vm3, %v13028_v34 }
 0xa56   :  { %18623 = vmatmul.mubr.msk.f32.gmra.mrb[42].mxu1 %vm6605_vm3, %v13029_v24 }
 0xa57   :  { %18625 = vmatprep.mubr.msk.f32.mxu1 %vm6605_vm3, %v13030_v15 }
 0xa5a   :  { %18626 = vmatmul.mubr.msk.f32.gmra.mrb[44].mxu1 %vm6605_vm3, %v13031_v5 }
 0xa5b   :  { %18628 = vmatprep.mubr.msk.f32.mxu1 %vm6605_vm3, %v13032_v44 }
 0xa5e   :  { %18629 = vmatmul.mubr.msk.f32.gmra.mrb[46].mxu1 %vm6605_vm3, %v13033_v27 }
 0xa5f   :  { %18631 = vmatprep.mubr.msk.f32.mxu1 %vm6605_vm3, %v13034_v58 }
 0xa62   :  { %18632 = vmatmul.mubr.msk.f32.gmra.mrb[48].mxu1 %vm6605_vm3, %v13035_v32 }
 0xa63   :  { %18634 = vmatprep.mubr.msk.f32.mxu1 %vm6605_vm3, %v13036_v47 }
 0xa66   :  { %18635 = vmatmul.mubr.msk.f32.gmra.mrb[50].mxu1 %vm6605_vm3, %v13037_v16 }
 0xa67   :  { %18637 = vmatprep.mubr.msk.f32.mxu1 %vm6605_vm3, %v13038_v37 }
 0xa6a   :  { %18638 = vmatmul.mubr.msk.f32.gmra.mrb[52].mxu1 %vm6605_vm3, %v13039_v35 }
 0xa6b   :  { %18640 = vmatprep.mubr.msk.f32.mxu1 %vm6605_vm3, %v13040_v49 }
 0xa6e   :  { %18641 = vmatmul.mubr.msk.f32.gmra.mrb[54].mxu1 %vm6605_vm3, %v13041_v48 }
 0xa6f   :  { %18643 = vmatprep.mubr.msk.f32.mxu1 %vm6605_vm3, %v13042_v23 }
 0xa72   :  { %18644 = vmatmul.mubr.msk.f32.gmra.mrb[56].mxu1 %vm6605_vm3, %v13043_v19 }
 0xa73   :  { %18646 = vmatprep.mubr.msk.f32.mxu1 %vm6605_vm3, %v13044_v43 }
 0xa76   :  { %18647 = vmatmul.mubr.msk.f32.gmra.mrb[58].mxu1 %vm6605_vm3, %v13045_v61 }
 0xa77   :  { %18649 = vmatprep.mubr.msk.f32.mxu1 %vm6605_vm3, %v24678_v2 }
 0xa7a   :  { %18650 = vmatmul.mubr.msk.f32.gmra.mrb[60].mxu1 %vm6605_vm3, %v24682_v7 }
 0xa7b   :  { %18652 = vmatprep.mubr.msk.f32.mxu1 %vm6605_vm3, %v13048_v57 }
 0xa7e   :  { %18653 = vmatmul.mubr.msk.f32.gmra.mrb[62].mxu1 %vm6605_vm3, %v13049_v54 }
 0xad5   :  { %v18561_v0 = vpop.f32.mrb[0].mxu1 }
 0xad6   :  { %v24963_v26 = vadd.f32 %v18561_v0, %v24960_v8  ;;  %v13311_v46 = vpop.f32.mrb[1].mxu1 }
 0xad7   :  { %v24966_v2 = vadd.f32 %v24960_v8, %v13311_v46 }
 0xad8   :  { %v13899_v7 = vmul.f32 %v24963_v26, %v24963_v26  ;;  %v13766_v6 = vsel %vm6605_vm3, %v24963_v26, 0.0 }
 0xad9   :  { %v13765_v63 = vsel %vm6605_vm3, %v24966_v2, 0.0  ;;  %v13898_v20 = vmul.f32 %v24966_v2, %v24966_v2  ;;  %v18564_v1 = vpop.f32.mrb[2].mxu1 }
 0xada   :  { %v24977_v38 = vadd.f32 %v18564_v1, %v24960_v8  ;;  %v13321_v56 = vpop.f32.mrb[3].mxu1  ;;  %v13963_v42 = vsel %vm6605_vm3, %v13899_v7, 0.0  ;;  %v13767_v17 = vadd.f32 %v13766_v6, %v13765_v63 }
 0xadb   :  { %v13962_v13 = vsel %vm6605_vm3, %v13898_v20, 0.0  ;;  %v24982_v62 = vadd.f32 %v24960_v8, %v13321_v56 }
 0xadc   :  { %v13901_v53 = vmul.f32 %v24977_v38, %v24977_v38  ;;  %v13964_v12 = vadd.f32 %v13963_v42, %v13962_v13  ;;  %v13770_v40 = vsel %vm6605_vm3, %v24977_v38, 0.0 }
 0xadd   :  { %v13768_v30 = vsel %vm6605_vm3, %v24982_v62, 0.0  ;;  %v13900_v45 = vmul.f32 %v24982_v62, %v24982_v62  ;;  %v18567_v25 = vpop.f32.mrb[4].mxu1 }
 0xade   :  { %v13769_v36 = vadd.f32 %v13768_v30, %v13767_v17  ;;  %v24991_v9 = vadd.f32 %v18567_v25, %v24960_v8  ;;  %v13331_v55 = vpop.f32.mrb[5].mxu1  ;;  %v13967_v51 = vsel %vm6605_vm3, %v13901_v53, 0.0 }
 0xadf   :  { %v13965_v14 = vsel %vm6605_vm3, %v13900_v45, 0.0  ;;  %v24997_v50 = vadd.f32 %v24960_v8, %v13331_v55 }
 0xae0   :  { %v13771_v52 = vadd.f32 %v13770_v40, %v13769_v36  ;;  %v13966_v22 = vadd.f32 %v13965_v14, %v13964_v12  ;;  %v13903_v18 = vmul.f32 %v24991_v9, %v24991_v9  ;;  %v13774_v39 = vsel %vm6605_vm3, %v24991_v9, 0.0 }
 0xae1   :  { %v13772_v3 = vsel %vm6605_vm3, %v24997_v50, 0.0  ;;  %v13902_v10 = vmul.f32 %v24997_v50, %v24997_v50  ;;  %v18570_v21 = vpop.f32.mrb[6].mxu1 }
 0xae2   :  { %v13968_v60 = vadd.f32 %v13967_v51, %v13966_v22  ;;  %v13773_v29 = vadd.f32 %v13772_v3, %v13771_v52  ;;  %v25007_v59 = vadd.f32 %v18570_v21, %v24960_v8  ;;  %v13341_v28 = vpop.f32.mrb[7].mxu1  ;;  %v13971_v11 = vsel %vm6605_vm3, %v13903_v18, 0.0 }
 0xae3   :  { %v13969_v31 = vsel %vm6605_vm3, %v13902_v10, 0.0  ;;  %v25013_v4 = vadd.f32 %v24960_v8, %v13341_v28 }
 0xae4   :  { %v13970_v33 = vadd.f32 %v13969_v31, %v13968_v60  ;;  %v13775_v41 = vadd.f32 %v13774_v39, %v13773_v29  ;;  %v13905_v34 = vmul.f32 %v25007_v59, %v25007_v59  ;;  %v13778_v47 = vsel %vm6605_vm3, %v25007_v59, 0.0 }
 0xae5   :  { %v13776_v24 = vsel %vm6605_vm3, %v25013_v4, 0.0  ;;  %v13904_v15 = vmul.f32 %v25013_v4, %v25013_v4  ;;  %v18573_v5 = vpop.f32.mrb[8].mxu1 }
 0xae6   :  { %v13777_v44 = vadd.f32 %v13776_v24, %v13775_v41  ;;  %v13972_v27 = vadd.f32 %v13971_v11, %v13970_v33  ;;  %v25023_v58 = vadd.f32 %v18573_v5, %v24960_v8  ;;  %v13351_v32 = vpop.f32.mrb[9].mxu1  ;;  %v13975_v48 = vsel %vm6605_vm3, %v13905_v34, 0.0 }
 0xae7   :  { %v13973_v16 = vsel %vm6605_vm3, %v13904_v15, 0.0  ;;  %v25029_v37 = vadd.f32 %v24960_v8, %v13351_v32 }
 0xae8   :  { %v13974_v35 = vadd.f32 %v13973_v16, %v13972_v27  ;;  %v13779_v49 = vadd.f32 %v13778_v47, %v13777_v44  ;;  %v13907_v23 = vmul.f32 %v25023_v58, %v25023_v58  ;;  %v13782_v7 = vsel %vm6605_vm3, %v25023_v58, 0.0 }
 0xae9   :  { %v13780_v19 = vsel %vm6605_vm3, %v25029_v37, 0.0  ;;  %v13906_v43 = vmul.f32 %v25029_v37, %v25029_v37  ;;  %v18576_v61 = vpop.f32.mrb[10].mxu1 }
 0xaea   :  { %v13781_v57 = vadd.f32 %v13780_v19, %v13779_v49  ;;  %v13976_v54 = vadd.f32 %v13975_v48, %v13974_v35  ;;  %v25039_v0 = vadd.f32 %v18576_v61, %v24960_v8  ;;  %v13361_v46 = vpop.f32.mrb[11].mxu1  ;;  %v13979_v56 = vsel %vm6605_vm3, %v13907_v23, 0.0 }
 0xaeb   :  { %v13977_v6 = vsel %vm6605_vm3, %v13906_v43, 0.0  ;;  %v25045_v63 = vadd.f32 %v24960_v8, %v13361_v46 }
 0xaec   :  { %v13978_v20 = vadd.f32 %v13977_v6, %v13976_v54  ;;  %v13783_v1 = vadd.f32 %v13782_v7, %v13781_v57  ;;  %v13909_v42 = vmul.f32 %v25039_v0, %v25039_v0  ;;  %v13786_v36 = vsel %vm6605_vm3, %v25039_v0, 0.0 }
 0xaed   :  { %v13784_v13 = vsel %vm6605_vm3, %v25045_v63, 0.0  ;;  %v13908_v17 = vmul.f32 %v25045_v63, %v25045_v63  ;;  %v18579_v53 = vpop.f32.mrb[12].mxu1 }
 0xaee   :  { %v13785_v30 = vadd.f32 %v13784_v13, %v13783_v1  ;;  %v13980_v45 = vadd.f32 %v13979_v56, %v13978_v20  ;;  %v25055_v25 = vadd.f32 %v18579_v53, %v24960_v8  ;;  %v13371_v12 = vpop.f32.mrb[13].mxu1  ;;  %v13983_v22 = vsel %vm6605_vm3, %v13909_v42, 0.0 }
 0xaef   :  { %v13981_v55 = vsel %vm6605_vm3, %v13908_v17, 0.0  ;;  %v25061_v40 = vadd.f32 %v24960_v8, %v13371_v12 }
 0xaf0   :  { %v13982_v14 = vadd.f32 %v13981_v55, %v13980_v45  ;;  %v13787_v52 = vadd.f32 %v13786_v36, %v13785_v30  ;;  %v13911_v51 = vmul.f32 %v25055_v25, %v25055_v25  ;;  %v13790_v39 = vsel %vm6605_vm3, %v25055_v25, 0.0 }
 0xaf1   :  { %v13788_v18 = vsel %vm6605_vm3, %v25061_v40, 0.0  ;;  %v13910_v3 = vmul.f32 %v25061_v40, %v25061_v40  ;;  %v18582_v10 = vpop.f32.mrb[14].mxu1 }
 0xaf2   :  { %v13789_v21 = vadd.f32 %v13788_v18, %v13787_v52  ;;  %v13984_v60 = vadd.f32 %v13983_v22, %v13982_v14  ;;  %v25071_v29 = vadd.f32 %v18582_v10, %v24960_v8  ;;  %v13381_v28 = vpop.f32.mrb[15].mxu1  ;;  %v13987_v34 = vsel %vm6605_vm3, %v13911_v51, 0.0 }
 0xaf3   :  { %v13985_v31 = vsel %vm6605_vm3, %v13910_v3, 0.0  ;;  %v25077_v33 = vadd.f32 %v24960_v8, %v13381_v28 }
 0xaf4   :  { %v13986_v41 = vadd.f32 %v13985_v31, %v13984_v60  ;;  %v13791_v11 = vadd.f32 %v13790_v39, %v13789_v21  ;;  %v13913_v24 = vmul.f32 %v25071_v29, %v25071_v29  ;;  %v13794_v35 = vsel %vm6605_vm3, %v25071_v29, 0.0 }
 0xaf5   :  { %v13792_v15 = vsel %vm6605_vm3, %v25077_v33, 0.0  ;;  %v13912_v5 = vmul.f32 %v25077_v33, %v25077_v33  ;;  %v18585_v44 = vpop.f32.mrb[16].mxu1 }
 0xaf6   :  { %v13793_v27 = vadd.f32 %v13792_v15, %v13791_v11  ;;  %v13988_v32 = vadd.f32 %v13987_v34, %v13986_v41  ;;  %v25087_v47 = vadd.f32 %v18585_v44, %v24960_v8  ;;  %v13391_v16 = vpop.f32.mrb[17].mxu1  ;;  %v13991_v43 = vsel %vm6605_vm3, %v13913_v24, 0.0 }
 0xaf7   :  { %v13989_v49 = vsel %vm6605_vm3, %v13912_v5, 0.0  ;;  %v25093_v48 = vadd.f32 %v24960_v8, %v13391_v16 }
 0xaf8   :  { %v13990_v23 = vadd.f32 %v13989_v49, %v13988_v32  ;;  %v13795_v19 = vadd.f32 %v13794_v35, %v13793_v27  ;;  %v13915_v61 = vmul.f32 %v25087_v47, %v25087_v47  ;;  %v13798_v56 = vsel %vm6605_vm3, %v25087_v47, 0.0 }
 0xaf9   :  { %v13796_v57 = vsel %vm6605_vm3, %v25093_v48, 0.0  ;;  %v13914_v54 = vmul.f32 %v25093_v48, %v25093_v48  ;;  %v18588_v46 = vpop.f32.mrb[18].mxu1 }
 0xafa   :  { %v13797_v7 = vadd.f32 %v13796_v57, %v13795_v19  ;;  %v13992_v6 = vadd.f32 %v13991_v43, %v13990_v23  ;;  %v25103_v20 = vadd.f32 %v18588_v46, %v24960_v8  ;;  %v13401_v1 = vpop.f32.mrb[19].mxu1  ;;  %v13995_v30 = vsel %vm6605_vm3, %v13915_v61, 0.0 }
 0xafb   :  { %v13993_v42 = vsel %vm6605_vm3, %v13914_v54, 0.0  ;;  %v25109_v13 = vadd.f32 %v24960_v8, %v13401_v1 }
 0xafc   :  { %v13994_v17 = vadd.f32 %v13993_v42, %v13992_v6  ;;  %v13799_v53 = vadd.f32 %v13798_v56, %v13797_v7  ;;  %v13917_v45 = vmul.f32 %v25103_v20, %v25103_v20  ;;  %v13802_v18 = vsel %vm6605_vm3, %v25103_v20, 0.0 }
 0xafd   :  { %v13800_v12 = vsel %vm6605_vm3, %v25109_v13, 0.0  ;;  %v13916_v36 = vmul.f32 %v25109_v13, %v25109_v13  ;;  %v18591_v55 = vpop.f32.mrb[20].mxu1 }
 0xafe   :  { %v13801_v14 = vadd.f32 %v13800_v12, %v13799_v53  ;;  %v13996_v52 = vadd.f32 %v13995_v30, %v13994_v17  ;;  %v25119_v22 = vadd.f32 %v18591_v55, %v24960_v8  ;;  %v13411_v51 = vpop.f32.mrb[21].mxu1  ;;  %v13999_v28 = vsel %vm6605_vm3, %v13917_v45, 0.0 }
 0xaff   :  { %v13997_v3 = vsel %vm6605_vm3, %v13916_v36, 0.0  ;;  %v25125_v10 = vadd.f32 %v24960_v8, %v13411_v51 }
 0xb00   :  { %v13998_v21 = vadd.f32 %v13997_v3, %v13996_v52  ;;  %v13803_v60 = vadd.f32 %v13802_v18, %v13801_v14  ;;  %v13919_v39 = vmul.f32 %v25119_v22, %v25119_v22  ;;  %v13806_v44 = vsel %vm6605_vm3, %v25119_v22, 0.0 }
 0xb01   :  { %v13804_v31 = vsel %vm6605_vm3, %v25125_v10, 0.0  ;;  %v13918_v41 = vmul.f32 %v25125_v10, %v25125_v10  ;;  %v18594_v11 = vpop.f32.mrb[22].mxu1 }
 0xb02   :  { %v13805_v34 = vadd.f32 %v13804_v31, %v13803_v60  ;;  %v14000_v24 = vadd.f32 %v13999_v28, %v13998_v21  ;;  %v25135_v15 = vadd.f32 %v18594_v11, %v24960_v8  ;;  %v13421_v5 = vpop.f32.mrb[23].mxu1  ;;  %v14003_v49 = vsel %vm6605_vm3, %v13919_v39, 0.0 }
 0xb03   :  { %v14001_v27 = vsel %vm6605_vm3, %v13918_v41, 0.0  ;;  %v25141_v32 = vadd.f32 %v24960_v8, %v13421_v5 }
 0xb04   :  { %27403 = vst [vmem:[#allocation4_spill] sm:$0xff] %v25135_v15  ;;  %v14002_v16 = vadd.f32 %v14001_v27, %v14000_v24  ;;  %v13807_v35 = vadd.f32 %v13806_v44, %v13805_v34  ;;  %v13921_v23 = vmul.f32 %v25135_v15, %v25135_v15  ;;  %v13810_v6 = vsel %vm6605_vm3, %v25135_v15, 0.0 }
 0xb05   :  { %v13808_v19 = vsel %vm6605_vm3, %v25141_v32, 0.0  ;;  %v13920_v43 = vmul.f32 %v25141_v32, %v25141_v32  ;;  %v18597_v61 = vpop.f32.mrb[24].mxu1 }
 0xb06   :  { %v13809_v57 = vadd.f32 %v13808_v19, %v13807_v35  ;;  %v14004_v54 = vadd.f32 %v14003_v49, %v14002_v16  ;;  %v25151_v46 = vadd.f32 %v18597_v61, %v24960_v8  ;;  %v13431_v7 = vpop.f32.mrb[25].mxu1  ;;  %v14007_v53 = vsel %vm6605_vm3, %v13921_v23, 0.0 }
 0xb07   :  { %v14005_v1 = vsel %vm6605_vm3, %v13920_v43, 0.0  ;;  %v25157_v56 = vadd.f32 %v24960_v8, %v13431_v7 }
 0xb08   :  { %27404 = vst [vmem:[#allocation5_spill] sm:$0xff] %v25151_v46  ;;  %v14006_v42 = vadd.f32 %v14005_v1, %v14004_v54  ;;  %v13811_v17 = vadd.f32 %v13810_v6, %v13809_v57  ;;  %v13923_v30 = vmul.f32 %v25151_v46, %v25151_v46  ;;  %v13814_v18 = vsel %vm6605_vm3, %v25151_v46, 0.0 }
 0xb09   :  { %27405 = vst [vmem:[#allocation6_spill] sm:$0xff] %v25157_v56  ;;  %v13812_v45 = vsel %vm6605_vm3, %v25157_v56, 0.0  ;;  %v13922_v12 = vmul.f32 %v25157_v56, %v25157_v56  ;;  %v18600_v36 = vpop.f32.mrb[26].mxu1 }
 0xb0a   :  { %v13813_v55 = vadd.f32 %v13812_v45, %v13811_v17  ;;  %v14008_v14 = vadd.f32 %v14007_v53, %v14006_v42  ;;  %v25167_v52 = vadd.f32 %v18600_v36, %v24960_v8  ;;  %v13441_v51 = vpop.f32.mrb[27].mxu1  ;;  %v14011_v39 = vsel %vm6605_vm3, %v13923_v30, 0.0 }
 0xb0b   :  { %v14009_v3 = vsel %vm6605_vm3, %v13922_v12, 0.0  ;;  %v25173_v21 = vadd.f32 %v24960_v8, %v13441_v51 }
 0xb0c   :  { %27406 = vst [vmem:[#allocation7_spill] sm:$0xff] %v25167_v52  ;;  %v14010_v60 = vadd.f32 %v14009_v3, %v14008_v14  ;;  %v13815_v28 = vadd.f32 %v13814_v18, %v13813_v55  ;;  %v13925_v31 = vmul.f32 %v25167_v52, %v25167_v52  ;;  %v13818_v16 = vsel %vm6605_vm3, %v25167_v52, 0.0 }
 0xb0d   :  { %27407 = vst [vmem:[#allocation62_spill] sm:$0xff] %v25173_v21  ;;  %v13816_v41 = vsel %vm6605_vm3, %v25173_v21, 0.0  ;;  %v13924_v11 = vmul.f32 %v25173_v21, %v25173_v21  ;;  %v18603_v34 = vpop.f32.mrb[28].mxu1 }
 0xb0e   :  { %v13817_v24 = vadd.f32 %v13816_v41, %v13815_v28  ;;  %v14012_v5 = vadd.f32 %v14011_v39, %v14010_v60  ;;  %v25183_v44 = vadd.f32 %v18603_v34, %v24960_v8  ;;  %v13451_v27 = vpop.f32.mrb[29].mxu1  ;;  %v14015_v43 = vsel %vm6605_vm3, %v13925_v31, 0.0 }
 0xb0f   :  { %v14013_v35 = vsel %vm6605_vm3, %v13924_v11, 0.0  ;;  %v25189_v49 = vadd.f32 %v24960_v8, %v13451_v27 }
 0xb10   :  { %27408 = vst [vmem:[#allocation63_spill] sm:$0xff] %v25183_v44  ;;  %v14014_v23 = vadd.f32 %v14013_v35, %v14012_v5  ;;  %v13819_v19 = vadd.f32 %v13818_v16, %v13817_v24  ;;  %v13927_v61 = vmul.f32 %v25183_v44, %v25183_v44  ;;  %v13822_v53 = vsel %vm6605_vm3, %v25183_v44, 0.0 }
 0xb11   :  { %27409 = vst [vmem:[#allocation64_spill] sm:$0xff] %v25189_v49  ;;  %v13820_v57 = vsel %vm6605_vm3, %v25189_v49, 0.0  ;;  %v13926_v54 = vmul.f32 %v25189_v49, %v25189_v49  ;;  %v18606_v7 = vpop.f32.mrb[30].mxu1 }
 0xb12   :  { %v13821_v6 = vadd.f32 %v13820_v57, %v13819_v19  ;;  %v14016_v1 = vadd.f32 %v14015_v43, %v14014_v23  ;;  %v25199_v42 = vadd.f32 %v18606_v7, %v24960_v8  ;;  %v13461_v17 = vpop.f32.mrb[31].mxu1  ;;  %v14019_v55 = vsel %vm6605_vm3, %v13927_v61, 0.0 }
 0xb13   :  { %v14017_v30 = vsel %vm6605_vm3, %v13926_v54, 0.0  ;;  %v25205_v45 = vadd.f32 %v24960_v8, %v13461_v17 }
 0xb14   :  { %27410 = vst [vmem:[#allocation65_spill] sm:$0xff] %v25199_v42  ;;  %v14018_v12 = vadd.f32 %v14017_v30, %v14016_v1  ;;  %v13823_v36 = vadd.f32 %v13822_v53, %v13821_v6  ;;  %v13929_v14 = vmul.f32 %v25199_v42, %v25199_v42  ;;  %v13826_v41 = vsel %vm6605_vm3, %v25199_v42, 0.0 }
 0xb15   :  { %27411 = vst [vmem:[#allocation66_spill] sm:$0xff] %v25205_v45  ;;  %v13824_v51 = vsel %vm6605_vm3, %v25205_v45, 0.0  ;;  %v13928_v18 = vmul.f32 %v25205_v45, %v25205_v45  ;;  %v18609_v3 = vpop.f32.mrb[32].mxu1 }
 0xb16   :  { %v13825_v60 = vadd.f32 %v13824_v51, %v13823_v36  ;;  %v14020_v28 = vadd.f32 %v14019_v55, %v14018_v12  ;;  %v25215_v39 = vadd.f32 %v18609_v3, %v24960_v8  ;;  %v13471_v31 = vpop.f32.mrb[33].mxu1  ;;  %v14023_v27 = vsel %vm6605_vm3, %v13929_v14, 0.0 }
 0xb17   :  { %v14021_v11 = vsel %vm6605_vm3, %v13928_v18, 0.0  ;;  %v25221_v34 = vadd.f32 %v24960_v8, %v13471_v31 }
 0xb18   :  { %27412 = vst [vmem:[#allocation67_spill] sm:$0xff] %v25215_v39  ;;  %v14022_v24 = vadd.f32 %v14021_v11, %v14020_v28  ;;  %v13827_v5 = vadd.f32 %v13826_v41, %v13825_v60  ;;  %v13931_v16 = vmul.f32 %v25215_v39, %v25215_v39  ;;  %v13830_v7 = vsel %vm6605_vm3, %v25215_v39, 0.0 }
 0xb19   :  { %27413 = vst [vmem:[#allocation68_spill] sm:$0xff] %v25221_v34  ;;  %v13828_v35 = vsel %vm6605_vm3, %v25221_v34, 0.0  ;;  %v13930_v23 = vmul.f32 %v25221_v34, %v25221_v34  ;;  %v18612_v19 = vpop.f32.mrb[34].mxu1 }
 0xb1a   :  { %v13829_v43 = vadd.f32 %v13828_v35, %v13827_v5  ;;  %v14024_v61 = vadd.f32 %v14023_v27, %v14022_v24  ;;  %v25231_v57 = vadd.f32 %v18612_v19, %v24960_v8  ;;  %v13481_v54 = vpop.f32.mrb[35].mxu1  ;;  %v14027_v30 = vsel %vm6605_vm3, %v13931_v16, 0.0 }
 0xb1b   :  { %v14025_v6 = vsel %vm6605_vm3, %v13930_v23, 0.0  ;;  %v25237_v1 = vadd.f32 %v24960_v8, %v13481_v54 }
 0xb1c   :  { %27414 = vst [vmem:[#allocation69_spill] sm:$0xff] %v25231_v57  ;;  %v14026_v17 = vadd.f32 %v14025_v6, %v14024_v61  ;;  %v13831_v53 = vadd.f32 %v13830_v7, %v13829_v43  ;;  %v13933_v12 = vmul.f32 %v25231_v57, %v25231_v57  ;;  %v13834_v28 = vsel %vm6605_vm3, %v25231_v57, 0.0 }
 0xb1d   :  { %27415 = vst [vmem:[#allocation70_spill] sm:$0xff] %v25237_v1  ;;  %v13832_v36 = vsel %vm6605_vm3, %v25237_v1, 0.0  ;;  %v13932_v55 = vmul.f32 %v25237_v1, %v25237_v1  ;;  %v18615_v14 = vpop.f32.mrb[36].mxu1 }
 0xb1e   :  { %v13833_v51 = vadd.f32 %v13832_v36, %v13831_v53  ;;  %v14028_v18 = vadd.f32 %v14027_v30, %v14026_v17  ;;  %v25247_v3 = vadd.f32 %v18615_v14, %v24960_v8  ;;  %v13491_v60 = vpop.f32.mrb[37].mxu1  ;;  %v14031_v5 = vsel %vm6605_vm3, %v13933_v12, 0.0 }
 0xb1f   :  { %v14029_v31 = vsel %vm6605_vm3, %v13932_v55, 0.0  ;;  %v25253_v41 = vadd.f32 %v24960_v8, %v13491_v60 }
 0xb20   :  { %27416 = vst [vmem:[#allocation71_spill] sm:$0xff] %v25247_v3  ;;  %v14030_v11 = vadd.f32 %v14029_v31, %v14028_v18  ;;  %v13835_v24 = vadd.f32 %v13834_v28, %v13833_v51  ;;  %v13935_v27 = vmul.f32 %v25247_v3, %v25247_v3  ;;  %v13838_v7 = vsel %vm6605_vm3, %v25247_v3, 0.0 }
 0xb21   :  { %27417 = vst [vmem:[#allocation72_spill] sm:$0xff] %v25253_v41  ;;  %v13836_v16 = vsel %vm6605_vm3, %v25253_v41, 0.0  ;;  %v13934_v35 = vmul.f32 %v25253_v41, %v25253_v41  ;;  %v18618_v23 = vpop.f32.mrb[38].mxu1 }
 0xb22   :  { %v13837_v19 = vadd.f32 %v13836_v16, %v13835_v24  ;;  %v14032_v43 = vadd.f32 %v14031_v5, %v14030_v11  ;;  %v25263_v61 = vadd.f32 %v18618_v23, %v24960_v8  ;;  %v13501_v54 = vpop.f32.mrb[39].mxu1  ;;  %v14035_v12 = vsel %vm6605_vm3, %v13935_v27, 0.0 }
 0xb23   :  { %v14033_v6 = vsel %vm6605_vm3, %v13934_v35, 0.0  ;;  %v25269_v17 = vadd.f32 %v24960_v8, %v13501_v54 }
 0xb24   :  { %27418 = vst [vmem:[#allocation8_spill] sm:$0xff] %v25263_v61  ;;  %v14034_v53 = vadd.f32 %v14033_v6, %v14032_v43  ;;  %v13839_v30 = vadd.f32 %v13838_v7, %v13837_v19  ;;  %v13937_v36 = vmul.f32 %v25263_v61, %v25263_v61  ;;  %v13842_v11 = vsel %vm6605_vm3, %v25263_v61, 0.0 }
 0xb25   :  { %27419 = vst [vmem:[#allocation10_spill] sm:$0xff] %v25269_v17  ;;  %v13840_v55 = vsel %vm6605_vm3, %v25269_v17, 0.0  ;;  %v13936_v14 = vmul.f32 %v25269_v17, %v25269_v17  ;;  %v18621_v51 = vpop.f32.mrb[40].mxu1 }
 0xb26   :  { %v13841_v18 = vadd.f32 %v13840_v55, %v13839_v30  ;;  %v14036_v60 = vadd.f32 %v14035_v12, %v14034_v53  ;;  %v25279_v28 = vadd.f32 %v18621_v51, %v24960_v8  ;;  %v13511_v31 = vpop.f32.mrb[41].mxu1  ;;  %v14039_v35 = vsel %vm6605_vm3, %v13937_v36, 0.0 }
 0xb27   :  { %v14037_v24 = vsel %vm6605_vm3, %v13936_v14, 0.0  ;;  %v25285_v5 = vadd.f32 %v24960_v8, %v13511_v31 }
 0xb28   :  { %27420 = vst [vmem:[#allocation9_spill] sm:$0xff] %v25279_v28  ;;  %v14038_v27 = vadd.f32 %v14037_v24, %v14036_v60  ;;  %v13843_v16 = vadd.f32 %v13842_v11, %v13841_v18  ;;  %v13939_v23 = vmul.f32 %v25279_v28, %v25279_v28  ;;  %v13846_v12 = vsel %vm6605_vm3, %v25279_v28, 0.0 }
 0xb29   :  { %27421 = vst [vmem:[#allocation12_spill] sm:$0xff] %v25285_v5  ;;  %v13844_v19 = vsel %vm6605_vm3, %v25285_v5, 0.0  ;;  %v13938_v43 = vmul.f32 %v25285_v5, %v25285_v5  ;;  %v18624_v54 = vpop.f32.mrb[42].mxu1 }
 0xb2a   :  { %v13845_v7 = vadd.f32 %v13844_v19, %v13843_v16  ;;  %v14040_v6 = vadd.f32 %v14039_v35, %v14038_v27  ;;  %v25295_v53 = vadd.f32 %v18624_v54, %v24960_v8  ;;  %v13521_v30 = vpop.f32.mrb[43].mxu1  ;;  %v14043_v18 = vsel %vm6605_vm3, %v13939_v23, 0.0 }
 0xb2b   :  { %v14041_v36 = vsel %vm6605_vm3, %v13938_v43, 0.0  ;;  %v25301_v55 = vadd.f32 %v24960_v8, %v13521_v30 }
 0xb2c   :  { %27422 = vst [vmem:[#allocation11_spill] sm:$0xff] %v25295_v53  ;;  %v14042_v14 = vadd.f32 %v14041_v36, %v14040_v6  ;;  %v13847_v51 = vadd.f32 %v13846_v12, %v13845_v7  ;;  %v13941_v60 = vmul.f32 %v25295_v53, %v25295_v53  ;;  %v13850_v43 = vsel %vm6605_vm3, %v25295_v53, 0.0 }
 0xb2d   :  { %27423 = vst [vmem:[#allocation14_spill] sm:$0xff] %v25301_v55  ;;  %v13848_v31 = vsel %vm6605_vm3, %v25301_v55, 0.0  ;;  %v13940_v11 = vmul.f32 %v25301_v55, %v25301_v55  ;;  %v18627_v24 = vpop.f32.mrb[44].mxu1 }
 0xb2e   :  { %v13849_v27 = vadd.f32 %v13848_v31, %v13847_v51  ;;  %v14044_v16 = vadd.f32 %v14043_v18, %v14042_v14  ;;  %v25311_v35 = vadd.f32 %v18627_v24, %v24960_v8  ;;  %v13531_v19 = vpop.f32.mrb[45].mxu1  ;;  %v14047_v30 = vsel %vm6605_vm3, %v13941_v60, 0.0 }
 0xb2f   :  { %v14045_v23 = vsel %vm6605_vm3, %v13940_v11, 0.0  ;;  %v25317_v54 = vadd.f32 %v24960_v8, %v13531_v19 }
 0xb30   :  { %27424 = vst [vmem:[#allocation13_spill] sm:$0xff] %v25311_v35  ;;  %v14046_v7 = vadd.f32 %v14045_v23, %v14044_v16  ;;  %v13851_v6 = vadd.f32 %v13850_v43, %v13849_v27  ;;  %v13943_v12 = vmul.f32 %v25311_v35, %v25311_v35  ;;  %v13854_v27 = vsel %vm6605_vm3, %v25311_v35, 0.0 }
 0xb31   :  { %27425 = vst [vmem:[#allocation16_spill] sm:$0xff] %v25317_v54  ;;  %v13852_v36 = vsel %vm6605_vm3, %v25317_v54, 0.0  ;;  %v13942_v14 = vmul.f32 %v25317_v54, %v25317_v54  ;;  %v18630_v51 = vpop.f32.mrb[46].mxu1 }
 0xb32   :  { %v13853_v18 = vadd.f32 %v13852_v36, %v13851_v6  ;;  %v14048_v31 = vadd.f32 %v14047_v30, %v14046_v7  ;;  %v25327_v11 = vadd.f32 %v18630_v51, %v24960_v8  ;;  %v13541_v24 = vpop.f32.mrb[47].mxu1  ;;  %v14051_v23 = vsel %vm6605_vm3, %v13943_v12, 0.0 }
 0xb33   :  { %v14049_v60 = vsel %vm6605_vm3, %v13942_v14, 0.0  ;;  %v25333_v16 = vadd.f32 %v24960_v8, %v13541_v24 }
 0xb34   :  { %v14050_v19 = vadd.f32 %v14049_v60, %v14048_v31  ;;  %v13855_v43 = vadd.f32 %v13854_v27, %v13853_v18  ;;  %v13945_v6 = vmul.f32 %v25327_v11, %v25327_v11  ;;  %v13858_v18 = vsel %vm6605_vm3, %v25327_v11, 0.0 }
 0xb35   :  { %v13856_v7 = vsel %vm6605_vm3, %v25333_v16, 0.0  ;;  %v13944_v30 = vmul.f32 %v25333_v16, %v25333_v16  ;;  %v18633_v36 = vpop.f32.mrb[48].mxu1 }
 0xb36   :  { %v13857_v51 = vadd.f32 %v13856_v7, %v13855_v43  ;;  %v14052_v35 = vadd.f32 %v14051_v23, %v14050_v19  ;;  %v25343_v14 = vadd.f32 %v18633_v36, %v24960_v8  ;;  %v13551_v24 = vpop.f32.mrb[49].mxu1  ;;  %v14055_v54 = vsel %vm6605_vm3, %v13945_v6, 0.0 }
 0xb37   :  { %v14053_v12 = vsel %vm6605_vm3, %v13944_v30, 0.0  ;;  %v25349_v31 = vadd.f32 %v24960_v8, %v13551_v24 }
 0xb38   :  { %v14054_v27 = vadd.f32 %v14053_v12, %v14052_v35  ;;  %v13859_v60 = vadd.f32 %v13858_v18, %v13857_v51  ;;  %v13947_v43 = vmul.f32 %v25343_v14, %v25343_v14  ;;  %v13862_v35 = vsel %vm6605_vm3, %v25343_v14, 0.0 }
 0xb39   :  { %v13860_v19 = vsel %vm6605_vm3, %v25349_v31, 0.0  ;;  %v13946_v23 = vmul.f32 %v25349_v31, %v25349_v31  ;;  %v18636_v7 = vpop.f32.mrb[50].mxu1 }
 0xb3a   :  { %v13861_v36 = vadd.f32 %v13860_v19, %v13859_v60  ;;  %v14056_v53 = vadd.f32 %v14055_v54, %v14054_v27  ;;  %v25359_v30 = vadd.f32 %v18636_v7, %v24960_v8  ;;  %v13561_v24 = vpop.f32.mrb[51].mxu1  ;;  %v14059_v55 = vsel %vm6605_vm3, %v13947_v43, 0.0 }
 0xb3b   :  { %v14057_v6 = vsel %vm6605_vm3, %v13946_v23, 0.0  ;;  %v25365_v51 = vadd.f32 %v24960_v8, %v13561_v24 }
 0xb3c   :  { %v14058_v18 = vadd.f32 %v14057_v6, %v14056_v53  ;;  %v13863_v12 = vadd.f32 %v13862_v35, %v13861_v36  ;;  %v13949_v60 = vmul.f32 %v25359_v30, %v25359_v30  ;;  %v13866_v53 = vsel %vm6605_vm3, %v25359_v30, 0.0 }
 0xb3d   :  { %v13864_v54 = vsel %vm6605_vm3, %v25365_v51, 0.0  ;;  %v13948_v27 = vmul.f32 %v25365_v51, %v25365_v51  ;;  %v18639_v19 = vpop.f32.mrb[52].mxu1 }
 0xb3e   :  { %v13865_v7 = vadd.f32 %v13864_v54, %v13863_v12  ;;  %v14060_v28 = vadd.f32 %v14059_v55, %v14058_v18  ;;  %v25375_v23 = vadd.f32 %v18639_v19, %v24960_v8  ;;  %v13571_v24 = vpop.f32.mrb[53].mxu1  ;;  %v14063_v5 = vsel %vm6605_vm3, %v13949_v60, 0.0 }
 0xb3f   :  { %v14061_v43 = vsel %vm6605_vm3, %v13948_v27, 0.0  ;;  %v25381_v36 = vadd.f32 %v24960_v8, %v13571_v24 }
 0xb40   :  { %v14062_v35 = vadd.f32 %v14061_v43, %v14060_v28  ;;  %v13867_v6 = vadd.f32 %v13866_v53, %v13865_v7  ;;  %v13951_v12 = vmul.f32 %v25375_v23, %v25375_v23  ;;  %v13870_v28 = vsel %vm6605_vm3, %v25375_v23, 0.0 }
 0xb41   :  { %v13868_v55 = vsel %vm6605_vm3, %v25381_v36, 0.0  ;;  %v13950_v18 = vmul.f32 %v25381_v36, %v25381_v36  ;;  %v18642_v54 = vpop.f32.mrb[54].mxu1 }
 0xb42   :  { %v13869_v19 = vadd.f32 %v13868_v55, %v13867_v6  ;;  %v14064_v61 = vadd.f32 %v14063_v5, %v14062_v35  ;;  %v25391_v27 = vadd.f32 %v18642_v54, %v24960_v8  ;;  %v13581_v24 = vpop.f32.mrb[55].mxu1  ;;  %v14067_v17 = vsel %vm6605_vm3, %v13951_v12, 0.0 }
 0xb43   :  { %v14065_v60 = vsel %vm6605_vm3, %v13950_v18, 0.0  ;;  %v25397_v7 = vadd.f32 %v24960_v8, %v13581_v24 }
 0xb44   :  { %27426 = vst [vmem:[#allocation19_spill] sm:$0xff] %v25391_v27  ;;  %v14066_v53 = vadd.f32 %v14065_v60, %v14064_v61  ;;  %v13871_v43 = vadd.f32 %v13870_v28, %v13869_v19  ;;  %v13953_v6 = vmul.f32 %v25391_v27, %v25391_v27  ;;  %v13874_v61 = vsel %vm6605_vm3, %v25391_v27, 0.0 }
 0xb45   :  { %v13872_v5 = vsel %vm6605_vm3, %v25397_v7, 0.0  ;;  %v13952_v35 = vmul.f32 %v25397_v7, %v25397_v7  ;;  %v18645_v55 = vpop.f32.mrb[56].mxu1 }
 0xb46   :  { %v13873_v54 = vadd.f32 %v13872_v5, %v13871_v43  ;;  %v14068_v3 = vadd.f32 %v14067_v17, %v14066_v53  ;;  %v25407_v18 = vadd.f32 %v18645_v55, %v24960_v8  ;;  %v13591_v24 = vpop.f32.mrb[57].mxu1  ;;  %v14071_v41 = vsel %vm6605_vm3, %v13953_v6, 0.0 }
 0xb47   :  { %v14069_v12 = vsel %vm6605_vm3, %v13952_v35, 0.0  ;;  %v25413_v19 = vadd.f32 %v24960_v8, %v13591_v24 }
 0xb48   :  { %27427 = vst [vmem:[#allocation27_spill] sm:$0xff] %v25407_v18  ;;  %v14070_v28 = vadd.f32 %v14069_v12, %v14068_v3  ;;  %v13875_v60 = vadd.f32 %v13874_v61, %v13873_v54  ;;  %v13955_v43 = vmul.f32 %v25407_v18, %v25407_v18  ;;  %v13878_v3 = vsel %vm6605_vm3, %v25407_v18, 0.0  ;;  %v27456_v18 = vld [vmem:[#allocation16_spill] sm:$0xff] }
 0xb49   :  { %27428 = vst [vmem:[#allocation30_spill] sm:$0xff] %v25413_v19  ;;  %v13876_v17 = vsel %vm6605_vm3, %v25413_v19, 0.0  ;;  %v13954_v53 = vmul.f32 %v25413_v19, %v25413_v19  ;;  %v18648_v5 = vpop.f32.mrb[58].mxu1  ;;  %v27457_v19 = vld [vmem:[#allocation13_spill] sm:$0xff] }
 0xb4a   :  { %v13877_v55 = vadd.f32 %v13876_v17, %v13875_v60  ;;  %v14072_v57 = vadd.f32 %v14071_v41, %v14070_v28  ;;  %v25423_v35 = vadd.f32 %v18648_v5, %v24960_v8  ;;  %v13601_v24 = vpop.f32.mrb[59].mxu1  ;;  %v14075_v1 = vsel %vm6605_vm3, %v13955_v43, 0.0 }
 0xb4b   :  { %v14073_v6 = vsel %vm6605_vm3, %v13954_v53, 0.0  ;;  %v25429_v54 = vadd.f32 %v24960_v8, %v13601_v24 }
 0xb4c   :  { %27429 = vst [vmem:[#allocation29_spill] sm:$0xff] %v25423_v35  ;;  %v14074_v61 = vadd.f32 %v14073_v6, %v14072_v57  ;;  %v13879_v12 = vadd.f32 %v13878_v3, %v13877_v55  ;;  %v13957_v60 = vmul.f32 %v25423_v35, %v25423_v35  ;;  %v13882_v57 = vsel %vm6605_vm3, %v25423_v35, 0.0 }
 0xb4d   :  { %27430 = vst [vmem:[#allocation31_spill] sm:$0xff] %v25429_v54  ;;  %v13880_v41 = vsel %vm6605_vm3, %v25429_v54, 0.0  ;;  %v13956_v28 = vmul.f32 %v25429_v54, %v25429_v54  ;;  %v18651_v17 = vpop.f32.mrb[60].mxu1  ;;  %v27455_v54 = vld [vmem:[#allocation11_spill] sm:$0xff] }
 0xb4e   :  { %v13881_v5 = vadd.f32 %v13880_v41, %v13879_v12  ;;  %v14076_v39 = vadd.f32 %v14075_v1, %v14074_v61  ;;  %v25439_v53 = vadd.f32 %v18651_v17, %v24960_v8  ;;  %v13611_v24 = vpop.f32.mrb[61].mxu1  ;;  %v14079_v34 = vsel %vm6605_vm3, %v13957_v60, 0.0 }
 0xb4f   :  { %v14077_v43 = vsel %vm6605_vm3, %v13956_v28, 0.0  ;;  %v25445_v55 = vadd.f32 %v24960_v8, %v13611_v24 }
 0xb50   :  { %27431 = vst [vmem:[#allocation15_spill] sm:$0xff] %v25439_v53  ;;  %v14078_v3 = vadd.f32 %v14077_v43, %v14076_v39  ;;  %v13883_v6 = vadd.f32 %v13882_v57, %v13881_v5  ;;  %v13959_v12 = vmul.f32 %v25439_v53, %v25439_v53  ;;  %v13886_v39 = vsel %vm6605_vm3, %v25439_v53, 0.0 }
 0xb51   :  { %27432 = vst [vmem:[#allocation18_spill] sm:$0xff] %v25445_v55  ;;  %v13884_v1 = vsel %vm6605_vm3, %v25445_v55, 0.0  ;;  %v13958_v61 = vmul.f32 %v25445_v55, %v25445_v55  ;;  %v18654_v41 = vpop.f32.mrb[62].mxu1 }
 0xb52   :  { %v13885_v17 = vadd.f32 %v13884_v1, %v13883_v6  ;;  %v14080_v42 = vadd.f32 %v14079_v34, %v14078_v3  ;;  %v25455_v28 = vadd.f32 %v18654_v41, %v24960_v8  ;;  %v13621_v24 = vpop.f32.mrb[63].mxu1  ;;  %v14083_v45 = vsel %vm6605_vm3, %v13959_v12, 0.0 }
 0xb53   :  { %v14081_v60 = vsel %vm6605_vm3, %v13958_v61, 0.0  ;;  %v25461_v5 = vadd.f32 %v24960_v8, %v13621_v24 }
 0xb54   :  { %27433 = vst [vmem:[#allocation17_spill] sm:$0xff] %v25455_v28  ;;  %v14082_v57 = vadd.f32 %v14081_v60, %v14080_v42  ;;  %v13887_v43 = vadd.f32 %v13886_v39, %v13885_v17  ;;  %v13961_v6 = vmul.f32 %v25455_v28, %v25455_v28  ;;  %v13890_v61 = vsel %vm6605_vm3, %v25455_v28, 0.0 }
 0xb55   :  { %27434 = vst [vmem:[#allocation20_spill] sm:$0xff] %v25461_v5  ;;  %v13888_v34 = vsel %vm6605_vm3, %v25461_v5, 0.0  ;;  %v13960_v3 = vmul.f32 %v25461_v5, %v25461_v5 }
 0xb56   :  { %v13889_v1 = vadd.f32 %v13888_v34, %v13887_v43  ;;  %v14084_v41 = vadd.f32 %v14083_v45, %v14082_v57  ;;  %v14087_v12 = vsel %vm6605_vm3, %v13961_v6, 0.0 }
 0xb57   :  { %v14085_v8 = vsel %vm6605_vm3, %v13960_v3, 0.0 }
 0xb58   :  { %v13891_v42 = vadd.f32 %v13890_v61, %v13889_v1  ;;  %v14086_v17 = vadd.f32 %v14085_v8, %v14084_v41 }
 0xb5a   :  { %v13892_v24 = vrot.slane %v13891_v42, 4  ;;  %v14088_v39 = vadd.f32 %v14087_v12, %v14086_v17 }
 0xb5c   :  { %v13893_v60 = vadd.f32 %v13892_v24, %v13891_v42  ;;  %v14089_v44 = vrot.slane %v14088_v39, 4 }
 0xb5e   :  { %v13894_v49 = vrot.slane %v13893_v60, 2  ;;  %v14090_v52 = vadd.f32 %v14089_v44, %v14088_v39 }
 0xb60   :  { %v13895_v21 = vadd.f32 %v13894_v49, %v13893_v60  ;;  %v14091_v46 = vrot.slane %v14090_v52, 2 }
 0xb62   :  { %v13896_v56 = vrot.slane %v13895_v21, 1  ;;  %v14092_v43 = vadd.f32 %v14091_v46, %v14090_v52 }
 0xb64   :  { %v13897_v45 = vadd.f32 %v13896_v56, %v13895_v21  ;;  %v14093_v57 = vrot.slane %v14092_v43, 1 }
 0xb66   :  { %v14094_v34 = vadd.f32 %v14093_v57, %v14092_v43  ;;  %v25474_v15 = vmul.f32 0.001953125, %v13897_v45 }
 0xb68   :  { %v14096_v3 = vmul.f32 0.001953125, %v14094_v34  ;;  %v14097_v1 = vmul.f32 %v25474_v15, %v25474_v15  ;;  %v14101_v39 = vsub.f32 %v24982_v62, %v25474_v15  ;;  %v14102_v60 = vsub.f32 %v24977_v38, %v25474_v15 }
 0xb69   :  { %v14103_v43 = vsub.f32 %v24997_v50, %v25474_v15  ;;  %v14104_v45 = vsub.f32 %v24991_v9, %v25474_v15  ;;  %v14108_v62 = vsub.f32 %v25023_v58, %v25474_v15  ;;  %v14109_v38 = vsub.f32 %v25045_v63, %v25474_v15 }
 0xb6a   :  { %v14098_v6 = vsub.f32 %v14096_v3, %v14097_v1  ;;  %v14099_v3 = vsub.f32 %v24966_v2, %v25474_v15  ;;  %v14100_v1 = vsub.f32 %v24963_v26, %v25474_v15  ;;  %v14106_v2 = vsub.f32 %v25007_v59, %v25474_v15 }
 0xb6b   :  { %v14107_v26 = vsub.f32 %v25029_v37, %v25474_v15  ;;  %v14110_v50 = vsub.f32 %v25039_v0, %v25474_v15  ;;  %v14111_v9 = vsub.f32 %v25061_v40, %v25474_v15  ;;  %v14113_v59 = vsub.f32 %v25077_v33, %v25474_v15 }
 0xb6c   :  { %v14163_v34 = vadd.f32 1e-05, %v14098_v6  ;;  %v14105_v6 = vsub.f32 %v25013_v4, %v25474_v15  ;;  %v14112_v4 = vsub.f32 %v25055_v25, %v25474_v15  ;;  %v14114_v37 = vsub.f32 %v25071_v29, %v25474_v15 }
 0xb6d   :  { %v14115_v58 = vsub.f32 %v25093_v48, %v25474_v15  ;;  %v14116_v63 = vsub.f32 %v25087_v47, %v25474_v15  ;;  %v14117_v0 = vsub.f32 %v25109_v13, %v25474_v15  ;;  %v14118_v40 = vsub.f32 %v25103_v20, %v25474_v15  ;;  %v27435_v48 = vld [vmem:[#allocation4_spill] sm:$0xff]  ;;  %v27436_v47 = vld [vmem:[#allocation6_spill] sm:$0xff]  ;;  %v27437_v13 = vld [vmem:[#allocation5_spill] sm:$0xff] }
 0xb6e   :  { %19718 = vrsqrt.f32 %v14163_v34  ;;  %v14119_v25 = vsub.f32 %v25125_v10, %v25474_v15  ;;  %v14120_v33 = vsub.f32 %v25119_v22, %v25474_v15  ;;  %v14121_v29 = vsub.f32 %v25141_v32, %v25474_v15  ;;  %v27438_v20 = vld [vmem:[#allocation62_spill] sm:$0xff]  ;;  %v27439_v10 = vld [vmem:[#allocation7_spill] sm:$0xff]  ;;  %v27440_v22 = vld [vmem:[#allocation64_spill] sm:$0xff] }
 0xb6f   :  { %v14122_v34 = vsub.f32 %v27435_v48, %v25474_v15  ;;  %v14123_v57 = vsub.f32 %v27436_v47, %v25474_v15  ;;  %v14124_v24 = vsub.f32 %v27437_v13, %v25474_v15  ;;  %v14125_v12 = vsub.f32 %v27438_v20, %v25474_v15  ;;  %v27441_v32 = vld [vmem:[#allocation63_spill] sm:$0xff]  ;;  %v27442_v48 = vld [vmem:[#allocation66_spill] sm:$0xff]  ;;  %v27443_v47 = vld [vmem:[#allocation65_spill] sm:$0xff] }
 0xb70   :  { %v14126_v17 = vsub.f32 %v27439_v10, %v25474_v15  ;;  %v14127_v42 = vsub.f32 %v27440_v22, %v25474_v15  ;;  %v14128_v8 = vsub.f32 %v27441_v32, %v25474_v15  ;;  %v14129_v61 = vsub.f32 %v27442_v48, %v25474_v15  ;;  %v27444_v13 = vld [vmem:[#allocation68_spill] sm:$0xff]  ;;  %v27445_v20 = vld [vmem:[#allocation67_spill] sm:$0xff]  ;;  %v27446_v10 = vld [vmem:[#allocation70_spill] sm:$0xff] }
 0xb71   :  { %v14130_v21 = vsub.f32 %v27443_v47, %v25474_v15  ;;  %v14131_v52 = vsub.f32 %v27444_v13, %v25474_v15  ;;  %v14132_v56 = vsub.f32 %v27445_v20, %v25474_v15  ;;  %v14133_v46 = vsub.f32 %v27446_v10, %v25474_v15  ;;  %v27447_v22 = vld [vmem:[#allocation69_spill] sm:$0xff]  ;;  %v27448_v32 = vld [vmem:[#allocation72_spill] sm:$0xff]  ;;  %v27449_v48 = vld [vmem:[#allocation71_spill] sm:$0xff] }
 0xb72   :  { %v14134_v49 = vsub.f32 %v27447_v22, %v25474_v15  ;;  %v14135_v44 = vsub.f32 %v27448_v32, %v25474_v15  ;;  %v14136_v41 = vsub.f32 %v27449_v48, %v25474_v15  ;;  %v27450_v47 = vld [vmem:[#allocation10_spill] sm:$0xff]  ;;  %v27451_v13 = vld [vmem:[#allocation8_spill] sm:$0xff]  ;;  %v27453_v10 = vld [vmem:[#allocation9_spill] sm:$0xff]  ;;  %v14142_v48 = vsub.f32 %v27455_v54, %v25474_v15 }
 0xb73   :  { %v14137_v28 = vsub.f32 %v27450_v47, %v25474_v15  ;;  %v14138_v5 = vsub.f32 %v27451_v13, %v25474_v15  ;;  %v27452_v20 = vld [vmem:[#allocation12_spill] sm:$0xff]  ;;  %v14140_v55 = vsub.f32 %v27453_v10, %v25474_v15  ;;  %v27454_v22 = vld [vmem:[#allocation14_spill] sm:$0xff]  ;;  %v14143_v47 = vsub.f32 %v27456_v18, %v25474_v15 }
 0xb74   :  { %v14139_v53 = vsub.f32 %v27452_v20, %v25474_v15  ;;  %v14141_v32 = vsub.f32 %v27454_v22, %v25474_v15  ;;  %v14144_v13 = vsub.f32 %v27457_v19, %v25474_v15 }
 0xb78   :  { %v25598_v35 = vpop.eup %19718 }
 0xb79   :  { %v25609_v27 = vmul.f32 %v25598_v35, %v14099_v3  ;;  %v25612_v20 = vmul.f32 %v25598_v35, %v14100_v1  ;;  %v25615_v10 = vmul.f32 %v25598_v35, %v14101_v39  ;;  %v25618_v22 = vmul.f32 %v25598_v35, %v14102_v60 }
 0xb7a   :  { %v25621_v54 = vmul.f32 %v25598_v35, %v14103_v43  ;;  %v25624_v18 = vmul.f32 %v25598_v35, %v14104_v45  ;;  %v25627_v19 = vmul.f32 %v25598_v35, %v14105_v6  ;;  %v25630_v3 = vmul.f32 %v25598_v35, %v14106_v2 }
 0xb7b   :  { %v25633_v1 = vmul.f32 %v25598_v35, %v14107_v26  ;;  %v25636_v39 = vmul.f32 %v25598_v35, %v14108_v62  ;;  %v25639_v60 = vmul.f32 %v25598_v35, %v14109_v38  ;;  %v25642_v43 = vmul.f32 %v25598_v35, %v14110_v50 }
 0xb7c   :  { %v25645_v45 = vmul.f32 %v25598_v35, %v14111_v9  ;;  %v25648_v6 = vmul.f32 %v25598_v35, %v14112_v4  ;;  %v25651_v2 = vmul.f32 %v25598_v35, %v14113_v59  ;;  %v25654_v26 = vmul.f32 %v25598_v35, %v14114_v37 }
 0xb7d   :  { %v25657_v62 = vmul.f32 %v25598_v35, %v14115_v58  ;;  %v25660_v38 = vmul.f32 %v25598_v35, %v14116_v63  ;;  %v25663_v50 = vmul.f32 %v25598_v35, %v14117_v0  ;;  %v25666_v9 = vmul.f32 %v25598_v35, %v14118_v40 }
 0xb7e   :  { %v25669_v4 = vmul.f32 %v25598_v35, %v14119_v25  ;;  %v25672_v59 = vmul.f32 %v25598_v35, %v14120_v33  ;;  %v25675_v37 = vmul.f32 %v25598_v35, %v14121_v29  ;;  %v25678_v58 = vmul.f32 %v25598_v35, %v14122_v34 }
 0xb7f   :  { %v25681_v63 = vmul.f32 %v25598_v35, %v14123_v57  ;;  %v25684_v0 = vmul.f32 %v25598_v35, %v14124_v24  ;;  %v25687_v40 = vmul.f32 %v25598_v35, %v14125_v12  ;;  %v25690_v25 = vmul.f32 %v25598_v35, %v14126_v17 }
 0xb80   :  { %v25693_v33 = vmul.f32 %v25598_v35, %v14127_v42  ;;  %v25696_v29 = vmul.f32 %v25598_v35, %v14128_v8  ;;  %v25699_v34 = vmul.f32 %v25598_v35, %v14129_v61  ;;  %v25702_v57 = vmul.f32 %v25598_v35, %v14130_v21 }
 0xb81   :  { %v25705_v24 = vmul.f32 %v25598_v35, %v14131_v52  ;;  %v25708_v12 = vmul.f32 %v25598_v35, %v14132_v56  ;;  %v25711_v17 = vmul.f32 %v25598_v35, %v14133_v46  ;;  %v25714_v42 = vmul.f32 %v25598_v35, %v14134_v49 }
 0xb82   :  { %v25717_v8 = vmul.f32 %v25598_v35, %v14135_v44  ;;  %v25720_v61 = vmul.f32 %v25598_v35, %v14136_v41  ;;  %v25723_v21 = vmul.f32 %v25598_v35, %v14137_v28  ;;  %v25726_v52 = vmul.f32 %v25598_v35, %v14138_v5 }
 0xb83   :  { %v25729_v56 = vmul.f32 %v25598_v35, %v14139_v53  ;;  %v25732_v46 = vmul.f32 %v25598_v35, %v14140_v55  ;;  %v25735_v49 = vmul.f32 %v25598_v35, %v14141_v32  ;;  %v25738_v44 = vmul.f32 %v25598_v35, %v14142_v48 }
 0xb84   :  { %v25741_v41 = vmul.f32 %v25598_v35, %v14143_v47  ;;  %v25744_v28 = vmul.f32 %v25598_v35, %v14144_v13  ;;  %v27458_v5 = vsub.f32 %v25333_v16, %v25474_v15  ;;  %v27459_v55 = vsub.f32 %v25327_v11, %v25474_v15 }
 0xb85   :  { %v27460_v48 = vsub.f32 %v25349_v31, %v25474_v15  ;;  %v27461_v13 = vsub.f32 %v25343_v14, %v25474_v15 }
 0xb86   :  { %v25750_v53 = vmul.f32 %v25598_v35, %v27458_v5  ;;  %v25756_v32 = vmul.f32 %v25598_v35, %v27459_v55  ;;  %v27462_v5 = vsub.f32 %v25365_v51, %v25474_v15  ;;  %v27464_v55 = vsub.f32 %v25359_v30, %v25474_v15 }
 0xb87   :  { %v25762_v47 = vmul.f32 %v25598_v35, %v27460_v48  ;;  %v25768_v16 = vmul.f32 %v25598_v35, %v27461_v13  ;;  %v27466_v48 = vsub.f32 %v25381_v36, %v25474_v15  ;;  %v27468_v13 = vsub.f32 %v25375_v23, %v25474_v15  ;;  %v27475_v23 = vld [vmem:[#allocation30_spill] sm:$0xff] }
 0xb88   :  { %v25774_v11 = vmul.f32 %v25598_v35, %v27462_v5  ;;  %v25780_v31 = vmul.f32 %v25598_v35, %v27464_v55  ;;  %v27470_v5 = vsub.f32 %v25397_v7, %v25474_v15  ;;  %v27472_v55 = vld [vmem:[#allocation19_spill] sm:$0xff] }
 0xb89   :  { %v25786_v14 = vmul.f32 %v25598_v35, %v27466_v48  ;;  %v25792_v51 = vmul.f32 %v25598_v35, %v27468_v13  ;;  %v25809_v48 = vld [vmem:[%s26703_s7] ss:$0 sm:$0xff]  ;;  %v27476_v13 = vsub.f32 %v27475_v23, %v25474_v15  ;;  %v27478_v7 = vld [vmem:[#allocation27_spill] sm:$0xff] }
 0xb8a   :  { %27463 = vst [vmem:[#allocation22_spill] sm:$0xff] %v25774_v11  ;;  %27465 = vst [vmem:[#allocation21_spill] sm:$0xff] %v25780_v31  ;;  %v25798_v30 = vmul.f32 %v25598_v35, %v27470_v5  ;;  %v27473_v31 = vsub.f32 %v27472_v55, %v25474_v15  ;;  %v27479_v5 = vsub.f32 %v27478_v7, %v25474_v15  ;;  %v27481_v55 = vld [vmem:[#allocation31_spill] sm:$0xff] }
 0xb8b   :  { %27467 = vst [vmem:[#allocation24_spill] sm:$0xff] %v25786_v14  ;;  %27469 = vst [vmem:[#allocation23_spill] sm:$0xff] %v25792_v51  ;;  %v25815_v51 = vmul.f32 %v25598_v35, %v27476_v13  ;;  %v27484_v14 = vld [vmem:[#allocation29_spill] sm:$0xff]  ;;  %v27487_v13 = vld [vmem:[#allocation18_spill] sm:$0xff] }
 0xb8c   :  { %27471 = vst [vmem:[#allocation26_spill] sm:$0xff] %v25798_v30  ;;  %v25804_v36 = vmul.f32 %v25598_v35, %v27473_v31  ;;  %v25821_v30 = vmul.f32 %v25598_v35, %v27479_v5  ;;  %v27482_v31 = vsub.f32 %v27481_v55, %v25474_v15  ;;  %v27485_v11 = vsub.f32 %v27484_v14, %v25474_v15  ;;  %v27489_v5 = vld [vmem:[#allocation15_spill] sm:$0xff] }
 0xb8d   :  { %27477 = vst [vmem:[#allocation28_spill] sm:$0xff] %v25815_v51  ;;  %v27488_v51 = vsub.f32 %v27487_v13, %v25474_v15 }
 0xb8e   :  { %27474 = vst [vmem:[#allocation25_spill] sm:$0xff] %v25804_v36  ;;  %27480 = vst [vmem:[#allocation33_spill] sm:$0xff] %v25821_v30  ;;  %v25827_v36 = vmul.f32 %v25598_v35, %v27482_v31  ;;  %v25833_v23 = vmul.f32 %v25598_v35, %v27485_v11  ;;  %v27490_v30 = vsub.f32 %v27489_v5, %v25474_v15  ;;  %v27491_v31 = vld [vmem:[#allocation20_spill] sm:$0xff]  ;;  %v27493_v11 = vld [vmem:[#allocation17_spill] sm:$0xff] }
 0xb8f   :  { %v25839_v7 = vmul.f32 %v25598_v35, %v27488_v51  ;;  %v25861_v51 = vmul.f32 %v25809_v48, %v25609_v27  ;;  %v25869_v5 = vmul.f32 %v25809_v48, %v25615_v10  ;;  %v25881_v27 = vmul.f32 %v25809_v48, %v25624_v18 }
 0xb90   :  { %27483 = vst [vmem:[#allocation34_spill] sm:$0xff] %v25827_v36  ;;  %27486 = vst [vmem:[#allocation35_spill] sm:$0xff] %v25833_v23  ;;  %v25845_v55 = vmul.f32 %v25598_v35, %v27490_v30  ;;  %v27492_v36 = vsub.f32 %v27491_v31, %v25474_v15  ;;  %v27494_v23 = vsub.f32 %v27493_v11, %v25474_v15 }
 0xb91   :  { %v25865_v30 = vmul.f32 %v25809_v48, %v25612_v20  ;;  %v25877_v15 = vmul.f32 %v25809_v48, %v25621_v54  ;;  %v25889_v20 = vmul.f32 %v25809_v48, %v25630_v3  ;;  %v25893_v10 = vmul.f32 %v25809_v48, %v25633_v1 }
 0xb92   :  { %v25851_v14 = vmul.f32 %v25598_v35, %v27492_v36  ;;  %v25857_v13 = vmul.f32 %v25598_v35, %v27494_v23  ;;  %v25873_v36 = vmul.f32 %v25809_v48, %v25618_v22  ;;  %v25885_v35 = vmul.f32 %v25809_v48, %v25627_v19  ;;  %v27498_v23 = vld [vmem:[#allocation21_spill] sm:$0xff]  ;;  %v27500_v31 = vld [vmem:[#allocation24_spill] sm:$0xff]  ;;  %v27502_v11 = vld [vmem:[#allocation23_spill] sm:$0xff] }
 0xb93   :  { %v25897_v22 = vmul.f32 %v25809_v48, %v25636_v39  ;;  %v25901_v54 = vmul.f32 %v25809_v48, %v25639_v60  ;;  %v25905_v18 = vmul.f32 %v25809_v48, %v25642_v43  ;;  %v25909_v19 = vmul.f32 %v25809_v48, %v25645_v45 }
 0xb94   :  { %v25913_v3 = vmul.f32 %v25809_v48, %v25648_v6  ;;  %v25917_v1 = vmul.f32 %v25809_v48, %v25651_v2  ;;  %v25921_v39 = vmul.f32 %v25809_v48, %v25654_v26  ;;  %v25925_v60 = vmul.f32 %v25809_v48, %v25657_v62 }
 0xb95   :  { %v25929_v43 = vmul.f32 %v25809_v48, %v25660_v38  ;;  %v25933_v45 = vmul.f32 %v25809_v48, %v25663_v50  ;;  %v25937_v6 = vmul.f32 %v25809_v48, %v25666_v9  ;;  %v25941_v2 = vmul.f32 %v25809_v48, %v25669_v4 }
 0xb96   :  { %v25945_v26 = vmul.f32 %v25809_v48, %v25672_v59  ;;  %v25949_v62 = vmul.f32 %v25809_v48, %v25675_v37  ;;  %v25953_v38 = vmul.f32 %v25809_v48, %v25678_v58  ;;  %v25957_v50 = vmul.f32 %v25809_v48, %v25681_v63 }
 0xb97   :  { %v25961_v9 = vmul.f32 %v25809_v48, %v25684_v0  ;;  %v25965_v4 = vmul.f32 %v25809_v48, %v25687_v40  ;;  %v25969_v59 = vmul.f32 %v25809_v48, %v25690_v25  ;;  %v25973_v37 = vmul.f32 %v25809_v48, %v25693_v33 }
 0xb98   :  { %v25977_v58 = vmul.f32 %v25809_v48, %v25696_v29  ;;  %v25981_v63 = vmul.f32 %v25809_v48, %v25699_v34  ;;  %v25985_v0 = vmul.f32 %v25809_v48, %v25702_v57  ;;  %v25989_v40 = vmul.f32 %v25809_v48, %v25705_v24 }
 0xb99   :  { %v25993_v25 = vmul.f32 %v25809_v48, %v25708_v12  ;;  %v25997_v33 = vmul.f32 %v25809_v48, %v25711_v17  ;;  %v26001_v29 = vmul.f32 %v25809_v48, %v25714_v42  ;;  %v26005_v34 = vmul.f32 %v25809_v48, %v25717_v8 }
 0xb9a   :  { %v26009_v57 = vmul.f32 %v25809_v48, %v25720_v61  ;;  %v26013_v24 = vmul.f32 %v25809_v48, %v25723_v21  ;;  %v26017_v12 = vmul.f32 %v25809_v48, %v25726_v52  ;;  %v26021_v17 = vmul.f32 %v25809_v48, %v25729_v56 }
 0xb9b   :  { %v26025_v42 = vmul.f32 %v25809_v48, %v25732_v46  ;;  %v26029_v8 = vmul.f32 %v25809_v48, %v25735_v49  ;;  %v26033_v61 = vmul.f32 %v25809_v48, %v25738_v44  ;;  %v26037_v21 = vmul.f32 %v25809_v48, %v25741_v41  ;;  %v27497_v41 = vld [vmem:[#allocation22_spill] sm:$0xff] }
 0xb9c   :  { %v26041_v52 = vmul.f32 %v25809_v48, %v25744_v28  ;;  %v26045_v56 = vmul.f32 %v25809_v48, %v25750_v53  ;;  %v26049_v46 = vmul.f32 %v25809_v48, %v25756_v32  ;;  %v26053_v49 = vmul.f32 %v25809_v48, %v25762_v47 }
 0xb9d   :  { %v26057_v44 = vmul.f32 %v25809_v48, %v25768_v16  ;;  %v26061_v28 = vmul.f32 %v25809_v48, %v27497_v41  ;;  %v26065_v53 = vmul.f32 %v25809_v48, %v27498_v23  ;;  %v26069_v32 = vmul.f32 %v25809_v48, %v27500_v31  ;;  %v26086_v23 = vld [vmem:[%s26704_s8] ss:$0 sm:$0xff] }
 0xb9e   :  { %27495 = vst [vmem:[#allocation36_spill] sm:$0xff] %v26053_v49  ;;  %v26073_v47 = vmul.f32 %v25809_v48, %v27502_v11  ;;  %v27504_v49 = vld [vmem:[#allocation26_spill] sm:$0xff] }
 0xb9f   :  { %27496 = vst [vmem:[#allocation37_spill] sm:$0xff] %v26057_v44  ;;  %27499 = vst [vmem:[#allocation38_spill] sm:$0xff] %v26065_v53  ;;  %v26077_v16 = vmul.f32 %v25809_v48, %v27504_v49  ;;  %v27506_v44 = vld [vmem:[#allocation25_spill] sm:$0xff]  ;;  %v27508_v53 = vld [vmem:[#allocation28_spill] sm:$0xff] }
 0xba0   :  { %27501 = vst [vmem:[#allocation39_spill] sm:$0xff] %v26069_v32  ;;  %27503 = vst [vmem:[#allocation40_spill] sm:$0xff] %v26073_v47  ;;  %v26081_v41 = vmul.f32 %v25809_v48, %v27506_v44  ;;  %v26090_v31 = vmul.f32 %v25809_v48, %v27508_v53  ;;  %v27509_v32 = vld [vmem:[#allocation33_spill] sm:$0xff]  ;;  %v27510_v47 = vld [vmem:[#allocation34_spill] sm:$0xff]  ;;  %v26110_v53 = vmul.f32 %v25809_v48, %v25845_v55 }
 0xba1   :  { %27505 = vst [vmem:[#allocation41_spill] sm:$0xff] %v26077_v16  ;;  %v26094_v11 = vmul.f32 %v25809_v48, %v27509_v32  ;;  %v26098_v49 = vmul.f32 %v25809_v48, %v27510_v47  ;;  %v27511_v16 = vld [vmem:[#allocation35_spill] sm:$0xff]  ;;  %v26114_v32 = vmul.f32 %v25809_v48, %v25851_v14  ;;  %v26118_v47 = vmul.f32 %v25809_v48, %v25857_v13 }
 0xba2   :  { %27507 = vst [vmem:[#allocation32_spill] sm:$0xff] %v26081_v41  ;;  %v26102_v44 = vmul.f32 %v25809_v48, %v27511_v16  ;;  %v26106_v41 = vmul.f32 %v25809_v48, %v25839_v7  ;;  %v26122_v16 = vadd.f32 %v26086_v23, %v25861_v51  ;;  %v26126_v7 = vadd.f32 %v26086_v23, %v25865_v30 }
 0xba3   :  { %v26130_v55 = vadd.f32 %v26086_v23, %v25869_v5  ;;  %v26134_v14 = vadd.f32 %v26086_v23, %v25873_v36  ;;  %v26138_v48 = vadd.f32 %v26086_v23, %v25877_v15  ;;  %v26142_v13 = vadd.f32 %v26086_v23, %v25881_v27 }
 0xba4   :  { %v26146_v51 = vadd.f32 %v26086_v23, %v25885_v35  ;;  %v26150_v30 = vadd.f32 %v26086_v23, %v25889_v20  ;;  %v26154_v5 = vadd.f32 %v26086_v23, %v25893_v10  ;;  %v26158_v36 = vadd.f32 %v26086_v23, %v25897_v22 }
 0xba5   :  { %v26162_v15 = vadd.f32 %v26086_v23, %v25901_v54  ;;  %v26166_v27 = vadd.f32 %v26086_v23, %v25905_v18  ;;  %v26170_v35 = vadd.f32 %v26086_v23, %v25909_v19  ;;  %v26174_v20 = vadd.f32 %v26086_v23, %v25913_v3 }
 0xba6   :  { %v26178_v10 = vadd.f32 %v26086_v23, %v25917_v1  ;;  %v26182_v22 = vadd.f32 %v26086_v23, %v25921_v39  ;;  %v26186_v54 = vadd.f32 %v26086_v23, %v25925_v60  ;;  %v26190_v18 = vadd.f32 %v26086_v23, %v25929_v43 }
 0xba7   :  { %v26194_v19 = vadd.f32 %v26086_v23, %v25933_v45  ;;  %v26198_v3 = vadd.f32 %v26086_v23, %v25937_v6  ;;  %v26202_v1 = vadd.f32 %v26086_v23, %v25941_v2  ;;  %v26206_v39 = vadd.f32 %v26086_v23, %v25945_v26 }
 0xba8   :  { %v26210_v60 = vadd.f32 %v26086_v23, %v25949_v62  ;;  %v26214_v43 = vadd.f32 %v26086_v23, %v25953_v38  ;;  %v26218_v45 = vadd.f32 %v26086_v23, %v25957_v50  ;;  %v26222_v6 = vadd.f32 %v26086_v23, %v25961_v9 }
 0xba9   :  { %v26226_v2 = vadd.f32 %v26086_v23, %v25965_v4  ;;  %v26230_v26 = vadd.f32 %v26086_v23, %v25969_v59  ;;  %v26234_v62 = vadd.f32 %v26086_v23, %v25973_v37  ;;  %v26238_v38 = vadd.f32 %v26086_v23, %v25977_v58 }
 0xbaa   :  { %v26242_v50 = vadd.f32 %v26086_v23, %v25981_v63  ;;  %v26246_v9 = vadd.f32 %v26086_v23, %v25985_v0  ;;  %v26250_v4 = vadd.f32 %v26086_v23, %v25989_v40  ;;  %v26254_v59 = vadd.f32 %v26086_v23, %v25993_v25 }
 0xbab   :  { %v26258_v37 = vadd.f32 %v26086_v23, %v25997_v33  ;;  %v26262_v58 = vadd.f32 %v26086_v23, %v26001_v29  ;;  %v26266_v63 = vadd.f32 %v26086_v23, %v26005_v34  ;;  %v26270_v0 = vadd.f32 %v26086_v23, %v26009_v57 }
 0xbac   :  { %v26274_v40 = vadd.f32 %v26086_v23, %v26013_v24  ;;  %v26278_v25 = vadd.f32 %v26086_v23, %v26017_v12  ;;  %v26282_v33 = vadd.f32 %v26086_v23, %v26021_v17  ;;  %v26286_v29 = vadd.f32 %v26086_v23, %v26025_v42 }
 0xbad   :  { %v26290_v34 = vadd.f32 %v26086_v23, %v26029_v8  ;;  %v26294_v57 = vadd.f32 %v26086_v23, %v26033_v61  ;;  %v26298_v24 = vadd.f32 %v26086_v23, %v26037_v21  ;;  %v26302_v12 = vadd.f32 %v26086_v23, %v26041_v52  ;;  %v27516_v8 = vld [vmem:[#allocation36_spill] sm:$0xff] }
 0xbae   :  { %v26306_v17 = vadd.f32 %v26086_v23, %v26045_v56  ;;  %v26310_v42 = vadd.f32 %v26086_v23, %v26049_v46  ;;  %v26314_v61 = vadd.f32 %v26086_v23, %v27516_v8  ;;  %v26322_v52 = vadd.f32 %v26086_v23, %v26061_v28 }
 0xbaf   :  { %27512 = vst [vmem:[#allocation42_spill] sm:$0xff] %v26294_v57  ;;  %27513 = vst [vmem:[#allocation43_spill] sm:$0xff] %v26302_v12  ;;  %v27518_v57 = vld [vmem:[#allocation37_spill] sm:$0xff]  ;;  %v27520_v12 = vld [vmem:[#allocation38_spill] sm:$0xff] }
 0xbb0   :  { %27514 = vst [vmem:[#allocation44_spill] sm:$0xff] %v26306_v17  ;;  %27515 = vst [vmem:[#allocation45_spill] sm:$0xff] %v26310_v42  ;;  %v26318_v21 = vadd.f32 %v26086_v23, %v27518_v57  ;;  %v26326_v56 = vadd.f32 %v26086_v23, %v27520_v12  ;;  %v27521_v17 = vld [vmem:[#allocation39_spill] sm:$0xff]  ;;  %v27522_v42 = vld [vmem:[#allocation40_spill] sm:$0xff]  ;;  %v26346_v12 = vadd.f32 %v26086_v23, %v26090_v31 }
 0xbb1   :  { %27517 = vst [vmem:[#allocation46_spill] sm:$0xff] %v26314_v61  ;;  %v26330_v46 = vadd.f32 %v26086_v23, %v27521_v17  ;;  %v26334_v8 = vadd.f32 %v26086_v23, %v27522_v42  ;;  %v27523_v61 = vld [vmem:[#allocation41_spill] sm:$0xff]  ;;  %v26350_v17 = vadd.f32 %v26086_v23, %v26094_v11  ;;  %v26354_v42 = vadd.f32 %v26086_v23, %v26098_v49 }
 0xbb2   :  { %27519 = vst [vmem:[#allocation47_spill] sm:$0xff] %v26318_v21  ;;  %v26338_v57 = vadd.f32 %v26086_v23, %v27523_v61  ;;  %v27524_v21 = vld [vmem:[#allocation32_spill] sm:$0xff]  ;;  %v26358_v61 = vadd.f32 %v26086_v23, %v26102_v44  ;;  %v26366_v31 = vadd.f32 %v26086_v23, %v26110_v53  ;;  %v26370_v11 = vadd.f32 %v26086_v23, %v26114_v32 }
 0xbb3   :  { %v26342_v28 = vadd.f32 %v26086_v23, %v27524_v21  ;;  %27525 = vst [vmem:[#allocation48_spill] sm:$0xff] %v26354_v42  ;;  %v26362_v21 = vadd.f32 %v26086_v23, %v26106_v41  ;;  %v26374_v49 = vadd.f32 %v26086_v23, %v26118_v47  ;;  %v14371_v42 = vmax.f32 %v26122_v16, 0.0 }
 0xbb4   :  { %27526 = vst [vmem:[#allocation49_spill] sm:$0xff] %v26358_v61  ;;  %27528 = vst [vmem:[#allocation51_spill] sm:$0xff] %v26366_v31  ;;  %v14372_v44 = vmax.f32 %v26126_v7, 0.0  ;;  %v14373_v61 = vmax.f32 %v26130_v55, 0.0  ;;  %v14374_v41 = vmax.f32 %v26134_v14, 0.0  ;;  %v14376_v53 = vmax.f32 %v26142_v13, 0.0 }
 0xbb5   :  { %27527 = vst [vmem:[#allocation50_spill] sm:$0xff] %v26362_v21  ;;  %27529 = vst [vmem:[#allocation52_spill] sm:$0xff] %v26370_v11  ;;  %v14375_v21 = vmax.f32 %v26138_v48, 0.0  ;;  %v14377_v31 = vmax.f32 %v26146_v51, 0.0  ;;  %v14378_v32 = vmax.f32 %v26150_v30, 0.0  ;;  %v14379_v11 = vmax.f32 %v26154_v5, 0.0 }
 0xbb6   :  { %v14380_v23 = vmax.f32 %v26158_v36, 0.0  ;;  %v14381_v47 = vmax.f32 %v26162_v15, 0.0  ;;  %v14382_v16 = vmax.f32 %v26166_v27, 0.0  ;;  %14435 = vst.msk [vmem:[%s26705_s9] sm:$0xff] %vm6605_vm3, %v14371_v42  ;;  %14436 = vst.msk [vmem:[%s26705_s9 + $0x8] sm:$0xff] %vm6605_vm3, %v14372_v44  ;;  %v14383_v7 = vmax.f32 %v26170_v35, 0.0 }
 0xbb7   :  { %14437 = vst.msk [vmem:[%s26705_s9 + $0x10] sm:$0xff] %vm6605_vm3, %v14373_v61  ;;  %14438 = vst.msk [vmem:[%s26705_s9 + $0x18] sm:$0xff] %vm6605_vm3, %v14374_v41  ;;  %v14384_v55 = vmax.f32 %v26174_v20, 0.0  ;;  %v14385_v14 = vmax.f32 %v26178_v10, 0.0  ;;  %v14386_v48 = vmax.f32 %v26182_v22, 0.0  ;;  %v14387_v13 = vmax.f32 %v26186_v54, 0.0 }
 0xbb8   :  { %14439 = vst.msk [vmem:[%s26705_s9 + $0x20] sm:$0xff] %vm6605_vm3, %v14375_v21  ;;  %14440 = vst.msk [vmem:[%s26705_s9 + $0x28] sm:$0xff] %vm6605_vm3, %v14376_v53  ;;  %v14388_v51 = vmax.f32 %v26190_v18, 0.0  ;;  %v14389_v30 = vmax.f32 %v26194_v19, 0.0  ;;  %v14390_v5 = vmax.f32 %v26198_v3, 0.0  ;;  %v14391_v36 = vmax.f32 %v26202_v1, 0.0 }
 0xbb9   :  { %14441 = vst.msk [vmem:[%s26705_s9 + $0x30] sm:$0xff] %vm6605_vm3, %v14377_v31  ;;  %14442 = vst.msk [vmem:[%s26705_s9 + $0x38] sm:$0xff] %vm6605_vm3, %v14378_v32  ;;  %v14392_v15 = vmax.f32 %v26206_v39, 0.0  ;;  %v14393_v27 = vmax.f32 %v26210_v60, 0.0  ;;  %v14394_v35 = vmax.f32 %v26214_v43, 0.0  ;;  %v14395_v20 = vmax.f32 %v26218_v45, 0.0 }
 0xbba   :  { %14443 = vst.msk [vmem:[%s26705_s9 + $0x40] sm:$0xff] %vm6605_vm3, %v14379_v11  ;;  %14444 = vst.msk [vmem:[%s26705_s9 + $0x48] sm:$0xff] %vm6605_vm3, %v14380_v23  ;;  %v14396_v10 = vmax.f32 %v26222_v6, 0.0  ;;  %v14397_v22 = vmax.f32 %v26226_v2, 0.0  ;;  %v14398_v54 = vmax.f32 %v26230_v26, 0.0  ;;  %v14399_v18 = vmax.f32 %v26234_v62, 0.0 }
 0xbbb   :  { %14445 = vst.msk [vmem:[%s26705_s9 + $0x50] sm:$0xff] %vm6605_vm3, %v14381_v47  ;;  %14446 = vst.msk [vmem:[%s26705_s9 + $0x58] sm:$0xff] %vm6605_vm3, %v14382_v16  ;;  %v14400_v19 = vmax.f32 %v26238_v38, 0.0  ;;  %v14401_v3 = vmax.f32 %v26242_v50, 0.0  ;;  %v14402_v1 = vmax.f32 %v26246_v9, 0.0  ;;  %v14403_v39 = vmax.f32 %v26250_v4, 0.0 }
 0xbbc   :  { %14447 = vst.msk [vmem:[%s26705_s9 + $0x60] sm:$0xff] %vm6605_vm3, %v14383_v7  ;;  %14448 = vst.msk [vmem:[%s26705_s9 + $0x68] sm:$0xff] %vm6605_vm3, %v14384_v55  ;;  %v14404_v60 = vmax.f32 %v26254_v59, 0.0  ;;  %v14405_v43 = vmax.f32 %v26258_v37, 0.0  ;;  %v14406_v45 = vmax.f32 %v26262_v58, 0.0  ;;  %v14407_v6 = vmax.f32 %v26266_v63, 0.0 }
 0xbbd   :  { %14449 = vst.msk [vmem:[%s26705_s9 + $0x70] sm:$0xff] %vm6605_vm3, %v14385_v14  ;;  %14450 = vst.msk [vmem:[%s26705_s9 + $0x78] sm:$0xff] %vm6605_vm3, %v14386_v48  ;;  %v14408_v2 = vmax.f32 %v26270_v0, 0.0  ;;  %v14409_v26 = vmax.f32 %v26274_v40, 0.0  ;;  %v14410_v62 = vmax.f32 %v26278_v25, 0.0  ;;  %v14411_v38 = vmax.f32 %v26282_v33, 0.0 }
 0xbbe   :  { %14451 = vst.msk [vmem:[%s26705_s9 + $0x80] sm:$0xff] %vm6605_vm3, %v14387_v13  ;;  %14452 = vst.msk [vmem:[%s26705_s9 + $0x88] sm:$0xff] %vm6605_vm3, %v14388_v51  ;;  %v14412_v50 = vmax.f32 %v26286_v29, 0.0  ;;  %v14413_v9 = vmax.f32 %v26290_v34, 0.0  ;;  %v27530_v4 = vld [vmem:[#allocation42_spill] sm:$0xff]  ;;  %v14415_v37 = vmax.f32 %v26298_v24, 0.0 }
 0xbbf   :  { %14453 = vst.msk [vmem:[%s26705_s9 + $0x90] sm:$0xff] %vm6605_vm3, %v14389_v30  ;;  %14454 = vst.msk [vmem:[%s26705_s9 + $0x98] sm:$0xff] %vm6605_vm3, %v14390_v5  ;;  %v14414_v59 = vmax.f32 %v27530_v4, 0.0  ;;  %v27531_v58 = vld [vmem:[#allocation43_spill] sm:$0xff]  ;;  %v27532_v0 = vld [vmem:[#allocation44_spill] sm:$0xff]  ;;  %v14421_v61 = vmax.f32 %v26322_v52, 0.0 }
 0xbc0   :  { %14455 = vst.msk [vmem:[%s26705_s9 + $0xa0] sm:$0xff] %vm6605_vm3, %v14391_v36  ;;  %14456 = vst.msk [vmem:[%s26705_s9 + $0xa8] sm:$0xff] %vm6605_vm3, %v14392_v15  ;;  %v14416_v63 = vmax.f32 %v27531_v58, 0.0  ;;  %v14417_v40 = vmax.f32 %v27532_v0, 0.0  ;;  %v27533_v25 = vld [vmem:[#allocation45_spill] sm:$0xff]  ;;  %v27534_v29 = vld [vmem:[#allocation46_spill] sm:$0xff] }
 0xbc1   :  { %14457 = vst.msk [vmem:[%s26705_s9 + $0xb0] sm:$0xff] %vm6605_vm3, %v14393_v27  ;;  %14458 = vst.msk [vmem:[%s26705_s9 + $0xb8] sm:$0xff] %vm6605_vm3, %v14394_v35  ;;  %v14418_v33 = vmax.f32 %v27533_v25, 0.0  ;;  %v14419_v34 = vmax.f32 %v27534_v29, 0.0  ;;  %v27535_v24 = vld [vmem:[#allocation47_spill] sm:$0xff]  ;;  %v14422_v21 = vmax.f32 %v26326_v56, 0.0 }
 0xbc2   :  { %14459 = vst.msk [vmem:[%s26705_s9 + $0xc0] sm:$0xff] %vm6605_vm3, %v14395_v20  ;;  %14460 = vst.msk [vmem:[%s26705_s9 + $0xc8] sm:$0xff] %vm6605_vm3, %v14396_v10  ;;  %v14420_v42 = vmax.f32 %v27535_v24, 0.0  ;;  %v14423_v52 = vmax.f32 %v26330_v46, 0.0  ;;  %v14424_v56 = vmax.f32 %v26334_v8, 0.0  ;;  %v14425_v31 = vmax.f32 %v26338_v57, 0.0 }
 0xbc3   :  { %14461 = vst.msk [vmem:[%s26705_s9 + $0xd0] sm:$0xff] %vm6605_vm3, %v14397_v22  ;;  %14462 = vst.msk [vmem:[%s26705_s9 + $0xd8] sm:$0xff] %vm6605_vm3, %v14398_v54  ;;  %v14426_v11 = vmax.f32 %v26342_v28, 0.0  ;;  %v14427_v46 = vmax.f32 %v26346_v12, 0.0  ;;  %v14428_v8 = vmax.f32 %v26350_v17, 0.0  ;;  %v27536_v57 = vld [vmem:[#allocation48_spill] sm:$0xff] }
 0xbc4   :  { %14463 = vst.msk [vmem:[%s26705_s9 + $0xe0] sm:$0xff] %vm6605_vm3, %v14399_v18  ;;  %14464 = vst.msk [vmem:[%s26705_s9 + $0xe8] sm:$0xff] %vm6605_vm3, %v14400_v19  ;;  %v14429_v28 = vmax.f32 %v27536_v57, 0.0  ;;  %v27537_v44 = vld [vmem:[#allocation49_spill] sm:$0xff]  ;;  %v27538_v12 = vld [vmem:[#allocation50_spill] sm:$0xff]  ;;  %v14434_v16 = vmax.f32 %v26374_v49, 0.0 }
 0xbc5   :  { %14465 = vst.msk [vmem:[%s26705_s9 + $0xf0] sm:$0xff] %vm6605_vm3, %v14401_v3  ;;  %14466 = vst.msk [vmem:[%s26705_s9 + $0xf8] sm:$0xff] %vm6605_vm3, %v14402_v1  ;;  %v14430_v41 = vmax.f32 %v27537_v44, 0.0  ;;  %v14431_v17 = vmax.f32 %v27538_v12, 0.0  ;;  %v27539_v53 = vld [vmem:[#allocation51_spill] sm:$0xff]  ;;  %v27540_v23 = vld [vmem:[#allocation52_spill] sm:$0xff] }
 0xbc6   :  { %14467 = vst.msk [vmem:[%s26705_s9 + $0x100] sm:$0xff] %vm6605_vm3, %v14403_v39  ;;  %14468 = vst.msk [vmem:[%s26705_s9 + $0x108] sm:$0xff] %vm6605_vm3, %v14404_v60  ;;  %v14432_v32 = vmax.f32 %v27539_v53, 0.0  ;;  %v14433_v47 = vmax.f32 %v27540_v23, 0.0 }
 0xbc7   :  { %14469 = vst.msk [vmem:[%s26705_s9 + $0x110] sm:$0xff] %vm6605_vm3, %v14405_v43  ;;  %14470 = vst.msk [vmem:[%s26705_s9 + $0x118] sm:$0xff] %vm6605_vm3, %v14406_v45 }
 0xbc8   :  { %14471 = vst.msk [vmem:[%s26705_s9 + $0x120] sm:$0xff] %vm6605_vm3, %v14407_v6  ;;  %14472 = vst.msk [vmem:[%s26705_s9 + $0x128] sm:$0xff] %vm6605_vm3, %v14408_v2 }
 0xbc9   :  { %14473 = vst.msk [vmem:[%s26705_s9 + $0x130] sm:$0xff] %vm6605_vm3, %v14409_v26  ;;  %14474 = vst.msk [vmem:[%s26705_s9 + $0x138] sm:$0xff] %vm6605_vm3, %v14410_v62 }
 0xbca   :  { %14475 = vst.msk [vmem:[%s26705_s9 + $0x140] sm:$0xff] %vm6605_vm3, %v14411_v38  ;;  %14476 = vst.msk [vmem:[%s26705_s9 + $0x148] sm:$0xff] %vm6605_vm3, %v14412_v50 }
 0xbcb   :  { %14477 = vst.msk [vmem:[%s26705_s9 + $0x150] sm:$0xff] %vm6605_vm3, %v14413_v9  ;;  %14478 = vst.msk [vmem:[%s26705_s9 + $0x158] sm:$0xff] %vm6605_vm3, %v14414_v59 }
 0xbcc   :  { %14479 = vst.msk [vmem:[%s26705_s9 + $0x160] sm:$0xff] %vm6605_vm3, %v14415_v37  ;;  %14480 = vst.msk [vmem:[%s26705_s9 + $0x168] sm:$0xff] %vm6605_vm3, %v14416_v63 }
 0xbcd   :  { %14481 = vst.msk [vmem:[%s26705_s9 + $0x170] sm:$0xff] %vm6605_vm3, %v14417_v40  ;;  %14482 = vst.msk [vmem:[%s26705_s9 + $0x178] sm:$0xff] %vm6605_vm3, %v14418_v33 }
 0xbce   :  { %14483 = vst.msk [vmem:[%s26705_s9 + $0x180] sm:$0xff] %vm6605_vm3, %v14419_v34  ;;  %14484 = vst.msk [vmem:[%s26705_s9 + $0x188] sm:$0xff] %vm6605_vm3, %v14420_v42 }
 0xbcf   :  { %14485 = vst.msk [vmem:[%s26705_s9 + $0x190] sm:$0xff] %vm6605_vm3, %v14421_v61  ;;  %14486 = vst.msk [vmem:[%s26705_s9 + $0x198] sm:$0xff] %vm6605_vm3, %v14422_v21 }
 0xbd0   :  { %14487 = vst.msk [vmem:[%s26705_s9 + $0x1a0] sm:$0xff] %vm6605_vm3, %v14423_v52  ;;  %14488 = vst.msk [vmem:[%s26705_s9 + $0x1a8] sm:$0xff] %vm6605_vm3, %v14424_v56 }
 0xbd1   :  { %14489 = vst.msk [vmem:[%s26705_s9 + $0x1b0] sm:$0xff] %vm6605_vm3, %v14425_v31  ;;  %14490 = vst.msk [vmem:[%s26705_s9 + $0x1b8] sm:$0xff] %vm6605_vm3, %v14426_v11 }
 0xbd2   :  { %14491 = vst.msk [vmem:[%s26705_s9 + $0x1c0] sm:$0xff] %vm6605_vm3, %v14427_v46  ;;  %14492 = vst.msk [vmem:[%s26705_s9 + $0x1c8] sm:$0xff] %vm6605_vm3, %v14428_v8 }
 0xbd3   :  { %14493 = vst.msk [vmem:[%s26705_s9 + $0x1d0] sm:$0xff] %vm6605_vm3, %v14429_v28  ;;  %14494 = vst.msk [vmem:[%s26705_s9 + $0x1d8] sm:$0xff] %vm6605_vm3, %v14430_v41 }
 0xbd4   :  { %14495 = vst.msk [vmem:[%s26705_s9 + $0x1e0] sm:$0xff] %vm6605_vm3, %v14431_v17  ;;  %14496 = vst.msk [vmem:[%s26705_s9 + $0x1e8] sm:$0xff] %vm6605_vm3, %v14432_v32 }
 0xbd5   :  { %14497 = vst.msk [vmem:[%s26705_s9 + $0x1f0] sm:$0xff] %vm6605_vm3, %v14433_v47  ;;  %14498 = vst.msk [vmem:[%s26705_s9 + $0x1f8] sm:$0xff] %vm6605_vm3, %v14434_v16 }

</bundles_post_ra>
